<compile_context>
chip_gen: v6e
topology: v6e:2x2x1
jax: 0.10.0
libtpu: 0.0.40
codegen_flags: <defaults>
</compile_context>

<pallas_src>
import jax
import jax.numpy as jnp
import numpy as np
from jax.experimental import pallas as pl
from jax.experimental.pallas import tpu as pltpu

_LANE = 128


def _round_up(x, m):
    return (x + m - 1) // m * m


def _fused_conv_block_kernel(xp_ref, w1_ref, s1_ref, t1_ref,
                             w2_ref, s2_ref, t2_ref, o_ref, mid_ref):
    """Fused [conv3x3 + BN + ReLU] x 2 for one image.

    xp_ref : (H+2, W+2, Ci)  bf16  input, spatially zero-padded by 1, C padded to 128
    w1_ref : (9, Ci, Cm)     bf16  layer-1 weights, tap-major (ky*3+kx)
    s1_ref : (1, Cm)         f32   layer-1 folded BN scale
    t1_ref : (1, Cm)         f32   layer-1 folded BN shift
    w2_ref : (9, Cm, Co)     bf16  layer-2 weights
    s2_ref : (1, Co)         f32   layer-2 folded BN scale
    t2_ref : (1, Co)         f32   layer-2 folded BN shift
    o_ref  : (H, W, Co)      f32   output
    mid_ref: (H+2, W+2, Cm)  bf16  VMEM scratch: zero-padded layer-1 activation
    """
    H, W, Co = o_ref.shape
    Cm = mid_ref.shape[-1]

    # ---- layer 1: 3x3 "same" conv as 9 shifted matmuls, + BN + ReLU --------
    acc1 = None
    for k in range(9):
        ky, kx = divmod(k, 3)
        patch = xp_ref[ky:ky + H, kx:kx + W, :].reshape(H * W, -1)   # (HW, Ci) bf16
        part = jnp.dot(patch, w1_ref[k], preferred_element_type=jnp.float32)
        acc1 = part if acc1 is None else acc1 + part
    y1 = jnp.maximum(acc1 * s1_ref[...] + t1_ref[...], 0.0)          # (HW, Cm) f32

    # Keep the zero-padded layer-1 activation entirely in VMEM (no HBM trip).
    mid_ref[...] = jnp.zeros_like(mid_ref)
    mid_ref[1:H + 1, 1:W + 1, :] = y1.reshape(H, W, Cm).astype(mid_ref.dtype)

    # ---- layer 2 ------------------------------------------------------------
    acc2 = None
    for k in range(9):
        ky, kx = divmod(k, 3)
        patch = mid_ref[ky:ky + H, kx:kx + W, :].reshape(H * W, -1)  # (HW, Cm) bf16
        part = jnp.dot(patch, w2_ref[k], preferred_element_type=jnp.float32)
        acc2 = part if acc2 is None else acc2 + part
    y2 = jnp.maximum(acc2 * s2_ref[...] + t2_ref[...], 0.0)          # (HW, Co) f32

    o_ref[...] = y2.reshape(H, W, Co).astype(o_ref.dtype)


def _prep_conv_weights(w_oihw, cin_p, cout_p):
    """OIHW -> (9, cin_p, cout_p) bf16, zero-padded channels, tap-major rows."""
    cout, cin, kh, kw = w_oihw.shape
    w = jnp.transpose(w_oihw, (2, 3, 1, 0))                           # (3,3,Cin,Cout)
    w = jnp.pad(w, ((0, 0), (0, 0), (0, cin_p - cin), (0, cout_p - cout)))
    return w.reshape(kh * kw, cin_p, cout_p).astype(jnp.bfloat16)


def _fold_bn(b, gamma, beta, mean, var, eps, cout_p):
    """Fold conv bias + eval-mode BatchNorm into per-channel scale/shift (f32)."""
    scale = gamma * jax.lax.rsqrt(var + eps)
    shift = beta + scale * (b - mean)
    pad = cout_p - scale.shape[0]
    scale = jnp.pad(scale, (0, pad)).reshape(1, cout_p).astype(jnp.float32)
    shift = jnp.pad(shift, (0, pad)).reshape(1, cout_p).astype(jnp.float32)
    return scale, shift


def conv_block_forward(x_nchw, params, eps=1e-5):
    """Pallas implementation of conv_block.forward (NCHW in, NCHW out)."""
    (w1, b1, g1, be1, m1, v1), (w2, b2, g2, be2, m2, v2) = params
    N, Cin, H, W = x_nchw.shape
    C1, C2 = w1.shape[0], w2.shape[0]
    Ci = _round_up(Cin, _LANE)      # padded input channels
    Cm = _round_up(C1, _LANE)       # padded mid channels
    Co = _round_up(C2, _LANE)       # padded output channels

    # NCHW -> NHWC, zero-pad spatially by 1 and channels up to 128 lanes, cast bf16.
    x = jnp.transpose(x_nchw, (0, 2, 3, 1))
    xp = jnp.pad(x, ((0, 0), (1, 1), (1, 1), (0, Ci - Cin))).astype(jnp.bfloat16)

    w1_k = _prep_conv_weights(w1, Ci, Cm)
    s1, t1 = _fold_bn(b1, g1, be1, m1, v1, eps, Cm)
    w2_k = _prep_conv_weights(w2, Cm, Co)
    s2, t2 = _fold_bn(b2, g2, be2, m2, v2, eps, Co)

    flops = 2 * N * H * W * 9 * (Ci * Cm + Cm * Co)
    bytes_accessed = (xp.size * 2 + w1_k.size * 2 + w2_k.size * 2
                      + (s1.size + t1.size + s2.size + t2.size) * 4
                      + N * H * W * Co * 4)

    out = pl.pallas_call(
        _fused_conv_block_kernel,
        out_shape=jax.ShapeDtypeStruct((N, H, W, Co), jnp.float32),
        grid_spec=pltpu.PrefetchScalarGridSpec(
            num_scalar_prefetch=0,
            grid=(N,),
            in_specs=[
                pl.BlockSpec((None, H + 2, W + 2, Ci), lambda n: (n, 0, 0, 0)),
                pl.BlockSpec((9, Ci, Cm), lambda n: (0, 0, 0)),
                pl.BlockSpec((1, Cm), lambda n: (0, 0)),
                pl.BlockSpec((1, Cm), lambda n: (0, 0)),
                pl.BlockSpec((9, Cm, Co), lambda n: (0, 0, 0)),
                pl.BlockSpec((1, Co), lambda n: (0, 0)),
                pl.BlockSpec((1, Co), lambda n: (0, 0)),
            ],
            out_specs=pl.BlockSpec((None, H, W, Co), lambda n: (n, 0, 0, 0)),
            scratch_shapes=[pltpu.VMEM((H + 2, W + 2, Cm), jnp.bfloat16)],
        ),
        compiler_params=pltpu.CompilerParams(
            dimension_semantics=("parallel",),
            vmem_limit_bytes=32 * 1024 * 1024),
        cost_estimate=pl.CostEstimate(
            flops=flops, transcendentals=0, bytes_accessed=bytes_accessed),
    )(xp, w1_k, s1, t1, w2_k, s2, t2)

    out = out[..., :C2]                                   # drop channel padding
    return jnp.transpose(out, (0, 3, 1, 2))               # NHWC -> NCHW


def conv_block_reference(x_nchw, params, eps=1e-5):
    """Pure-JAX f32 reference (lax conv) mirroring the PyTorch module."""
    x = x_nchw
    for (w_oihw, b, gamma, beta, mean, var) in params:
        y = jax.lax.conv_general_dilated(
            x, w_oihw, window_strides=(1, 1), padding="SAME",
            dimension_numbers=("NCHW", "OIHW", "NCHW"))
        y = y + b[None, :, None, None]
        y = (y - mean[None, :, None, None]) * (
            gamma * jax.lax.rsqrt(var + eps))[None, :, None, None]
        y = y + beta[None, :, None, None]
        x = jnp.maximum(y, 0.0)
    return x


def make_params(key, ch_in, ch_out):
    """Deterministic synthetic parameters for the two conv+BN layers."""
    params = []
    cin = ch_in
    for layer in range(2):
        keys = jax.random.split(jax.random.fold_in(key, layer), 6)
        w = 0.1 * jax.random.normal(keys[0], (ch_out, cin, 3, 3), jnp.float32)
        b = 0.1 * jax.random.normal(keys[1], (ch_out,), jnp.float32)
        gamma = 1.0 + 0.1 * jax.random.normal(keys[2], (ch_out,), jnp.float32)
        beta = 0.1 * jax.random.normal(keys[3], (ch_out,), jnp.float32)
        mean = 0.1 * jax.random.normal(keys[4], (ch_out,), jnp.float32)
        var = 0.5 + jax.random.uniform(keys[5], (ch_out,), jnp.float32)
        params.append((w, b, gamma, beta, mean, var))
        cin = ch_out
    return params


if __name__ == "__main__":
    key = jax.random.PRNGKey(0)
    k_x, k_p = jax.random.split(key)

    N, CH_IN, CH_OUT, H, W = 2, 4, 8, 16, 16
    x = jax.random.normal(k_x, (N, CH_IN, H, W), jnp.float32)
    params = make_params(k_p, CH_IN, CH_OUT)

    fwd = jax.jit(conv_block_forward)
    out = jax.block_until_ready(fwd(x, params))
    ref = jax.block_until_ready(conv_block_reference(x, params))

    assert out.shape == (N, CH_OUT, H, W), out.shape
    # bf16 MXU inputs (with f32 accumulation + f32 BN/ReLU epilogue) vs the
    # pure-f32 reference: tolerance loosened from 1e-3 to 2e-2 accordingly.
    np.testing.assert_allclose(np.asarray(out), np.asarray(ref),
                               rtol=2e-2, atol=2e-2)
    print("KERNEL_OK")
</pallas_src>

<mosaic_0001>
module attributes {stable_mosaic.version = 11 : i64} {
  func.func @_fused_conv_block_kernel(%arg0: i32, %arg1: memref<1x18x18x128xbf16, #tpu.memory_space<vmem>>, %arg2: memref<9x128x128xbf16, #tpu.memory_space<vmem>>, %arg3: memref<1x128xf32, #tpu.memory_space<vmem>>, %arg4: memref<1x128xf32, #tpu.memory_space<vmem>>, %arg5: memref<9x128x128xbf16, #tpu.memory_space<vmem>>, %arg6: memref<1x128xf32, #tpu.memory_space<vmem>>, %arg7: memref<1x128xf32, #tpu.memory_space<vmem>>, %arg8: memref<1x16x16x128xf32, #tpu.memory_space<vmem>>, %arg9: memref<18x18x128xbf16, #tpu.memory_space<vmem>>) attributes {dimension_semantics = [#tpu.dimension_semantics<parallel>], iteration_bounds = array<i64: 2>, scalar_prefetch = 0 : i64, scratch_operands = 1 : i64, tpu.core_type = #tpu.core_type<tc>, window_params = [{transform_indices = @transform_0, window_bounds = array<i64: 1, 18, 18, 128>}, {pipeline_mode = #tpu.pipeline_mode<synchronous>, transform_indices = @transform_1, window_bounds = array<i64: 9, 128, 128>}, {pipeline_mode = #tpu.pipeline_mode<synchronous>, transform_indices = @transform_2, window_bounds = array<i64: 1, 128>}, {pipeline_mode = #tpu.pipeline_mode<synchronous>, transform_indices = @transform_3, window_bounds = array<i64: 1, 128>}, {pipeline_mode = #tpu.pipeline_mode<synchronous>, transform_indices = @transform_4, window_bounds = array<i64: 9, 128, 128>}, {pipeline_mode = #tpu.pipeline_mode<synchronous>, transform_indices = @transform_5, window_bounds = array<i64: 1, 128>}, {pipeline_mode = #tpu.pipeline_mode<synchronous>, transform_indices = @transform_6, window_bounds = array<i64: 1, 128>}, {transform_indices = @transform_7, window_bounds = array<i64: 1, 16, 16, 128>}]} {
    %c0 = arith.constant 0 : index
    %c0_0 = arith.constant 0 : index
    %c0_1 = arith.constant 0 : index
    %c0_2 = arith.constant 0 : index
    %0 = vector.load %arg1[%c0, %c0_0, %c0_1, %c0_2] : memref<1x18x18x128xbf16, #tpu.memory_space<vmem>>, vector<1x16x16x128xbf16>
    %1 = vector.shape_cast %0 : vector<1x16x16x128xbf16> to vector<16x16x128xbf16>
    %2 = vector.shape_cast %1 : vector<16x16x128xbf16> to vector<256x128xbf16>
    %c0_3 = arith.constant 0 : index
    %c0_4 = arith.constant 0 : index
    %c0_5 = arith.constant 0 : index
    %3 = vector.load %arg2[%c0_3, %c0_4, %c0_5] : memref<9x128x128xbf16, #tpu.memory_space<vmem>>, vector<1x128x128xbf16>
    %4 = vector.shape_cast %3 : vector<1x128x128xbf16> to vector<128x128xbf16>
    %cst = arith.constant dense<0.000000e+00> : vector<256x128xf32>
    %5 = tpu.matmul %2, %4, %cst {dimension_numbers = #tpu.dot_dimension_numbers<[1], [0], [0], [1], [0, 0, 1, 1], [], []>} : vector<256x128xbf16>, vector<128x128xbf16>, vector<256x128xf32> -> vector<256x128xf32>
    %c0_6 = arith.constant 0 : index
    %c0_7 = arith.constant 0 : index
    %c1 = arith.constant 1 : index
    %c0_8 = arith.constant 0 : index
    %6 = vector.load %arg1[%c0_6, %c0_7, %c1, %c0_8] : memref<1x18x18x128xbf16, #tpu.memory_space<vmem>>, vector<1x16x16x128xbf16>
    %7 = vector.shape_cast %6 : vector<1x16x16x128xbf16> to vector<16x16x128xbf16>
    %8 = vector.shape_cast %7 : vector<16x16x128xbf16> to vector<256x128xbf16>
    %c1_9 = arith.constant 1 : index
    %c0_10 = arith.constant 0 : index
    %c0_11 = arith.constant 0 : index
    %9 = vector.load %arg2[%c1_9, %c0_10, %c0_11] : memref<9x128x128xbf16, #tpu.memory_space<vmem>>, vector<1x128x128xbf16>
    %10 = vector.shape_cast %9 : vector<1x128x128xbf16> to vector<128x128xbf16>
    %cst_12 = arith.constant dense<0.000000e+00> : vector<256x128xf32>
    %11 = tpu.matmul %8, %10, %cst_12 {dimension_numbers = #tpu.dot_dimension_numbers<[1], [0], [0], [1], [0, 0, 1, 1], [], []>} : vector<256x128xbf16>, vector<128x128xbf16>, vector<256x128xf32> -> vector<256x128xf32>
    %12 = arith.addf %5, %11 : vector<256x128xf32>
    %c0_13 = arith.constant 0 : index
    %c0_14 = arith.constant 0 : index
    %c2 = arith.constant 2 : index
    %c0_15 = arith.constant 0 : index
    %13 = vector.load %arg1[%c0_13, %c0_14, %c2, %c0_15] : memref<1x18x18x128xbf16, #tpu.memory_space<vmem>>, vector<1x16x16x128xbf16>
    %14 = vector.shape_cast %13 : vector<1x16x16x128xbf16> to vector<16x16x128xbf16>
    %15 = vector.shape_cast %14 : vector<16x16x128xbf16> to vector<256x128xbf16>
    %c2_16 = arith.constant 2 : index
    %c0_17 = arith.constant 0 : index
    %c0_18 = arith.constant 0 : index
    %16 = vector.load %arg2[%c2_16, %c0_17, %c0_18] : memref<9x128x128xbf16, #tpu.memory_space<vmem>>, vector<1x128x128xbf16>
    %17 = vector.shape_cast %16 : vector<1x128x128xbf16> to vector<128x128xbf16>
    %cst_19 = arith.constant dense<0.000000e+00> : vector<256x128xf32>
    %18 = tpu.matmul %15, %17, %cst_19 {dimension_numbers = #tpu.dot_dimension_numbers<[1], [0], [0], [1], [0, 0, 1, 1], [], []>} : vector<256x128xbf16>, vector<128x128xbf16>, vector<256x128xf32> -> vector<256x128xf32>
    %19 = arith.addf %12, %18 : vector<256x128xf32>
    %c0_20 = arith.constant 0 : index
    %c1_21 = arith.constant 1 : index
    %c0_22 = arith.constant 0 : index
    %c0_23 = arith.constant 0 : index
    %20 = vector.load %arg1[%c0_20, %c1_21, %c0_22, %c0_23] : memref<1x18x18x128xbf16, #tpu.memory_space<vmem>>, vector<1x16x16x128xbf16>
    %21 = vector.shape_cast %20 : vector<1x16x16x128xbf16> to vector<16x16x128xbf16>
    %22 = vector.shape_cast %21 : vector<16x16x128xbf16> to vector<256x128xbf16>
    %c3 = arith.constant 3 : index
    %c0_24 = arith.constant 0 : index
    %c0_25 = arith.constant 0 : index
    %23 = vector.load %arg2[%c3, %c0_24, %c0_25] : memref<9x128x128xbf16, #tpu.memory_space<vmem>>, vector<1x128x128xbf16>
    %24 = vector.shape_cast %23 : vector<1x128x128xbf16> to vector<128x128xbf16>
    %cst_26 = arith.constant dense<0.000000e+00> : vector<256x128xf32>
    %25 = tpu.matmul %22, %24, %cst_26 {dimension_numbers = #tpu.dot_dimension_numbers<[1], [0], [0], [1], [0, 0, 1, 1], [], []>} : vector<256x128xbf16>, vector<128x128xbf16>, vector<256x128xf32> -> vector<256x128xf32>
    %26 = arith.addf %19, %25 : vector<256x128xf32>
    %c0_27 = arith.constant 0 : index
    %c1_28 = arith.constant 1 : index
    %c1_29 = arith.constant 1 : index
    %c0_30 = arith.constant 0 : index
    %27 = vector.load %arg1[%c0_27, %c1_28, %c1_29, %c0_30] : memref<1x18x18x128xbf16, #tpu.memory_space<vmem>>, vector<1x16x16x128xbf16>
    %28 = vector.shape_cast %27 : vector<1x16x16x128xbf16> to vector<16x16x128xbf16>
    %29 = vector.shape_cast %28 : vector<16x16x128xbf16> to vector<256x128xbf16>
    %c4 = arith.constant 4 : index
    %c0_31 = arith.constant 0 : index
    %c0_32 = arith.constant 0 : index
    %30 = vector.load %arg2[%c4, %c0_31, %c0_32] : memref<9x128x128xbf16, #tpu.memory_space<vmem>>, vector<1x128x128xbf16>
    %31 = vector.shape_cast %30 : vector<1x128x128xbf16> to vector<128x128xbf16>
    %cst_33 = arith.constant dense<0.000000e+00> : vector<256x128xf32>
    %32 = tpu.matmul %29, %31, %cst_33 {dimension_numbers = #tpu.dot_dimension_numbers<[1], [0], [0], [1], [0, 0, 1, 1], [], []>} : vector<256x128xbf16>, vector<128x128xbf16>, vector<256x128xf32> -> vector<256x128xf32>
    %33 = arith.addf %26, %32 : vector<256x128xf32>
    %c0_34 = arith.constant 0 : index
    %c1_35 = arith.constant 1 : index
    %c2_36 = arith.constant 2 : index
    %c0_37 = arith.constant 0 : index
    %34 = vector.load %arg1[%c0_34, %c1_35, %c2_36, %c0_37] : memref<1x18x18x128xbf16, #tpu.memory_space<vmem>>, vector<1x16x16x128xbf16>
    %35 = vector.shape_cast %34 : vector<1x16x16x128xbf16> to vector<16x16x128xbf16>
    %36 = vector.shape_cast %35 : vector<16x16x128xbf16> to vector<256x128xbf16>
    %c5 = arith.constant 5 : index
    %c0_38 = arith.constant 0 : index
    %c0_39 = arith.constant 0 : index
    %37 = vector.load %arg2[%c5, %c0_38, %c0_39] : memref<9x128x128xbf16, #tpu.memory_space<vmem>>, vector<1x128x128xbf16>
    %38 = vector.shape_cast %37 : vector<1x128x128xbf16> to vector<128x128xbf16>
    %cst_40 = arith.constant dense<0.000000e+00> : vector<256x128xf32>
    %39 = tpu.matmul %36, %38, %cst_40 {dimension_numbers = #tpu.dot_dimension_numbers<[1], [0], [0], [1], [0, 0, 1, 1], [], []>} : vector<256x128xbf16>, vector<128x128xbf16>, vector<256x128xf32> -> vector<256x128xf32>
    %40 = arith.addf %33, %39 : vector<256x128xf32>
    %c0_41 = arith.constant 0 : index
    %c2_42 = arith.constant 2 : index
    %c0_43 = arith.constant 0 : index
    %c0_44 = arith.constant 0 : index
    %41 = vector.load %arg1[%c0_41, %c2_42, %c0_43, %c0_44] : memref<1x18x18x128xbf16, #tpu.memory_space<vmem>>, vector<1x16x16x128xbf16>
    %42 = vector.shape_cast %41 : vector<1x16x16x128xbf16> to vector<16x16x128xbf16>
    %43 = vector.shape_cast %42 : vector<16x16x128xbf16> to vector<256x128xbf16>
    %c6 = arith.constant 6 : index
    %c0_45 = arith.constant 0 : index
    %c0_46 = arith.constant 0 : index
    %44 = vector.load %arg2[%c6, %c0_45, %c0_46] : memref<9x128x128xbf16, #tpu.memory_space<vmem>>, vector<1x128x128xbf16>
    %45 = vector.shape_cast %44 : vector<1x128x128xbf16> to vector<128x128xbf16>
    %cst_47 = arith.constant dense<0.000000e+00> : vector<256x128xf32>
    %46 = tpu.matmul %43, %45, %cst_47 {dimension_numbers = #tpu.dot_dimension_numbers<[1], [0], [0], [1], [0, 0, 1, 1], [], []>} : vector<256x128xbf16>, vector<128x128xbf16>, vector<256x128xf32> -> vector<256x128xf32>
    %47 = arith.addf %40, %46 : vector<256x128xf32>
    %c0_48 = arith.constant 0 : index
    %c2_49 = arith.constant 2 : index
    %c1_50 = arith.constant 1 : index
    %c0_51 = arith.constant 0 : index
    %48 = vector.load %arg1[%c0_48, %c2_49, %c1_50, %c0_51] : memref<1x18x18x128xbf16, #tpu.memory_space<vmem>>, vector<1x16x16x128xbf16>
    %49 = vector.shape_cast %48 : vector<1x16x16x128xbf16> to vector<16x16x128xbf16>
    %50 = vector.shape_cast %49 : vector<16x16x128xbf16> to vector<256x128xbf16>
    %c7 = arith.constant 7 : index
    %c0_52 = arith.constant 0 : index
    %c0_53 = arith.constant 0 : index
    %51 = vector.load %arg2[%c7, %c0_52, %c0_53] : memref<9x128x128xbf16, #tpu.memory_space<vmem>>, vector<1x128x128xbf16>
    %52 = vector.shape_cast %51 : vector<1x128x128xbf16> to vector<128x128xbf16>
    %cst_54 = arith.constant dense<0.000000e+00> : vector<256x128xf32>
    %53 = tpu.matmul %50, %52, %cst_54 {dimension_numbers = #tpu.dot_dimension_numbers<[1], [0], [0], [1], [0, 0, 1, 1], [], []>} : vector<256x128xbf16>, vector<128x128xbf16>, vector<256x128xf32> -> vector<256x128xf32>
    %54 = arith.addf %47, %53 : vector<256x128xf32>
    %c0_55 = arith.constant 0 : index
    %c2_56 = arith.constant 2 : index
    %c2_57 = arith.constant 2 : index
    %c0_58 = arith.constant 0 : index
    %55 = vector.load %arg1[%c0_55, %c2_56, %c2_57, %c0_58] : memref<1x18x18x128xbf16, #tpu.memory_space<vmem>>, vector<1x16x16x128xbf16>
    %56 = vector.shape_cast %55 : vector<1x16x16x128xbf16> to vector<16x16x128xbf16>
    %57 = vector.shape_cast %56 : vector<16x16x128xbf16> to vector<256x128xbf16>
    %c8 = arith.constant 8 : index
    %c0_59 = arith.constant 0 : index
    %c0_60 = arith.constant 0 : index
    %58 = vector.load %arg2[%c8, %c0_59, %c0_60] : memref<9x128x128xbf16, #tpu.memory_space<vmem>>, vector<1x128x128xbf16>
    %59 = vector.shape_cast %58 : vector<1x128x128xbf16> to vector<128x128xbf16>
    %cst_61 = arith.constant dense<0.000000e+00> : vector<256x128xf32>
    %60 = tpu.matmul %57, %59, %cst_61 {dimension_numbers = #tpu.dot_dimension_numbers<[1], [0], [0], [1], [0, 0, 1, 1], [], []>} : vector<256x128xbf16>, vector<128x128xbf16>, vector<256x128xf32> -> vector<256x128xf32>
    %61 = arith.addf %54, %60 : vector<256x128xf32>
    %c0_62 = arith.constant 0 : index
    %c0_63 = arith.constant 0 : index
    %62 = vector.load %arg3[%c0_62, %c0_63] : memref<1x128xf32, #tpu.memory_space<vmem>>, vector<1x128xf32>
    %63 = vector.broadcast %62 : vector<1x128xf32> to vector<256x128xf32>
    %64 = arith.mulf %61, %63 : vector<256x128xf32>
    %c0_64 = arith.constant 0 : index
    %c0_65 = arith.constant 0 : index
    %65 = vector.load %arg4[%c0_64, %c0_65] : memref<1x128xf32, #tpu.memory_space<vmem>>, vector<1x128xf32>
    %66 = vector.broadcast %65 : vector<1x128xf32> to vector<256x128xf32>
    %67 = arith.addf %64, %66 : vector<256x128xf32>
    %cst_66 = arith.constant 0.000000e+00 : f32
    %68 = vector.broadcast %cst_66 : f32 to vector<256x128xf32>
    %69 = arith.maximumf %67, %68 : vector<256x128xf32>
    %cst_67 = arith.constant 0.000000e+00 : bf16
    %70 = vector.broadcast %cst_67 : bf16 to vector<18x18x128xbf16>
    %c0_68 = arith.constant 0 : index
    %c0_69 = arith.constant 0 : index
    %c0_70 = arith.constant 0 : index
    %71 = vector.load %arg9[%c0_68, %c0_69, %c0_70] : memref<18x18x128xbf16, #tpu.memory_space<vmem>>, vector<18x18x128xbf16>
    tpu.vector_store %arg9[%c0_68, %c0_69, %c0_70], %70 {strides = array<i32>} : memref<18x18x128xbf16, #tpu.memory_space<vmem>>, vector<18x18x128xbf16>,
    %72 = vector.shape_cast %69 : vector<256x128xf32> to vector<16x16x128xf32>
    %73 = arith.truncf %72 : vector<16x16x128xf32> to vector<16x16x128xbf16>
    %c1_71 = arith.constant 1 : index
    %c1_72 = arith.constant 1 : index
    %c0_73 = arith.constant 0 : index
    %74 = vector.load %arg9[%c1_71, %c1_72, %c0_73] : memref<18x18x128xbf16, #tpu.memory_space<vmem>>, vector<16x16x128xbf16>
    tpu.vector_store %arg9[%c1_71, %c1_72, %c0_73], %73 {strides = array<i32>} : memref<18x18x128xbf16, #tpu.memory_space<vmem>>, vector<16x16x128xbf16>,
    %c0_74 = arith.constant 0 : index
    %c0_75 = arith.constant 0 : index
    %c0_76 = arith.constant 0 : index
    %75 = vector.load %arg9[%c0_74, %c0_75, %c0_76] : memref<18x18x128xbf16, #tpu.memory_space<vmem>>, vector<16x16x128xbf16>
    %76 = vector.shape_cast %75 : vector<16x16x128xbf16> to vector<256x128xbf16>
    %c0_77 = arith.constant 0 : index
    %c0_78 = arith.constant 0 : index
    %c0_79 = arith.constant 0 : index
    %77 = vector.load %arg5[%c0_77, %c0_78, %c0_79] : memref<9x128x128xbf16, #tpu.memory_space<vmem>>, vector<1x128x128xbf16>
    %78 = vector.shape_cast %77 : vector<1x128x128xbf16> to vector<128x128xbf16>
    %cst_80 = arith.constant dense<0.000000e+00> : vector<256x128xf32>
    %79 = tpu.matmul %76, %78, %cst_80 {dimension_numbers = #tpu.dot_dimension_numbers<[1], [0], [0], [1], [0, 0, 1, 1], [], []>} : vector<256x128xbf16>, vector<128x128xbf16>, vector<256x128xf32> -> vector<256x128xf32>
    %c0_81 = arith.constant 0 : index
    %c1_82 = arith.constant 1 : index
    %c0_83 = arith.constant 0 : index
    %80 = vector.load %arg9[%c0_81, %c1_82, %c0_83] : memref<18x18x128xbf16, #tpu.memory_space<vmem>>, vector<16x16x128xbf16>
    %81 = vector.shape_cast %80 : vector<16x16x128xbf16> to vector<256x128xbf16>
    %c1_84 = arith.constant 1 : index
    %c0_85 = arith.constant 0 : index
    %c0_86 = arith.constant 0 : index
    %82 = vector.load %arg5[%c1_84, %c0_85, %c0_86] : memref<9x128x128xbf16, #tpu.memory_space<vmem>>, vector<1x128x128xbf16>
    %83 = vector.shape_cast %82 : vector<1x128x128xbf16> to vector<128x128xbf16>
    %cst_87 = arith.constant dense<0.000000e+00> : vector<256x128xf32>
    %84 = tpu.matmul %81, %83, %cst_87 {dimension_numbers = #tpu.dot_dimension_numbers<[1], [0], [0], [1], [0, 0, 1, 1], [], []>} : vector<256x128xbf16>, vector<128x128xbf16>, vector<256x128xf32> -> vector<256x128xf32>
    %85 = arith.addf %79, %84 : vector<256x128xf32>
    %c0_88 = arith.constant 0 : index
    %c2_89 = arith.constant 2 : index
    %c0_90 = arith.constant 0 : index
    %86 = vector.load %arg9[%c0_88, %c2_89, %c0_90] : memref<18x18x128xbf16, #tpu.memory_space<vmem>>, vector<16x16x128xbf16>
    %87 = vector.shape_cast %86 : vector<16x16x128xbf16> to vector<256x128xbf16>
    %c2_91 = arith.constant 2 : index
    %c0_92 = arith.constant 0 : index
    %c0_93 = arith.constant 0 : index
    %88 = vector.load %arg5[%c2_91, %c0_92, %c0_93] : memref<9x128x128xbf16, #tpu.memory_space<vmem>>, vector<1x128x128xbf16>
    %89 = vector.shape_cast %88 : vector<1x128x128xbf16> to vector<128x128xbf16>
    %cst_94 = arith.constant dense<0.000000e+00> : vector<256x128xf32>
    %90 = tpu.matmul %87, %89, %cst_94 {dimension_numbers = #tpu.dot_dimension_numbers<[1], [0], [0], [1], [0, 0, 1, 1], [], []>} : vector<256x128xbf16>, vector<128x128xbf16>, vector<256x128xf32> -> vector<256x128xf32>
    %91 = arith.addf %85, %90 : vector<256x128xf32>
    %c1_95 = arith.constant 1 : index
    %c0_96 = arith.constant 0 : index
    %c0_97 = arith.constant 0 : index
    %92 = vector.load %arg9[%c1_95, %c0_96, %c0_97] : memref<18x18x128xbf16, #tpu.memory_space<vmem>>, vector<16x16x128xbf16>
    %93 = vector.shape_cast %92 : vector<16x16x128xbf16> to vector<256x128xbf16>
    %c3_98 = arith.constant 3 : index
    %c0_99 = arith.constant 0 : index
    %c0_100 = arith.constant 0 : index
    %94 = vector.load %arg5[%c3_98, %c0_99, %c0_100] : memref<9x128x128xbf16, #tpu.memory_space<vmem>>, vector<1x128x128xbf16>
    %95 = vector.shape_cast %94 : vector<1x128x128xbf16> to vector<128x128xbf16>
    %cst_101 = arith.constant dense<0.000000e+00> : vector<256x128xf32>
    %96 = tpu.matmul %93, %95, %cst_101 {dimension_numbers = #tpu.dot_dimension_numbers<[1], [0], [0], [1], [0, 0, 1, 1], [], []>} : vector<256x128xbf16>, vector<128x128xbf16>, vector<256x128xf32> -> vector<256x128xf32>
    %97 = arith.addf %91, %96 : vector<256x128xf32>
    %c1_102 = arith.constant 1 : index
    %c1_103 = arith.constant 1 : index
    %c0_104 = arith.constant 0 : index
    %98 = vector.load %arg9[%c1_102, %c1_103, %c0_104] : memref<18x18x128xbf16, #tpu.memory_space<vmem>>, vector<16x16x128xbf16>
    %99 = vector.shape_cast %98 : vector<16x16x128xbf16> to vector<256x128xbf16>
    %c4_105 = arith.constant 4 : index
    %c0_106 = arith.constant 0 : index
    %c0_107 = arith.constant 0 : index
    %100 = vector.load %arg5[%c4_105, %c0_106, %c0_107] : memref<9x128x128xbf16, #tpu.memory_space<vmem>>, vector<1x128x128xbf16>
    %101 = vector.shape_cast %100 : vector<1x128x128xbf16> to vector<128x128xbf16>
    %cst_108 = arith.constant dense<0.000000e+00> : vector<256x128xf32>
    %102 = tpu.matmul %99, %101, %cst_108 {dimension_numbers = #tpu.dot_dimension_numbers<[1], [0], [0], [1], [0, 0, 1, 1], [], []>} : vector<256x128xbf16>, vector<128x128xbf16>, vector<256x128xf32> -> vector<256x128xf32>
    %103 = arith.addf %97, %102 : vector<256x128xf32>
    %c1_109 = arith.constant 1 : index
    %c2_110 = arith.constant 2 : index
    %c0_111 = arith.constant 0 : index
    %104 = vector.load %arg9[%c1_109, %c2_110, %c0_111] : memref<18x18x128xbf16, #tpu.memory_space<vmem>>, vector<16x16x128xbf16>
    %105 = vector.shape_cast %104 : vector<16x16x128xbf16> to vector<256x128xbf16>
    %c5_112 = arith.constant 5 : index
    %c0_113 = arith.constant 0 : index
    %c0_114 = arith.constant 0 : index
    %106 = vector.load %arg5[%c5_112, %c0_113, %c0_114] : memref<9x128x128xbf16, #tpu.memory_space<vmem>>, vector<1x128x128xbf16>
    %107 = vector.shape_cast %106 : vector<1x128x128xbf16> to vector<128x128xbf16>
    %cst_115 = arith.constant dense<0.000000e+00> : vector<256x128xf32>
    %108 = tpu.matmul %105, %107, %cst_115 {dimension_numbers = #tpu.dot_dimension_numbers<[1], [0], [0], [1], [0, 0, 1, 1], [], []>} : vector<256x128xbf16>, vector<128x128xbf16>, vector<256x128xf32> -> vector<256x128xf32>
    %109 = arith.addf %103, %108 : vector<256x128xf32>
    %c2_116 = arith.constant 2 : index
    %c0_117 = arith.constant 0 : index
    %c0_118 = arith.constant 0 : index
    %110 = vector.load %arg9[%c2_116, %c0_117, %c0_118] : memref<18x18x128xbf16, #tpu.memory_space<vmem>>, vector<16x16x128xbf16>
    %111 = vector.shape_cast %110 : vector<16x16x128xbf16> to vector<256x128xbf16>
    %c6_119 = arith.constant 6 : index
    %c0_120 = arith.constant 0 : index
    %c0_121 = arith.constant 0 : index
    %112 = vector.load %arg5[%c6_119, %c0_120, %c0_121] : memref<9x128x128xbf16, #tpu.memory_space<vmem>>, vector<1x128x128xbf16>
    %113 = vector.shape_cast %112 : vector<1x128x128xbf16> to vector<128x128xbf16>
    %cst_122 = arith.constant dense<0.000000e+00> : vector<256x128xf32>
    %114 = tpu.matmul %111, %113, %cst_122 {dimension_numbers = #tpu.dot_dimension_numbers<[1], [0], [0], [1], [0, 0, 1, 1], [], []>} : vector<256x128xbf16>, vector<128x128xbf16>, vector<256x128xf32> -> vector<256x128xf32>
    %115 = arith.addf %109, %114 : vector<256x128xf32>
    %c2_123 = arith.constant 2 : index
    %c1_124 = arith.constant 1 : index
    %c0_125 = arith.constant 0 : index
    %116 = vector.load %arg9[%c2_123, %c1_124, %c0_125] : memref<18x18x128xbf16, #tpu.memory_space<vmem>>, vector<16x16x128xbf16>
    %117 = vector.shape_cast %116 : vector<16x16x128xbf16> to vector<256x128xbf16>
    %c7_126 = arith.constant 7 : index
    %c0_127 = arith.constant 0 : index
    %c0_128 = arith.constant 0 : index
    %118 = vector.load %arg5[%c7_126, %c0_127, %c0_128] : memref<9x128x128xbf16, #tpu.memory_space<vmem>>, vector<1x128x128xbf16>
    %119 = vector.shape_cast %118 : vector<1x128x128xbf16> to vector<128x128xbf16>
    %cst_129 = arith.constant dense<0.000000e+00> : vector<256x128xf32>
    %120 = tpu.matmul %117, %119, %cst_129 {dimension_numbers = #tpu.dot_dimension_numbers<[1], [0], [0], [1], [0, 0, 1, 1], [], []>} : vector<256x128xbf16>, vector<128x128xbf16>, vector<256x128xf32> -> vector<256x128xf32>
    %121 = arith.addf %115, %120 : vector<256x128xf32>
    %c2_130 = arith.constant 2 : index
    %c2_131 = arith.constant 2 : index
    %c0_132 = arith.constant 0 : index
    %122 = vector.load %arg9[%c2_130, %c2_131, %c0_132] : memref<18x18x128xbf16, #tpu.memory_space<vmem>>, vector<16x16x128xbf16>
    %123 = vector.shape_cast %122 : vector<16x16x128xbf16> to vector<256x128xbf16>
    %c8_133 = arith.constant 8 : index
    %c0_134 = arith.constant 0 : index
    %c0_135 = arith.constant 0 : index
    %124 = vector.load %arg5[%c8_133, %c0_134, %c0_135] : memref<9x128x128xbf16, #tpu.memory_space<vmem>>, vector<1x128x128xbf16>
    %125 = vector.shape_cast %124 : vector<1x128x128xbf16> to vector<128x128xbf16>
    %cst_136 = arith.constant dense<0.000000e+00> : vector<256x128xf32>
    %126 = tpu.matmul %123, %125, %cst_136 {dimension_numbers = #tpu.dot_dimension_numbers<[1], [0], [0], [1], [0, 0, 1, 1], [], []>} : vector<256x128xbf16>, vector<128x128xbf16>, vector<256x128xf32> -> vector<256x128xf32>
    %127 = arith.addf %121, %126 : vector<256x128xf32>
    %c0_137 = arith.constant 0 : index
    %c0_138 = arith.constant 0 : index
    %128 = vector.load %arg6[%c0_137, %c0_138] : memref<1x128xf32, #tpu.memory_space<vmem>>, vector<1x128xf32>
    %129 = vector.broadcast %128 : vector<1x128xf32> to vector<256x128xf32>
    %130 = arith.mulf %127, %129 : vector<256x128xf32>
    %c0_139 = arith.constant 0 : index
    %c0_140 = arith.constant 0 : index
    %131 = vector.load %arg7[%c0_139, %c0_140] : memref<1x128xf32, #tpu.memory_space<vmem>>, vector<1x128xf32>
    %132 = vector.broadcast %131 : vector<1x128xf32> to vector<256x128xf32>
    %133 = arith.addf %130, %132 : vector<256x128xf32>
    %cst_141 = arith.constant 0.000000e+00 : f32
    %134 = vector.broadcast %cst_141 : f32 to vector<256x128xf32>
    %135 = arith.maximumf %133, %134 : vector<256x128xf32>
    %136 = vector.shape_cast %135 : vector<256x128xf32> to vector<16x16x128xf32>
    %c0_142 = arith.constant 0 : index
    %c0_143 = arith.constant 0 : index
    %c0_144 = arith.constant 0 : index
    %c0_145 = arith.constant 0 : index
    %137 = vector.load %arg8[%c0_142, %c0_143, %c0_144, %c0_145] : memref<1x16x16x128xf32, #tpu.memory_space<vmem>>, vector<1x16x16x128xf32>
    %138 = vector.shape_cast %137 : vector<1x16x16x128xf32> to vector<16x16x128xf32>
    %139 = vector.shape_cast %136 : vector<16x16x128xf32> to vector<1x16x16x128xf32>
    tpu.vector_store %arg8[%c0_142, %c0_143, %c0_144, %c0_145], %139 {strides = array<i32>} : memref<1x16x16x128xf32, #tpu.memory_space<vmem>>, vector<1x16x16x128xf32>,
    return
  }
  func.func @transform_0(%arg0: i32) -> (i32, i32, i32, i32) {
    %c0_i32 = arith.constant 0 : i32
    %c0_i32_0 = arith.constant 0 : i32
    %c0_i32_1 = arith.constant 0 : i32
    %c0_i32_2 = arith.constant 0 : i32
    return %arg0, %c0_i32, %c0_i32_0, %c0_i32_1 : i32, i32, i32, i32
  }
  func.func @transform_1(%arg0: i32) -> (i32, i32, i32) {
    %c0_i32 = arith.constant 0 : i32
    %c0_i32_0 = arith.constant 0 : i32
    %c0_i32_1 = arith.constant 0 : i32
    %c0_i32_2 = arith.constant 0 : i32
    return %c0_i32, %c0_i32_0, %c0_i32_1 : i32, i32, i32
  }
  func.func @transform_2(%arg0: i32) -> (i32, i32) {
    %c0_i32 = arith.constant 0 : i32
    %c0_i32_0 = arith.constant 0 : i32
    %c0_i32_1 = arith.constant 0 : i32
    return %c0_i32, %c0_i32_0 : i32, i32
  }
  func.func @transform_3(%arg0: i32) -> (i32, i32) {
    %c0_i32 = arith.constant 0 : i32
    %c0_i32_0 = arith.constant 0 : i32
    %c0_i32_1 = arith.constant 0 : i32
    return %c0_i32, %c0_i32_0 : i32, i32
  }
  func.func @transform_4(%arg0: i32) -> (i32, i32, i32) {
    %c0_i32 = arith.constant 0 : i32
    %c0_i32_0 = arith.constant 0 : i32
    %c0_i32_1 = arith.constant 0 : i32
    %c0_i32_2 = arith.constant 0 : i32
    return %c0_i32, %c0_i32_0, %c0_i32_1 : i32, i32, i32
  }
  func.func @transform_5(%arg0: i32) -> (i32, i32) {
    %c0_i32 = arith.constant 0 : i32
    %c0_i32_0 = arith.constant 0 : i32
    %c0_i32_1 = arith.constant 0 : i32
    return %c0_i32, %c0_i32_0 : i32, i32
  }
  func.func @transform_6(%arg0: i32) -> (i32, i32) {
    %c0_i32 = arith.constant 0 : i32
    %c0_i32_0 = arith.constant 0 : i32
    %c0_i32_1 = arith.constant 0 : i32
    return %c0_i32, %c0_i32_0 : i32, i32
  }
  func.func @transform_7(%arg0: i32) -> (i32, i32, i32, i32) {
    %c0_i32 = arith.constant 0 : i32
    %c0_i32_0 = arith.constant 0 : i32
    %c0_i32_1 = arith.constant 0 : i32
    %c0_i32_2 = arith.constant 0 : i32
    return %arg0, %c0_i32, %c0_i32_0, %c0_i32_1 : i32, i32, i32, i32
  }
}

</mosaic_0001>

<bundles_post_ra>
// kernel: conv_block_forward.1
= control target key start
LH: loop header
LB: loop body
LE: loop exit
PB: predicated region body
PF: predicated region fallthrough
CT: control target
= control target key end

     0   :  { %s13458_s24 = smov 0   ;;  %s18356_s0 = inlined_call_operand.vmem [shape: bf16[2,18,18,128], index: 0, kind: input, shape index: {}]   ;;  %s18357_s1 = inlined_call_operand.vmem [shape: bf16[9,128,128], index: 1, kind: input, shape index: {}]   ;;  %s18358_s2 = inlined_call_operand.vmem [shape: f32[1,128], index: 2, kind: input, shape index: {}]   ;;  %s18359_s3 = inlined_call_operand.vmem [shape: f32[1,128], index: 3, kind: input, shape index: {}]   ;;  %s18360_s4 = inlined_call_operand.vmem [shape: bf16[9,128,128], index: 4, kind: input, shape index: {}]   ;;  %s18361_s5 = inlined_call_operand.vmem [shape: f32[1,128], index: 5, kind: input, shape index: {}]   ;;  %s18362_s6 = inlined_call_operand.vmem [shape: f32[1,128], index: 6, kind: input, shape index: {}]   ;;  %s18363_s7 = inlined_call_operand.vmem [shape: f32[2,16,16,128], index: 7, kind: output, shape index: {}]  }
   0x1 LB: > { %s10789_s25 = sadd.s32 4294967295, %s13415_s24   ;;  %p10793_p0 = scmp.ge.s32.totalorder %s13415_s24, 1  ;;  %s13415_s24 = sphi %s13458_s24, %s17_s24  }
   0x2   : > { %p237_p1 = scmp.lt.s32.totalorder %s13415_s24, 3 }
   0x4   : > { %p238_p2 = pnand %p10793_p0, %p237_p1 }
   0x6   : > { %241 = sbr.rel (%p238_p2) target bundleno = 1145 (0x479), region = 48 }
   0xb   : > { %v13150_v0 = vld [vmem:[%s18357_s1 + $0x78] sm:$0xff]   ;;  %p269_p3 = scmp.lt.s32.totalorder %s10789_s25, 1  ;;  %v13152_v2 = vld [vmem:[%s18357_s1 + $0x70] sm:$0xff]   ;;  %v13154_v4 = vld [vmem:[%s18357_s1 + $0x68] sm:$0xff]   ;;  %vm344_vm0 = vsmask.f32 3328 }
   0xc   : > { %v13151_v1 = vld [vmem:[%s18357_s1 + $0x38] sm:$0xff]   ;;  %12276 = vmatprep.subr.bf16.mxu0 %v13150_v0  ;;  %v13153_v3 = vld [vmem:[%s18357_s1 + $0x30] sm:$0xff]   ;;  %v13155_v5 = vld [vmem:[%s18357_s1 + $0x28] sm:$0xff]   ;;  %vm345_vm1 = vsmask.f32 7440  ;;  %v18383_v37 = vmov 0 }
   0xd   : > { %12324 = vmatprep.subr.bf16.mxu1 %v13151_v1  ;;  %12277 = vmatpush3.bf16.msra.mxu0 %v13150_v0  ;;  %s18733_s25 = smov (!%p269_p3, %s10789_s25), 1  ;;  %v13156_v6 = vld [vmem:[%s18357_s1 + $0x60] sm:$0xff]   ;;  %v13158_v8 = vld [vmem:[%s18357_s1 + $0x58] sm:$0xff]   ;;  %v13160_v10 = vld [vmem:[%s18357_s1 + $0x50] sm:$0xff]   ;;  %vm1374_vm3 = vcmask 1042432   ;;  %vm1375_vm4 = vcmask 1046532  }
   0xe   : > { %12325 = vmatpush3.bf16.msra.mxu1 %v13151_v1  ;;  %12278 = vmatprep.subr.bf16.mxu0 %v13152_v2  ;;  %v13157_v7 = vld [vmem:[%s18357_s1 + $0x20] sm:$0xff]   ;;  %s13140_s19 = smul.u32 216, %s18733_s25  ;;  %v13159_v9 = vld [vmem:[%s18357_s1 + $0x18] sm:$0xff]   ;;  %v13161_v11 = vld [vmem:[%s18357_s1 + $0x10] sm:$0xff]   ;;  %vm5673_vm6 = vcmask 1043456   ;;  %vm5680_vm10 = vcmask 1040384  }
   0xf   : > { %12326 = vmatprep.subr.bf16.mxu1 %v13153_v3  ;;  %v13162_v17 = vld [vmem:[%s18357_s1 + $0x48] sm:$0xff]   ;;  %vm13543_vm2 = vmor %vm344_vm0, %vm345_vm1  ;;  %v13164_v48 = vld [vmem:[%s18357_s1 + $0x40] sm:$0xff]   ;;  %vm5674_vm7 = vsmask.f32 7938  ;;  %vm5349_vm8 = vsmask.f32 256 }
  0x10   : > { %s13502_s28 = scalar_lea.vmem %s18356_s0, %s13140_s19  ;;  %v13163_v32 = vld [vmem:[%s18357_s1 + $0x8] sm:$0xff]   ;;  %v18384_v37 = vsel %vm13543_vm2, 4294967295, %v18383_v37  ;;  %v13165_v53 = vld [vmem:[%s18357_s1] sm:$0xff]   ;;  %vm13895_vm5 = vmor %vm1374_vm3, %vm1375_vm4  ;;  %vm5350_vm9 = vsmask.f32 4368  ;;  %s11811_s20 = sshll.u32 %s18733_s25, 8 }
  0x11   : > { %12279 = vmatpush3.bf16.msra.mxu0 %v13152_v2  ;;  %v280_v12 = vld [vmem:[%s13502_s28] sm:$0xf]  ;;  %v13512_v13 = vld [vmem:[%s13502_s28 + $0x4] sm:$0xf]  ;;  %v13515_v14 = vld [vmem:[%s13502_s28 + $0x8] sm:$0x1]  ;;  %s18147_s22 = scalar_lea.vmem %s18363_s7, %s11811_s20 }
  0x12   : > { %12327 = vmatpush3.bf16.msra.mxu1 %v13153_v3  ;;  %12280 = vmatprep.subr.bf16.mxu0 %v13154_v4  ;;  %v348_v15 = vshrl.u32 %v280_v12, 16  ;;  %v351_v16 = vshll.u32 %v280_v12, 16  ;;  %v357_v18 = vshll.u32 %v13512_v13, 16  ;;  %v361_v19 = vshrl.u32 %v13512_v13, 16  ;;  %v13525_v22 = vld [vmem:[%s13502_s28 + $0xc] sm:$0xf]  ;;  %vm15755_vm11 = vmand %vm5673_vm6, %vm5674_vm7 }
  0x13   : > { %12328 = vmatprep.subr.bf16.mxu1 %v13155_v5  ;;  %v367_v20 = vshll.u32 %v13515_v14, 16  ;;  %v1382_v21 = vrot.slane %v13515_v14, 5  ;;  %v10837_v25 = vcombine.low %v280_v12, %v13512_v13  ;;  %v13529_v26 = vld [vmem:[%s13502_s28 + $0x10] sm:$0xf]  ;;  %v13532_v27 = vld [vmem:[%s13502_s28 + $0x14] sm:$0x1]  ;;  %vm15767_vm12 = vmor %vm5349_vm8, %vm5350_vm9 }
  0x14   : > { %v350_v23 = vrot.slane %v348_v15, 4  ;;  %v353_v24 = vrot.slane %v351_v16, 5  ;;  %v359_v28 = vrot.slane %v357_v18, 5  ;;  %v363_v29 = vrot.slane %v361_v19, 4  ;;  %18385 = vst [vmem:[#allocation3_spill] sm:$0xff] %v18384_v37  ;;  %vm15773_vm13 = vmand %vm5680_vm10, %vm5349_vm8 }
  0x15   : > { %12281 = vmatpush3.bf16.msra.mxu0 %v13154_v4  ;;  %v369_v30 = vrot.slane %v367_v20, 5  ;;  %v372_v31 = vshrl.u32 %v13525_v22, 16  ;;  %12340 = vmatprep.mubr.bf16.mxu1 %v10837_v25  ;;  %v375_v34 = vshll.u32 %v13525_v22, 16  ;;  %v381_v35 = vshll.u32 %v13529_v26, 16  ;;  %v13550_v42 = vld [vmem:[%s13502_s28 + $0x18] sm:$0xf] }
  0x16   : > { %12329 = vmatpush3.bf16.msra.mxu1 %v13155_v5  ;;  %12282 = vmatprep.subr.bf16.mxu0 %v13156_v6  ;;  %v354_v33 = vor.u32 %v353_v24, %v350_v23  ;;  %v385_v36 = vshrl.u32 %v13529_v26, 16  ;;  %v364_v38 = vor.u32 %v363_v29, %v359_v28  ;;  %v391_v40 = vshll.u32 %v13532_v27, 16  ;;  %v13553_v47 = vld [vmem:[%s13502_s28 + $0x1c] sm:$0xf]  ;;  %v13567_v57 = vld [vmem:[%s13502_s28 + $0x20] sm:$0x1] }
  0x17   : > { %12330 = vmatprep.subr.bf16.mxu1 %v13157_v7  ;;  %v374_v39 = vrot.slane %v372_v31, 4  ;;  %v1389_v41 = vrot.slane %v13532_v27, 5  ;;  %v377_v44 = vrot.slane %v375_v34, 5  ;;  %v383_v45 = vrot.slane %v381_v35, 5  ;;  %v13571_v59 = vld [vmem:[%s13502_s28 + $0x24] sm:$0xf] }
  0x18   : > { %v355_v43 = vrot.slane %v354_v33, 4  ;;  %v387_v46 = vrot.slane %v385_v36, 4  ;;  %v365_v49 = vrot.slane %v364_v38, 4  ;;  %v393_v50 = vrot.slane %v391_v40, 5  ;;  %v13578_v0 = vld [vmem:[%s13502_s28 + $0x28] sm:$0xf] }
  0x19   : > { %12283 = vmatpush3.bf16.msra.mxu0 %v13156_v6  ;;  %v10838_v51 = vcombine.low %v13525_v22, %v13529_v26  ;;  %v396_v52 = vshrl.u32 %v13550_v42, 16  ;;  %v378_v55 = vor.u32 %v377_v44, %v374_v39  ;;  %v399_v58 = vshll.u32 %v13550_v42, 16  ;;  %v13168_v5 = vld [vmem:[%s18357_s1 + $0xb8] sm:$0xff]   ;;  %v13591_v15 = vld [vmem:[%s13502_s28 + $0x2c] sm:$0x1]  ;;  %v13171_v36 = vld [vmem:[%s18357_s1 + $0xb0] sm:$0xff]  }
  0x1a   : > { %12331 = vmatpush3.bf16.msra.mxu1 %v13157_v7  ;;  %12284 = vmatprep.subr.bf16.mxu0 %v13158_v8  ;;  %v360_v54 = vsel %vm13543_vm2, %v355_v43, %v359_v28  ;;  %v388_v56 = vor.u32 %v387_v46, %v383_v45  ;;  %v370_v60 = vsel %vm13543_vm2, %v365_v49, %v369_v30  ;;  %v405_v62 = vshll.u32 %v13553_v47, 16  ;;  %v13599_v24 = vld [vmem:[%s13502_s28 + $0x30] sm:$0xf]  ;;  %v13604_v31 = vld [vmem:[%s13502_s28 + $0x34] sm:$0xf] }
  0x1b   : > { %12332 = vmatprep.subr.bf16.mxu1 %v13159_v9  ;;  %v398_v61 = vrot.slane %v396_v52, 4  ;;  %v409_v63 = vshrl.u32 %v13553_v47, 16  ;;  %v10813_v1 = vcombine.low %v360_v54, %v370_v60  ;;  %v379_v2 = vrot.slane %v378_v55, 4  ;;  %v13613_v38 = vld [vmem:[%s13502_s28 + $0x38] sm:$0x1]  ;;  %v13182_v44 = vld [vmem:[%s18357_s1 + $0xf0] sm:$0xff]  }
  0x1c   : > { %v389_v3 = vrot.slane %v388_v56, 4  ;;  %v401_v4 = vrot.slane %v399_v58, 5  ;;  %v407_v6 = vrot.slane %v405_v62, 5  ;;  %v420_v16 = vshrl.u32 %v13571_v59, 16  ;;  %v13174_v56 = vld [vmem:[%s18357_s1 + $0xa8] sm:$0xff]  }
  0x1d   : > { %12285 = vmatpush3.bf16.msra.mxu0 %v13158_v8  ;;  %v411_v7 = vrot.slane %v409_v63, 4  ;;  %v415_v8 = vshll.u32 %v13567_v57, 16  ;;  %12292 = vmatprep.mubr.bf16.mxu0 %v10813_v1  ;;  %v423_v23 = vshll.u32 %v13571_v59, 16  ;;  %v429_v29 = vshll.u32 %v13578_v0, 16 }
  0x1e   : > { %12333 = vmatpush3.bf16.msra.mxu1 %v13159_v9  ;;  %12286 = vmatprep.subr.bf16.mxu0 %v13160_v10  ;;  %v10839_v9 = vcombine.low %v13550_v42, %v13553_v47  ;;  %v402_v12 = vor.u32 %v401_v4, %v398_v61  ;;  %v422_v28 = vrot.slane %v420_v16, 4  ;;  %v433_v30 = vshrl.u32 %v13578_v0, 16  ;;  %v13186_v4 = vld [vmem:[%s18357_s1 + $0xe8] sm:$0xff]  }
  0x1f   : > { %12334 = vmatprep.subr.bf16.mxu1 %v13161_v11  ;;  %v412_v19 = vor.u32 %v411_v7, %v407_v6  ;;  %v417_v20 = vrot.slane %v415_v8, 5  ;;  %v425_v33 = vrot.slane %v423_v23, 5  ;;  %v439_v34 = vshll.u32 %v13591_v15, 16  ;;  %v13659_v23 = vld [vmem:[%s13502_s28 + $0x4c] sm:$0xf] }
  0x20   : > { %v403_v25 = vrot.slane %v402_v12, 4  ;;  %v10840_v35 = vcombine.low %v13571_v59, %v13578_v0  ;;  %v431_v40 = vrot.slane %v429_v29, 5  ;;  %v435_v42 = vrot.slane %v433_v30, 4 }
  0x21   : > { %12287 = vmatpush3.bf16.msra.mxu0 %v13160_v10  ;;  %v384_v10 = vsel %vm13543_vm2, %v379_v2, %v383_v45  ;;  %v444_v43 = vshrl.u32 %v13599_v24, 16  ;;  %v426_v46 = vor.u32 %v425_v33, %v422_v28  ;;  %v447_v49 = vshll.u32 %v13599_v24, 16  ;;  %v13642_v2 = vld [vmem:[%s13502_s28 + $0x44] sm:$0x1] }
  0x22   : > { %12335 = vmatpush3.bf16.msra.mxu1 %v13161_v11  ;;  %12288 = vmatprep.subr.bf16.mxu0 %v13162_v17  ;;  %v394_v11 = vsel %vm13543_vm2, %v389_v3, %v393_v50  ;;  %v408_v39 = vsel %vm13543_vm2, %v403_v25, %v407_v6  ;;  %v13625_v50 = vld [vmem:[%s13502_s28 + $0x3c] sm:$0xf]  ;;  %v453_v55 = vshll.u32 %v13604_v31, 16  ;;  %v457_v61 = vshrl.u32 %v13604_v31, 16 }
  0x23   : > { %12336 = vmatprep.subr.bf16.mxu1 %v13163_v32  ;;  %v10814_v18 = vcombine.low %v384_v10, %v394_v11  ;;  %v446_v54 = vrot.slane %v444_v43, 4  ;;  %v427_v58 = vrot.slane %v426_v46, 4  ;;  %v449_v60 = vrot.slane %v447_v49, 5  ;;  %v13682_v46 = vld [vmem:[%s13502_s28 + $0x54] sm:$0xf] }
  0x24   : > { %v463_v22 = vshll.u32 %v13613_v38, 16  ;;  %v455_v63 = vrot.slane %v453_v55, 5  ;;  %v10841_v1 = vcombine.low %v13599_v24, %v13604_v31  ;;  %v468_v3 = vshrl.u32 %v13625_v50, 16  ;;  %v13177_v24 = vld [vmem:[%s18357_s1 + $0xa0] sm:$0xff]  }
  0x25   : > { %12289 = vmatpush3.bf16.msra.mxu0 %v13162_v17  ;;  %v13181_v17 = vld [vmem:[%s18357_s1 + $0xf8] sm:$0xff]   ;;  %v450_v6 = vor.u32 %v449_v60, %v446_v54  ;;  %v459_v7 = vrot.slane %v457_v61, 4  ;;  %v471_v12 = vshll.u32 %v13625_v50, 16  ;;  %v487_v29 = vshll.u32 %v13642_v2, 16 }
  0x26   : > { %12337 = vmatpush3.bf16.msra.mxu1 %v13163_v32  ;;  %12290 = vmatprep.subr.bf16.mxu0 %v13164_v48  ;;  %v413_v32 = vrot.slane %v412_v19, 4  ;;  %v465_v8 = vrot.slane %v463_v22, 5  ;;  %v470_v11 = vrot.slane %v468_v3, 4  ;;  %v1400_v27 = vrot.slane %v13578_v0, 5  ;;  %v13202_v0 = vld [vmem:[%s13502_s28 + $0x24] sm:$0xff]  }
  0x27   : > { %12338 = vmatprep.subr.bf16.mxu1 %v13165_v53  ;;  %v460_v19 = vor.u32 %v459_v7, %v455_v63  ;;  %v473_v25 = vrot.slane %v471_v12, 5  ;;  %v489_v43 = vrot.slane %v487_v29, 5  ;;  %v13192_v29 = vld [vmem:[%s18357_s1 + $0xd0] sm:$0xff]  }
  0x28   : > { %v418_v45 = vsel %vm13543_vm2, %v413_v32, %v417_v20 }
  0x29   : > { %12291 = vmatpush3.bf16.msra.mxu0 %v13164_v48  ;;  %v441_v48 = vrot.slane %v439_v34, 5  ;;  %v10815_v52 = vcombine.low %v408_v39, %v418_v45  ;;  %v461_v33 = vrot.slane %v460_v19, 4  ;;  %v501_v45 = vshll.u32 %v13659_v23, 16  ;;  %v13185_v19 = vld [vmem:[%s18357_s1 + $0x90] sm:$0xff]  }
  0x2a   : > { %12339 = vmatpush3.bf16.msra.mxu1 %v13165_v53  ;;  %12372 = vmatprep.subr.bf16.mxu0 %v13168_v5  ;;  %v436_v53 = vor.u32 %v435_v42, %v431_v40  ;;  %v474_v42 = vor.u32 %v473_v25, %v470_v11 }
  0x2b   : > { %12420 = vmatprep.subr.bf16.mxu1 %v13181_v17  ;;  %v466_v49 = vsel %vm13543_vm2, %v461_v33, %v465_v8 }
  0x2c   : > { %12293 = vmatmul.mubr.bf16.vlgmr.msra.gmra.mxu0 %v10814_v18  ;;  %v437_v62 = vrot.slane %v436_v53, 4  ;;  %v451_v18 = vrot.slane %v450_v6, 4  ;;  %v475_v54 = vrot.slane %v474_v42, 4  ;;  %v13732_v42 = vld [vmem:[%s13502_s28 + $0x6c] sm:$0xf] }
  0x2d   : > { %12341 = vmatmul.mubr.bf16.vlgmr.msra.gmra.mxu1 %v10838_v51  ;;  %12373 = vmatpush3.bf16.msra.mxu0 %v13168_v5  ;;  %v13637_v51 = vld [vmem:[%s13502_s28 + $0x40] sm:$0xf]  ;;  %v432_v5 = vsel %vm13543_vm2, %v427_v58, %v431_v40  ;;  %v13694_v58 = vld [vmem:[%s13502_s28 + $0x5c] sm:$0x1] }
  0x2e   : > { %12344 = vmatprep.mubr.bf16.mxu1 %v10839_v9  ;;  %12374 = vmatprep.subr.bf16.mxu0 %v13171_v36  ;;  %v13651_v9 = vld [vmem:[%s13502_s28 + $0x48] sm:$0xf]  ;;  %v442_v10 = vsel %vm13543_vm2, %v437_v62, %v441_v48  ;;  %v477_v16 = vshll.u32 %v13637_v51, 16  ;;  %v481_v20 = vshrl.u32 %v13637_v51, 16  ;;  %v10842_v30 = vcombine.low %v13625_v50, %v13637_v51  ;;  %v13187_v40 = vld [vmem:[%s18357_s1 + $0xe0] sm:$0xff]   ;;  %v13180_v48 = vld [vmem:[%s18357_s1 + $0x98] sm:$0xff]  }
  0x2f   : > { %12296 = vmatprep.mubr.bf16.mxu0 %v10815_v52  ;;  %12421 = vmatpush3.bf16.msra.mxu1 %v13181_v17  ;;  %v10816_v17 = vcombine.low %v432_v5, %v442_v10  ;;  %v456_v32 = vsel %vm13543_vm2, %v451_v18, %v455_v63  ;;  %v492_v39 = vshrl.u32 %v13651_v9, 16  ;;  %v505_v50 = vshrl.u32 %v13659_v23, 16  ;;  %v13691_v52 = vld [vmem:[%s13502_s28 + $0x58] sm:$0xf]  ;;  %v13710_v10 = vld [vmem:[%s13502_s28 + $0x60] sm:$0xf] }
  0x30   : > { %12422 = vmatprep.subr.bf16.mxu1 %v13182_v44  ;;  %v479_v28 = vrot.slane %v477_v16, 5  ;;  %v483_v34 = vrot.slane %v481_v20, 4  ;;  %v10817_v53 = vcombine.low %v456_v32, %v466_v49  ;;  %v10843_v62 = vcombine.low %v13651_v9, %v13659_v23  ;;  %v13191_v63 = vld [vmem:[%s18357_s1 + $0xd8] sm:$0xff]   ;;  %v13713_v18 = vld [vmem:[%s13502_s28 + $0x64] sm:$0xf] }
  0x31   : > { %12375 = vmatpush3.bf16.msra.mxu0 %v13171_v36  ;;  %v13670_v36 = vld [vmem:[%s13502_s28 + $0x50] sm:$0x1]  ;;  %v507_v61 = vrot.slane %v505_v50, 4  ;;  %v519_v5 = vshll.u32 %v13682_v46, 16  ;;  %v529_v25 = vshrl.u32 %v13691_v52, 16  ;;  %v549_v50 = vshll.u32 %v13713_v18, 16 }
  0x32   : > { %12376 = vmatprep.subr.bf16.mxu0 %v13174_v56  ;;  %v484_v59 = vor.u32 %v483_v34, %v479_v28  ;;  %v511_v22 = vshll.u32 %v13670_v36, 16  ;;  %v10844_v34 = vcombine.low %v13682_v46, %v13691_v52  ;;  %v13738_v49 = vld [vmem:[%s13502_s28 + $0x70] sm:$0xf] }
  0x33   : > { %12423 = vmatpush3.bf16.msra.mxu1 %v13182_v44  ;;  %v495_v44 = vshll.u32 %v13651_v9, 16  ;;  %v525_v9 = vshll.u32 %v13691_v52, 16 }
  0x34   : > { %12297 = vmatmul.mubr.bf16.gmra.mxu0 %v10816_v17  ;;  %12424 = vmatprep.subr.bf16.mxu1 %v13186_v4  ;;  %v485_v60 = vrot.slane %v484_v59, 4  ;;  %v513_v8 = vrot.slane %v511_v22, 5  ;;  %v521_v17 = vrot.slane %v519_v5, 5 }
  0x35   : > { %12345 = vmatmul.mubr.bf16.gmra.mxu1 %v10840_v35  ;;  %12377 = vmatpush3.bf16.msra.mxu0 %v13174_v56  ;;  %v494_v35 = vrot.slane %v492_v39, 4  ;;  %v497_v55 = vrot.slane %v495_v44, 5  ;;  %v503_v56 = vrot.slane %v501_v45, 5  ;;  %v13728_v39 = vld [vmem:[%s13502_s28 + $0x68] sm:$0x1]  ;;  %v531_v44 = vrot.slane %v529_v25, 4 }
  0x36   : > { %12348 = vmatprep.mubr.bf16.mxu1 %v10841_v1  ;;  %12378 = vmatprep.subr.bf16.mxu0 %v13177_v24  ;;  %v480_v1 = vsel %vm13543_vm2, %v475_v54, %v479_v28  ;;  %v490_v6 = vsel %vm13543_vm2, %v485_v60, %v489_v43  ;;  %v535_v28 = vshll.u32 %v13694_v58, 16  ;;  %v543_v45 = vshll.u32 %v13710_v10, 16  ;;  %v13190_v54 = vld [vmem:[%s18357_s1 + $0x88] sm:$0xff]  }
  0x37   : > { %12425 = vmatpush3.bf16.msra.mxu1 %v13186_v4  ;;  %12300 = vmatprep.mubr.bf16.mxu0 %v10817_v53  ;;  %v498_v3 = vor.u32 %v497_v55, %v494_v35  ;;  %v516_v4 = vshrl.u32 %v13682_v46, 16  ;;  %v508_v7 = vor.u32 %v507_v61, %v503_v56  ;;  %v10818_v11 = vcombine.low %v480_v1, %v490_v6  ;;  %v13742_v53 = vld [vmem:[%s13502_s28 + $0x74] sm:$0x1] }
  0x38   : > { %12426 = vmatprep.subr.bf16.mxu1 %v13187_v40  ;;  %v553_v60 = vshrl.u32 %v13713_v18, 16  ;;  %v559_v61 = vshll.u32 %v13728_v39, 16  ;;  %v10845_v1 = vcombine.low %v13710_v10, %v13713_v18 }
  0x39   : > { %12379 = vmatpush3.bf16.msra.mxu0 %v13177_v24  ;;  %v499_v12 = vrot.slane %v498_v3, 4  ;;  %v518_v16 = vrot.slane %v516_v4, 4  ;;  %v509_v20 = vrot.slane %v508_v7, 4  ;;  %v527_v24 = vrot.slane %v525_v9, 5  ;;  %v13195_v7 = vld [vmem:[%s18357_s1 + $0x80] sm:$0xff]  }
  0x3a   : > { %12380 = vmatprep.subr.bf16.mxu0 %v13180_v48  ;;  %v555_v5 = vrot.slane %v553_v60, 4  ;;  %v561_v6 = vrot.slane %v559_v61, 5  ;;  %v567_v9 = vshll.u32 %v13732_v42, 16  ;;  %v13794_v61 = vld [vmem:[%s13502_s28 + $0x88] sm:$0xf] }
  0x3b   : > { %12427 = vmatpush3.bf16.msra.mxu1 %v13187_v40  ;;  %v504_v32 = vsel %vm13543_vm2, %v499_v12, %v503_v56  ;;  %v522_v33 = vor.u32 %v521_v17, %v518_v16  ;;  %v540_v40 = vshrl.u32 %v13710_v10, 16  ;;  %v514_v43 = vsel %vm13543_vm2, %v509_v20, %v513_v8  ;;  %v300_v20 = vld [vmem:[%s13502_s28 + $0x78] sm:$0xf] }
  0x3c   : > { %12428 = vmatprep.subr.bf16.mxu1 %v13191_v63  ;;  %12301 = vmatmul.mubr.bf16.gmra.mxu0 %v10818_v11  ;;  %v10819_v59 = vcombine.low %v504_v32, %v514_v43  ;;  %v532_v55 = vor.u32 %v531_v44, %v527_v24  ;;  %v545_v56 = vrot.slane %v543_v45, 5  ;;  %v573_v11 = vshll.u32 %v13738_v49, 16  ;;  %v13783_v45 = vld [vmem:[%s18357_s1 + $0x138] sm:$0xff]  }
  0x3d   : > { %12349 = vmatmul.mubr.bf16.gmra.mxu1 %v10842_v30  ;;  %v537_v30 = vrot.slane %v535_v28, 5  ;;  %12381 = vmatpush3.bf16.msra.mxu0 %v13180_v48  ;;  %v523_v35 = vrot.slane %v522_v33, 4  ;;  %v542_v46 = vrot.slane %v540_v40, 4  ;;  %v13196_v48 = vld [vmem:[%s18357_s1 + $0xc8] sm:$0xff]   ;;  %v577_v10 = vshrl.u32 %v13738_v49, 16 }
  0x3e   : > { %12352 = vmatprep.mubr.bf16.mxu1 %v10843_v62  ;;  %12382 = vmatprep.subr.bf16.mxu0 %v13185_v19  ;;  %v551_v62 = vrot.slane %v549_v50, 5  ;;  %v533_v3 = vrot.slane %v532_v55, 4  ;;  %v569_v28 = vrot.slane %v567_v9, 5  ;;  %v575_v32 = vrot.slane %v573_v11, 5  ;;  %v13771_v40 = vld [vmem:[%s13502_s28 + $0x80] sm:$0x1] }
  0x3f   : > { %12429 = vmatpush3.bf16.msra.mxu1 %v13191_v63  ;;  %12304 = vmatprep.mubr.bf16.mxu0 %v10819_v59  ;;  %v528_v22 = vsel %vm13543_vm2, %v523_v35, %v527_v24  ;;  %v564_v63 = vshrl.u32 %v13732_v42, 16  ;;  %v546_v4 = vor.u32 %v545_v56, %v542_v46  ;;  %v13768_v24 = vld [vmem:[%s13502_s28 + $0x7c] sm:$0xf]  ;;  %v579_v33 = vrot.slane %v577_v10, 4  ;;  %v13786_v55 = vld [vmem:[%s13502_s28 + $0x84] sm:$0xf] }
  0x40   : > { %12430 = vmatprep.subr.bf16.mxu1 %v13192_v29  ;;  %v538_v12 = vsel %vm13543_vm2, %v533_v3, %v537_v30  ;;  %v556_v17 = vor.u32 %v555_v5, %v551_v62  ;;  %v588_v46 = vshrl.u32 %v300_v20, 16  ;;  %v591_v50 = vshll.u32 %v300_v20, 16 }
  0x41   : > { %12383 = vmatpush3.bf16.msra.mxu0 %v13185_v19  ;;  %v566_v8 = vrot.slane %v564_v63, 4  ;;  %v547_v16 = vrot.slane %v546_v4, 4  ;;  %v583_v19 = vshll.u32 %v13742_v53, 16  ;;  %v10820_v25 = vcombine.low %v528_v22, %v538_v12  ;;  %v13797_v22 = vld [vmem:[%s13502_s28 + $0x8c] sm:$0x1] }
  0x42   : > { %12384 = vmatprep.subr.bf16.mxu0 %v13190_v54  ;;  %v557_v44 = vrot.slane %v556_v17, 4  ;;  %v580_v35 = vor.u32 %v579_v33, %v575_v32  ;;  %v597_v60 = vshll.u32 %v13768_v24, 16  ;;  %v590_v3 = vrot.slane %v588_v46, 4  ;;  %v13812_v33 = vld [vmem:[%s13502_s28 + $0x94] sm:$0xf] }
  0x43   : > { %12431 = vmatpush3.bf16.msra.mxu1 %v13192_v29  ;;  %v13197_v29 = vld [vmem:[%s18357_s1 + $0xc0] sm:$0xff]   ;;  %v552_v43 = vsel %vm13543_vm2, %v547_v16, %v551_v62  ;;  %v585_v30 = vrot.slane %v583_v19, 5  ;;  %v570_v59 = vor.u32 %v569_v28, %v566_v8  ;;  %v593_v4 = vrot.slane %v591_v50, 5  ;;  %v304_v19 = vld [vmem:[%s13502_s28 + $0x90] sm:$0xf] }
  0x44   : > { %12432 = vmatprep.subr.bf16.mxu1 %v13196_v48  ;;  %12305 = vmatmul.mubr.bf16.gmra.mxu0 %v10820_v25  ;;  %v562_v56 = vsel %vm13543_vm2, %v557_v44, %v561_v6  ;;  %v581_v63 = vrot.slane %v580_v35, 4  ;;  %v599_v5 = vrot.slane %v597_v60, 5  ;;  %v612_v10 = vshrl.u32 %v13786_v55, 16 }
  0x45   : > { %12353 = vmatmul.mubr.bf16.gmra.mxu1 %v10844_v34  ;;  %v10846_v34 = vcombine.low %v13732_v42, %v13738_v49  ;;  %12385 = vmatpush3.bf16.msra.mxu0 %v13190_v54  ;;  %v601_v42 = vshrl.u32 %v13768_v24, 16  ;;  %v607_v54 = vshll.u32 %v13771_v40, 16  ;;  %v10821_v62 = vcombine.low %v552_v43, %v562_v56  ;;  %v13820_v56 = vld [vmem:[%s13502_s28 + $0x9c] sm:$0xf] }
  0x46   : > { %12356 = vmatprep.mubr.bf16.mxu1 %v10845_v1  ;;  %12386 = vmatprep.subr.bf16.mxu0 %v13195_v7  ;;  %v571_v1 = vrot.slane %v570_v59, 4  ;;  %v586_v11 = vsel %vm13543_vm2, %v581_v63, %v585_v30  ;;  %v594_v16 = vor.u32 %v593_v4, %v590_v3  ;;  %v614_v25 = vrot.slane %v612_v10, 4 }
  0x47   : > { %12433 = vmatpush3.bf16.msra.mxu1 %v13196_v48  ;;  %v603_v6 = vrot.slane %v601_v42, 4  ;;  %v609_v8 = vrot.slane %v607_v54, 5  ;;  %12308 = vmatprep.mubr.bf16.mxu0 %v10821_v62  ;;  %v10847_v48 = vcombine.low %v300_v20, %v13768_v24  ;;  %v621_v28 = vshll.u32 %v13794_v61, 16 }
  0x48   : > { %12434 = vmatprep.subr.bf16.mxu1 %v13197_v29  ;;  %v576_v9 = vsel %vm13543_vm2, %v571_v1, %v575_v32  ;;  %v625_v32 = vshrl.u32 %v13794_v61, 16  ;;  %v631_v20 = vshll.u32 %v13797_v22, 16  ;;  %v595_v43 = vrot.slane %v594_v16, 4  ;;  %v13827_v1 = vld [vmem:[%s13502_s28 + $0xa0] sm:$0xf] }
  0x49   : > { %12387 = vmatpush3.bf16.msra.mxu0 %v13195_v7  ;;  %v10822_v12 = vcombine.low %v576_v9, %v586_v11  ;;  %v604_v17 = vor.u32 %v603_v6, %v599_v5  ;;  %v615_v7 = vshll.u32 %v13786_v55, 16  ;;  %v10848_v59 = vcombine.low %v13786_v55, %v13794_v61 }
  0x4a   : > { %12468 = vmatprep.subr.bf16.mxu0 %v13783_v45  ;;  %v627_v35 = vrot.slane %v625_v32, 4  ;;  %v633_v46 = vrot.slane %v631_v20, 5  ;;  %v636_v50 = vshrl.u32 %v304_v19, 16  ;;  %v600_v60 = vsel %vm13543_vm2, %v595_v43, %v599_v5  ;;  %v13833_v5 = vld [vmem:[%s13502_s28 + $0xa4] sm:$0x1] }
  0x4b   : > { %12435 = vmatpush3.bf16.msra.mxu1 %v13197_v29  ;;  %v605_v44 = vrot.slane %v604_v17, 4  ;;  %v617_v30 = vrot.slane %v615_v7, 5  ;;  %v13817_v29 = vld [vmem:[%s13502_s28 + $0x98] sm:$0x1]  ;;  %v639_v62 = vshll.u32 %v304_v19, 16  ;;  %v645_v4 = vshll.u32 %v13812_v33, 16 }
  0x4c   : > { %12309 = vmatmul.mubr.bf16.gmra.mxu0 %v10822_v12  ;;  %v638_v3 = vrot.slane %v636_v50, 4  ;;  %v649_v11 = vshrl.u32 %v13812_v33, 16  ;;  %v10849_v12 = vcombine.low %v304_v19, %v13812_v33  ;;  %v660_v16 = vshrl.u32 %v13820_v56, 16  ;;  %v308_v32 = vld [vmem:[%s13502_s28 + $0xa8] sm:$0xf] }
  0x4d   : > { %12357 = vmatmul.mubr.bf16.gmra.mxu1 %v10846_v34  ;;  %v623_v34 = vrot.slane %v621_v28, 5  ;;  %v610_v42 = vsel %vm13543_vm2, %v605_v44, %v609_v8  ;;  %v618_v54 = vor.u32 %v617_v30, %v614_v25  ;;  %v641_v9 = vrot.slane %v639_v62, 5  ;;  %v13845_v19 = vld [vmem:[%s13502_s28 + $0xac] sm:$0xf] }
  0x4e   : > { %12360 = vmatprep.mubr.bf16.mxu1 %v10847_v48  ;;  %v10823_v55 = vcombine.low %v600_v60, %v610_v42  ;;  %v655_v48 = vshll.u32 %v13817_v29, 16  ;;  %v647_v10 = vrot.slane %v645_v4, 5  ;;  %v651_v25 = vrot.slane %v649_v11, 4 }
  0x4f   : > { %v628_v63 = vor.u32 %v627_v35, %v623_v34  ;;  %v619_v6 = vrot.slane %v618_v54, 4  ;;  %v642_v7 = vor.u32 %v641_v9, %v638_v3  ;;  %v662_v43 = vrot.slane %v660_v16, 4  ;;  %v13863_v9 = vld [vmem:[%s13502_s28 + $0xb4] sm:$0xf] }
  0x50   : > { %12312 = vmatprep.mubr.bf16.mxu0 %v10823_v55  ;;  %v657_v28 = vrot.slane %v655_v48, 5  ;;  %v663_v44 = vshll.u32 %v13820_v56, 16  ;;  %v669_v30 = vshll.u32 %v13827_v1, 16  ;;  %v652_v60 = vor.u32 %v651_v25, %v647_v10  ;;  %v13857_v55 = vld [vmem:[%s13502_s28 + $0xb0] sm:$0x1] }
  0x51   : > { %v629_v8 = vrot.slane %v628_v63, 4  ;;  %v624_v17 = vsel %vm13543_vm2, %v619_v6, %v623_v34  ;;  %v13850_v34 = vld [vmem:[%s18357_s1 + $0x178] sm:$0xff]   ;;  %v643_v50 = vrot.slane %v642_v7, 4  ;;  %v679_v54 = vshll.u32 %v13833_v5, 16 }
  0x52   : > { %v671_v42 = vrot.slane %v669_v30, 5  ;;  %v10850_v62 = vcombine.low %v13820_v56, %v13827_v1  ;;  %12516 = vmatprep.subr.bf16.mxu1 %v13850_v34  ;;  %v653_v3 = vrot.slane %v652_v60, 4  ;;  %v684_v6 = vshrl.u32 %v308_v32, 16 }
  0x53   : > { %v634_v20 = vsel %vm13543_vm2, %v629_v8, %v633_v46  ;;  %v665_v46 = vrot.slane %v663_v44, 5  ;;  %v648_v63 = vsel %vm13543_vm2, %v643_v50, %v647_v10  ;;  %v681_v48 = vrot.slane %v679_v54, 5  ;;  %v13870_v10 = vld [vmem:[%s13502_s28 + $0xb8] sm:$0xf] }
  0x54   : > { %v10824_v35 = vcombine.low %v624_v17, %v634_v20  ;;  %v687_v8 = vshll.u32 %v308_v32, 16  ;;  %v693_v56 = vshll.u32 %v13845_v19, 16  ;;  %v686_v17 = vrot.slane %v684_v6, 4 }
  0x55   : > { %12361 = vmatmul.mubr.bf16.gmra.mxu1 %v10848_v59  ;;  %v673_v59 = vshrl.u32 %v13827_v1, 16  ;;  %v666_v11 = vor.u32 %v665_v46, %v662_v43  ;;  %v697_v7 = vshrl.u32 %v13845_v19, 16  ;;  %v703_v60 = vshll.u32 %v13857_v55, 16 }
  0x56   : > { %12364 = vmatprep.mubr.bf16.mxu1 %v10849_v12  ;;  %12313 = vmatmul.mubr.bf16.gmra.mxu0 %v10824_v35  ;;  %v658_v12 = vsel %vm13543_vm2, %v653_v3, %v657_v28  ;;  %v689_v44 = vrot.slane %v687_v8, 5  ;;  %v695_v30 = vrot.slane %v693_v56, 5  ;;  %v13873_v35 = vld [vmem:[%s13502_s28 + $0xbc] sm:$0x1]  ;;  %v1326_v28 = vld [vmem:[%s13502_s28] sm:$0xe] }
  0x57   : > { %v675_v4 = vrot.slane %v673_v59, 4  ;;  %v10825_v25 = vcombine.low %v648_v63, %v658_v12  ;;  %v667_v20 = vrot.slane %v666_v11, 4  ;;  %v699_v50 = vrot.slane %v697_v7, 4  ;;  %v1327_v8 = vld [vmem:[%s13502_s28 + $0xc] sm:$0xe] }
  0x58   : > { %v10851_v59 = vcombine.low %v308_v32, %v13845_v19  ;;  %v690_v54 = vor.u32 %v689_v44, %v686_v17  ;;  %v708_v63 = vshrl.u32 %v13863_v9, 16  ;;  %v711_v3 = vshll.u32 %v13863_v9, 16 }
  0x59   : > { %v676_v16 = vor.u32 %v675_v4, %v671_v42  ;;  %12316 = vmatprep.mubr.bf16.mxu0 %v10825_v25  ;;  %v672_v46 = vsel %vm13543_vm2, %v667_v20, %v671_v42  ;;  %v700_v6 = vor.u32 %v699_v50, %v695_v30  ;;  %v705_v11 = vrot.slane %v703_v60, 5  ;;  %v1328_v20 = vld [vmem:[%s13502_s28 + $0x18] sm:$0xe] }
  0x5a   : > { %v717_v32 = vshll.u32 %v13870_v10, 16  ;;  %v691_v12 = vrot.slane %v690_v54, 4  ;;  %v710_v42 = vrot.slane %v708_v63, 4  ;;  %v721_v7 = vshrl.u32 %v13870_v10, 16 }
  0x5b   : > { %v677_v43 = vrot.slane %v676_v16, 4  ;;  %v701_v16 = vrot.slane %v700_v6, 4  ;;  %v727_v25 = vshll.u32 %v13873_v35, 16  ;;  %v18386_v50 = vmov 0 }
  0x5c   : > { %v719_v17 = vrot.slane %v717_v32, 5  ;;  %v18387_v50 = vsel %vm13895_vm5, 4294967295, %v18386_v50  ;;  %v10861_v60 = vrot.slane %v1326_v28, 9  ;;  %v723_v54 = vrot.slane %v721_v7, 4 }
  0x5d   : > { %12365 = vmatmul.mubr.bf16.gmra.mxu1 %v10850_v62  ;;  %v682_v4 = vsel %vm13543_vm2, %v677_v43, %v681_v48  ;;  %v713_v62 = vrot.slane %v711_v3, 5  ;;  %v696_v48 = vsel %vm13543_vm2, %v691_v12, %v695_v30  ;;  %v10852_v43 = vcombine.low %v13863_v9, %v13870_v10  ;;  %18388 = vst [vmem:[#allocation4_spill] sm:$0xff] %v18387_v50  ;;  %v13199_v30 = vld [vmem:[%s13502_s28 + $0xc] sm:$0xff]  }
  0x5e   : > { %12368 = vmatprep.mubr.bf16.mxu1 %v10851_v59  ;;  %v10826_v56 = vcombine.low %v672_v46, %v682_v4  ;;  %v1329_v59 = vld [vmem:[%s13502_s28 + $0x24] sm:$0xe]  ;;  %v706_v46 = vsel %vm13543_vm2, %v701_v16, %v705_v11  ;;  %v729_v63 = vrot.slane %v727_v25, 5  ;;  %v1379_v3 = vrot.slane %v13512_v13, 5 }
  0x5f   : > { %v714_v44 = vor.u32 %v713_v62, %v710_v42  ;;  %v10827_v4 = vcombine.low %v696_v48, %v706_v46  ;;  %v10862_v9 = vrot.slane %v1327_v8, 9  ;;  %v1386_v32 = vrot.slane %v13529_v26, 5  ;;  %v1330_v62 = vld [vmem:[%s13502_s28 + $0x30] sm:$0xe] }
  0x60   : > { %12317 = vmatmul.mubr.bf16.gmra.mxu0 %v10826_v56  ;;  %v724_v56 = vor.u32 %v723_v54, %v719_v17  ;;  %v1380_v28 = vsel %vm13895_vm5, %v10861_v60, %v1379_v3  ;;  %v1381_v12 = vrot.slane %v1379_v3, 4  ;;  %v10863_v42 = vrot.slane %v1328_v20, 9  ;;  %v1331_v20 = vld [vmem:[%s13502_s28 + $0x3c] sm:$0xe] }
  0x61   : > { %v715_v6 = vrot.slane %v714_v44, 4  ;;  %12320 = vmatprep.mubr.bf16.mxu0 %v10827_v4  ;;  %v13911_v13 = vsel %vm13895_vm5, %v10862_v9, %v1386_v32  ;;  %v1388_v8 = vrot.slane %v1386_v32, 4  ;;  %v1393_v26 = vrot.slane %v13553_v47, 5  ;;  %v13200_v47 = vld [vmem:[%s13502_s28 + $0x18] sm:$0xff]  }
  0x62   : > { %v725_v16 = vrot.slane %v724_v56, 4  ;;  %v1383_v7 = vsel %vm13895_vm5, %v1381_v12, %v1382_v21  ;;  %v1396_v25 = vrot.slane %v13567_v57, 5  ;;  %v10865_v54 = vrot.slane %v1330_v62, 9  ;;  %v13214_v12 = vld [vmem:[%s18357_s1 + $0x170] sm:$0xff]  }
  0x63   : > { %v720_v11 = vsel %vm13543_vm2, %v715_v6, %v719_v17  ;;  %v10864_v17 = vrot.slane %v1329_v59, 9  ;;  %v10893_v48 = vcombine.low %v1380_v28, %v1383_v7  ;;  %v13925_v44 = vsel %vm13895_vm5, %v1388_v8, %v1389_v41  ;;  %v1333_v6 = vld [vmem:[%s13502_s28 + $0x54] sm:$0xe]  ;;  %v1334_v28 = vld [vmem:[%s13502_s28 + $0x60] sm:$0xe] }
  0x64   : > { %v13930_v14 = vsel %vm13895_vm5, %v10863_v42, %v1393_v26  ;;  %v1395_v21 = vrot.slane %v1393_v26, 4  ;;  %v730_v57 = vsel %vm13543_vm2, %v725_v16, %v729_v63  ;;  %v10894_v60 = vcombine.low %v13911_v13, %v13925_v44  ;;  %v1335_v16 = vld [vmem:[%s13502_s28 + $0x6c] sm:$0xe] }
  0x65   : > { %12369 = vmatmul.mubr.bf16.gmra.mxu1 %v10852_v43  ;;  %v1332_v43 = vld [vmem:[%s13502_s28 + $0x48] sm:$0xe]  ;;  %v1403_v41 = vrot.slane %v13591_v15, 5  ;;  %v10828_v59 = vcombine.low %v720_v11, %v730_v57  ;;  %v1407_v3 = vrot.slane %v13604_v31, 5  ;;  %v13948_v63 = vsel %vm13895_vm5, %v10864_v17, %v1400_v27  ;;  %v13201_v17 = vld [vmem:[%s18357_s1 + $0x130] sm:$0xff]  }
  0x66   : > { %12436 = vmatprep.mubr.bf16.mxu1 %v13199_v30  ;;  %v13941_v46 = vsel %vm13895_vm5, %v1395_v21, %v1396_v25  ;;  %v1402_v4 = vrot.slane %v1400_v27, 4  ;;  %v1410_v15 = vrot.slane %v13613_v38, 5  ;;  %v10866_v31 = vrot.slane %v1331_v20, 9  ;;  %v13203_v20 = vld [vmem:[%s13502_s28 + $0x30] sm:$0xff]  }
  0x67   : > { %v10895_v30 = vcombine.low %v13930_v14, %v13941_v46  ;;  %v13955_v9 = vsel %vm13895_vm5, %v10865_v54, %v1407_v3  ;;  %v1409_v32 = vrot.slane %v1407_v3, 4  ;;  %v1414_v56 = vrot.slane %v13637_v51, 5  ;;  %v13205_v46 = vld [vmem:[%s13502_s28 + $0x3c] sm:$0xff]  }
  0x68   : > { %12321 = vmatmul.mubr.bf16.gmra.mxu0 %v10828_v59  ;;  %v13964_v38 = vsel %vm13895_vm5, %v1402_v4, %v1403_v41  ;;  %v1417_v42 = vrot.slane %v13642_v2, 5  ;;  %v10867_v11 = vrot.slane %v1332_v43, 9  ;;  %v1421_v13 = vrot.slane %v13659_v23, 5  ;;  %v1336_v59 = vld [vmem:[%s13502_s28 + $0x78] sm:$0xe] }
  0x69   : > { %12388 = vmatprep.mubr.bf16.mxu0 %v10893_v48  ;;  %v10896_v51 = vcombine.low %v13948_v63, %v13964_v38  ;;  %v13972_v8 = vsel %vm13895_vm5, %v1409_v32, %v1410_v15  ;;  %v13976_v26 = vsel %vm13895_vm5, %v10866_v31, %v1414_v56  ;;  %v1416_v62 = vrot.slane %v1414_v56, 4  ;;  %v13219_v31 = vld [vmem:[%s18357_s1 + $0x160] sm:$0xff]  }
  0x6a   : > { %v10897_v2 = vcombine.low %v13955_v9, %v13972_v8  ;;  %v13983_v23 = vsel %vm13895_vm5, %v10867_v11, %v1421_v13  ;;  %v1423_v7 = vrot.slane %v1421_v13, 4  ;;  %v1424_v25 = vrot.slane %v13670_v36, 5  ;;  %v13218_v36 = vld [vmem:[%s18357_s1 + $0x168] sm:$0xff]  }
  0x6b   : > { %v13993_v48 = vsel %vm13895_vm5, %v1416_v62, %v1417_v42  ;;  %v10868_v44 = vrot.slane %v1333_v6, 9  ;;  %v1431_v14 = vrot.slane %v13694_v58, 5  ;;  %v10869_v43 = vrot.slane %v1334_v28, 9 }
  0x6c   : > { %v14004_v21 = vsel %vm13895_vm5, %v1423_v7, %v1424_v25  ;;  %v1435_v57 = vrot.slane %v13713_v18, 5  ;;  %v1438_v41 = vrot.slane %v13728_v39, 5  ;;  %v10870_v4 = vrot.slane %v1335_v16, 9  ;;  %v13223_v16 = vld [vmem:[%s18357_s1 + $0x158] sm:$0xff]   ;;  %v13206_v7 = vld [vmem:[%s13502_s28 + $0x48] sm:$0xff]  }
  0x6d   : > { %12437 = vmatmul.mubr.bf16.vlgmr.msra.gmra.mxu1 %v13200_v47  ;;  %v1428_v47 = vrot.slane %v13691_v52, 5  ;;  %v10899_v52 = vcombine.low %v13983_v23, %v14004_v21  ;;  %v1442_v18 = vrot.slane %v13738_v49, 5  ;;  %v1445_v6 = vrot.slane %v13742_v53, 5  ;;  %v13204_v49 = vld [vmem:[%s18357_s1 + $0x128] sm:$0xff]   ;;  %v10992_v21 = vld [vmem:[%s13502_s28 + $0x18] sm:$0xf] }
  0x6e   : > { %12440 = vmatprep.mubr.bf16.mxu1 %v13202_v0  ;;  %12517 = vmatpush3.bf16.msra.mxu1 %v13850_v34  ;;  %v10898_v34 = vcombine.low %v13976_v26, %v13993_v48  ;;  %v14018_v54 = vsel %vm13895_vm5, %v10869_v43, %v1435_v57  ;;  %v1437_v3 = vrot.slane %v1435_v57, 4  ;;  %v1337_v0 = vld [vmem:[%s13502_s28 + $0x84] sm:$0xe]  ;;  %v10871_v39 = vrot.slane %v1336_v59, 9  ;;  %v13224_v59 = vld [vmem:[%s18357_s1 + $0x150] sm:$0xff]  }
  0x6f   : > { %12518 = vmatprep.subr.bf16.mxu1 %v13214_v12  ;;  %v14011_v58 = vsel %vm13895_vm5, %v10868_v44, %v1428_v47  ;;  %v1430_v27 = vrot.slane %v1428_v47, 4  ;;  %v1449_v32 = vrot.slane %v13768_v24, 5  ;;  %v14043_v24 = vsel %vm13895_vm5, %v10870_v4, %v1442_v18  ;;  %v14171_v48 = vld [vmem:[%s13502_s28 + $0x14] sm:$0x1] }
  0x70   : > { %12389 = vmatmul.mubr.bf16.vlgmr.msra.gmra.mxu0 %v10894_v60  ;;  %v14039_v53 = vsel %vm13895_vm5, %v1437_v3, %v1438_v41  ;;  %v1444_v56 = vrot.slane %v1442_v18, 4  ;;  %v10872_v11 = vrot.slane %v1337_v0, 9  ;;  %v1456_v13 = vrot.slane %v13794_v61, 5  ;;  %v13208_v61 = vld [vmem:[%s13502_s28 + $0x54] sm:$0xff]  }
  0x71   : > { %v14024_v15 = vsel %vm13895_vm5, %v1430_v27, %v1431_v14  ;;  %12469 = vmatpush3.bf16.msra.mxu0 %v13783_v45  ;;  %12392 = vmatprep.mubr.bf16.mxu0 %v10895_v30  ;;  %v10901_v45 = vcombine.low %v14018_v54, %v14039_v53  ;;  %v14049_v30 = vsel %vm13895_vm5, %v10871_v39, %v1449_v32  ;;  %v1451_v28 = vrot.slane %v1449_v32, 4  ;;  %v1338_v14 = vld [vmem:[%s13502_s28 + $0x90] sm:$0xe]  ;;  %v1339_v27 = vld [vmem:[%s13502_s28 + $0x9c] sm:$0xe]  ;;  %v13209_v32 = vld [vmem:[%s13502_s28 + $0x60] sm:$0xff]  }
  0x72   : > { %12519 = vmatpush3.bf16.msra.mxu1 %v13214_v12  ;;  %v10900_v60 = vcombine.low %v14011_v58, %v14024_v15  ;;  %12470 = vmatprep.subr.bf16.mxu0 %v13201_v17  ;;  %v1452_v12 = vrot.slane %v13771_v40, 5  ;;  %v14054_v42 = vsel %vm13895_vm5, %v1444_v56, %v1445_v6  ;;  %v1459_v62 = vrot.slane %v13797_v22, 5  ;;  %v13207_v40 = vld [vmem:[%s18357_s1 + $0x120] sm:$0xff]   ;;  %v1341_v39 = vld [vmem:[%s13502_s28 + $0xb4] sm:$0xe]  ;;  %v14216_v53 = vld [vmem:[%s18357_s1 + $0x1b8] sm:$0xff]  }
  0x73   : > { %12520 = vmatprep.subr.bf16.mxu1 %v13218_v36  ;;  %v10902_v25 = vcombine.low %v14043_v24, %v14054_v42  ;;  %v14076_v44 = vsel %vm13895_vm5, %v10872_v11, %v1456_v13  ;;  %v1458_v47 = vrot.slane %v1456_v13, 4  ;;  %v10873_v43 = vrot.slane %v1338_v14, 9  ;;  %v13211_v11 = vld [vmem:[%s13502_s28 + $0x6c] sm:$0xff]  }
  0x74   : > { %v1466_v57 = vrot.slane %v13817_v29, 5  ;;  %v1470_v41 = vrot.slane %v13827_v1, 5  ;;  %v13210_v29 = vld [vmem:[%s18357_s1 + $0x118] sm:$0xff]   ;;  %v1477_v18 = vrot.slane %v13845_v19, 5  ;;  %v1480_v6 = vrot.slane %v13857_v55, 5 }
  0x75   : > { %12441 = vmatmul.mubr.bf16.gmra.mxu1 %v13203_v20  ;;  %v14069_v20 = vsel %vm13895_vm5, %v1451_v28, %v1452_v12  ;;  %12471 = vmatpush3.bf16.msra.mxu0 %v13201_v17  ;;  %v1473_v17 = vrot.slane %v13833_v5, 5  ;;  %v10876_v56 = vrot.slane %v1341_v39, 9  ;;  %v1484_v28 = vrot.slane %v13870_v10, 5 }
  0x76   : > { %12444 = vmatprep.mubr.bf16.mxu1 %v13205_v46  ;;  %12521 = vmatpush3.bf16.msra.mxu1 %v13218_v36  ;;  %v10903_v22 = vcombine.low %v14049_v30, %v14069_v20  ;;  %v1463_v36 = vrot.slane %v13812_v33, 5  ;;  %v14089_v46 = vsel %vm13895_vm5, %v1458_v47, %v1459_v62  ;;  %v10874_v33 = vrot.slane %v1339_v27, 9  ;;  %v13220_v47 = vld [vmem:[%s18357_s1 + $0x108] sm:$0xff]  }
  0x77   : > { %12522 = vmatprep.subr.bf16.mxu1 %v13219_v31  ;;  %12472 = vmatprep.subr.bf16.mxu0 %v13204_v49  ;;  %v10904_v1 = vcombine.low %v14076_v44, %v14089_v46  ;;  %v1472_v4 = vrot.slane %v1470_v41, 4  ;;  %v1479_v0 = vrot.slane %v1477_v18, 4  ;;  %v1487_v12 = vrot.slane %v13873_v35, 5  ;;  %v13229_v35 = vld [vmem:[%s18357_s1 + $0x140] sm:$0xff]  }
  0x78   : > { %v1465_v3 = vrot.slane %v1463_v36, 4  ;;  %12393 = vmatmul.mubr.bf16.gmra.mxu0 %v10896_v51  ;;  %v14101_v5 = vsel %vm13895_vm5, %v10873_v43, %v1463_v36  ;;  %v14113_v38 = vsel %vm13895_vm5, %v10874_v33, %v1470_v41  ;;  %v13228_v51 = vld [vmem:[%s18357_s1 + $0x148] sm:$0xff]   ;;  %v14146_v62 = vsel %vm13895_vm5, %v10876_v56, %v1484_v28 }
  0x79   : > { %12396 = vmatprep.mubr.bf16.mxu0 %v10897_v2  ;;  %12473 = vmatpush3.bf16.msra.mxu0 %v13204_v49  ;;  %v14119_v9 = vsel %vm13895_vm5, %v1472_v4, %v1473_v17  ;;  %v1340_v2 = vld [vmem:[%s13502_s28 + $0xa8] sm:$0xe]  ;;  %v14138_v55 = vsel %vm13895_vm5, %v1479_v0, %v1480_v6  ;;  %v1486_v10 = vrot.slane %v1484_v28, 4  ;;  %v2266_v23 = vshll.u32 %v14171_v48, 16  ;;  %v14179_v17 = vld [vmem:[%s13502_s28 + $0x20] sm:$0x1] }
  0x7a   : > { %12523 = vmatpush3.bf16.msra.mxu1 %v13219_v31  ;;  %v14109_v63 = vsel %vm13895_vm5, %v1465_v3, %v1466_v57  ;;  %12474 = vmatprep.subr.bf16.mxu0 %v13207_v40  ;;  %v10906_v8 = vcombine.low %v14113_v38, %v14119_v9  ;;  %v13215_v31 = vld [vmem:[%s18357_s1 + $0x110] sm:$0xff]   ;;  %v10875_v49 = vrot.slane %v1340_v2, 9  ;;  %v13212_v3 = vld [vmem:[%s13502_s28 + $0x78] sm:$0xff]   ;;  %v2274_v4 = vshll.u32 %v10992_v21, 16  ;;  %v13216_v2 = vld [vmem:[%s13502_s28 + $0x84] sm:$0xff]  }
  0x7b   : > { %12524 = vmatprep.subr.bf16.mxu1 %v13223_v16  ;;  %v10905_v19 = vcombine.low %v14101_v5, %v14109_v63  ;;  %v2290_v39 = vshll.u32 %v14179_v17, 16 }
  0x7c   : > { %v14142_v13 = vsel %vm13895_vm5, %v10875_v49, %v1477_v18  ;;  %v13225_v49 = vld [vmem:[%s18357_s1 + $0x100] sm:$0xff]   ;;  %v2276_v28 = vrot.slane %v2274_v4, 5 }
  0x7d   : > { %12445 = vmatmul.mubr.bf16.gmra.mxu1 %v13206_v7  ;;  %12475 = vmatpush3.bf16.msra.mxu0 %v13207_v40  ;;  %v14158_v7 = vsel %vm13895_vm5, %v1486_v10, %v1487_v12  ;;  %v10989_v40 = vld [vmem:[%s13502_s28 + $0xc] sm:$0xf] }
  0x7e   : > { %12448 = vmatprep.mubr.bf16.mxu1 %v13208_v61  ;;  %12525 = vmatpush3.bf16.msra.mxu1 %v13223_v16  ;;  %v10907_v16 = vcombine.low %v14142_v13, %v14138_v55  ;;  %v10990_v61 = vld [vmem:[%s13502_s28 + $0x10] sm:$0xf]  ;;  %v10908_v26 = vcombine.low %v14146_v62, %v14158_v7  ;;  %v2250_v14 = vshll.u32 %v10989_v40, 16  ;;  %v11077_v12 = vld [vmem:[%s13502_s28 + $0xc] sm:$0xe] }
  0x7f   : > { %12526 = vmatprep.subr.bf16.mxu1 %v13224_v59  ;;  %12476 = vmatprep.subr.bf16.mxu0 %v13210_v29  ;;  %v2256_v36 = vshll.u32 %v10990_v61, 16  ;;  %v2260_v43 = vshrl.u32 %v10990_v61, 16  ;;  %v11010_v13 = vld [vmem:[%s13502_s28 + $0x60] sm:$0xf] }
  0x80   : > { %12397 = vmatmul.mubr.bf16.gmra.mxu0 %v10898_v34  ;;  %v2247_v34 = vshrl.u32 %v10989_v40, 16  ;;  %v2252_v27 = vrot.slane %v2250_v14, 5  ;;  %v11093_v14 = vrot.slane %v11077_v12, 9 }
  0x81   : > { %12400 = vmatprep.mubr.bf16.mxu0 %v10899_v52  ;;  %12477 = vmatpush3.bf16.msra.mxu0 %v13210_v29  ;;  %v14176_v52 = vld [vmem:[%s13502_s28 + $0x1c] sm:$0xf]  ;;  %v2258_v41 = vrot.slane %v2256_v36, 5  ;;  %v2262_v33 = vrot.slane %v2260_v43, 4  ;;  %v2268_v29 = vrot.slane %v2266_v23, 5 }
  0x82   : > { %12527 = vmatpush3.bf16.msra.mxu1 %v13224_v59  ;;  %12478 = vmatprep.subr.bf16.mxu0 %v13215_v31  ;;  %v2249_v57 = vrot.slane %v2247_v34, 4  ;;  %v2271_v59 = vshrl.u32 %v10992_v21, 16  ;;  %v2280_v18 = vshll.u32 %v14176_v52, 16  ;;  %v2292_v34 = vrot.slane %v2290_v39, 5  ;;  %v11078_v36 = vld [vmem:[%s13502_s28 + $0x18] sm:$0xe] }
  0x83   : > { %12528 = vmatprep.subr.bf16.mxu1 %v13228_v51  ;;  %v2263_v56 = vor.u32 %v2262_v33, %v2258_v41  ;;  %v11094_v15 = vrot.slane %v11078_v36, 9  ;;  %v3028_v33 = vrot.slane %v14179_v17, 5 }
  0x84   : > { %v2253_v0 = vor.u32 %v2252_v27, %v2249_v57  ;;  %v2273_v6 = vrot.slane %v2271_v59, 4  ;;  %v3021_v57 = vrot.slane %v14171_v48, 5  ;;  %v14224_v27 = vld [vmem:[%s13502_s28 + $0x28] sm:$0xf] }
  0x85   : > { %12449 = vmatmul.mubr.bf16.gmra.mxu1 %v13209_v32  ;;  %12479 = vmatpush3.bf16.msra.mxu0 %v13215_v31  ;;  %v14189_v32 = vld [vmem:[%s18357_s1 + $0x1f8] sm:$0xff]   ;;  %v2282_v31 = vrot.slane %v2280_v18, 5  ;;  %v2264_v43 = vrot.slane %v2263_v56, 4  ;;  %v2304_v17 = vshll.u32 %v14224_v27, 16  ;;  %v2308_v39 = vshrl.u32 %v14224_v27, 16 }
  0x86   : > { %12452 = vmatprep.mubr.bf16.mxu1 %v13211_v11  ;;  %12529 = vmatpush3.bf16.msra.mxu1 %v13228_v51  ;;  %v2284_v51 = vshrl.u32 %v14176_v52, 16  ;;  %v3018_v11 = vrot.slane %v10990_v61, 5  ;;  %v2254_v10 = vrot.slane %v2253_v0, 4  ;;  %v2277_v23 = vor.u32 %v2276_v28, %v2273_v6  ;;  %v10998_v0 = vld [vmem:[%s13502_s28 + $0x30] sm:$0xf] }
  0x87   : > { %12530 = vmatprep.subr.bf16.mxu1 %v13229_v35  ;;  %12480 = vmatprep.subr.bf16.mxu0 %v13220_v47  ;;  %v2269_v48 = vsel %vm13543_vm2, %v2264_v43, %v2268_v29  ;;  %v14232_v29 = vld [vmem:[%s13502_s28 + $0x2c] sm:$0x1]  ;;  %v10999_v56 = vld [vmem:[%s13502_s28 + $0x34] sm:$0xf]  ;;  %v2306_v36 = vrot.slane %v2304_v17, 5  ;;  %v2310_v43 = vrot.slane %v2308_v39, 4 }
  0x88   : > { %v2286_v40 = vrot.slane %v2284_v51, 4  ;;  %12401 = vmatmul.mubr.bf16.gmra.mxu0 %v10900_v60  ;;  %v3020_v21 = vrot.slane %v3018_v11, 4  ;;  %v14208_v58 = vsel %vm13895_vm5, %v11093_v14, %v3018_v11  ;;  %v10995_v60 = vld [vmem:[%s13502_s28 + $0x24] sm:$0xf]  ;;  %v2278_v54 = vrot.slane %v2277_v23, 4  ;;  %v13217_v28 = vld [vmem:[%s13502_s28 + $0x90] sm:$0xff]  }
  0x89   : > { %12404 = vmatprep.mubr.bf16.mxu0 %v10901_v45  ;;  %12481 = vmatpush3.bf16.msra.mxu0 %v13220_v47  ;;  %v3025_v47 = vrot.slane %v14176_v52, 5  ;;  %v2298_v51 = vshll.u32 %v10995_v60, 16  ;;  %v2314_v11 = vshll.u32 %v14232_v29, 16  ;;  %v11079_v23 = vld [vmem:[%s13502_s28 + $0x24] sm:$0xe]  ;;  %v3032_v20 = vrot.slane %v14224_v27, 5 }
  0x8a   : > { %12531 = vmatpush3.bf16.msra.mxu1 %v13229_v35  ;;  %v2259_v35 = vsel %vm13543_vm2, %v2254_v10, %v2258_v41  ;;  %v2287_v61 = vor.u32 %v2286_v40, %v2282_v31  ;;  %12482 = vmatprep.subr.bf16.mxu0 %v13225_v49  ;;  %v14220_v45 = vsel %vm13895_vm5, %v3020_v21, %v3021_v57  ;;  %v11000_v10 = vld [vmem:[%s13502_s28 + $0x38] sm:$0x1]  ;;  %v13221_v40 = vld [vmem:[%s13502_s28 + $0x9c] sm:$0xff]   ;;  %v2319_v57 = vshrl.u32 %v10998_v0, 16 }
  0x8b   : > { %12612 = vmatprep.subr.bf16.mxu1 %v14189_v32  ;;  %v14226_v41 = vcombine.low %v2259_v35, %v2269_v48  ;;  %v2283_v4 = vsel %vm13543_vm2, %v2278_v54, %v2282_v31  ;;  %v14238_v52 = vsel %vm13895_vm5, %v11094_v15, %v3025_v47  ;;  %v3027_v18 = vrot.slane %v3025_v47, 4  ;;  %v11080_v47 = vld [vmem:[%s13502_s28 + $0x30] sm:$0xe] }
  0x8c   : > { %v2288_v59 = vrot.slane %v2287_v61, 4  ;;  %v2300_v14 = vrot.slane %v2298_v51, 5  ;;  %v2316_v21 = vrot.slane %v2314_v11, 5  ;;  %v2322_v35 = vshll.u32 %v10998_v0, 16 }
  0x8d   : > { %12453 = vmatmul.mubr.bf16.gmra.mxu1 %v13212_v3  ;;  %v11125_v3 = vcombine.low %v14208_v58, %v14220_v45  ;;  %12483 = vmatpush3.bf16.msra.mxu0 %v13225_v49  ;;  %v14252_v12 = vsel %vm13895_vm5, %v3027_v18, %v3028_v33  ;;  %v2328_v61 = vshll.u32 %v10999_v56, 16  ;;  %v2332_v48 = vshrl.u32 %v10999_v56, 16 }
  0x8e   : > { %12456 = vmatprep.mubr.bf16.mxu1 %v13216_v2  ;;  %v2295_v2 = vshrl.u32 %v10995_v60, 16  ;;  %v2293_v6 = vsel %vm13543_vm2, %v2288_v59, %v2292_v34  ;;  %12564 = vmatprep.subr.bf16.mxu0 %v14216_v53  ;;  %v11126_v34 = vcombine.low %v14238_v52, %v14252_v12  ;;  %v2311_v60 = vor.u32 %v2310_v43, %v2306_v36  ;;  %v11013_v52 = vld [vmem:[%s13502_s28 + $0x6c] sm:$0xf] }
  0x8f   : > { %v14247_v31 = vcombine.low %v2283_v4, %v2293_v6  ;;  %v2338_v54 = vshll.u32 %v11000_v10, 16  ;;  %v2321_v59 = vrot.slane %v2319_v57, 4  ;;  %v2324_v33 = vrot.slane %v2322_v35, 5  ;;  %v14288_v57 = vld [vmem:[%s13502_s28 + $0x44] sm:$0x1] }
  0x90   : > { %v2297_v49 = vrot.slane %v2295_v2, 4  ;;  %12405 = vmatmul.mubr.bf16.gmra.mxu0 %v10902_v25  ;;  %v2330_v4 = vrot.slane %v2328_v61, 5  ;;  %v11095_v24 = vrot.slane %v11079_v23, 9  ;;  %v2312_v25 = vrot.slane %v2311_v60, 4 }
  0x91   : > { %12408 = vmatprep.mubr.bf16.mxu0 %v10903_v22  ;;  %v2334_v18 = vrot.slane %v2332_v48, 4  ;;  %v2340_v2 = vrot.slane %v2338_v54, 5  ;;  %v2325_v30 = vor.u32 %v2324_v33, %v2321_v59  ;;  %v3035_v22 = vrot.slane %v14232_v29, 5  ;;  %v11004_v48 = vld [vmem:[%s13502_s28 + $0x48] sm:$0xf] }
  0x92   : > { %v2301_v15 = vor.u32 %v2300_v14, %v2297_v49  ;;  %v11096_v0 = vrot.slane %v11080_v47, 9  ;;  %v2317_v51 = vsel %vm13543_vm2, %v2312_v25, %v2316_v21  ;;  %v3039_v39 = vrot.slane %v10999_v56, 5  ;;  %v13222_v49 = vld [vmem:[%s13502_s28 + $0xa8] sm:$0xff]   ;;  %v11002_v14 = vld [vmem:[%s13502_s28 + $0x40] sm:$0xf] }
  0x93   : > { %v2335_v17 = vor.u32 %v2334_v18, %v2330_v4  ;;  %v14279_v27 = vsel %vm13895_vm5, %v11095_v24, %v3032_v20  ;;  %v3034_v29 = vrot.slane %v3032_v20, 4  ;;  %v3042_v21 = vrot.slane %v11000_v10, 5  ;;  %v14301_v54 = vld [vmem:[%s13502_s28 + $0x4c] sm:$0xf]  ;;  %v14319_v59 = vld [vmem:[%s13502_s28 + $0x50] sm:$0x1] }
  0x94   : > { %v2302_v42 = vrot.slane %v2301_v15, 4  ;;  %v14285_v23 = vsel %vm13895_vm5, %v11096_v0, %v3039_v39  ;;  %v3041_v56 = vrot.slane %v3039_v39, 4  ;;  %v2352_v10 = vshll.u32 %v11002_v14, 16  ;;  %v11081_v20 = vld [vmem:[%s13502_s28 + $0x3c] sm:$0xe] }
  0x95   : > { %12457 = vmatmul.mubr.bf16.gmra.mxu1 %v13217_v28  ;;  %v11001_v28 = vld [vmem:[%s13502_s28 + $0x3c] sm:$0xf]  ;;  %v2336_v43 = vrot.slane %v2335_v17, 4  ;;  %v14297_v61 = vsel %vm13895_vm5, %v3034_v29, %v3035_v22  ;;  %v2362_v24 = vshll.u32 %v14288_v57, 16  ;;  %v2370_v18 = vshll.u32 %v11004_v48, 16  ;;  %v13227_v22 = vld [vmem:[%s13502_s28 + $0xc0] sm:$0xff]  }
  0x96   : > { %12460 = vmatprep.mubr.bf16.mxu1 %v13221_v40  ;;  %v2307_v6 = vsel %vm13543_vm2, %v2302_v42, %v2306_v36  ;;  %v2326_v40 = vrot.slane %v2325_v30, 4  ;;  %v13226_v36 = vld [vmem:[%s13502_s28 + $0xb4] sm:$0xff]   ;;  %v2343_v15 = vshrl.u32 %v11001_v28, 16  ;;  %v2346_v60 = vshll.u32 %v11001_v28, 16  ;;  %v11082_v29 = vld [vmem:[%s13502_s28 + $0x48] sm:$0xe] }
  0x97   : > { %v14275_v11 = vcombine.low %v2307_v6, %v2317_v51  ;;  %v2341_v44 = vsel %vm13543_vm2, %v2336_v43, %v2340_v2  ;;  %v11127_v46 = vcombine.low %v14279_v27, %v14297_v61  ;;  %v2354_v33 = vrot.slane %v2352_v10, 5  ;;  %v13238_v27 = vld [vmem:[%s18357_s1 + $0x1e8] sm:$0xff]   ;;  %v13231_v61 = vld [vmem:[%s18357_s1 + $0x1b0] sm:$0xff]  }
  0x98   : > { %12409 = vmatmul.mubr.bf16.gmra.mxu0 %v10904_v1  ;;  %v2331_v35 = vsel %vm13543_vm2, %v2326_v40, %v2330_v4  ;;  %v14312_v1 = vsel %vm13895_vm5, %v3041_v56, %v3042_v21  ;;  %v2345_v63 = vrot.slane %v2343_v15, 4  ;;  %v2356_v4 = vshrl.u32 %v11002_v14, 16 }
  0x99   : > { %12412 = vmatprep.mubr.bf16.mxu0 %v10905_v19  ;;  %v14314_v47 = vcombine.low %v2331_v35, %v2341_v44  ;;  %v11128_v5 = vcombine.low %v14285_v23, %v14312_v1  ;;  %v2348_v19 = vrot.slane %v2346_v60, 5  ;;  %v2367_v42 = vshrl.u32 %v11004_v48, 16  ;;  %v11007_v44 = vld [vmem:[%s13502_s28 + $0x54] sm:$0xf] }
  0x9a   : > { %v2376_v2 = vshll.u32 %v14301_v54, 16  ;;  %v2380_v30 = vshrl.u32 %v14301_v54, 16  ;;  %v2358_v0 = vrot.slane %v2356_v4, 4  ;;  %v2364_v6 = vrot.slane %v2362_v24, 5 }
  0x9b   : > { %v2349_v25 = vor.u32 %v2348_v19, %v2345_v63  ;;  %v2369_v51 = vrot.slane %v2367_v42, 4  ;;  %v2386_v17 = vshll.u32 %v14319_v59, 16  ;;  %v2372_v28 = vrot.slane %v2370_v18, 5  ;;  %v14346_v63 = vld [vmem:[%s13502_s28 + $0x5c] sm:$0x1] }
  0x9c   : > { %v2382_v40 = vrot.slane %v2380_v30, 4  ;;  %v11097_v56 = vrot.slane %v11081_v20, 9  ;;  %v3046_v21 = vrot.slane %v11002_v14, 5  ;;  %v3049_v48 = vrot.slane %v14288_v57, 5 }
  0x9d   : > { %12461 = vmatmul.mubr.bf16.gmra.mxu1 %v13222_v49  ;;  %v2350_v39 = vrot.slane %v2349_v25, 4  ;;  %v2378_v49 = vrot.slane %v2376_v2, 5  ;;  %v2388_v43 = vrot.slane %v2386_v17, 5  ;;  %v2373_v15 = vor.u32 %v2372_v28, %v2369_v51  ;;  %v14361_v25 = vld [vmem:[%s13502_s28 + $0x64] sm:$0xf] }
  0x9e   : > { %12464 = vmatprep.mubr.bf16.mxu1 %v13226_v36  ;;  %v2359_v36 = vor.u32 %v2358_v0, %v2354_v33  ;;  %v14340_v14 = vsel %vm13895_vm5, %v11097_v56, %v3046_v21  ;;  %v3048_v38 = vrot.slane %v3046_v21, 4  ;;  %v11098_v9 = vrot.slane %v11082_v29, 9  ;;  %v14385_v17 = vld [vmem:[%s13502_s28 + $0x68] sm:$0x1]  ;;  %v11083_v21 = vld [vmem:[%s13502_s28 + $0x54] sm:$0xe] }
  0x9f   : > { %v2355_v35 = vsel %vm13543_vm2, %v2350_v39, %v2354_v33  ;;  %v2383_v60 = vor.u32 %v2382_v40, %v2378_v49  ;;  %v2374_v19 = vrot.slane %v2373_v15, 4  ;;  %v3053_v33 = vrot.slane %v14301_v54, 5  ;;  %v13236_v40 = vld [vmem:[%s18357_s1 + $0x1f0] sm:$0xff]  }
  0xa0   : > { %12413 = vmatmul.mubr.bf16.gmra.mxu0 %v10906_v8  ;;  %v2360_v10 = vrot.slane %v2359_v36, 4  ;;  %v14343_v8 = vld [vmem:[%s13502_s28 + $0x58] sm:$0xf]  ;;  %v3056_v55 = vrot.slane %v14319_v59, 5  ;;  %v14358_v4 = vsel %vm13895_vm5, %v3048_v38, %v3049_v48  ;;  %v2391_v24 = vshrl.u32 %v11007_v44, 16 }
  0xa1   : > { %12416 = vmatprep.mubr.bf16.mxu0 %v10907_v16  ;;  %v2384_v57 = vrot.slane %v2383_v60, 4  ;;  %v2394_v42 = vshll.u32 %v11007_v44, 16  ;;  %v2379_v59 = vsel %vm13543_vm2, %v2374_v19, %v2378_v49  ;;  %v11129_v45 = vcombine.low %v14340_v14, %v14358_v4  ;;  %v13241_v14 = vld [vmem:[%s18357_s1 + $0x1d8] sm:$0xff]   ;;  %v13233_v4 = vld [vmem:[%s18357_s1 + $0x1a0] sm:$0xff]  }
  0xa2   : > { %v2365_v16 = vsel %vm13543_vm2, %v2360_v10, %v2364_v6  ;;  %v14375_v18 = vsel %vm13895_vm5, %v11098_v9, %v3053_v33  ;;  %v3055_v2 = vrot.slane %v3053_v33, 4  ;;  %v2393_v30 = vrot.slane %v2391_v24, 4 }
  0xa3   : > { %v14363_v54 = vcombine.low %v2355_v35, %v2365_v16  ;;  %v2389_v58 = vsel %vm13543_vm2, %v2384_v57, %v2388_v43  ;;  %v2396_v20 = vrot.slane %v2394_v42, 5  ;;  %v2404_v0 = vshrl.u32 %v14343_v8, 16  ;;  %v11084_v35 = vld [vmem:[%s13502_s28 + $0x60] sm:$0xe] }
  0xa4   : > { %v2410_v6 = vshll.u32 %v14346_v63, 16  ;;  %v14382_v51 = vsel %vm13895_vm5, %v3055_v2, %v3056_v55  ;;  %v2415_v39 = vshrl.u32 %v11010_v13, 16  ;;  %v2418_v28 = vshll.u32 %v11010_v13, 16  ;;  %v14414_v55 = vld [vmem:[%s13502_s28 + $0x70] sm:$0xf] }
  0xa5   : > { %12465 = vmatmul.mubr.bf16.gmra.mxu1 %v13227_v22  ;;  %v2400_v22 = vshll.u32 %v14343_v8, 16  ;;  %v2424_v49 = vshll.u32 %v14361_v25, 16  ;;  %v11130_v29 = vcombine.low %v14375_v18, %v14382_v51  ;;  %v2397_v36 = vor.u32 %v2396_v20, %v2393_v30  ;;  %v14427_v13 = vld [vmem:[%s13502_s28 + $0x74] sm:$0x1] }
  0xa6   : > { %12532 = vmatprep.mubr.bf16.mxu1 %v11125_v3  ;;  %v14371_v3 = vcombine.low %v2379_v59, %v2389_v58  ;;  %v2406_v56 = vrot.slane %v2404_v0, 4  ;;  %v2412_v15 = vrot.slane %v2410_v6, 5  ;;  %v2417_v60 = vrot.slane %v2415_v39, 4 }
  0xa7   : > { %v2402_v43 = vrot.slane %v2400_v22, 5  ;;  %v2420_v48 = vrot.slane %v2418_v28, 5  ;;  %v2426_v44 = vrot.slane %v2424_v49, 5  ;;  %v2398_v62 = vrot.slane %v2397_v36, 4  ;;  %v11016_v22 = vld [vmem:[%s13502_s28 + $0x78] sm:$0xf] }
  0xa8   : > { %12417 = vmatmul.mubr.bf16.gmra.mxu0 %v10908_v26  ;;  %v2428_v26 = vshrl.u32 %v14361_v25, 16  ;;  %v2434_v10 = vshll.u32 %v14385_v17, 16  ;;  %v11099_v38 = vrot.slane %v11083_v21, 9  ;;  %v3060_v9 = vrot.slane %v14343_v8, 5  ;;  %v14473_v21 = vld [vmem:[%s13502_s28 + $0x80] sm:$0x1] }
  0xa9   : > { %12484 = vmatprep.mubr.bf16.mxu0 %v14226_v41  ;;  %v2407_v7 = vor.u32 %v2406_v56, %v2402_v43  ;;  %v2421_v41 = vor.u32 %v2420_v48, %v2417_v60  ;;  %v3063_v19 = vrot.slane %v14346_v63, 5  ;;  %v2403_v12 = vsel %vm13543_vm2, %v2398_v62, %v2402_v43  ;;  %v14460_v43 = vld [vmem:[%s13502_s28 + $0x7c] sm:$0xf] }
  0xaa   : > { %v2430_v57 = vrot.slane %v2428_v26, 4  ;;  %v2436_v33 = vrot.slane %v2434_v10, 5  ;;  %v3062_v8 = vrot.slane %v3060_v9, 4  ;;  %v11100_v63 = vrot.slane %v11084_v35, 9 }
  0xab   : > { %v3067_v42 = vrot.slane %v14361_v25, 5  ;;  %v3070_v59 = vrot.slane %v14385_v17, 5  ;;  %v2439_v20 = vshrl.u32 %v11013_v52, 16  ;;  %v13232_v25 = vld [vmem:[%s18357_s1 + $0x1a8] sm:$0xff]   ;;  %v2442_v49 = vshll.u32 %v11013_v52, 16 }
  0xac   : > { %v2431_v24 = vor.u32 %v2430_v57, %v2426_v44  ;;  %v14439_v30 = vsel %vm13895_vm5, %v3062_v8, %v3063_v19  ;;  %v2452_v36 = vshrl.u32 %v14414_v55, 16  ;;  %v2463_v35 = vshrl.u32 %v11016_v22, 16  ;;  %v13242_v57 = vld [vmem:[%s18357_s1 + $0x1d0] sm:$0xff]  }
  0xad   : > { %12533 = vmatmul.mubr.bf16.vlgmr.msra.gmra.mxu1 %v11126_v34  ;;  %v2408_v34 = vrot.slane %v2407_v7, 4  ;;  %v14450_v17 = vsel %vm13895_vm5, %v11100_v63, %v3067_v42  ;;  %v3069_v39 = vrot.slane %v3067_v42, 4  ;;  %v2441_v28 = vrot.slane %v2439_v20, 4 }
  0xae   : > { %12536 = vmatprep.mubr.bf16.mxu1 %v11127_v46  ;;  %12613 = vmatpush3.bf16.msra.mxu1 %v14189_v32  ;;  %v2422_v46 = vrot.slane %v2421_v41, 4  ;;  %v14424_v32 = vsel %vm13895_vm5, %v11099_v38, %v3060_v9  ;;  %v2432_v0 = vrot.slane %v2431_v24, 4  ;;  %v2444_v1 = vrot.slane %v2442_v49, 5  ;;  %v11086_v38 = vld [vmem:[%s13502_s28 + $0x78] sm:$0xe] }
  0xaf   : > { %12614 = vmatprep.subr.bf16.mxu1 %v13236_v40  ;;  %v2413_v16 = vsel %vm13543_vm2, %v2408_v34, %v2412_v15  ;;  %v11131_v6 = vcombine.low %v14424_v32, %v14439_v30  ;;  %v11085_v15 = vld [vmem:[%s13502_s28 + $0x6c] sm:$0xe]  ;;  %v2454_v48 = vrot.slane %v2452_v36, 4  ;;  %v2465_v62 = vrot.slane %v2463_v35, 4  ;;  %v11019_v34 = vld [vmem:[%s13502_s28 + $0x84] sm:$0xf] }
  0xb0   : > { %v14433_v58 = vcombine.low %v2403_v12, %v2413_v16  ;;  %v2427_v2 = vsel %vm13543_vm2, %v2422_v46, %v2426_v44  ;;  %12485 = vmatmul.mubr.bf16.vlgmr.msra.gmra.mxu0 %v14247_v31  ;;  %v13239_v31 = vld [vmem:[%s18357_s1 + $0x1e0] sm:$0xff]   ;;  %v2437_v56 = vsel %vm13543_vm2, %v2432_v0, %v2436_v33  ;;  %v2466_v7 = vshll.u32 %v11016_v22, 16  ;;  %v14528_v0 = vld [vmem:[%s13502_s28 + $0x8c] sm:$0x1] }
  0xb1   : > { %12565 = vmatpush3.bf16.msra.mxu0 %v14216_v53  ;;  %12488 = vmatprep.mubr.bf16.mxu0 %v14275_v11  ;;  %v14469_v53 = vsel %vm13895_vm5, %v3069_v39, %v3070_v59  ;;  %v2458_v11 = vshll.u32 %v14427_v13, 16  ;;  %v14479_v60 = vcombine.low %v2427_v2, %v2437_v56  ;;  %v2472_v26 = vshll.u32 %v14460_v43, 16 }
  0xb2   : > { %12615 = vmatpush3.bf16.msra.mxu1 %v13236_v40  ;;  %v2448_v40 = vshll.u32 %v14414_v55, 16  ;;  %12566 = vmatprep.subr.bf16.mxu0 %v13231_v61  ;;  %v11132_v23 = vcombine.low %v14450_v17, %v14469_v53  ;;  %v2476_v10 = vshrl.u32 %v14460_v43, 16  ;;  %v2482_v41 = vshll.u32 %v14473_v21, 16 }
  0xb3   : > { %12616 = vmatprep.subr.bf16.mxu1 %v13238_v27  ;;  %v2460_v44 = vrot.slane %v2458_v11, 5  ;;  %v2468_v19 = vrot.slane %v2466_v7, 5  ;;  %v11101_v52 = vrot.slane %v11085_v15, 9  ;;  %v3074_v12 = vrot.slane %v14414_v55, 5 }
  0xb4   : > { %v2484_v46 = vrot.slane %v2482_v41, 5  ;;  %v3077_v59 = vrot.slane %v14427_v13, 5  ;;  %v3081_v22 = vrot.slane %v14460_v43, 5  ;;  %v3084_v13 = vrot.slane %v14473_v21, 5  ;;  %v13237_v21 = vld [vmem:[%s18357_s1 + $0x190] sm:$0xff]  }
  0xb5   : > { %12537 = vmatmul.mubr.bf16.gmra.mxu1 %v11128_v5  ;;  %v2450_v5 = vrot.slane %v2448_v40, 5  ;;  %12567 = vmatpush3.bf16.msra.mxu0 %v13231_v61  ;;  %v2478_v61 = vrot.slane %v2476_v10, 4  ;;  %v2469_v63 = vor.u32 %v2468_v19, %v2465_v62  ;;  %v14501_v16 = vsel %vm13895_vm5, %v11101_v52, %v3074_v12  ;;  %v13244_v40 = vld [vmem:[%s18357_s1 + $0x1c8] sm:$0xff]  }
  0xb6   : > { %12540 = vmatprep.mubr.bf16.mxu1 %v11129_v45  ;;  %12617 = vmatpush3.bf16.msra.mxu1 %v13238_v27  ;;  %v2445_v45 = vor.u32 %v2444_v1, %v2441_v28  ;;  %v2474_v27 = vrot.slane %v2472_v26, 5  ;;  %v3076_v55 = vrot.slane %v3074_v12, 4  ;;  %v2487_v39 = vshrl.u32 %v11019_v34, 16  ;;  %v13245_v26 = vld [vmem:[%s18357_s1 + $0x1c0] sm:$0xff]  }
  0xb7   : > { %12618 = vmatprep.subr.bf16.mxu1 %v13239_v31  ;;  %12568 = vmatprep.subr.bf16.mxu0 %v13232_v25  ;;  %v2455_v9 = vor.u32 %v2454_v48, %v2450_v5  ;;  %v2470_v20 = vrot.slane %v2469_v63, 4  ;;  %v3083_v30 = vrot.slane %v3081_v22, 4  ;;  %v2490_v56 = vshll.u32 %v11019_v34, 16  ;;  %v14559_v48 = vld [vmem:[%s13502_s28 + $0x98] sm:$0x1] }
  0xb8   : > { %v2446_v33 = vrot.slane %v2445_v45, 4  ;;  %12489 = vmatmul.mubr.bf16.gmra.mxu0 %v14314_v47  ;;  %v2479_v42 = vor.u32 %v2478_v61, %v2474_v27  ;;  %v11102_v47 = vrot.slane %v11086_v38, 9  ;;  %v2489_v43 = vrot.slane %v2487_v39, 4  ;;  %v11088_v45 = vld [vmem:[%s13502_s28 + $0x90] sm:$0xe] }
  0xb9   : > { %v2456_v8 = vrot.slane %v2455_v9, 4  ;;  %12492 = vmatprep.mubr.bf16.mxu0 %v14363_v54  ;;  %12569 = vmatpush3.bf16.msra.mxu0 %v13232_v25  ;;  %v13234_v54 = vld [vmem:[%s18357_s1 + $0x198] sm:$0xff]   ;;  %v14518_v25 = vld [vmem:[%s13502_s28 + $0x88] sm:$0xf]  ;;  %v2475_v28 = vsel %vm13543_vm2, %v2470_v20, %v2474_v27  ;;  %v14554_v15 = vsel %vm13895_vm5, %v3083_v30, %v3084_v13  ;;  %v2492_v7 = vrot.slane %v2490_v56, 5 }
  0xba   : > { %12619 = vmatpush3.bf16.msra.mxu1 %v13239_v31  ;;  %v2451_v24 = vsel %vm13543_vm2, %v2446_v33, %v2450_v5  ;;  %12570 = vmatprep.subr.bf16.mxu0 %v13233_v4  ;;  %v2480_v51 = vrot.slane %v2479_v42, 4  ;;  %v11022_v31 = vld [vmem:[%s13502_s28 + $0x90] sm:$0xf]  ;;  %v14536_v32 = vsel %vm13895_vm5, %v11102_v47, %v3081_v22  ;;  %v2496_v11 = vshll.u32 %v14518_v25, 16  ;;  %v11025_v61 = vld [vmem:[%s13502_s28 + $0x9c] sm:$0xf] }
  0xbb   : > { %12620 = vmatprep.subr.bf16.mxu1 %v13241_v14  ;;  %v2461_v2 = vsel %vm13543_vm2, %v2456_v8, %v2460_v44  ;;  %v2500_v1 = vshrl.u32 %v14518_v25, 16  ;;  %v2506_v5 = vshll.u32 %v14528_v0, 16  ;;  %v11087_v44 = vld [vmem:[%s13502_s28 + $0x84] sm:$0xe]  ;;  %v11134_v62 = vcombine.low %v14536_v32, %v14554_v15  ;;  %v14599_v39 = vld [vmem:[%s13502_s28 + $0xa4] sm:$0x1] }
  0xbc   : > { %v14523_v18 = vcombine.low %v2451_v24, %v2461_v2  ;;  %v2485_v36 = vsel %vm13543_vm2, %v2480_v51, %v2484_v46  ;;  %v2514_v38 = vshll.u32 %v11022_v31, 16  ;;  %v2493_v19 = vor.u32 %v2492_v7, %v2489_v43  ;;  %v14583_v24 = vld [vmem:[%s13502_s28 + $0xa0] sm:$0xf]  ;;  %v11089_v7 = vld [vmem:[%s13502_s28 + $0x9c] sm:$0xe] }
  0xbd   : > { %12541 = vmatmul.mubr.bf16.gmra.mxu1 %v11130_v29  ;;  %v3078_v29 = vsel %vm13895_vm5, %v3076_v55, %v3077_v59  ;;  %12571 = vmatpush3.bf16.msra.mxu0 %v13233_v4  ;;  %v14550_v35 = vcombine.low %v2475_v28, %v2485_v36  ;;  %v2511_v4 = vshrl.u32 %v11022_v31, 16  ;;  %v2502_v10 = vrot.slane %v2500_v1, 4  ;;  %v11090_v15 = vld [vmem:[%s13502_s28 + $0xa8] sm:$0xe] }
  0xbe   : > { %12544 = vmatprep.mubr.bf16.mxu1 %v11131_v6  ;;  %12621 = vmatpush3.bf16.msra.mxu1 %v13241_v14  ;;  %v11133_v49 = vcombine.low %v14501_v16, %v3078_v29  ;;  %v14539_v6 = vld [vmem:[%s13502_s28 + $0x94] sm:$0xf]  ;;  %v2498_v14 = vrot.slane %v2496_v11, 5  ;;  %v2508_v41 = vrot.slane %v2506_v5, 5  ;;  %v2530_v34 = vshll.u32 %v14559_v48, 16 }
  0xbf   : > { %12622 = vmatprep.subr.bf16.mxu1 %v13242_v57  ;;  %12572 = vmatprep.subr.bf16.mxu0 %v13234_v54  ;;  %v2520_v9 = vshll.u32 %v14539_v6, 16  ;;  %v2513_v52 = vrot.slane %v2511_v4, 4  ;;  %v2524_v12 = vshrl.u32 %v14539_v6, 16  ;;  %v11103_v27 = vrot.slane %v11087_v44, 9  ;;  %v14612_v11 = vld [vmem:[%s13502_s28 + $0xac] sm:$0xf] }
  0xc0   : > { %12493 = vmatmul.mubr.bf16.gmra.mxu0 %v14371_v3  ;;  %v2503_v3 = vor.u32 %v2502_v10, %v2498_v14  ;;  %v2494_v46 = vrot.slane %v2493_v19, 4  ;;  %v2532_v63 = vrot.slane %v2530_v34, 5  ;;  %v3088_v16 = vrot.slane %v14518_v25, 5  ;;  %v13243_v25 = vld [vmem:[%s18357_s1 + $0x180] sm:$0xff]   ;;  %v14629_v44 = vld [vmem:[%s13502_s28 + $0xb0] sm:$0x1] }
  0xc1   : > { %12496 = vmatprep.mubr.bf16.mxu0 %v14433_v58  ;;  %12573 = vmatpush3.bf16.msra.mxu0 %v13234_v54  ;;  %v2522_v33 = vrot.slane %v2520_v9, 5  ;;  %v13240_v58 = vld [vmem:[%s18357_s1 + $0x188] sm:$0xff]   ;;  %v2526_v8 = vrot.slane %v2524_v12, 4  ;;  %v11104_v55 = vrot.slane %v11088_v45, 9  ;;  %v3095_v22 = vrot.slane %v14539_v6, 5 }
  0xc2   : > { %12623 = vmatpush3.bf16.msra.mxu1 %v13242_v57  ;;  %v2516_v57 = vrot.slane %v2514_v38, 5  ;;  %12574 = vmatprep.subr.bf16.mxu0 %v13237_v21  ;;  %v2504_v17 = vrot.slane %v2503_v3, 4  ;;  %v2499_v42 = vsel %vm13543_vm2, %v2494_v46, %v2498_v14  ;;  %v3089_v47 = vsel %vm13895_vm5, %v11103_v27, %v3088_v16 }
  0xc3   : > { %12624 = vmatprep.subr.bf16.mxu1 %v13244_v40  ;;  %v2527_v59 = vor.u32 %v2526_v8, %v2522_v33  ;;  %v3090_v2 = vrot.slane %v3088_v16, 4  ;;  %v3098_v13 = vrot.slane %v14559_v48, 5  ;;  %v2535_v31 = vshrl.u32 %v11025_v61, 16 }
  0xc4   : > { %v2517_v53 = vor.u32 %v2516_v57, %v2513_v52  ;;  %v2509_v20 = vsel %vm13543_vm2, %v2504_v17, %v2508_v41  ;;  %v3096_v30 = vsel %vm13895_vm5, %v11104_v55, %v3095_v22  ;;  %v3097_v6 = vrot.slane %v3095_v22, 4 }
  0xc5   : > { %12545 = vmatmul.mubr.bf16.gmra.mxu1 %v11132_v23  ;;  %v3091_v23 = vrot.slane %v14528_v0, 5  ;;  %12575 = vmatpush3.bf16.msra.mxu0 %v13237_v21  ;;  %v11063_v51 = vcombine.low %v2499_v42, %v2509_v20  ;;  %v2528_v29 = vrot.slane %v2527_v59, 4  ;;  %v2537_v43 = vrot.slane %v2535_v31, 4  ;;  %v14617_v21 = vld [vmem:[%s18357_s1 + $0x238] sm:$0xff]  }
  0xc6   : > { %12548 = vmatprep.mubr.bf16.mxu1 %v11133_v49  ;;  %12625 = vmatpush3.bf16.msra.mxu1 %v13244_v40  ;;  %v2518_v54 = vrot.slane %v2517_v53, 4  ;;  %v11028_v40 = vld [vmem:[%s13502_s28 + $0xa8] sm:$0xf]  ;;  %v2538_v56 = vshll.u32 %v11025_v61, 16  ;;  %v3099_v1 = vsel %vm13895_vm5, %v3097_v6, %v3098_v13  ;;  %v2548_v5 = vshrl.u32 %v14583_v24, 16 }
  0xc7   : > { %12626 = vmatprep.subr.bf16.mxu1 %v13245_v26  ;;  %12576 = vmatprep.subr.bf16.mxu0 %v13240_v58  ;;  %v3092_v0 = vsel %vm13895_vm5, %v3090_v2, %v3091_v23  ;;  %v2533_v36 = vsel %vm13543_vm2, %v2528_v29, %v2532_v63  ;;  %v2554_v48 = vshll.u32 %v14599_v39, 16  ;;  %v11136_v14 = vcombine.low %v3096_v30, %v3099_v1  ;;  %v14651_v20 = vld [vmem:[%s13502_s28 + $0xbc] sm:$0x1]  ;;  %v14657_v29 = vld [vmem:[%s13502_s28 + $0xc4] sm:$0xf] }
  0xc8   : > { %12497 = vmatmul.mubr.bf16.gmra.mxu0 %v14479_v60  ;;  %v2523_v28 = vsel %vm13543_vm2, %v2518_v54, %v2522_v33  ;;  %v11135_v49 = vcombine.low %v3089_v47, %v3092_v0  ;;  %v2544_v60 = vshll.u32 %v14583_v24, 16  ;;  %v2540_v4 = vrot.slane %v2538_v56, 5  ;;  %v11031_v33 = vld [vmem:[%s13502_s28 + $0xb4] sm:$0xf] }
  0xc9   : > { %12500 = vmatprep.mubr.bf16.mxu0 %v14523_v18  ;;  %12577 = vmatpush3.bf16.msra.mxu0 %v13240_v58  ;;  %v14622_v18 = vcombine.low %v2523_v28, %v2533_v36  ;;  %v2559_v32 = vshrl.u32 %v11028_v40, 16  ;;  %v2562_v10 = vshll.u32 %v11028_v40, 16  ;;  %v2568_v41 = vshll.u32 %v14612_v11, 16 }
  0xca   : > { %12627 = vmatpush3.bf16.msra.mxu1 %v13245_v26  ;;  %12578 = vmatprep.subr.bf16.mxu0 %v13243_v25  ;;  %v2546_v45 = vrot.slane %v2544_v60, 5  ;;  %v2556_v26 = vrot.slane %v2554_v48, 5  ;;  %v2541_v38 = vor.u32 %v2540_v4, %v2537_v43  ;;  %v2572_v19 = vshrl.u32 %v14612_v11, 16  ;;  %v11091_v43 = vld [vmem:[%s13502_s28 + $0xb4] sm:$0xe] }
  0xcb   : > { %v2561_v9 = vrot.slane %v2559_v32, 4  ;;  %v2578_v52 = vshll.u32 %v14629_v44, 16  ;;  %v2564_v34 = vrot.slane %v2562_v10, 5  ;;  %v2570_v3 = vrot.slane %v2568_v41, 5  ;;  %v11092_v41 = vld [vmem:[%s13502_s28 + $0xc0] sm:$0xe] }
  0xcc   : > { %v11105_v57 = vrot.slane %v11089_v7, 9  ;;  %v2542_v27 = vrot.slane %v2541_v38, 4  ;;  %v2574_v61 = vrot.slane %v2572_v19, 4  ;;  %v3102_v46 = vrot.slane %v14583_v24, 5  ;;  %v11032_v24 = vld [vmem:[%s13502_s28 + $0xb8] sm:$0xf] }
  0xcd   : > { %12549 = vmatmul.mubr.bf16.gmra.mxu1 %v11134_v62  ;;  %v2550_v62 = vrot.slane %v2548_v5, 4  ;;  %12579 = vmatpush3.bf16.msra.mxu0 %v13243_v25  ;;  %v2580_v58 = vrot.slane %v2578_v52, 5  ;;  %v2565_v63 = vor.u32 %v2564_v34, %v2561_v9  ;;  %v3105_v16 = vrot.slane %v14599_v39, 5 }
  0xce   : > { %12552 = vmatprep.mubr.bf16.mxu1 %v11135_v49  ;;  %12660 = vmatprep.subr.bf16.mxu0 %v14617_v21  ;;  %v11106_v17 = vrot.slane %v11090_v15, 9  ;;  %v2547_v53 = vsel %vm13543_vm2, %v2542_v27, %v2546_v45  ;;  %v2575_v23 = vor.u32 %v2574_v61, %v2570_v3  ;;  %v3103_v55 = vsel %vm13895_vm5, %v11105_v57, %v3102_v46  ;;  %v14664_v49 = vld [vmem:[%s13502_s28 + $0xc8] sm:$0x1] }
  0xcf   : > { %v2551_v12 = vor.u32 %v2550_v62, %v2546_v45  ;;  %v3104_v42 = vrot.slane %v3102_v46, 4  ;;  %v2566_v59 = vrot.slane %v2565_v63, 4  ;;  %v3109_v47 = vrot.slane %v14612_v11, 5 }
  0xd0   : > { %12501 = vmatmul.mubr.bf16.gmra.mxu0 %v14550_v35  ;;  %v3112_v2 = vrot.slane %v14629_v44, 5  ;;  %v2576_v22 = vrot.slane %v2575_v23, 4  ;;  %v2583_v25 = vshrl.u32 %v11031_v33, 16  ;;  %v2586_v40 = vshll.u32 %v11031_v33, 16 }
  0xd1   : > { %v2552_v8 = vrot.slane %v2551_v12, 4  ;;  %12504 = vmatprep.mubr.bf16.mxu0 %v11063_v51  ;;  %v3106_v13 = vsel %vm13895_vm5, %v3104_v42, %v3105_v16  ;;  %v11034_v51 = vld [vmem:[%s13502_s28 + $0xc0] sm:$0xf]  ;;  %v2571_v0 = vsel %vm13543_vm2, %v2566_v59, %v2570_v3  ;;  %v3110_v31 = vsel %vm13895_vm5, %v11106_v17, %v3109_v47  ;;  %v11222_v17 = vld [vmem:[%s13502_s28 + $0x1c] sm:$0xf] }
  0xd2   : > { %v11137_v39 = vcombine.low %v3103_v55, %v3106_v13  ;;  %v3111_v28 = vrot.slane %v3109_v47, 4  ;;  %v2581_v30 = vsel %vm13543_vm2, %v2576_v22, %v2580_v58  ;;  %v2585_v6 = vrot.slane %v2583_v25, 4  ;;  %v11221_v58 = vld [vmem:[%s13502_s28 + $0x18] sm:$0xf] }
  0xd3   : > { %v2557_v35 = vsel %vm13543_vm2, %v2552_v8, %v2556_v26  ;;  %v2592_v36 = vshll.u32 %v11032_v24, 16  ;;  %v11066_v56 = vcombine.low %v2571_v0, %v2581_v30  ;;  %v2596_v11 = vshrl.u32 %v11032_v24, 16 }
  0xd4   : > { %v11065_v54 = vcombine.low %v2547_v53, %v2557_v35  ;;  %v3113_v60 = vsel %vm13895_vm5, %v3111_v28, %v3112_v2  ;;  %v2602_v1 = vshll.u32 %v14651_v20, 16  ;;  %v2588_v48 = vrot.slane %v2586_v40, 5  ;;  %v11223_v53 = vld [vmem:[%s13502_s28 + $0x20] sm:$0x1]  ;;  %v11224_v35 = vld [vmem:[%s13502_s28 + $0x24] sm:$0xf] }
  0xd5   : > { %12553 = vmatmul.mubr.bf16.gmra.mxu1 %v11136_v14  ;;  %v11138_v5 = vcombine.low %v3110_v31, %v3113_v60  ;;  %v2594_v44 = vrot.slane %v2592_v36, 5  ;;  %v2607_v7 = vshrl.u32 %v11034_v51, 16  ;;  %v2598_v14 = vrot.slane %v2596_v11, 4 }
  0xd6   : > { %12556 = vmatprep.mubr.bf16.mxu1 %v11137_v39  ;;  %v2604_v4 = vrot.slane %v2602_v1, 5  ;;  %v2610_v45 = vshll.u32 %v11034_v51, 16  ;;  %v2616_v32 = vshll.u32 %v14657_v29, 16  ;;  %v2589_v15 = vor.u32 %v2588_v48, %v2585_v6  ;;  %v14704_v6 = vld [vmem:[%s13502_s28 + $0x2c] sm:$0x1]  ;;  %v13246_v48 = vld [vmem:[%s13502_s28 + $0x18] sm:$0xff]  }
  0xd7   : > { %v2609_v62 = vrot.slane %v2607_v7, 4  ;;  %v2620_v26 = vshrl.u32 %v14657_v29, 16  ;;  %v2626_v10 = vshll.u32 %v14664_v49, 16  ;;  %v2599_v38 = vor.u32 %v2598_v14, %v2594_v44 }
  0xd8   : > { %12505 = vmatmul.mubr.bf16.gmra.mxu0 %v14622_v18  ;;  %v2612_v9 = vrot.slane %v2610_v45, 5  ;;  %v2618_v19 = vrot.slane %v2616_v32, 5  ;;  %v11107_v18 = vrot.slane %v11091_v43, 9  ;;  %v2590_v52 = vrot.slane %v2589_v15, 4  ;;  %v11227_v45 = vld [vmem:[%s13502_s28 + $0x30] sm:$0xf] }
  0xd9   : > { %12508 = vmatprep.mubr.bf16.mxu0 %v11065_v54  ;;  %v2622_v12 = vrot.slane %v2620_v26, 4  ;;  %v2628_v34 = vrot.slane %v2626_v10, 5  ;;  %v3116_v3 = vrot.slane %v11032_v24, 5  ;;  %v2600_v57 = vrot.slane %v2599_v38, 4  ;;  %v14693_v54 = vld [vmem:[%s13502_s28 + $0x28] sm:$0xf] }
  0xda   : > { %v2613_v33 = vor.u32 %v2612_v9, %v2609_v62  ;;  %v3119_v27 = vrot.slane %v14651_v20, 5  ;;  %v11108_v61 = vrot.slane %v11092_v41, 9  ;;  %v2595_v46 = vsel %vm13543_vm2, %v2590_v52, %v2594_v44  ;;  %v11228_v10 = vld [vmem:[%s13502_s28 + $0x34] sm:$0xf] }
  0xdb   : > { %v2623_v8 = vor.u32 %v2622_v12, %v2618_v19  ;;  %v3117_v63 = vsel %vm13895_vm5, %v11107_v18, %v3116_v3  ;;  %v3118_v16 = vrot.slane %v3116_v3, 4  ;;  %v2605_v23 = vsel %vm13543_vm2, %v2600_v57, %v2604_v4  ;;  %v11230_v3 = vld [vmem:[%s13502_s28 + $0x3c] sm:$0xf] }
  0xdc   : > { %v2614_v55 = vrot.slane %v2613_v33, 4  ;;  %v3123_v42 = vrot.slane %v14657_v29, 5  ;;  %v3126_v24 = vrot.slane %v14664_v49, 5  ;;  %v11067_v59 = vcombine.low %v2595_v46, %v2605_v23 }
  0xdd   : > { %12557 = vmatmul.mubr.bf16.gmra.mxu1 %v11138_v5  ;;  %v2624_v47 = vrot.slane %v2623_v8, 4  ;;  %v3120_v2 = vsel %vm13895_vm5, %v3118_v16, %v3119_v27  ;;  %v3886_v20 = vshrl.u32 %v11221_v58, 16  ;;  %v3889_v39 = vshll.u32 %v11221_v58, 16 }
  0xde   : > { %v2619_v22 = vsel %vm13543_vm2, %v2614_v55, %v2618_v19  ;;  %v11139_v13 = vcombine.low %v3117_v63, %v3120_v2  ;;  %v3124_v25 = vsel %vm13895_vm5, %v11108_v61, %v3123_v42  ;;  %v3125_v51 = vrot.slane %v3123_v42, 4  ;;  %v11229_v19 = vld [vmem:[%s13502_s28 + $0x38] sm:$0x1] }
  0xdf   : > { %v2629_v29 = vsel %vm13543_vm2, %v2624_v47, %v2628_v34  ;;  %v3888_v0 = vrot.slane %v3886_v20, 4  ;;  %v3895_v31 = vshll.u32 %v11222_v17, 16  ;;  %v3899_v49 = vshrl.u32 %v11222_v17, 16 }
  0xe0   : > { %12509 = vmatmul.mubr.bf16.gmra.mxu0 %v11066_v56  ;;  %12560 = vmatprep.mubr.bf16.mxu1 %v11139_v13  ;;  %v3127_v28 = vsel %vm13895_vm5, %v3125_v51, %v3126_v24  ;;  %v3905_v30 = vshll.u32 %v11223_v53, 16  ;;  %v3891_v36 = vrot.slane %v3889_v39, 5  ;;  %v3910_v56 = vshrl.u32 %v11224_v35, 16  ;;  %v11231_v13 = vld [vmem:[%s13502_s28 + $0x40] sm:$0xf]  ;;  %v13251_v39 = vld [vmem:[%s18357_s1 + $0x230] sm:$0xff]  }
  0xe1   : > { %12512 = vmatprep.mubr.bf16.mxu0 %v11067_v59  ;;  %v11140_v40 = vcombine.low %v3124_v25, %v3127_v28  ;;  %v3897_v43 = vrot.slane %v3895_v31, 5  ;;  %v11068_v60 = vcombine.low %v2619_v22, %v2629_v29  ;;  %v3901_v11 = vrot.slane %v3899_v49, 4  ;;  %v14733_v31 = vld [vmem:[%s13502_s28 + $0x44] sm:$0x1] }
  0xe2   : > { %v3913_v1 = vshll.u32 %v11224_v35, 16  ;;  %v3919_v5 = vshll.u32 %v14693_v54, 16  ;;  %v3892_v44 = vor.u32 %v3891_v36, %v3888_v0  ;;  %v3912_v7 = vrot.slane %v3910_v56, 4  ;;  %v13247_v35 = vld [vmem:[%s13502_s28 + $0x24] sm:$0xff]   ;;  %v13249_v0 = vld [vmem:[%s13502_s28 + $0x30] sm:$0xff]  }
  0xe3   : > { %v3923_v14 = vshrl.u32 %v14693_v54, 16  ;;  %v3929_v4 = vshll.u32 %v14704_v6, 16  ;;  %v3902_v32 = vor.u32 %v3901_v11, %v3897_v43  ;;  %v3907_v15 = vrot.slane %v3905_v30, 5 }
  0xe4   : > { %v3915_v62 = vrot.slane %v3913_v1, 5  ;;  %v3921_v26 = vrot.slane %v3919_v5, 5  ;;  %v3893_v41 = vrot.slane %v3892_v44, 4  ;;  %v3934_v12 = vshrl.u32 %v11227_v45, 16 }
  0xe5   : > { %12561 = vmatmul.mubr.bf16.gmra.mxu1 %v11140_v40  ;;  %v3925_v38 = vrot.slane %v3923_v14, 4  ;;  %v3931_v9 = vrot.slane %v3929_v4, 5  ;;  %v3903_v18 = vrot.slane %v3902_v32, 4  ;;  %v3937_v34 = vshll.u32 %v11227_v45, 16 }
  0xe6   : > { %v3916_v52 = vor.u32 %v3915_v62, %v3912_v7  ;;  %v3898_v33 = vsel %vm13543_vm2, %v3893_v41, %v3897_v43  ;;  %v3943_v61 = vshll.u32 %v11228_v10, 16  ;;  %v3947_v58 = vshrl.u32 %v11228_v10, 16  ;;  %v11234_v7 = vld [vmem:[%s13502_s28 + $0x4c] sm:$0xf]  ;;  %v11235_v62 = vld [vmem:[%s13502_s28 + $0x50] sm:$0x1] }
  0xe7   : > { %v3926_v27 = vor.u32 %v3925_v38, %v3921_v26  ;;  %v3908_v8 = vsel %vm13543_vm2, %v3903_v18, %v3907_v15  ;;  %v3936_v16 = vrot.slane %v3934_v12, 4  ;;  %v3939_v17 = vrot.slane %v3937_v34, 5 }
  0xe8   : > { %12513 = vmatmul.mubr.bf16.gmra.mxu0 %v11068_v60  ;;  %v3917_v63 = vrot.slane %v3916_v52, 4  ;;  %v11285_v23 = vcombine.low %v3898_v33, %v3908_v8  ;;  %v3945_v24 = vrot.slane %v3943_v61, 5  ;;  %v3949_v20 = vrot.slane %v3947_v58, 4  ;;  %v11233_v60 = vld [vmem:[%s13502_s28 + $0x48] sm:$0xf] }
  0xe9   : > { %12580 = vmatprep.mubr.bf16.mxu0 %v13246_v48  ;;  %v3927_v42 = vrot.slane %v3926_v27, 4  ;;  %v3940_v2 = vor.u32 %v3939_v17, %v3936_v16  ;;  %v3953_v22 = vshll.u32 %v11229_v19, 16  ;;  %v3958_v28 = vshrl.u32 %v11230_v3, 16  ;;  %v11236_v58 = vld [vmem:[%s13502_s28 + $0x54] sm:$0xf] }
  0xea   : > { %v3922_v47 = vsel %vm13543_vm2, %v3917_v63, %v3921_v26  ;;  %12628 = vmatprep.mubr.bf16.mxu1 %v11285_v23  ;;  %v3961_v49 = vshll.u32 %v11230_v3, 16  ;;  %v3950_v43 = vor.u32 %v3949_v20, %v3945_v24  ;;  %v3967_v44 = vshll.u32 %v11231_v13, 16  ;;  %v13257_v20 = vld [vmem:[%s18357_s1 + $0x220] sm:$0xff]  }
  0xeb   : > { %v3932_v51 = vsel %vm13543_vm2, %v3927_v42, %v3931_v9  ;;  %v3941_v36 = vrot.slane %v3940_v2, 4  ;;  %v3955_v56 = vrot.slane %v3953_v22, 5  ;;  %v3960_v5 = vrot.slane %v3958_v28, 4  ;;  %v14762_v2 = vld [vmem:[%s13502_s28 + $0x58] sm:$0xf] }
  0xec   : > { %v12294_v57 = vpop.f32.mrf.mxu0  ;;  %v11286_v30 = vcombine.low %v3922_v47, %v3932_v51  ;;  %v3963_v48 = vrot.slane %v3961_v49, 5  ;;  %v3951_v45 = vrot.slane %v3950_v43, 4  ;;  %v3971_v32 = vshrl.u32 %v11231_v13, 16  ;;  %v11239_v43 = vld [vmem:[%s13502_s28 + $0x60] sm:$0xf] }
  0xed   : > { %v12342_v46 = vpop.f32.mrf.mxu1  ;;  %v3946_v4 = vsel %vm13543_vm2, %v3941_v36, %v3945_v24  ;;  %v3977_v15 = vshll.u32 %v14733_v31, 16  ;;  %v3969_v9 = vrot.slane %v3967_v44, 5  ;;  %v3982_v34 = vshrl.u32 %v11233_v60, 16 }
  0xee   : > { %v14718_v53 = vadd.f32 %v12342_v46, %v12294_v57  ;;  %v894_v55 = vpop.f32.mrf.mxu0  ;;  %12629 = vmatmul.mubr.bf16.vlgmr.msra.gmra.mxu1 %v11286_v30  ;;  %v3964_v38 = vor.u32 %v3963_v48, %v3960_v5  ;;  %v3956_v18 = vsel %vm13543_vm2, %v3951_v45, %v3955_v56  ;;  %v3973_v52 = vrot.slane %v3971_v32, 4  ;;  %v13250_v46 = vld [vmem:[%s13502_s28 + $0x3c] sm:$0xff]  }
  0xef   : > { %v1199_v59 = vpop.f32.mrf.mxu1  ;;  %v3979_v12 = vrot.slane %v3977_v15, 5  ;;  %v11287_v57 = vcombine.low %v3946_v4, %v3956_v18  ;;  %v3985_v61 = vshll.u32 %v11233_v60, 16  ;;  %v3984_v16 = vrot.slane %v3982_v34, 4  ;;  %v14790_v34 = vld [vmem:[%s13502_s28 + $0x64] sm:$0xf] }
  0xf0   : > { %v14724_v25 = vadd.f32 %v1199_v59, %v894_v55  ;;  %v12295_v29 = vpop.f32.mrf.mxu0  ;;  %12581 = vmatmul.mubr.bf16.vlgmr.msra.gmra.mxu0 %v13247_v35  ;;  %v3965_v27 = vrot.slane %v3964_v38, 4  ;;  %v3974_v63 = vor.u32 %v3973_v52, %v3969_v9  ;;  %v3991_v17 = vshll.u32 %v11234_v7, 16  ;;  %v13252_v35 = vld [vmem:[%s13502_s28 + $0x48] sm:$0xff]   ;;  %v13253_v52 = vld [vmem:[%s13502_s28 + $0x54] sm:$0xff]  }
  0xf1   : > { %v12343_v40 = vpop.f32.mrf.mxu1  ;;  %12661 = vmatpush3.bf16.msra.mxu0 %v14617_v21  ;;  %12584 = vmatprep.mubr.bf16.mxu0 %v13249_v0  ;;  %v13254_v21 = vld [vmem:[%s18357_s1 + $0x228] sm:$0xff]   ;;  %v3995_v23 = vshrl.u32 %v11234_v7, 16  ;;  %v3987_v59 = vrot.slane %v3985_v61, 5  ;;  %v4001_v47 = vshll.u32 %v11235_v62, 16  ;;  %v14768_v0 = vld [vmem:[%s13502_s28 + $0x5c] sm:$0x1] }
  0xf2   : > { %v14736_v11 = vadd.f32 %v12343_v40, %v12295_v29  ;;  %v897_v1 = vpop.f32.mrf.mxu0  ;;  %12662 = vmatprep.subr.bf16.mxu0 %v13251_v39  ;;  %12632 = vmatprep.mubr.bf16.mxu1 %v11287_v57  ;;  %v3970_v42 = vsel %vm13543_vm2, %v3965_v27, %v3969_v9  ;;  %v3975_v22 = vrot.slane %v3974_v63, 4  ;;  %v3993_v51 = vrot.slane %v3991_v17, 5  ;;  %v13260_v9 = vld [vmem:[%s18357_s1 + $0x218] sm:$0xff]  }
  0xf3   : > { %v1202_v14 = vpop.f32.mrf.mxu1  ;;  %v3997_v29 = vrot.slane %v3995_v23, 4  ;;  %v3988_v30 = vor.u32 %v3987_v59, %v3984_v16  ;;  %v4003_v40 = vrot.slane %v4001_v47, 5  ;;  %v4009_v36 = vshll.u32 %v11236_v58, 16 }
  0xf4   : > { %v14745_v10 = vadd.f32 %v1202_v14, %v897_v1  ;;  %v12298_v41 = vpop.f32.mrf.mxu0  ;;  %v3980_v56 = vsel %vm13543_vm2, %v3975_v22, %v3979_v12  ;;  %v4015_v48 = vshll.u32 %v14762_v2, 16  ;;  %v4025_v38 = vshll.u32 %v14768_v0, 16 }
  0xf5   : > { %v12346_v19 = vpop.f32.mrf.mxu1  ;;  %12663 = vmatpush3.bf16.msra.mxu0 %v13251_v39  ;;  %v4006_v39 = vshrl.u32 %v11236_v58, 16  ;;  %v3998_v1 = vor.u32 %v3997_v29, %v3993_v51  ;;  %v11288_v44 = vcombine.low %v3970_v42, %v3980_v56  ;;  %v3989_v14 = vrot.slane %v3988_v30, 4 }
  0xf6   : > { %v14752_v3 = vadd.f32 %v12346_v19, %v12298_v41  ;;  %v910_v33 = vpop.f32.mrf.mxu0  ;;  %12664 = vmatprep.subr.bf16.mxu0 %v13254_v21  ;;  %v4011_v4 = vrot.slane %v4009_v36, 5  ;;  %v4017_v62 = vrot.slane %v4015_v48, 5  ;;  %v4019_v41 = vshrl.u32 %v14762_v2, 16  ;;  %v14815_v36 = vld [vmem:[%s13502_s28 + $0x74] sm:$0x1] }
  0xf7   : > { %v1215_v8 = vpop.f32.mrf.mxu1  ;;  %v4008_v5 = vrot.slane %v4006_v39, 4  ;;  %v3999_v15 = vrot.slane %v3998_v1, 4  ;;  %12633 = vmatmul.mubr.bf16.gmra.mxu1 %v11288_v44  ;;  %v3994_v12 = vsel %vm13543_vm2, %v3989_v14, %v3993_v51  ;;  %v4027_v58 = vrot.slane %v4025_v38, 5  ;;  %v13263_v39 = vld [vmem:[%s18357_s1 + $0x210] sm:$0xff]  }
  0xf8   : > { %v14756_v55 = vadd.f32 %v1215_v8, %v910_v33  ;;  %v12299_v24 = vpop.f32.mrf.mxu0  ;;  %12585 = vmatmul.mubr.bf16.gmra.mxu0 %v13250_v46  ;;  %v4021_v61 = vrot.slane %v4019_v41, 4  ;;  %v13255_v46 = vld [vmem:[%s13502_s28 + $0x60] sm:$0xff]   ;;  %v14796_v8 = vld [vmem:[%s13502_s28 + $0x68] sm:$0x1]  ;;  %v4030_v63 = vshrl.u32 %v11239_v43, 16  ;;  %v4033_v42 = vshll.u32 %v11239_v43, 16 }
  0xf9   : > { %v12347_v13 = vpop.f32.mrf.mxu1  ;;  %12588 = vmatprep.mubr.bf16.mxu0 %v13252_v35  ;;  %12665 = vmatpush3.bf16.msra.mxu0 %v13254_v21  ;;  %v4012_v21 = vor.u32 %v4011_v4, %v4008_v5  ;;  %v4004_v57 = vsel %vm13543_vm2, %v3999_v15, %v4003_v40  ;;  %v14802_v35 = vld [vmem:[%s13502_s28 + $0x70] sm:$0xf]  ;;  %v4039_v51 = vshll.u32 %v14790_v34, 16  ;;  %v4043_v29 = vshrl.u32 %v14790_v34, 16 }
  0xfa   : > { %v14770_v28 = vadd.f32 %v12347_v13, %v12299_v24  ;;  %v913_v49 = vpop.f32.mrf.mxu0  ;;  %12666 = vmatprep.subr.bf16.mxu0 %v13257_v20  ;;  %v11289_v16 = vcombine.low %v3994_v12, %v4004_v57  ;;  %v11242_v24 = vld [vmem:[%s13502_s28 + $0x6c] sm:$0xf]  ;;  %v4022_v59 = vor.u32 %v4021_v61, %v4017_v62  ;;  %v4032_v13 = vrot.slane %v4030_v63, 4 }
  0xfb   : > { %v1218_v60 = vpop.f32.mrf.mxu1  ;;  %v4013_v23 = vrot.slane %v4012_v21, 4  ;;  %v4035_v30 = vrot.slane %v4033_v42, 5  ;;  %v4049_v40 = vshll.u32 %v14796_v8, 16  ;;  %v4041_v1 = vrot.slane %v4039_v51, 5 }
  0xfc   : > { %v14776_v7 = vadd.f32 %v1218_v60, %v913_v49  ;;  %v12302_v45 = vpop.f32.mrf.mxu0  ;;  %12636 = vmatprep.mubr.bf16.mxu1 %v11289_v16  ;;  %v4023_v43 = vrot.slane %v4022_v59, 4  ;;  %v4045_v5 = vrot.slane %v4043_v29, 4  ;;  %v4054_v48 = vshrl.u32 %v11242_v24, 16 }
  0xfd   : > { %v12350_v32 = vpop.f32.mrf.mxu1  ;;  %12667 = vmatpush3.bf16.msra.mxu0 %v13257_v20  ;;  %v4018_v20 = vsel %vm13543_vm2, %v4013_v23, %v4017_v62  ;;  %v4036_v14 = vor.u32 %v4035_v30, %v4032_v13  ;;  %v4051_v4 = vrot.slane %v4049_v40, 5  ;;  %v4063_v38 = vshll.u32 %v14802_v35, 16  ;;  %v14836_v13 = vld [vmem:[%s13502_s28 + $0x7c] sm:$0xf]  ;;  %v14841_v40 = vld [vmem:[%s13502_s28 + $0x80] sm:$0x1] }
  0xfe   : > { %v14784_v18 = vadd.f32 %v12350_v32, %v12302_v45  ;;  %v926_v33 = vpop.f32.mrf.mxu0  ;;  %12668 = vmatprep.subr.bf16.mxu0 %v13260_v9  ;;  %v4057_v45 = vshll.u32 %v11242_v24, 16  ;;  %v4028_v32 = vsel %vm13543_vm2, %v4023_v43, %v4027_v58  ;;  %v4046_v62 = vor.u32 %v4045_v5, %v4041_v1  ;;  %v13256_v58 = vld [vmem:[%s13502_s28 + $0x6c] sm:$0xff]  }
  0xff   : > { %v1231_v27 = vpop.f32.mrf.mxu1  ;;  %v4056_v41 = vrot.slane %v4054_v48, 4  ;;  %v11290_v12 = vcombine.low %v4018_v20, %v4028_v32  ;;  %v4037_v21 = vrot.slane %v4036_v14, 4  ;;  %v4065_v16 = vrot.slane %v4063_v38, 5  ;;  %v11248_v14 = vld [vmem:[%s13502_s28 + $0x84] sm:$0xf] }
 0x100   : > { %v14798_v17 = vadd.f32 %v1231_v27, %v926_v33  ;;  %v12303_v47 = vpop.f32.mrf.mxu0  ;;  %12589 = vmatmul.mubr.bf16.gmra.mxu0 %v13253_v52  ;;  %v13266_v52 = vld [vmem:[%s18357_s1 + $0x208] sm:$0xff]   ;;  %v4059_v57 = vrot.slane %v4057_v45, 5  ;;  %v11245_v33 = vld [vmem:[%s13502_s28 + $0x78] sm:$0xf]  ;;  %v4073_v23 = vshll.u32 %v14815_v36, 16 }
 0x101   : > { %v12351_v22 = vpop.f32.mrf.mxu1  ;;  %12592 = vmatprep.mubr.bf16.mxu0 %v13255_v46  ;;  %12669 = vmatpush3.bf16.msra.mxu0 %v13260_v9  ;;  %v4067_v9 = vshrl.u32 %v14802_v35, 16  ;;  %v4047_v46 = vrot.slane %v4046_v62, 4  ;;  %v4042_v24 = vsel %vm13543_vm2, %v4037_v21, %v4041_v1  ;;  %v4078_v43 = vshrl.u32 %v11245_v33, 16 }
 0x102   : > { %v14811_v49 = vadd.f32 %v12351_v22, %v12303_v47  ;;  %v929_v56 = vpop.f32.mrf.mxu0  ;;  %12670 = vmatprep.subr.bf16.mxu0 %v13263_v39  ;;  %12637 = vmatmul.mubr.bf16.gmra.mxu1 %v11290_v12  ;;  %v4060_v59 = vor.u32 %v4059_v57, %v4056_v41  ;;  %v13258_v22 = vld [vmem:[%s13502_s28 + $0x78] sm:$0xff]   ;;  %v4075_v20 = vrot.slane %v4073_v23, 5  ;;  %v4087_v62 = vshll.u32 %v14836_v13, 16 }
 0x103   : > { %v1234_v60 = vpop.f32.mrf.mxu1  ;;  %v4069_v47 = vrot.slane %v4067_v9, 4  ;;  %v4052_v51 = vsel %vm13543_vm2, %v4047_v46, %v4051_v4  ;;  %v4080_v32 = vrot.slane %v4078_v43, 4  ;;  %v4091_v41 = vshrl.u32 %v14836_v13, 16  ;;  %v13259_v43 = vld [vmem:[%s13502_s28 + $0x84] sm:$0xff]  }
 0x104   : > { %v14817_v44 = vadd.f32 %v1234_v60, %v929_v56  ;;  %v12306_v61 = vpop.f32.mrf.mxu0  ;;  %v4081_v56 = vshll.u32 %v11245_v33, 16  ;;  %v11291_v60 = vcombine.low %v4042_v24, %v4052_v51  ;;  %v4061_v5 = vrot.slane %v4060_v59, 4  ;;  %v11251_v51 = vld [vmem:[%s13502_s28 + $0x90] sm:$0xf] }
 0x105   : > { %v12354_v15 = vpop.f32.mrf.mxu1  ;;  %12671 = vmatpush3.bf16.msra.mxu0 %v13263_v39  ;;  %v4070_v48 = vor.u32 %v4069_v47, %v4065_v16  ;;  %v13269_v39 = vld [vmem:[%s18357_s1 + $0x200] sm:$0xff]   ;;  %v4097_v57 = vshll.u32 %v14841_v40, 16  ;;  %v4093_v46 = vrot.slane %v4091_v41, 4  ;;  %v4102_v23 = vshrl.u32 %v11248_v14, 16  ;;  %v14864_v47 = vld [vmem:[%s13502_s28 + $0x8c] sm:$0x1] }
 0x106   : > { %v14830_v42 = vadd.f32 %v12354_v15, %v12306_v61  ;;  %v942_v29 = vpop.f32.mrf.mxu0  ;;  %12672 = vmatprep.subr.bf16.mxu0 %v13266_v52  ;;  %v4083_v15 = vrot.slane %v4081_v56, 5  ;;  %12640 = vmatprep.mubr.bf16.mxu1 %v11291_v60  ;;  %v4066_v38 = vsel %vm13543_vm2, %v4061_v5, %v4065_v16  ;;  %v4121_v41 = vshll.u32 %v14864_v47, 16 }
 0x107   : > { %v1247_v63 = vpop.f32.mrf.mxu1  ;;  %v4071_v12 = vrot.slane %v4070_v48, 4  ;;  %v4099_v59 = vrot.slane %v4097_v57, 5  ;;  %v4126_v57 = vshrl.u32 %v11251_v51, 16 }
 0x108   : > { %v14843_v1 = vadd.f32 %v1247_v63, %v942_v29  ;;  %12593 = vmatmul.mubr.bf16.gmra.mxu0 %v13256_v58  ;;  %v12307_v4 = vpop.f32.mrf.mxu0  ;;  %v4084_v61 = vor.u32 %v4083_v15, %v4080_v32  ;;  %v4089_v58 = vrot.slane %v4087_v62, 5  ;;  %v14857_v63 = vld [vmem:[%s13502_s28 + $0x88] sm:$0xf] }
 0x109   : > { %v12355_v30 = vpop.f32.mrf.mxu1  ;;  %12596 = vmatprep.mubr.bf16.mxu0 %v13258_v22  ;;  %12673 = vmatpush3.bf16.msra.mxu0 %v13266_v52  ;;  %v4076_v16 = vsel %vm13543_vm2, %v4071_v12, %v4075_v20  ;;  %v4105_v22 = vshll.u32 %v11248_v14, 16  ;;  %v4104_v52 = vrot.slane %v4102_v23, 4  ;;  %v13261_v14 = vld [vmem:[%s13502_s28 + $0x90] sm:$0xff]   ;;  %v14882_v23 = vld [vmem:[%s13502_s28 + $0x98] sm:$0x1] }
 0x10a   : > { %18389 = vst [vmem:[#allocation5_spill] sm:$0xff] %v14843_v1  ;;  %v14853_v21 = vadd.f32 %v12355_v30, %v12307_v4  ;;  %v945_v9 = vpop.f32.mrf.mxu0  ;;  %12674 = vmatprep.subr.bf16.mxu0 %v13269_v39  ;;  %v11292_v29 = vcombine.low %v4066_v38, %v4076_v16  ;;  %v4085_v56 = vrot.slane %v4084_v61, 4  ;;  %v4094_v60 = vor.u32 %v4093_v46, %v4089_v58  ;;  %v14877_v12 = vld [vmem:[%s13502_s28 + $0x94] sm:$0xf]  ;;  %v11254_v16 = vld [vmem:[%s13502_s28 + $0x9c] sm:$0xf] }
 0x10b   : > { %v1250_v45 = vpop.f32.mrf.mxu1  ;;  %v4107_v20 = vrot.slane %v4105_v22, 5  ;;  %v4111_v4 = vshll.u32 %v14857_v63, 16  ;;  %v4123_v22 = vrot.slane %v4121_v41, 5  ;;  %v14900_v41 = vld [vmem:[%s13502_s28 + $0xa4] sm:$0x1] }
 0x10c   : > { %18390 = vst [vmem:[#allocation6_spill] sm:$0xff] %v14853_v21  ;;  %v14861_v24 = vadd.f32 %v1250_v45, %v945_v9  ;;  %v12310_v30 = vpop.f32.mrf.mxu0  ;;  %v4115_v45 = vshrl.u32 %v14857_v63, 16  ;;  %12641 = vmatmul.mubr.bf16.gmra.mxu1 %v11292_v29  ;;  %v4090_v32 = vsel %vm13543_vm2, %v4085_v56, %v4089_v58  ;;  %v4095_v15 = vrot.slane %v4094_v60, 4  ;;  %18397 = vst [vmem:[#allocation13_spill] sm:$0xff] %v14900_v41  ;;  %v14950_v21 = vld [vmem:[%s13502_s28 + $0xc4] sm:$0xf] }
 0x10d   : > { %v12358_v33 = vpop.f32.mrf.mxu1  ;;  %12675 = vmatpush3.bf16.msra.mxu0 %v13269_v39  ;;  %v4113_v61 = vrot.slane %v4111_v4, 5  ;;  %v4128_v56 = vrot.slane %v4126_v57, 4  ;;  %v4129_v60 = vshll.u32 %v11251_v51, 16  ;;  %v14890_v39 = vld [vmem:[%s13502_s28 + $0xa0] sm:$0xf]  ;;  %v4145_v51 = vshll.u32 %v14882_v23, 16 }
 0x10e   : > { %18391 = vst [vmem:[#allocation7_spill] sm:$0xff] %v14861_v24  ;;  %v14868_v48 = vadd.f32 %v12358_v33, %v12310_v30  ;;  %v958_v62 = vpop.f32.mrf.mxu0  ;;  %v4108_v33 = vor.u32 %v4107_v20, %v4104_v52  ;;  %v4117_v46 = vrot.slane %v4115_v45, 4  ;;  %v4100_v58 = vsel %vm13543_vm2, %v4095_v15, %v4099_v59  ;;  %v11257_v57 = vld [vmem:[%s13502_s28 + $0xa8] sm:$0xf]  ;;  %18405 = vst [vmem:[#allocation21_spill] sm:$0xff] %v14950_v21 }
 0x10f   : > { %v1263_v5 = vpop.f32.mrf.mxu1  ;;  %v4131_v45 = vrot.slane %v4129_v60, 5  ;;  %v4135_v15 = vshll.u32 %v14877_v12, 16  ;;  %v4147_v60 = vrot.slane %v4145_v51, 5 }
 0x110   : > { %18392 = vst [vmem:[#allocation8_spill] sm:$0xff] %v14868_v48  ;;  %v14879_v9 = vadd.f32 %v1263_v5, %v958_v62  ;;  %12597 = vmatmul.mubr.bf16.gmra.mxu0 %v13259_v43  ;;  %v12311_v29 = vpop.f32.mrf.mxu0  ;;  %v11293_v5 = vcombine.low %v4090_v32, %v4100_v58  ;;  %v4109_v52 = vrot.slane %v4108_v33, 4  ;;  %v4118_v20 = vor.u32 %v4117_v46, %v4113_v61  ;;  %v13262_v33 = vld [vmem:[%s13502_s28 + $0x9c] sm:$0xff]  }
 0x111   : > { %v12359_v38 = vpop.f32.mrf.mxu1  ;;  %12600 = vmatprep.mubr.bf16.mxu0 %v13261_v14  ;;  %v4139_v62 = vshrl.u32 %v14877_v12, 16  ;;  %v4150_v14 = vshrl.u32 %v11254_v16, 16  ;;  %v4132_v46 = vor.u32 %v4131_v45, %v4128_v56  ;;  %v4137_v58 = vrot.slane %v4135_v15, 5 }
 0x112   : > { %18393 = vst [vmem:[#allocation9_spill] sm:$0xff] %v14879_v9  ;;  %v14892_v4 = vadd.f32 %v12359_v38, %v12311_v29  ;;  %v14894_v43 = vpop.f32.mrf.mxu0  ;;  %12644 = vmatprep.mubr.bf16.mxu1 %v11293_v5  ;;  %v4114_v32 = vsel %vm13543_vm2, %v4109_v52, %v4113_v61  ;;  %v4119_v38 = vrot.slane %v4118_v20, 4  ;;  %v13264_v61 = vld [vmem:[%s13502_s28 + $0xa8] sm:$0xff]   ;;  %v4177_v48 = vshll.u32 %v11257_v57, 16 }
 0x113   : > { %v14887_v30 = vpop.f32.mrf.mxu1  ;;  %18396 = vst [vmem:[#allocation12_spill] sm:$0xff] %v14894_v43  ;;  %v4141_v29 = vrot.slane %v4139_v62, 4  ;;  %v4152_v5 = vrot.slane %v4150_v14, 4  ;;  %v4159_v43 = vshll.u32 %v14890_v39, 16  ;;  %v14911_v52 = vld [vmem:[%s13502_s28 + $0xac] sm:$0xf] }
 0x114   : > { %18394 = vst [vmem:[#allocation10_spill] sm:$0xff] %v14887_v30  ;;  %18395 = vst [vmem:[#allocation11_spill] sm:$0xff] %v14892_v4  ;;  %v4124_v19 = vsel %vm13543_vm2, %v4119_v38, %v4123_v22  ;;  %v4153_v30 = vshll.u32 %v11254_v16, 16  ;;  %v4133_v56 = vrot.slane %v4132_v46, 4  ;;  %v4163_v22 = vshrl.u32 %v14890_v39, 16 }
 0x115   : > { %v12362_v59 = vpop.f32.mrf.mxu1  ;;  %v11294_v20 = vcombine.low %v4114_v32, %v4124_v19  ;;  %v4142_v45 = vor.u32 %v4141_v29, %v4137_v58  ;;  %v4161_v9 = vrot.slane %v4159_v43, 5  ;;  %v4169_v38 = vshll.u32 %v14900_v41, 16  ;;  %v14918_v16 = vld [vmem:[%s13502_s28 + $0xb0] sm:$0x1]  ;;  %v11260_v43 = vld [vmem:[%s13502_s28 + $0xb4] sm:$0xf] }
 0x116   : > { %v12314_v26 = vpop.f32.mrf.mxu0  ;;  %v4155_v51 = vrot.slane %v4153_v30, 5  ;;  %18399 = vst [vmem:[#allocation15_spill] sm:$0xff] %v14918_v16  ;;  %v4174_v30 = vshrl.u32 %v11257_v57, 16  ;;  %v4165_v46 = vrot.slane %v4163_v22, 4  ;;  %v4179_v57 = vrot.slane %v4177_v48, 5 }
 0x117   : > { %v1279_v27 = vpop.f32.mrf.mxu1  ;;  %v14913_v4 = vadd.f32 %v12362_v59, %v12314_v26  ;;  %12645 = vmatmul.mubr.bf16.gmra.mxu1 %v11294_v20  ;;  %v4138_v26 = vsel %vm13543_vm2, %v4133_v56, %v4137_v58  ;;  %v4143_v19 = vrot.slane %v4142_v45, 4  ;;  %v4171_v29 = vrot.slane %v4169_v38, 5  ;;  %v14928_v20 = vld [vmem:[%s13502_s28 + $0xb8] sm:$0xf]  ;;  %v11263_v48 = vld [vmem:[%s13502_s28 + $0xc0] sm:$0xf] }
 0x118   : > { %v974_v62 = vpop.f32.mrf.mxu0  ;;  %12601 = vmatmul.mubr.bf16.gmra.mxu0 %v13262_v33  ;;  %v4156_v14 = vor.u32 %v4155_v51, %v4152_v5  ;;  %v13265_v56 = vld [vmem:[%s13502_s28 + $0xb4] sm:$0xff]   ;;  %v4176_v45 = vrot.slane %v4174_v30, 4  ;;  %v4166_v22 = vor.u32 %v4165_v46, %v4161_v9  ;;  %v4198_v46 = vshrl.u32 %v11260_v43, 16 }
 0x119   : > { %18398 = vst [vmem:[#allocation14_spill] sm:$0xff] %v14913_v4  ;;  %v12363_v15 = vpop.f32.mrf.mxu1  ;;  %v14922_v59 = vadd.f32 %v1279_v27, %v974_v62  ;;  %12604 = vmatprep.mubr.bf16.mxu0 %v13264_v61  ;;  %v4148_v33 = vsel %vm13543_vm2, %v4143_v19, %v4147_v60  ;;  %v4183_v62 = vshll.u32 %v14911_v52, 16  ;;  %v13267_v61 = vld [vmem:[%s13502_s28 + $0xc0] sm:$0xff]   ;;  %v4193_v60 = vshll.u32 %v14918_v16, 16  ;;  %v14943_v19 = vld [vmem:[%s13502_s28 + $0xbc] sm:$0x1] }
 0x11a   : > { %v12315_v4 = vpop.f32.mrf.mxu0  ;;  %v11295_v5 = vcombine.low %v4138_v26, %v4148_v33  ;;  %v4157_v51 = vrot.slane %v4156_v14, 4  ;;  %18404 = vst [vmem:[#allocation20_spill] sm:$0xff] %v14943_v19  ;;  %v4167_v30 = vrot.slane %v4166_v22, 4  ;;  %v4180_v14 = vor.u32 %v4179_v57, %v4176_v45 }
 0x11b   : > { %18400 = vst [vmem:[#allocation16_spill] sm:$0xff] %v14922_v59  ;;  %v14924_v32 = vpop.f32.mrf.mxu1  ;;  %v14932_v58 = vadd.f32 %v12363_v15, %v12315_v4  ;;  %v4185_v59 = vrot.slane %v4183_v62, 5  ;;  %v4187_v4 = vshrl.u32 %v14911_v52, 16  ;;  %v4201_v62 = vshll.u32 %v11260_v43, 16 }
 0x11c   : > { %18401 = vst [vmem:[#allocation17_spill] sm:$0xff] %v14924_v32  ;;  %v14936_v38 = vpop.f32.mrf.mxu0  ;;  %12648 = vmatprep.mubr.bf16.mxu1 %v11295_v5  ;;  %v4162_v26 = vsel %vm13543_vm2, %v4157_v51, %v4161_v9  ;;  %v4195_v32 = vrot.slane %v4193_v60, 5  ;;  %v4172_v16 = vsel %vm13543_vm2, %v4167_v30, %v4171_v29  ;;  %v4181_v9 = vrot.slane %v4180_v14, 4 }
 0x11d   : > { %18402 = vst [vmem:[#allocation18_spill] sm:$0xff] %v14932_v58  ;;  %v12366_v27 = vpop.f32.mrf.mxu1  ;;  %18403 = vst [vmem:[#allocation19_spill] sm:$0xff] %v14936_v38  ;;  %v4189_v38 = vrot.slane %v4187_v4, 4  ;;  %v4207_v58 = vshll.u32 %v14928_v20, 16  ;;  %v4200_v51 = vrot.slane %v4198_v46, 4  ;;  %v11296_v45 = vcombine.low %v4162_v26, %v4172_v16 }
 0x11e   : > { %v4203_v4 = vrot.slane %v4201_v62, 5  ;;  %v4186_v41 = vsel %vm13543_vm2, %v4181_v9, %v4185_v59  ;;  %v4211_v29 = vshrl.u32 %v14928_v20, 16  ;;  %v14965_v16 = vld [vmem:[%s13502_s28 + $0xc8] sm:$0x1]  ;;  %v4222_v30 = vshrl.u32 %v11263_v48, 16 }
 0x11f   : > { %v1295_v15 = vpop.f32.mrf.mxu1  ;;  %v4190_v22 = vor.u32 %v4189_v38, %v4185_v59  ;;  %v4209_v43 = vrot.slane %v4207_v58, 5  ;;  %18409 = vst [vmem:[#allocation25_spill] sm:$0xff] %v14965_v16  ;;  %12649 = vmatmul.mubr.bf16.gmra.mxu1 %v11296_v45  ;;  %v4225_v14 = vshll.u32 %v11263_v48, 16  ;;  %v11266_v46 = vld [vmem:[%s13502_s28 + $0xcc] sm:$0xf] }
 0x120   : > { %v12318_v33 = vpop.f32.mrf.mxu0  ;;  %12605 = vmatmul.mubr.bf16.gmra.mxu0 %v13265_v56  ;;  %v4204_v38 = vor.u32 %v4203_v4, %v4200_v51  ;;  %v4213_v59 = vrot.slane %v4211_v29, 4  ;;  %v14972_v62 = vld [vmem:[%s13502_s28 + $0xd0] sm:$0xf] }
 0x121   : > { %v12367_v24 = vpop.f32.mrf.mxu1  ;;  %v14954_v5 = vadd.f32 %v12366_v27, %v12318_v33  ;;  %v4217_v27 = vshll.u32 %v14943_v19, 16  ;;  %12608 = vmatprep.mubr.bf16.mxu0 %v13267_v61  ;;  %v4191_v56 = vrot.slane %v4190_v22, 4  ;;  %v4231_v33 = vshll.u32 %v14950_v21, 16  ;;  %18411 = vst [vmem:[#allocation27_spill] sm:$0xff] %v14972_v62  ;;  %v13268_v51 = vld [vmem:[%s13502_s28 + $0xcc] sm:$0xff]  }
 0x122   : > { %v990_v57 = vpop.f32.mrf.mxu0  ;;  %v4205_v9 = vrot.slane %v4204_v38, 4  ;;  %v4224_v22 = vrot.slane %v4222_v30, 4  ;;  %v4214_v29 = vor.u32 %v4213_v59, %v4209_v43 }
 0x123   : > { %18406 = vst [vmem:[#allocation22_spill] sm:$0xff] %v14954_v5  ;;  %v14956_v60 = vpop.f32.mrf.mxu1  ;;  %v14960_v1 = vadd.f32 %v1295_v15, %v990_v57  ;;  %v4196_v61 = vsel %vm13543_vm2, %v4191_v56, %v4195_v32  ;;  %v4227_v57 = vrot.slane %v4225_v14, 5  ;;  %v4241_v32 = vshll.u32 %v14965_v16, 16  ;;  %v14984_v56 = vld [vmem:[%s13502_s28 + $0xd4] sm:$0x1] }
 0x124   : > { %18407 = vst [vmem:[#allocation23_spill] sm:$0xff] %v14956_v60  ;;  %v12319_v58 = vpop.f32.mrf.mxu0  ;;  %v11297_v48 = vcombine.low %v4186_v41, %v4196_v61  ;;  %v4210_v60 = vsel %vm13543_vm2, %v4205_v9, %v4209_v43  ;;  %v4215_v30 = vrot.slane %v4214_v29, 4  ;;  %v4246_v14 = vshrl.u32 %v11266_v46, 16  ;;  %v11310_v5 = vld [vmem:[%s13502_s28 + $0x24] sm:$0xe] }
 0x125   : > { %18408 = vst [vmem:[#allocation24_spill] sm:$0xff] %v14960_v1  ;;  %v12370_v26 = vpop.f32.mrf.mxu1  ;;  %v14968_v15 = vadd.f32 %v12367_v24, %v12319_v58  ;;  %v4219_v24 = vrot.slane %v4217_v27, 5  ;;  %v4233_v58 = vrot.slane %v4231_v33, 5  ;;  %v4235_v1 = vshrl.u32 %v14950_v21, 16  ;;  %v11309_v27 = vld [vmem:[%s13502_s28 + $0x18] sm:$0xe] }
 0x126   : > { %v14976_v45 = vpop.f32.mrf.mxu0  ;;  %12652 = vmatprep.mubr.bf16.mxu1 %v11297_v48  ;;  %v4255_v41 = vshll.u32 %v14972_v62, 16  ;;  %v4243_v61 = vrot.slane %v4241_v32, 5  ;;  %v4259_v9 = vshrl.u32 %v14972_v62, 16  ;;  %v4248_v29 = vrot.slane %v4246_v14, 4  ;;  %v13390_v14 = vld [vmem:[%s13502_s28 + $0x1c] sm:$0xf] }
 0x127   : > { %18410 = vst [vmem:[#allocation26_spill] sm:$0xff] %v14968_v15  ;;  %18412 = vst [vmem:[#allocation28_spill] sm:$0xff] %v14976_v45  ;;  %v1311_v4 = vpop.f32.mrf.mxu1  ;;  %v4228_v15 = vor.u32 %v4227_v57, %v4224_v22  ;;  %v4249_v45 = vshll.u32 %v11266_v46, 16  ;;  %v4237_v43 = vrot.slane %v4235_v1, 4  ;;  %v4220_v57 = vsel %vm13543_vm2, %v4215_v30, %v4219_v24  ;;  %v11311_v24 = vld [vmem:[%s13502_s28 + $0x30] sm:$0xe] }
 0x128   : > { %v12322_v59 = vpop.f32.mrf.mxu0  ;;  %12609 = vmatmul.mubr.bf16.gmra.mxu0 %v13268_v51  ;;  %v11298_v16 = vcombine.low %v4210_v60, %v4220_v57  ;;  %v4257_v32 = vrot.slane %v4255_v41, 5  ;;  %v4261_v19 = vrot.slane %v4259_v9, 4  ;;  %v11325_v60 = vrot.slane %v11309_v27, 9  ;;  %v11312_v9 = vld [vmem:[%s13502_s28 + $0x3c] sm:$0xe] }
 0x129   : > { %v12371_v38 = vpop.f32.mrf.mxu1  ;;  %v4229_v33 = vrot.slane %v4228_v15, 4  ;;  %v14993_v48 = vadd.f32 %v12370_v26, %v12322_v59  ;;  %v4251_v46 = vrot.slane %v4249_v45, 5  ;;  %v4238_v1 = vor.u32 %v4237_v43, %v4233_v58 }
 0x12a   : > { %v1006_v51 = vpop.f32.mrf.mxu0  ;;  %v4265_v26 = vshll.u32 %v14984_v56, 16  ;;  %12653 = vmatmul.mubr.bf16.gmra.mxu1 %v11298_v16  ;;  %v4657_v59 = vrot.slane %v13390_v14, 5  ;;  %v4262_v43 = vor.u32 %v4261_v19, %v4257_v32 }
 0x12b   : > { %v14989_v22 = vpop.f32.mrf.mxu1  ;;  %v4234_v15 = vsel %vm13543_vm2, %v4229_v33, %v4233_v58  ;;  %v4252_v21 = vor.u32 %v4251_v46, %v4248_v29  ;;  %v4239_v45 = vrot.slane %v4238_v1, 4  ;;  %v13391_v33 = vld [vmem:[%s13502_s28 + $0x20] sm:$0x1]  ;;  %v11326_v1 = vrot.slane %v11310_v5, 9 }
 0x12c   : > { %18413 = vst [vmem:[#allocation29_spill] sm:$0xff] %v14989_v22  ;;  %v14998_v22 = vadd.f32 %v1311_v4, %v1006_v51  ;;  %v12323_v30 = vpop.f32.mrf.mxu0  ;;  %v4660_v57 = vrot.slane %v13391_v33, 5  ;;  %v4267_v4 = vrot.slane %v4265_v26, 5  ;;  %v4658_v16 = vsel %vm13895_vm5, %v11325_v60, %v4657_v59  ;;  %v11313_v26 = vld [vmem:[%s13502_s28 + $0x48] sm:$0xe] }
 0x12d   : > { %v12438_v62 = vpop.f32.mrf.mxu1  ;;  %v4253_v41 = vrot.slane %v4252_v21, 4  ;;  %v15004_v51 = vadd.f32 %v12371_v38, %v12323_v30  ;;  %v4244_v29 = vsel %vm13543_vm2, %v4239_v45, %v4243_v61  ;;  %v4659_v27 = vrot.slane %v4657_v59, 4 }
 0x12e   : > { %v15009_v46 = vpop.f32.mrf.mxu0  ;;  %v11299_v21 = vcombine.low %v4234_v15, %v4244_v29  ;;  %v4263_v38 = vrot.slane %v4262_v43, 4  ;;  %v18415_v30 = vrot.slane %v14693_v54, 5  ;;  %v11327_v33 = vrot.slane %v11311_v24, 9  ;;  %v11314_v29 = vld [vmem:[%s13502_s28 + $0x54] sm:$0xe] }
 0x12f   : > { %v2039_v58 = vpop.f32.mrf.mxu1  ;;  %18414 = vst [vmem:[#allocation30_spill] sm:$0xff] %v15009_v46  ;;  %v4258_v19 = vsel %vm13543_vm2, %v4253_v41, %v4257_v32  ;;  %v4661_v61 = vsel %vm13895_vm5, %v4659_v27, %v4660_v57  ;;  %v13392_v43 = vld [vmem:[%s13502_s28 + $0x34] sm:$0xf] }
 0x130   : > { %v12390_v45 = vpop.f32.mrf.mxu0  ;;  %v4665_v5 = vsel %vm13895_vm5, %v11326_v1, %v18415_v30  ;;  %v18416_v60 = vmov %v18415_v30  ;;  %12656 = vmatprep.mubr.bf16.mxu1 %v11299_v21  ;;  %v4268_v32 = vsel %vm13543_vm2, %v4263_v38, %v4267_v4  ;;  %v11357_v41 = vcombine.low %v4658_v16, %v4661_v61  ;;  %v13393_v30 = vld [vmem:[%s13502_s28 + $0x38] sm:$0x1]  ;;  %v13394_v61 = vld [vmem:[%s13502_s28 + $0x40] sm:$0xf] }
 0x131   : > { %v12439_v14 = vpop.f32.mrf.mxu1  ;;  %v4666_v59 = vrot.slane %v18416_v60, 4  ;;  %v1781_v57 = vadd.f32 %v12390_v45, %v14718_v53  ;;  %v4671_v27 = vrot.slane %v13392_v43, 5  ;;  %v11300_v46 = vcombine.low %v4258_v19, %v4268_v32 }
 0x132   : > { %v18418_v1 = vrot.slane %v14704_v6, 5  ;;  %v1652_v24 = vpop.f32.mrf.mxu0  ;;  %v4674_v60 = vrot.slane %v13393_v30, 5  ;;  %v11328_v21 = vrot.slane %v11312_v9, 9  ;;  %12676 = vmatprep.mubr.bf16.mxu0 %v11357_v41  ;;  %v4678_v45 = vrot.slane %v13394_v61, 5  ;;  %v13395_v9 = vld [vmem:[%s13502_s28 + $0x4c] sm:$0xf] }
 0x133   : > { %v15025_v15 = vpop.f32.mrf.mxu1  ;;  %v1779_v53 = vadd.f32 %v1652_v24, %v14724_v25  ;;  %v15038_v16 = vadd.f32 %v12438_v62, %v1781_v57  ;;  %v4672_v19 = vsel %vm13895_vm5, %v11327_v33, %v4671_v27  ;;  %12657 = vmatmul.mubr.bf16.gmra.mxu1 %v11300_v46  ;;  %v4673_v38 = vrot.slane %v4671_v27, 4  ;;  %v13396_v25 = vld [vmem:[%s13502_s28 + $0x50] sm:$0x1]  ;;  %v11316_v61 = vld [vmem:[%s13502_s28 + $0x6c] sm:$0xe] }
 0x134   : > { %18417 = vst [vmem:[#allocation31_spill] sm:$0xff] %v15025_v15  ;;  %v4668_v54 = vsel %vm13895_vm5, %v4666_v59, %v18418_v1  ;;  %v12391_v6 = vpop.f32.mrf.mxu0  ;;  %v11329_v32 = vrot.slane %v11313_v26, 9  ;;  %v4685_v43 = vrot.slane %v13395_v9, 5  ;;  %v4688_v62 = vrot.slane %v13396_v25, 5  ;;  %v11315_v1 = vld [vmem:[%s13502_s28 + $0x60] sm:$0xe] }
 0x135   : > { %v12442_v15 = vpop.f32.mrf.mxu1  ;;  %v11358_v4 = vcombine.low %v4665_v5, %v4668_v54  ;;  %v1782_v5 = vadd.f32 %v12391_v6, %v14736_v11  ;;  %v15045_v41 = vadd.f32 %v2039_v58, %v1779_v53  ;;  %v11330_v57 = vrot.slane %v11314_v29, 9 }
 0x136   : > { %v1655_v33 = vpop.f32.mrf.mxu0  ;;  %v4675_v46 = vsel %vm13895_vm5, %v4673_v38, %v4674_v60  ;;  %v4679_v27 = vsel %vm13895_vm5, %v11328_v21, %v4678_v45  ;;  %v4680_v26 = vrot.slane %v4678_v45, 4  ;;  %v4686_v24 = vsel %vm13895_vm5, %v11329_v32, %v4685_v43 }
 0x137   : > { %v2055_v59 = vpop.f32.mrf.mxu1  ;;  %12677 = vmatmul.mubr.bf16.vlgmr.msra.gmra.mxu0 %v11358_v4  ;;  %v15056_v11 = vadd.f32 %v1655_v33, %v14745_v10  ;;  %v15058_v58 = vadd.f32 %v12439_v14, %v1782_v5  ;;  %v11359_v29 = vcombine.low %v4672_v19, %v4675_v46  ;;  %v4687_v30 = vrot.slane %v4685_v43, 4 }
 0x138   : > { %v12394_v4 = vpop.f32.mrf.mxu0  ;;  %v18419_v53 = vrot.slane %v14733_v31, 5  ;;  %v4692_v21 = vrot.slane %v14762_v2, 5  ;;  %v4699_v38 = vrot.slane %v14790_v34, 5  ;;  %v11331_v5 = vrot.slane %v11315_v1, 9 }
 0x139   : > { %v12443_v54 = vpop.f32.mrf.mxu1  ;;  %12680 = vmatprep.mubr.bf16.mxu0 %v11359_v29  ;;  %v1785_v10 = vadd.f32 %v12394_v4, %v14752_v3  ;;  %v4689_v19 = vsel %vm13895_vm5, %v4687_v30, %v4688_v62  ;;  %v4702_v3 = vrot.slane %v14796_v8, 5  ;;  %v18420_v46 = vrot.slane %v14768_v0, 5 }
 0x13a   : > { %v4682_v60 = vsel %vm13895_vm5, %v4680_v26, %v18419_v53  ;;  %v1668_v45 = vpop.f32.mrf.mxu0  ;;  %v11361_v31 = vcombine.low %v4686_v24, %v4689_v19  ;;  %v4693_v32 = vsel %vm13895_vm5, %v11330_v57, %v4692_v21  ;;  %v4694_v9 = vrot.slane %v4692_v21, 4  ;;  %v11317_v24 = vld [vmem:[%s13502_s28 + $0x78] sm:$0xe] }
 0x13b   : > { %v15064_v6 = vpop.f32.mrf.mxu1  ;;  %v11360_v14 = vcombine.low %v4679_v27, %v4682_v60  ;;  %v1783_v2 = vadd.f32 %v1668_v45, %v14756_v55  ;;  %v15075_v34 = vadd.f32 %v12442_v15, %v1785_v10  ;;  %v4701_v25 = vrot.slane %v4699_v38, 4 }
 0x13c   : > { %v12395_v33 = vpop.f32.mrf.mxu0  ;;  %v4696_v62 = vsel %vm13895_vm5, %v4694_v9, %v18420_v46  ;;  %v11332_v26 = vrot.slane %v11316_v61, 9  ;;  %v4706_v57 = vrot.slane %v14802_v35, 5  ;;  %v4713_v4 = vrot.slane %v14836_v13, 5 }
 0x13d   : > { %v12446_v43 = vpop.f32.mrf.mxu1  ;;  %v1786_v1 = vadd.f32 %v12395_v33, %v14770_v28  ;;  %v15085_v55 = vadd.f32 %v2055_v59, %v1783_v2  ;;  %v11362_v15 = vcombine.low %v4693_v32, %v4696_v62  ;;  %v4700_v28 = vsel %vm13895_vm5, %v11331_v5, %v4699_v38 }
 0x13e   : > { %v1671_v29 = vpop.f32.mrf.mxu0  ;;  %v15089_v0 = vsel %vm13895_vm5, %v11332_v26, %v4706_v57  ;;  %v4708_v30 = vrot.slane %v4706_v57, 4  ;;  %v4703_v59 = vsel %vm13895_vm5, %v4701_v25, %v4702_v3  ;;  %v18421_v61 = vrot.slane %v14815_v36, 5  ;;  %v11318_v36 = vld [vmem:[%s13502_s28 + $0x84] sm:$0xe]  ;;  %v15125_v26 = vld [vmem:[%s13502_s28 + $0x9c] sm:$0xe] }
 0x13f   : > { %v2071_v27 = vpop.f32.mrf.mxu1  ;;  %12681 = vmatmul.mubr.bf16.gmra.mxu0 %v11360_v14  ;;  %v15093_v53 = vadd.f32 %v1671_v29, %v14776_v7  ;;  %v15095_v35 = vadd.f32 %v12443_v54, %v1786_v1  ;;  %v11333_v10 = vrot.slane %v11317_v24, 9  ;;  %v11363_v19 = vcombine.low %v4700_v28, %v4703_v59  ;;  %v15135_v1 = vld [vmem:[%s13502_s28 + $0xa8] sm:$0xe]  ;;  %v15141_v28 = vld [vmem:[%s13502_s28 + $0xb4] sm:$0xe] }
 0x140   : > { %12684 = vmatprep.mubr.bf16.mxu0 %v11361_v31  ;;  %v12398_v60 = vpop.f32.mrf.mxu0  ;;  %v4710_v13 = vsel %vm13895_vm5, %v4708_v30, %v18421_v61  ;;  %v4715_v45 = vrot.slane %v4713_v4, 4  ;;  %v4716_v31 = vrot.slane %v14841_v40, 5  ;;  %v4720_v25 = vrot.slane %v14857_v63, 5  ;;  %v15147_v61 = vld [vmem:[%s13502_s28 + $0xc0] sm:$0xe] }
 0x141   : > { %v12447_v8 = vpop.f32.mrf.mxu1  ;;  %v1789_v7 = vadd.f32 %v12398_v60, %v14784_v18  ;;  %v11364_v54 = vcombine.low %v15089_v0, %v4710_v13  ;;  %v11319_v18 = vld [vmem:[%s13502_s28 + $0x90] sm:$0xe]  ;;  %v11334_v62 = vrot.slane %v11318_v36, 9  ;;  %v4727_v63 = vrot.slane %v14877_v12, 5  ;;  %v18422_v13 = vld [vmem:[#allocation5_spill] sm:$0xff] }
 0x142   : > { %v1684_v14 = vpop.f32.mrf.mxu0  ;;  %v4734_v24 = vrot.slane %v14890_v39, 5  ;;  %v4722_v0 = vrot.slane %v4720_v25, 4  ;;  %v11335_v30 = vrot.slane %v11319_v18, 9  ;;  %v11336_v60 = vrot.slane %v15125_v26, 9  ;;  %v18426_v26 = vld [vmem:[#allocation7_spill] sm:$0xff] }
 0x143   : > { %v15101_v21 = vpop.f32.mrf.mxu1  ;;  %v1787_v32 = vadd.f32 %v1684_v14, %v14798_v17  ;;  %v15111_v9 = vadd.f32 %v12446_v43, %v1789_v7  ;;  %v4714_v17 = vsel %vm13895_vm5, %v11333_v10, %v4713_v4  ;;  %v4717_v43 = vsel %vm13895_vm5, %v4715_v45, %v4716_v31 }
 0x144   : > { %v12399_v5 = vpop.f32.mrf.mxu0  ;;  %v11365_v4 = vcombine.low %v4714_v17, %v4717_v43  ;;  %v4729_v59 = vrot.slane %v4727_v63, 4  ;;  %v4741_v39 = vrot.slane %v14911_v52, 5  ;;  %v4736_v14 = vrot.slane %v4734_v24, 4  ;;  %v18424_v52 = vld [vmem:[#allocation6_spill] sm:$0xff] }
 0x145   : > { %v12450_v38 = vpop.f32.mrf.mxu1  ;;  %v1790_v3 = vadd.f32 %v12399_v5, %v14811_v49  ;;  %v15117_v33 = vadd.f32 %v2071_v27, %v1787_v32  ;;  %v4723_v27 = vrot.slane %v14864_v47, 5  ;;  %v4730_v47 = vrot.slane %v14882_v23, 5 }
 0x146   : > { %v1687_v46 = vpop.f32.mrf.mxu0  ;;  %v4721_v31 = vsel %vm13895_vm5, %v11334_v62, %v4720_v25  ;;  %v11337_v23 = vrot.slane %v15135_v1, 9  ;;  %v4748_v36 = vrot.slane %v14928_v20, 5  ;;  %v4743_v43 = vrot.slane %v4741_v39, 4  ;;  %v18425_v62 = vld [vmem:[#allocation15_spill] sm:$0xff] }
 0x147   : > { %v2087_v2 = vpop.f32.mrf.mxu1  ;;  %12685 = vmatmul.mubr.bf16.gmra.mxu0 %v11362_v15  ;;  %v15128_v57 = vadd.f32 %v1687_v46, %v14817_v44  ;;  %v15130_v49 = vadd.f32 %v12447_v8, %v1790_v3  ;;  %v4728_v3 = vsel %vm13895_vm5, %v11335_v30, %v4727_v63  ;;  %v4731_v25 = vsel %vm13895_vm5, %v4729_v59, %v4730_v47  ;;  %v18429_v59 = vld [vmem:[#allocation8_spill] sm:$0xff] }
 0x148   : > { %12688 = vmatprep.mubr.bf16.mxu0 %v11363_v19  ;;  %v12402_v15 = vpop.f32.mrf.mxu0  ;;  %v4744_v20 = vrot.slane %v18425_v62, 5  ;;  %v11339_v63 = vrot.slane %v15147_v61, 9  ;;  %v18431_v61 = vld [vmem:[#allocation11_spill] sm:$0xff] }
 0x149   : > { %v12451_v40 = vpop.f32.mrf.mxu1  ;;  %v1793_v12 = vadd.f32 %v12402_v15, %v14830_v42  ;;  %v18423_v42 = vld [vmem:[#allocation13_spill] sm:$0xff] }
 0x14a   : > { %v1700_v44 = vpop.f32.mrf.mxu0  ;;  %v4737_v19 = vrot.slane %v18423_v42, 5 }
 0x14b   : > { %v15137_v29 = vpop.f32.mrf.mxu1  ;;  %v1791_v7 = vadd.f32 %v1700_v44, %v18422_v13  ;;  %v15150_v10 = vadd.f32 %v12450_v38, %v1793_v12  ;;  %v4724_v38 = vsel %vm13895_vm5, %v4722_v0, %v4723_v27  ;;  %v18427_v27 = vld [vmem:[#allocation20_spill] sm:$0xff]  ;;  %v4750_v12 = vrot.slane %v4748_v36, 4 }
 0x14c   : > { %v12403_v45 = vpop.f32.mrf.mxu0  ;;  %v4751_v15 = vrot.slane %v18427_v27, 5  ;;  %v11366_v13 = vcombine.low %v4721_v31, %v4724_v38  ;;  %v4735_v31 = vsel %vm13895_vm5, %v11336_v60, %v4734_v24  ;;  %v4738_v38 = vsel %vm13895_vm5, %v4736_v14, %v4737_v19 }
 0x14d   : > { %v12454_v8 = vpop.f32.mrf.mxu1  ;;  %v1794_v5 = vadd.f32 %v12403_v45, %v18424_v52  ;;  %v15158_v18 = vadd.f32 %v2087_v2, %v1791_v7  ;;  %v18430_v45 = vld [vmem:[#allocation9_spill] sm:$0xff] }
 0x14e   : > { %v1703_v46 = vpop.f32.mrf.mxu0 }
 0x14f   : > { %v2103_v32 = vpop.f32.mrf.mxu1  ;;  %12689 = vmatmul.mubr.bf16.gmra.mxu0 %v11364_v54  ;;  %v11338_v54 = vrot.slane %v15141_v28, 9  ;;  %v15169_v2 = vadd.f32 %v1703_v46, %v18426_v26  ;;  %v15171_v1 = vadd.f32 %v12451_v40, %v1794_v5  ;;  %v11367_v28 = vcombine.low %v4728_v3, %v4731_v25 }
 0x150   : > { %12692 = vmatprep.mubr.bf16.mxu0 %v11365_v4  ;;  %v12406_v0 = vpop.f32.mrf.mxu0  ;;  %v18428_v4 = vld [vmem:[#allocation21_spill] sm:$0xff] }
 0x151   : > { %v12455_v17 = vpop.f32.mrf.mxu1  ;;  %v4755_v44 = vrot.slane %v18428_v4, 5  ;;  %v1797_v47 = vadd.f32 %v12406_v0, %v18429_v59  ;;  %v4745_v0 = vsel %vm13895_vm5, %v4743_v43, %v4744_v20  ;;  %v18432_v59 = vld [vmem:[#allocation14_spill] sm:$0xff] }
 0x152   : > { %v1716_v7 = vpop.f32.mrf.mxu0  ;;  %v18435_v43 = vld [vmem:[#allocation18_spill] sm:$0xff] }
 0x153   : > { %v15175_v30 = vpop.f32.mrf.mxu1  ;;  %v1795_v52 = vadd.f32 %v1716_v7, %v18430_v45  ;;  %v15180_v40 = vadd.f32 %v12454_v8, %v1797_v47  ;;  %v4742_v8 = vsel %vm13895_vm5, %v11337_v23, %v4741_v39  ;;  %v18434_v45 = vld [vmem:[#allocation25_spill] sm:$0xff] }
 0x154   : > { %v12407_v5 = vpop.f32.mrf.mxu0  ;;  %v11369_v24 = vcombine.low %v4742_v8, %v4745_v0  ;;  %v4758_v39 = vrot.slane %v18434_v45, 5  ;;  %v18438_v45 = vld [vmem:[#allocation24_spill] sm:$0xff] }
 0x155   : > { %v12458_v42 = vpop.f32.mrf.mxu1  ;;  %v1798_v62 = vadd.f32 %v12407_v5, %v18431_v61  ;;  %v15183_v26 = vadd.f32 %v2103_v32, %v1795_v52 }
 0x156   : > { %v15185_v27 = vpop.f32.mrf.mxu0 }
 0x157   : > { %v2119_v46 = vpop.f32.mrf.mxu1  ;;  %12693 = vmatmul.mubr.bf16.gmra.mxu0 %v11366_v13  ;;  %v15191_v25 = vadd.f32 %v12455_v17, %v1798_v62  ;;  %v11368_v13 = vcombine.low %v4735_v31, %v4738_v38  ;;  %v4757_v17 = vrot.slane %v4755_v44, 4  ;;  %v4749_v62 = vsel %vm13895_vm5, %v11338_v54, %v4748_v36  ;;  %v18436_v38 = vld [vmem:[#allocation27_spill] sm:$0xff] }
 0x158   : > { %12696 = vmatprep.mubr.bf16.mxu0 %v11367_v28  ;;  %v12410_v32 = vpop.f32.mrf.mxu0  ;;  %v18433_v28 = vld [vmem:[#allocation16_spill] sm:$0xff]  ;;  %v4762_v8 = vrot.slane %v18436_v38, 5 }
 0x159   : > { %v12459_v3 = vpop.f32.mrf.mxu1  ;;  %v1801_v47 = vadd.f32 %v12410_v32, %v18432_v59  ;;  %v4756_v32 = vsel %vm13895_vm5, %v11339_v63, %v4755_v44  ;;  %v11324_v59 = vld [vmem:[%s13502_s28 + $0xcc] sm:$0xe]  ;;  %v13270_v44 = vld [vmem:[%s18360_s4 + $0x78] sm:$0xff]  }
 0x15a   : > { %v1732_v7 = vpop.f32.mrf.mxu0  ;;  %12708 = vmatprep.subr.bf16.mxu1 %v13270_v44 }
 0x15b   : > { %v15197_v4 = vpop.f32.mrf.mxu1  ;;  %v1799_v14 = vadd.f32 %v1732_v7, %v18433_v28  ;;  %v15201_v19 = vadd.f32 %v12458_v42, %v1801_v47  ;;  %v4752_v42 = vsel %vm13895_vm5, %v4750_v12, %v4751_v15  ;;  %v18437_v7 = vld [vmem:[#allocation22_spill] sm:$0xff]  ;;  %v11340_v12 = vrot.slane %v11324_v59, 9  ;;  %12709 = vmatpush3.bf16.msra.mxu1 %v13270_v44 }
 0x15c   : > { %v12411_v23 = vpop.f32.mrf.mxu0  ;;  %v11370_v54 = vcombine.low %v4749_v62, %v4752_v42  ;;  %v4764_v28 = vrot.slane %v4762_v8, 4 }
 0x15d   : > { %v12462_v60 = vpop.f32.mrf.mxu1  ;;  %v1802_v20 = vadd.f32 %v12411_v23, %v18435_v43  ;;  %v15205_v5 = vadd.f32 %v2119_v46, %v1799_v14  ;;  %v4759_v46 = vsel %vm13895_vm5, %v4757_v17, %v4758_v39  ;;  %v18439_v43 = vld [vmem:[#allocation26_spill] sm:$0xff] }
 0x15e   : > { %v15207_v61 = vpop.f32.mrf.mxu0  ;;  %v11371_v15 = vcombine.low %v4756_v32, %v4759_v46 }
 0x15f   : > { %v2135_v52 = vpop.f32.mrf.mxu1  ;;  %12697 = vmatmul.mubr.bf16.gmra.mxu0 %v11368_v13  ;;  %v15214_v0 = vadd.f32 %v12459_v3, %v1802_v20  ;;  %v4765_v3 = vrot.slane %v14984_v56, 5  ;;  %v4763_v56 = vsel %vm13895_vm5, %v11340_v12, %v4762_v8 }
 0x160   : > { %12700 = vmatprep.mubr.bf16.mxu0 %v11369_v24  ;;  %v12414_v47 = vpop.f32.mrf.mxu0 }
 0x161   : > { %v12463_v31 = vpop.f32.mrf.mxu1  ;;  %v1805_v36 = vadd.f32 %v12414_v47, %v18437_v7 }
 0x162   : > { %v1748_v24 = vpop.f32.mrf.mxu0 }
 0x163   : > { %v15221_v13 = vpop.f32.mrf.mxu1  ;;  %v1803_v23 = vadd.f32 %v1748_v24, %v18438_v45  ;;  %v15226_v63 = vadd.f32 %v12462_v60, %v1805_v36  ;;  %v4766_v60 = vsel %vm13895_vm5, %v4764_v28, %v4765_v3 }
 0x164   : > { %v12415_v17 = vpop.f32.mrf.mxu0  ;;  %v11372_v47 = vcombine.low %v4763_v56, %v4766_v60  ;;  %v13272_v56 = vld [vmem:[%s18360_s4 + $0x68] sm:$0xff]  }
 0x165   : > { %v12466_v14 = vpop.f32.mrf.mxu1  ;;  %v1806_v20 = vadd.f32 %v12415_v17, %v18439_v43  ;;  %v15232_v62 = vadd.f32 %v2135_v52, %v1803_v23 }
 0x166   : > { %v15234_v42 = vpop.f32.mrf.mxu0 }
 0x167   : > { %v2151_v39 = vpop.f32.mrf.mxu1  ;;  %12701 = vmatmul.mubr.bf16.gmra.mxu0 %v11370_v54  ;;  %v15240_v32 = vadd.f32 %v12463_v31, %v1806_v20 }
 0x168   : > { %12704 = vmatprep.mubr.bf16.mxu0 %v11371_v15  ;;  %v12418_v46 = vpop.f32.mrf.mxu0 }
 0x169   : > { %v12467_v38 = vpop.f32.mrf.mxu1  ;;  %v1809_v52 = vadd.f32 %v12418_v46, %v14993_v48  ;;  %v13271_v48 = vld [vmem:[%s18360_s4 + $0x70] sm:$0xff]  }
 0x16a   : > { %v1764_v7 = vpop.f32.mrf.mxu0  ;;  %12710 = vmatprep.subr.bf16.mxu1 %v13271_v48 }
 0x16b   : > { %v15242_v59 = vpop.f32.mrf.mxu1  ;;  %v1807_v54 = vadd.f32 %v1764_v7, %v14998_v22  ;;  %v15248_v24 = vadd.f32 %v12466_v14, %v1809_v52  ;;  %12711 = vmatpush3.bf16.msra.mxu1 %v13271_v48  ;;  %v13417_v48 = vmov 0  }
 0x16c   : > { %v12419_v8 = vpop.f32.mrf.mxu0  ;;  %12712 = vmatprep.subr.bf16.mxu1 %v13272_v56  ;;  %5205 = vst [vmem:[#allocation2 + $0x18] sm:$0xf] %v13417_v48  ;;  %5199 = vst [vmem:[#allocation2] sm:$0xf] %v13417_v48 }
 0x16d   : > { %v15245_v36 = vpop.f32.mrf.mxu1  ;;  %v1810_v31 = vadd.f32 %v12419_v8, %v15004_v51  ;;  %v15253_v12 = vadd.f32 %v2151_v39, %v1807_v54  ;;  %5200 = vst [vmem:[#allocation2 + $0x4] sm:$0xf] %v13417_v48  ;;  %5201 = vst [vmem:[#allocation2 + $0x8] sm:$0x1] %v13417_v48 }
 0x16e   : > { %v15258_v28 = vpop.f32.mrf.mxu0  ;;  %5202 = vst [vmem:[#allocation2 + $0xc] sm:$0xf] %v13417_v48  ;;  %5203 = vst [vmem:[#allocation2 + $0x10] sm:$0xf] %v13417_v48 }
 0x16f   : > { %v15250_v15 = vpop.f32.mrf.mxu1  ;;  %12705 = vmatmul.mubr.bf16.gmra.mxu0 %v11372_v47  ;;  %v15262_v45 = vadd.f32 %v12467_v38, %v1810_v31  ;;  %12713 = vmatpush3.bf16.msra.mxu1 %v13272_v56  ;;  %5204 = vst [vmem:[#allocation2 + $0x14] sm:$0x1] %v13417_v48  ;;  %5206 = vst [vmem:[#allocation2 + $0x1c] sm:$0xf] %v13417_v48 }
 0x170   : > { %v12486_v22 = vpop.f32.mrf.mxu0  ;;  %5207 = vst [vmem:[#allocation2 + $0x20] sm:$0x1] %v13417_v48  ;;  %5208 = vst [vmem:[#allocation2 + $0x24] sm:$0xf] %v13417_v48 }
 0x171   : > { %v15260_v3 = vpop.f32.mrf.mxu1  ;;  %v15267_v23 = vadd.f32 %v12486_v22, %v15038_v16  ;;  %5209 = vst [vmem:[#allocation2 + $0x28] sm:$0xf] %v13417_v48  ;;  %5210 = vst [vmem:[#allocation2 + $0x2c] sm:$0x1] %v13417_v48 }
 0x172   : > { %v2793_v51 = vpop.f32.mrf.mxu0  ;;  %5211 = vst [vmem:[#allocation2 + $0x30] sm:$0xf] %v13417_v48  ;;  %5212 = vst [vmem:[#allocation2 + $0x34] sm:$0xf] %v13417_v48 }
 0x173   : > { %v15264_v14 = vpop.f32.mrf.mxu1  ;;  %v15272_v17 = vadd.f32 %v2793_v51, %v15045_v41  ;;  %5213 = vst [vmem:[#allocation2 + $0x38] sm:$0x1] %v13417_v48  ;;  %5214 = vst [vmem:[#allocation2 + $0x3c] sm:$0xf] %v13417_v48 }
 0x174   : > { %v12487_v39 = vpop.f32.mrf.mxu0  ;;  %5215 = vst [vmem:[#allocation2 + $0x40] sm:$0xf] %v13417_v48  ;;  %5216 = vst [vmem:[#allocation2 + $0x44] sm:$0x1] %v13417_v48 }
 0x175   : > { %v15269_v44 = vpop.f32.mrf.mxu1  ;;  %v15277_v20 = vadd.f32 %v12487_v39, %v15058_v58  ;;  %v13273_v58 = vld [vmem:[%s18360_s4 + $0x38] sm:$0xff]   ;;  %5217 = vst [vmem:[#allocation2 + $0x48] sm:$0xf] %v13417_v48  ;;  %5218 = vst [vmem:[#allocation2 + $0x4c] sm:$0xf] %v13417_v48 }
 0x176   : > { %18440 = vst [vmem:[#allocation5_spill] sm:$0xff] %v15269_v44  ;;  %v15282_v60 = vpop.f32.mrf.mxu0  ;;  %12756 = vmatprep.subr.bf16.mxu0 %v13273_v58  ;;  %5219 = vst [vmem:[#allocation2 + $0x50] sm:$0x1] %v13417_v48 }
 0x177   : > { %v15274_v43 = vpop.f32.mrf.mxu1  ;;  %5220 = vst [vmem:[#allocation2 + $0x54] sm:$0xf] %v13417_v48  ;;  %5221 = vst [vmem:[#allocation2 + $0x58] sm:$0xf] %v13417_v48  ;;  %12757 = vmatpush3.bf16.msra.mxu0 %v13273_v58  ;;  %v13276_v58 = vld [vmem:[%s18360_s4 + $0x28] sm:$0xff]  }
 0x178   : > { %18441 = vst [vmem:[#allocation13_spill] sm:$0xff] %v15274_v43  ;;  %v12490_v38 = vpop.f32.mrf.mxu0  ;;  %5222 = vst [vmem:[#allocation2 + $0x5c] sm:$0x1] %v13417_v48 }
 0x179   : > { %v15284_v16 = vpop.f32.mrf.mxu1  ;;  %v15289_v41 = vadd.f32 %v12490_v38, %v15075_v34  ;;  %5223 = vst [vmem:[#allocation2 + $0x60] sm:$0xf] %v13417_v48  ;;  %5224 = vst [vmem:[#allocation2 + $0x64] sm:$0xf] %v13417_v48 }
 0x17a   : > { %v2809_v52 = vpop.f32.mrf.mxu0  ;;  %5225 = vst [vmem:[#allocation2 + $0x68] sm:$0x1] %v13417_v48  ;;  %5226 = vst [vmem:[#allocation2 + $0x6c] sm:$0xf] %v13417_v48 }
 0x17b   : > { %v15286_v46 = vpop.f32.mrf.mxu1  ;;  %18443 = vst [vmem:[#allocation15_spill] sm:$0xff] %v15289_v41  ;;  %v15297_v7 = vadd.f32 %v2809_v52, %v15085_v55  ;;  %5227 = vst [vmem:[#allocation2 + $0x70] sm:$0xf] %v13417_v48 }
 0x17c   : > { %18442 = vst [vmem:[#allocation6_spill] sm:$0xff] %v15286_v46  ;;  %v12491_v54 = vpop.f32.mrf.mxu0  ;;  %5228 = vst [vmem:[#allocation2 + $0x74] sm:$0x1] %v13417_v48 }
 0x17d   : > { %v15291_v47 = vpop.f32.mrf.mxu1  ;;  %18444 = vst [vmem:[#allocation7_spill] sm:$0xff] %v15297_v7  ;;  %v2927_v31 = vadd.f32 %v12491_v54, %v15095_v35  ;;  %5229 = vst [vmem:[#allocation2 + $0x78] sm:$0xf] %v13417_v48  ;;  %v13275_v35 = vld [vmem:[%s18360_s4 + $0x30] sm:$0xff]  }
 0x17e   : > { %5230 = vst [vmem:[#allocation2 + $0x7c] sm:$0xf] %v13417_v48  ;;  %5231 = vst [vmem:[#allocation2 + $0x80] sm:$0x1] %v13417_v48  ;;  %v15302_v34 = vpop.f32.mrf.mxu0  ;;  %12758 = vmatprep.subr.bf16.mxu0 %v13275_v35 }
 0x17f   : > { %v15299_v8 = vpop.f32.mrf.mxu1  ;;  %5232 = vst [vmem:[#allocation2 + $0x84] sm:$0xf] %v13417_v48  ;;  %5233 = vst [vmem:[#allocation2 + $0x88] sm:$0xf] %v13417_v48  ;;  %v15308_v22 = vadd.f32 %v15284_v16, %v2927_v31  ;;  %12759 = vmatpush3.bf16.msra.mxu0 %v13275_v35 }
 0x180   : > { %5234 = vst [vmem:[#allocation2 + $0x8c] sm:$0x1] %v13417_v48  ;;  %5235 = vst [vmem:[#allocation2 + $0x90] sm:$0xf] %v13417_v48  ;;  %v12494_v51 = vpop.f32.mrf.mxu0  ;;  %12760 = vmatprep.subr.bf16.mxu0 %v13276_v58 }
 0x181   : > { %5236 = vst [vmem:[#allocation2 + $0x94] sm:$0xf] %v13417_v48  ;;  %5237 = vst [vmem:[#allocation2 + $0x98] sm:$0x1] %v13417_v48  ;;  %v12543_v55 = vpop.f32.mrf.mxu1  ;;  %v2930_v56 = vadd.f32 %v12494_v51, %v15111_v9 }
 0x182   : > { %5238 = vst [vmem:[#allocation2 + $0x9c] sm:$0xf] %v13417_v48  ;;  %5239 = vst [vmem:[#allocation2 + $0xa0] sm:$0xf] %v13417_v48  ;;  %v2825_v38 = vpop.f32.mrf.mxu0 }
 0x183   : > { %5240 = vst [vmem:[#allocation2 + $0xa4] sm:$0x1] %v13417_v48  ;;  %5241 = vst [vmem:[#allocation2 + $0xa8] sm:$0xf] %v13417_v48  ;;  %v15310_v39 = vpop.f32.mrf.mxu1  ;;  %v2928_v54 = vadd.f32 %v2825_v38, %v15117_v33  ;;  %12761 = vmatpush3.bf16.msra.mxu0 %v13276_v58  ;;  %v13278_v33 = vld [vmem:[%s18360_s4 + $0x20] sm:$0xff]  }
 0x184   : > { %5242 = vst [vmem:[#allocation2 + $0xac] sm:$0xf] %v13417_v48  ;;  %5243 = vst [vmem:[#allocation2 + $0xb0] sm:$0x1] %v13417_v48  ;;  %v12495_v16 = vpop.f32.mrf.mxu0  ;;  %12762 = vmatprep.subr.bf16.mxu0 %v13278_v33 }
 0x185   : > { %5244 = vst [vmem:[#allocation2 + $0xb4] sm:$0xf] %v13417_v48  ;;  %5245 = vst [vmem:[#allocation2 + $0xb8] sm:$0xf] %v13417_v48  ;;  %v12546_v52 = vpop.f32.mrf.mxu1  ;;  %v2931_v50 = vadd.f32 %v12495_v16, %v15130_v49  ;;  %v13274_v49 = vld [vmem:[%s18360_s4 + $0x60] sm:$0xff]  }
 0x186   : > { %5246 = vst [vmem:[#allocation2 + $0xbc] sm:$0x1] %v13417_v48  ;;  %5247 = vst [vmem:[#allocation2 + $0xc0] sm:$0xf] %v13417_v48  ;;  %v15324_v9 = vpop.f32.mrf.mxu0  ;;  %12714 = vmatprep.subr.bf16.mxu1 %v13274_v49 }
 0x187   : > { %5248 = vst [vmem:[#allocation2 + $0xc4] sm:$0xf] %v13417_v48  ;;  %5249 = vst [vmem:[#allocation2 + $0xc8] sm:$0x1] %v13417_v48  ;;  %v3339_v31 = vpop.f32.mrf.mxu1  ;;  %v15326_v51 = vadd.f32 %v12543_v55, %v2931_v50  ;;  %12763 = vmatpush3.bf16.msra.mxu0 %v13278_v33  ;;  %12715 = vmatpush3.bf16.msra.mxu1 %v13274_v49 }
 0x188   : > { %5250 = vst [vmem:[#allocation2 + $0xcc] sm:$0xf] %v13417_v48  ;;  %5251 = vst [vmem:[#allocation2 + $0xd0] sm:$0xf] %v13417_v48  ;;  %v12498_v46 = vpop.f32.mrf.mxu0 }
 0x189   : > { %5252 = vst [vmem:[#allocation2 + $0xd4] sm:$0x1] %v13417_v48  ;;  %18445 = vst [vmem:[#allocation20_spill] sm:$0xff] %v15310_v39  ;;  %v15318_v48 = vadd.f32 %v15291_v47, %v2930_v56  ;;  %v15322_v39 = vadd.f32 %v15299_v8, %v2928_v54  ;;  %v12547_v35 = vpop.f32.mrf.mxu1  ;;  %v2934_v47 = vadd.f32 %v12498_v46, %v15150_v10  ;;  %v13279_v10 = vld [vmem:[%s18360_s4 + $0x18] sm:$0xff]  }
 0x18a   : > { %v2841_v8 = vpop.f32.mrf.mxu0  ;;  %12764 = vmatprep.subr.bf16.mxu0 %v13279_v10 }
 0x18b   : > { %v15328_v43 = vpop.f32.mrf.mxu1  ;;  %v2932_v38 = vadd.f32 %v2841_v8, %v15158_v18  ;;  %v15338_v50 = vadd.f32 %v12546_v52, %v2934_v47  ;;  %12765 = vmatpush3.bf16.msra.mxu0 %v13279_v10 }
 0x18c   : > { %18446 = vst [vmem:[#allocation21_spill] sm:$0xff] %v15328_v43  ;;  %v12499_v55 = vpop.f32.mrf.mxu0 }
 0x18d   : > { %v12550_v56 = vpop.f32.mrf.mxu1  ;;  %v2935_v54 = vadd.f32 %v12499_v55, %v15171_v1  ;;  %v15341_v16 = vadd.f32 %v3339_v31, %v2932_v38  ;;  %v13281_v1 = vld [vmem:[%s18360_s4 + $0x10] sm:$0xff]  }
 0x18e   : > { %v15346_v46 = vpop.f32.mrf.mxu0  ;;  %12766 = vmatprep.subr.bf16.mxu0 %v13281_v1 }
 0x18f   : > { %v3355_v58 = vpop.f32.mrf.mxu1  ;;  %18447 = vst [vmem:[#allocation8_spill] sm:$0xff] %v15346_v46  ;;  %v15348_v7 = vadd.f32 %v12547_v35, %v2935_v54  ;;  %v13277_v35 = vld [vmem:[%s18360_s4 + $0x58] sm:$0xff]   ;;  %12767 = vmatpush3.bf16.msra.mxu0 %v13281_v1  ;;  %v13282_v1 = vld [vmem:[%s18360_s4 + $0x8] sm:$0xff]  }
 0x190   : > { %v12502_v18 = vpop.f32.mrf.mxu0  ;;  %12716 = vmatprep.subr.bf16.mxu1 %v13277_v35  ;;  %12768 = vmatprep.subr.bf16.mxu0 %v13282_v1 }
 0x191   : > { %v12551_v43 = vpop.f32.mrf.mxu1  ;;  %v2938_v33 = vadd.f32 %v12502_v18, %v15180_v40  ;;  %12717 = vmatpush3.bf16.msra.mxu1 %v13277_v35 }
 0x192   : > { %v2857_v31 = vpop.f32.mrf.mxu0 }
 0x193   : > { %v15350_v52 = vpop.f32.mrf.mxu1  ;;  %v2936_v49 = vadd.f32 %v2857_v31, %v15183_v26  ;;  %v15357_v8 = vadd.f32 %v12550_v56, %v2938_v33  ;;  %12769 = vmatpush3.bf16.msra.mxu0 %v13282_v1 }
 0x194   : > { %18448 = vst [vmem:[#allocation9_spill] sm:$0xff] %v15350_v52  ;;  %v12503_v38 = vpop.f32.mrf.mxu0 }
 0x195   : > { %v12554_v47 = vpop.f32.mrf.mxu1  ;;  %v2939_v40 = vadd.f32 %v12503_v38, %v15191_v25  ;;  %v15363_v54 = vadd.f32 %v3355_v58, %v2936_v49  ;;  %v13280_v58 = vld [vmem:[%s18360_s4 + $0x50] sm:$0xff]  }
 0x196   : > { %v15365_v10 = vpop.f32.mrf.mxu0  ;;  %12718 = vmatprep.subr.bf16.mxu1 %v13280_v58 }
 0x197   : > { %v3371_v55 = vpop.f32.mrf.mxu1  ;;  %18449 = vst [vmem:[#allocation11_spill] sm:$0xff] %v15365_v10  ;;  %v15367_v26 = vadd.f32 %v12551_v43, %v2939_v40  ;;  %12719 = vmatpush3.bf16.msra.mxu1 %v13280_v58  ;;  %v5791_v58 = vld [vmem:[#allocation2 + $0x4] sm:$0xf] }
 0x198   : > { %v12506_v56 = vpop.f32.mrf.mxu0 }
 0x199   : > { %v12555_v18 = vpop.f32.mrf.mxu1  ;;  %v2942_v31 = vadd.f32 %v12506_v56, %v15201_v19 }
 0x19a   : > { %v2873_v52 = vpop.f32.mrf.mxu0 }
 0x19b   : > { %v15369_v33 = vpop.f32.mrf.mxu1  ;;  %v2940_v49 = vadd.f32 %v2873_v52, %v15205_v5  ;;  %v15379_v35 = vadd.f32 %v12554_v47, %v2942_v31  ;;  %v13284_v5 = vld [vmem:[%s18360_s4] sm:$0xff]  }
 0x19c   : > { %18450 = vst [vmem:[#allocation14_spill] sm:$0xff] %v15369_v33  ;;  %v12507_v43 = vpop.f32.mrf.mxu0  ;;  %12770 = vmatprep.subr.bf16.mxu0 %v13284_v5 }
 0x19d   : > { %v12558_v25 = vpop.f32.mrf.mxu1  ;;  %v2943_v19 = vadd.f32 %v12507_v43, %v15214_v0  ;;  %v15382_v40 = vadd.f32 %v3371_v55, %v2940_v49  ;;  %v13283_v0 = vld [vmem:[%s18360_s4 + $0x48] sm:$0xff]   ;;  %v5790_v55 = vld [vmem:[#allocation2] sm:$0xf]  ;;  %12771 = vmatpush3.bf16.msra.mxu0 %v13284_v5 }
 0x19e   : > { %v15384_v56 = vpop.f32.mrf.mxu0  ;;  %12720 = vmatprep.subr.bf16.mxu1 %v13283_v0  ;;  %v11455_v43 = vcombine.low %v5790_v55, %v5791_v58 }
 0x19f   : > { %v3387_v38 = vpop.f32.mrf.mxu1  ;;  %18451 = vst [vmem:[#allocation16_spill] sm:$0xff] %v15384_v56  ;;  %v15386_v10 = vadd.f32 %v12555_v18, %v2943_v19  ;;  %12721 = vmatpush3.bf16.msra.mxu1 %v13283_v0 }
 0x1a0   : > { %v12510_v46 = vpop.f32.mrf.mxu0  ;;  %12772 = vmatprep.mubr.bf16.mxu0 %v11455_v43  ;;  %v5858_v43 = vshll.u32 %v5790_v55, 16 }
 0x1a1   : > { %v12559_v33 = vpop.f32.mrf.mxu1  ;;  %v2946_v52 = vadd.f32 %v12510_v46, %v15226_v63 }
 0x1a2   : > { %v2889_v31 = vpop.f32.mrf.mxu0 }
 0x1a3   : > { %v15392_v47 = vpop.f32.mrf.mxu1  ;;  %v2944_v1 = vadd.f32 %v2889_v31, %v15232_v62  ;;  %v15398_v18 = vadd.f32 %v12558_v25, %v2946_v52 }
 0x1a4   : > { %18452 = vst [vmem:[#allocation25_spill] sm:$0xff] %v15392_v47  ;;  %v12511_v49 = vpop.f32.mrf.mxu0 }
 0x1a5   : > { %v2947_v63 = vadd.f32 %v12511_v49, %v15240_v32  ;;  %v15401_v46 = vadd.f32 %v3387_v38, %v2944_v1  ;;  %v12562_v19 = vpop.f32.mrf.mxu1 }
 0x1a6   : > { %v15403_v47 = vpop.f32.mrf.mxu0 }
 0x1a7   : > { %18453 = vst [vmem:[#allocation18_spill] sm:$0xff] %v15403_v47  ;;  %v15405_v56 = vadd.f32 %v12559_v33, %v2947_v63  ;;  %v3403_v44 = vpop.f32.mrf.mxu1  ;;  %v5855_v33 = vshrl.u32 %v5790_v55, 16  ;;  %v5864_v55 = vshll.u32 %v5791_v58, 16 }
 0x1a8   : > { %v12514_v62 = vpop.f32.mrf.mxu0 }
 0x1a9   : > { %v2950_v25 = vadd.f32 %v12514_v62, %v15248_v24  ;;  %v12563_v5 = vpop.f32.mrf.mxu1  ;;  %v13287_v24 = vld [vmem:[%s18360_s4 + $0x40] sm:$0xff]   ;;  %v5868_v62 = vshrl.u32 %v5791_v58, 16 }
 0x1aa   : > { %v2905_v52 = vpop.f32.mrf.mxu0  ;;  %12722 = vmatprep.subr.bf16.mxu1 %v13287_v24 }
 0x1ab   : > { %v2948_v31 = vadd.f32 %v2905_v52, %v15253_v12  ;;  %v15409_v41 = vadd.f32 %v12562_v19, %v2950_v25  ;;  %v15411_v38 = vpop.f32.mrf.mxu1  ;;  %12723 = vmatpush3.bf16.msra.mxu1 %v13287_v24  ;;  %v5857_v25 = vrot.slane %v5855_v33, 4  ;;  %v5860_v52 = vrot.slane %v5858_v43, 5 }
 0x1ac   : > { %v12515_v32 = vpop.f32.mrf.mxu0  ;;  %18454 = vst [vmem:[#allocation27_spill] sm:$0xff] %v15411_v38  ;;  %v5838_v38 = vld [vmem:[#allocation2 + $0x8] sm:$0x1] }
 0x1ad   : > { %v2951_v0 = vadd.f32 %v12515_v32, %v15262_v45  ;;  %v15414_v1 = vadd.f32 %v3403_v44, %v2948_v31  ;;  %v5874_v47 = vshll.u32 %v5838_v38, 16 }
 0x1ae   : > { %v15416_v49 = vpop.f32.mrf.mxu0  ;;  %v15425_v19 = vpop.f32.mrf.mxu1 }
 0x1af   : > { %18455 = vst [vmem:[#allocation22_spill] sm:$0xff] %v15416_v49  ;;  %v15421_v63 = vadd.f32 %v12563_v5, %v2951_v0  ;;  %18457 = vst [vmem:[#allocation26_spill] sm:$0xff] %v15425_v19  ;;  %v5866_v5 = vrot.slane %v5864_v55, 5  ;;  %v5870_v0 = vrot.slane %v5868_v62, 4  ;;  %v5861_v19 = vor.u32 %v5860_v52, %v5857_v25 }
 0x1b0   : > { %v15423_v12 = vpop.f32.mrf.mxu0  ;;  %v15429_v44 = vpop.f32.mrf.mxu1  ;;  %v5876_v43 = vrot.slane %v5874_v47, 5 }
 0x1b1   : > { %18456 = vst [vmem:[#allocation24_spill] sm:$0xff] %v15423_v12  ;;  %18459 = vst [vmem:[#allocation33_spill] sm:$0xff] %v15429_v44  ;;  %v5871_v49 = vor.u32 %v5870_v0, %v5866_v5  ;;  %v5862_v44 = vrot.slane %v5861_v19, 4 }
 0x1b2   : > { %v15427_v45 = vpop.f32.mrf.mxu0  ;;  %v15433_v32 = vpop.f32.mrf.mxu1 }
 0x1b3   : > { %18458 = vst [vmem:[#allocation32_spill] sm:$0xff] %v15427_v45  ;;  %18460 = vst [vmem:[#allocation34_spill] sm:$0xff] %v15433_v32  ;;  %v5872_v33 = vrot.slane %v5871_v49, 4  ;;  %v5867_v32 = vsel %vm13543_vm2, %v5862_v44, %v5866_v5 }
 0x1b4   : > { %v15431_v31 = vpop.f32.mrf.mxu0  ;;  %v15437_v24 = vpop.f32.mrf.mxu1 }
 0x1b5   : > { %v5877_v62 = vsel %vm13543_vm2, %v5872_v33, %v5876_v43 }
 0x1b6   : > { %v15435_v12 = vpop.f32.mrf.mxu0  ;;  %v11431_v25 = vcombine.low %v5867_v32, %v5877_v62 }
 0x1b7   : > { %v15447_v55 = vpop.f32.mrf.mxu1 }
 0x1b8   : > { %v15439_v45 = vpop.f32.mrf.mxu0  ;;  %12724 = vmatprep.mubr.bf16.mxu1 %v11431_v25 }
 0x1b9   : > { %v15452_v0 = vpop.f32.mrf.mxu1 }
 0x1ba   : > { %v15441_v58 = vpop.f32.mrf.mxu0 }
 0x1bb   : > { %v15456_v47 = vpop.f32.mrf.mxu1 }
 0x1bc   : > { %v12587_v52 = vpop.f32.mrf.mxu0 }
 0x1bd   : > { %v15450_v38 = vadd.f32 %v12587_v52, %v15308_v22  ;;  %v15461_v5 = vpop.f32.mrf.mxu1  ;;  %v13291_v52 = vld [vmem:[%s18360_s4 + $0xb8] sm:$0xff]  }
 0x1be   : > { %v15454_v49 = vpop.f32.mrf.mxu0  ;;  %12804 = vmatprep.subr.bf16.mxu1 %v13291_v52 }
 0x1c0   : > { %v12590_v19 = vpop.f32.mrf.mxu0 }
 0x1c1   : > { %v15459_v44 = vadd.f32 %v12590_v19, %v15318_v48 }
 0x1c2   : > { %v3710_v33 = vpop.f32.mrf.mxu0  ;;  %v15466_v22 = vpop.f32.mrf.mxu1 }
 0x1c3   : > { %v15464_v32 = vadd.f32 %v3710_v33, %v15322_v39  ;;  %18462 = vst [vmem:[#allocation36_spill] sm:$0xff] %v15466_v22 }
 0x1c4   : > { %v12591_v43 = vpop.f32.mrf.mxu0  ;;  %v15476_v48 = vpop.f32.mrf.mxu1 }
 0x1c5   : > { %18461 = vst [vmem:[#allocation35_spill] sm:$0xff] %v15464_v32  ;;  %v15469_v62 = vadd.f32 %v12591_v43, %v15326_v51  ;;  %18464 = vst [vmem:[#allocation38_spill] sm:$0xff] %v15476_v48 }
 0x1c6   : > { %v15471_v25 = vpop.f32.mrf.mxu0  ;;  %v15478_v37 = vpop.f32.mrf.mxu1 }
 0x1c7   : > { %18463 = vst [vmem:[#allocation37_spill] sm:$0xff] %v15469_v62  ;;  %18465 = vst [vmem:[#allocation39_spill] sm:$0xff] %v15478_v37 }
 0x1c8   : > { %v12594_v19 = vpop.f32.mrf.mxu0  ;;  %v15483_v32 = vpop.f32.mrf.mxu1 }
 0x1c9   : > { %v15481_v39 = vadd.f32 %v12594_v19, %v15338_v50 }
 0x1ca   : > { %v3726_v33 = vpop.f32.mrf.mxu0 }
 0x1cb   : > { %18466 = vst [vmem:[#allocation40_spill] sm:$0xff] %v15481_v39  ;;  %v15486_v51 = vadd.f32 %v3726_v33, %v15341_v16 }
 0x1cc   : > { %v12595_v43 = vpop.f32.mrf.mxu0  ;;  %v15491_v22 = vpop.f32.mrf.mxu1 }
 0x1cd   : > { %18467 = vst [vmem:[#allocation41_spill] sm:$0xff] %v15486_v51  ;;  %v15489_v62 = vadd.f32 %v12595_v43, %v15348_v7 }
 0x1ce   : > { %v15493_v48 = vpop.f32.mrf.mxu0  ;;  %v15495_v52 = vpop.f32.mrf.mxu1 }
 0x1cf   : > { %18468 = vst [vmem:[#allocation42_spill] sm:$0xff] %v15489_v62  ;;  %18469 = vst [vmem:[#allocation43_spill] sm:$0xff] %v15495_v52 }
 0x1d0   : > { %v12598_v37 = vpop.f32.mrf.mxu0  ;;  %v15500_v19 = vpop.f32.mrf.mxu1 }
 0x1d1   : > { %v15498_v50 = vadd.f32 %v12598_v37, %v15357_v8  ;;  %18471 = vst [vmem:[#allocation45_spill] sm:$0xff] %v15500_v19 }
 0x1d2   : > { %v3742_v39 = vpop.f32.mrf.mxu0  ;;  %v15505_v33 = vpop.f32.mrf.mxu1 }
 0x1d3   : > { %18470 = vst [vmem:[#allocation44_spill] sm:$0xff] %v15498_v50  ;;  %v15503_v16 = vadd.f32 %v3742_v39, %v15363_v54  ;;  %18473 = vst [vmem:[#allocation47_spill] sm:$0xff] %v15505_v33  ;;  %v18490_v33 = vld [vmem:[#allocation28_spill] sm:$0xff] }
 0x1d4   : > { %v12599_v7 = vpop.f32.mrf.mxu0 }
 0x1d5   : > { %18472 = vst [vmem:[#allocation46_spill] sm:$0xff] %v15503_v16  ;;  %v15508_v43 = vadd.f32 %v12599_v7, %v15367_v26 }
 0x1d6   : > { %v15510_v62 = vpop.f32.mrf.mxu0 }
 0x1d7   : > { %18474 = vst [vmem:[#allocation48_spill] sm:$0xff] %v15508_v43  ;;  %v15512_v51 = vpop.f32.mrf.mxu1 }
 0x1d8   : > { %18475 = vst [vmem:[#allocation49_spill] sm:$0xff] %v15512_v51  ;;  %v12602_v52 = vpop.f32.mrf.mxu0 }
 0x1d9   : > { %v15515_v37 = vadd.f32 %v12602_v52, %v15379_v35  ;;  %v15517_v8 = vpop.f32.mrf.mxu1 }
 0x1da   : > { %18477 = vst [vmem:[#allocation51_spill] sm:$0xff] %v15517_v8  ;;  %v3758_v50 = vpop.f32.mrf.mxu0  ;;  %v18488_v8 = vld [vmem:[#allocation19_spill] sm:$0xff] }
 0x1db   : > { %18476 = vst [vmem:[#allocation50_spill] sm:$0xff] %v15515_v37  ;;  %v15520_v54 = vadd.f32 %v3758_v50, %v15382_v40  ;;  %v15522_v39 = vpop.f32.mrf.mxu1  ;;  %v18486_v50 = vld [vmem:[#allocation12_spill] sm:$0xff] }
 0x1dc   : > { %18479 = vst [vmem:[#allocation53_spill] sm:$0xff] %v15522_v39  ;;  %v12603_v16 = vpop.f32.mrf.mxu0 }
 0x1dd   : > { %18478 = vst [vmem:[#allocation52_spill] sm:$0xff] %v15520_v54  ;;  %v15525_v26 = vadd.f32 %v12603_v16, %v15386_v10  ;;  %v15527_v7 = vpop.f32.mrf.mxu1  ;;  %v18487_v54 = vld [vmem:[#allocation10_spill] sm:$0xff]  ;;  %v18489_v10 = vld [vmem:[#allocation17_spill] sm:$0xff] }
 0x1de   : > { %18481 = vst [vmem:[#allocation55_spill] sm:$0xff] %v15527_v7  ;;  %v15529_v43 = vpop.f32.mrf.mxu0  ;;  %v1267_v39 = vadd.f32 %v18487_v54, %v18486_v50  ;;  %v1283_v16 = vadd.f32 %v18489_v10, %v18488_v8 }
 0x1df   : > { %18480 = vst [vmem:[#allocation54_spill] sm:$0xff] %v15525_v26  ;;  %18482 = vst [vmem:[#allocation56_spill] sm:$0xff] %v15529_v43  ;;  %v15534_v52 = vpop.f32.mrf.mxu1  ;;  %v18491_v43 = vld [vmem:[#allocation23_spill] sm:$0xff] }
 0x1e0   : > { %v12606_v51 = vpop.f32.mrf.mxu0  ;;  %18484 = vst [vmem:[#allocation58_spill] sm:$0xff] %v15534_v52  ;;  %v1299_v19 = vadd.f32 %v18491_v43, %v18490_v33  ;;  %v1796_v54 = vadd.f32 %v15185_v27, %v1267_v39  ;;  %v1800_v50 = vadd.f32 %v15207_v61, %v1283_v16  ;;  %v2171_v43 = vadd.f32 %v15064_v6, %v15093_v53 }
 0x1e1   : > { %v15532_v35 = vadd.f32 %v12606_v51, %v15398_v18  ;;  %v15543_v26 = vpop.f32.mrf.mxu1  ;;  %v18492_v18 = vld [vmem:[#allocation30_spill] sm:$0xff]  ;;  %v18493_v51 = vld [vmem:[#allocation29_spill] sm:$0xff]  ;;  %v2175_v27 = vadd.f32 %v15101_v21, %v15128_v57  ;;  %v2179_v39 = vadd.f32 %v15137_v29, %v15169_v2  ;;  %v3420_v21 = vadd.f32 %v15245_v36, %v15267_v23  ;;  %v18497_v36 = vld [vmem:[#allocation7_spill] sm:$0xff] }
 0x1e2   : > { %v3774_v37 = vpop.f32.mrf.mxu0  ;;  %v2925_v6 = vadd.f32 %v15302_v34, %v2171_v43  ;;  %v3418_v29 = vadd.f32 %v15250_v15, %v15272_v17  ;;  %v3421_v2 = vadd.f32 %v15260_v3, %v15277_v20  ;;  %v18496_v34 = vld [vmem:[#allocation5_spill] sm:$0xff]  ;;  %v18500_v17 = vld [vmem:[#allocation6_spill] sm:$0xff]  ;;  %v18501_v20 = vld [vmem:[#allocation11_spill] sm:$0xff] }
 0x1e3   : > { %18483 = vst [vmem:[#allocation57_spill] sm:$0xff] %v15532_v35  ;;  %v15537_v40 = vadd.f32 %v3774_v37, %v15401_v46  ;;  %v1315_v35 = vadd.f32 %v18493_v51, %v18492_v18  ;;  %v18494_v46 = vld [vmem:[#allocation31_spill] sm:$0xff]  ;;  %v15556_v8 = vpop.f32.mrf.mxu1  ;;  %v18498_v23 = vld [vmem:[#allocation13_spill] sm:$0xff]  ;;  %v18502_v18 = vld [vmem:[#allocation16_spill] sm:$0xff] }
 0x1e4   : > { %v12607_v7 = vpop.f32.mrf.mxu0  ;;  %v2167_v37 = vadd.f32 %v18494_v46, %v15056_v11  ;;  %v3423_v3 = vadd.f32 %v18500_v17, %v2925_v6  ;;  %v18503_v51 = vld [vmem:[#allocation18_spill] sm:$0xff] }
 0x1e5   : > { %18485 = vst [vmem:[#allocation59_spill] sm:$0xff] %v15537_v40  ;;  %v15550_v52 = vadd.f32 %v12607_v7, %v15405_v56  ;;  %v1804_v40 = vadd.f32 %v15234_v42, %v1299_v19  ;;  %v1808_v33 = vadd.f32 %v15258_v28, %v1315_v35  ;;  %v15565_v7 = vpop.f32.mrf.mxu1  ;;  %v2183_v42 = vadd.f32 %v15175_v30, %v1796_v54  ;;  %v18504_v54 = vld [vmem:[#allocation22_spill] sm:$0xff] }
 0x1e6   : > { %v15558_v10 = vpop.f32.mrf.mxu0  ;;  %v2921_v56 = vadd.f32 %v15282_v60, %v2167_v37  ;;  %v2187_v28 = vadd.f32 %v15197_v4, %v1800_v50  ;;  %v2929_v4 = vadd.f32 %v15324_v9, %v2175_v27  ;;  %v3808_v27 = vadd.f32 %v15431_v31, %v3421_v2  ;;  %v18511_v31 = vld [vmem:[#allocation25_spill] sm:$0xff] }
 0x1e7   : > { %v2191_v60 = vadd.f32 %v15221_v13, %v1804_v40  ;;  %v2195_v19 = vadd.f32 %v15242_v59, %v1808_v33  ;;  %v18495_v59 = vld [vmem:[#allocation15_spill] sm:$0xff]  ;;  %v18499_v40 = vld [vmem:[#allocation8_spill] sm:$0xff] }
 0x1e8   : > { %v12610_v11 = vpop.f32.mrf.mxu0  ;;  %v3419_v30 = vadd.f32 %v15264_v14, %v2921_v56  ;;  %v3424_v35 = vadd.f32 %v18496_v34, %v18495_v59  ;;  %v2933_v16 = vadd.f32 %v18499_v40, %v2179_v39  ;;  %v2937_v14 = vadd.f32 %v18501_v20, %v2183_v42  ;;  %v18505_v33 = vld [vmem:[#allocation24_spill] sm:$0xff]  ;;  %v18515_v40 = vld [vmem:[#allocation34_spill] sm:$0xff] }
 0x1e9   : > { %v15570_v61 = vadd.f32 %v12610_v11, %v15409_v41  ;;  %v2941_v9 = vadd.f32 %v18502_v18, %v2187_v28  ;;  %v2945_v46 = vadd.f32 %v18503_v51, %v2191_v60  ;;  %v2949_v50 = vadd.f32 %v18504_v54, %v2195_v19  ;;  %v18506_v56 = vld [vmem:[#allocation32_spill] sm:$0xff]  ;;  %v18508_v60 = vld [vmem:[#allocation21_spill] sm:$0xff] }
 0x1ea   : > { %v3790_v53 = vpop.f32.mrf.mxu0  ;;  %v15590_v41 = vpop.f32.mrf.mxu1  ;;  %v3807_v43 = vadd.f32 %v18505_v33, %v3420_v21  ;;  %v3805_v11 = vadd.f32 %v18506_v56, %v3418_v29  ;;  %v3806_v6 = vadd.f32 %v15435_v12, %v3419_v30  ;;  %v3811_v42 = vadd.f32 %v15439_v45, %v3424_v35  ;;  %v18509_v21 = vld [vmem:[#allocation9_spill] sm:$0xff]  ;;  %v18510_v29 = vld [vmem:[#allocation14_spill] sm:$0xff]  ;;  %v18512_v30 = vld [vmem:[#allocation27_spill] sm:$0xff] }
 0x1eb   : > { %v15582_v57 = vadd.f32 %v3790_v53, %v15414_v1  ;;  %v3422_v1 = vadd.f32 %v18498_v23, %v18497_v36  ;;  %v3810_v19 = vadd.f32 %v15454_v49, %v3423_v3  ;;  %v3435_v34 = vadd.f32 %v18509_v21, %v2937_v14  ;;  %v18513_v35 = vld [vmem:[#allocation26_spill] sm:$0xff]  ;;  %v18514_v23 = vld [vmem:[#allocation33_spill] sm:$0xff] }
 0x1ec   : > { %v12611_v13 = vpop.f32.mrf.mxu0  ;;  %v15604_v37 = vpop.f32.mrf.mxu1  ;;  %v3439_v36 = vadd.f32 %v18510_v29, %v2941_v9  ;;  %v3443_v2 = vadd.f32 %v18511_v31, %v2945_v46  ;;  %v3447_v45 = vadd.f32 %v18512_v30, %v2949_v50  ;;  %v4560_v49 = vadd.f32 %v15437_v24, %v3806_v6  ;;  %v18516_v9 = vld [vmem:[#allocation36_spill] sm:$0xff]  ;;  %v18518_v46 = vld [vmem:[#allocation38_spill] sm:$0xff]  ;;  %v18522_v56 = vld [vmem:[#allocation41_spill] sm:$0xff] }
 0x1ed   : > { %v15598_v15 = vadd.f32 %v12611_v13, %v15421_v63  ;;  %v18507_v63 = vld [vmem:[#allocation20_spill] sm:$0xff]  ;;  %v3809_v28 = vadd.f32 %v15441_v58, %v3422_v1  ;;  %v3431_v13 = vadd.f32 %v18508_v60, %v2933_v16  ;;  %v4561_v58 = vadd.f32 %v18513_v35, %v3807_v43  ;;  %v18529_v21 = vld [vmem:[#allocation49_spill] sm:$0xff] }
 0x1ee   : > { %v3427_v39 = vadd.f32 %v18507_v63, %v2929_v4  ;;  %v15614_v53 = vpop.f32.mrf.mxu1  ;;  %v3793_v59 = vpop.f32.mrf.mxu0  ;;  %v4559_v1 = vadd.f32 %v18514_v23, %v3805_v11  ;;  %v4562_v16 = vadd.f32 %v18515_v40, %v3808_v27  ;;  %v4565_v17 = vadd.f32 %v15447_v55, %v3811_v42  ;;  %v18523_v11 = vld [vmem:[#allocation43_spill] sm:$0xff]  ;;  %v18524_v63 = vld [vmem:[#allocation42_spill] sm:$0xff]  ;;  %v18526_v42 = vld [vmem:[#allocation56_spill] sm:$0xff] }
 0x1ef   : > { %v15629_v3 = vadd.f32 %v15452_v0, %v3809_v28  ;;  %v3818_v20 = vadd.f32 %v15493_v48, %v3431_v13  ;;  %v15637_v18 = vadd.f32 %v15461_v5, %v3810_v19  ;;  %v15641_v51 = vadd.f32 %v18516_v9, %v15459_v44  ;;  %v15647_v0 = vld [vmem:[%s18358_s2] ss:$0 sm:$0xff]  ;;  %v18517_v48 = vld [vmem:[#allocation35_spill] sm:$0xff] }
 0x1f0   : > { %v3814_v4 = vadd.f32 %v15471_v25, %v3427_v39  ;;  %v4531_v12 = vpop.f32.mrf.mxu1  ;;  %v15634_v25 = vadd.f32 %v15456_v47, %v15450_v38  ;;  %v3822_v24 = vadd.f32 %v15510_v62, %v3435_v34  ;;  %v15651_v54 = vadd.f32 %v18518_v46, %v18517_v48  ;;  %v18519_v38 = vld [vmem:[#allocation37_spill] sm:$0xff]  ;;  %v18520_v47 = vld [vmem:[#allocation39_spill] sm:$0xff]  ;;  %v18521_v62 = vld [vmem:[#allocation40_spill] sm:$0xff] }
 0x1f1   : > { %v15655_v5 = vadd.f32 %v18520_v47, %v18519_v38  ;;  %v15662_v43 = vadd.f32 %v15491_v22, %v18521_v62  ;;  %v15666_v27 = vadd.f32 %v18523_v11, %v18522_v56  ;;  %v18525_v39 = vld [vmem:[#allocation45_spill] sm:$0xff]  ;;  %v3826_v28 = vadd.f32 %v18526_v42, %v3439_v36  ;;  %v18527_v13 = vld [vmem:[#allocation47_spill] sm:$0xff]  ;;  %v18528_v22 = vld [vmem:[#allocation44_spill] sm:$0xff] }
 0x1f2   : > { %v15658_v50 = vadd.f32 %v15483_v32, %v3814_v4  ;;  %v15670_v6 = vadd.f32 %v18525_v39, %v18524_v63  ;;  %v15676_v32 = vld [vmem:[%s18359_s3] ss:$0 sm:$0xff]  ;;  %v15679_v19 = vadd.f32 %v18527_v13, %v3818_v20  ;;  %v15683_v34 = vadd.f32 %v18529_v21, %v18528_v22  ;;  %v18530_v4 = vld [vmem:[#allocation46_spill] sm:$0xff]  ;;  %v18531_v36 = vld [vmem:[#allocation51_spill] sm:$0xff] }
 0x1f3   : > { %v12658_v14 = vpop.f32.mrf.mxu1  ;;  %v15688_v30 = vadd.f32 %v18531_v36, %v18530_v4  ;;  %v18532_v35 = vld [vmem:[#allocation48_spill] sm:$0xff]  ;;  %v18534_v40 = vld [vmem:[#allocation55_spill] sm:$0xff]  ;;  %v3830_v9 = vadd.f32 %v15558_v10, %v3443_v2  ;;  %v18535_v46 = vld [vmem:[#allocation50_spill] sm:$0xff]  ;;  %v15713_v10 = vadd.f32 %v15565_v7, %v3826_v28  ;;  %v3834_v2 = vadd.f32 %v3793_v59, %v3447_v45 }
 0x1f4   : > { %v15695_v20 = vadd.f32 %v18534_v40, %v3822_v24  ;;  %v18536_v38 = vld [vmem:[#allocation58_spill] sm:$0xff]  ;;  %v18537_v56 = vld [vmem:[#allocation52_spill] sm:$0xff]  ;;  %v15727_v7 = vadd.f32 %v15614_v53, %v15550_v52 }
 0x1f5   : > { %v4544_v44 = vpop.f32.mrf.mxu1  ;;  %v15700_v47 = vadd.f32 %v18536_v38, %v18535_v46  ;;  %v15706_v11 = vadd.f32 %v15543_v26, %v18537_v56  ;;  %v18538_v63 = vld [vmem:[#allocation54_spill] sm:$0xff]  ;;  %v18539_v26 = vld [vmem:[#allocation57_spill] sm:$0xff]  ;;  %v15729_v59 = vadd.f32 %v4531_v12, %v3830_v9  ;;  %v15747_v9 = vld [vmem:[%s18360_s4 + $0xf8] sm:$0xff]  }
 0x1f6   : > { %v15710_v24 = vadd.f32 %v15556_v8, %v18538_v63  ;;  %v15719_v22 = vadd.f32 %v15590_v41, %v18539_v26  ;;  %v18540_v8 = vld [vmem:[#allocation59_spill] sm:$0xff]  ;;  %v15734_v41 = vadd.f32 %v12658_v14, %v15570_v61  ;;  %12852 = vmatprep.subr.bf16.mxu0 %v15747_v9 }
 0x1f7   : > { %v12678_v55 = vpop.f32.mrf.mxu0  ;;  %v15723_v21 = vadd.f32 %v15604_v37, %v18540_v8  ;;  %v15737_v37 = vadd.f32 %v4544_v44, %v15582_v57 }
 0x1f8   : > { %v5059_v33 = vadd.f32 %v12678_v55, %v4561_v58  ;;  %v18533_v58 = vld [vmem:[#allocation53_spill] sm:$0xff]  ;;  %v12659_v55 = vpop.f32.mrf.mxu1 }
 0x1f9   : > { %v4930_v60 = vpop.f32.mrf.mxu0  ;;  %v15692_v23 = vadd.f32 %v18533_v58, %v18532_v35  ;;  %v15740_v36 = vadd.f32 %v12659_v55, %v15598_v15 }
 0x1fa   : > { %v5098_v29 = vmul.f32 %v15647_v0, %v5059_v33  ;;  %v5057_v31 = vadd.f32 %v4930_v60, %v4559_v1  ;;  %v4547_v45 = vpop.f32.mrf.mxu1 }
 0x1fb   : > { %v12679_v48 = vpop.f32.mrf.mxu0  ;;  %v15742_v12 = vadd.f32 %v4547_v45, %v3834_v2 }
 0x1fc   : > { %v5137_v1 = vadd.f32 %v15676_v32, %v5098_v29  ;;  %v5096_v33 = vmul.f32 %v15647_v0, %v5057_v31  ;;  %v5060_v62 = vadd.f32 %v12679_v48, %v4562_v16 }
 0x1fd   : > { %v4933_v39 = vpop.f32.mrf.mxu0 }
 0x1fe   : > { %v5169_v42 = vmax.f32 %v5137_v1, 0.0  ;;  %v5135_v60 = vadd.f32 %v15676_v32, %v5096_v33  ;;  %v5099_v16 = vmul.f32 %v15647_v0, %v5060_v62  ;;  %v5058_v13 = vadd.f32 %v4933_v39, %v4560_v49  ;;  %v5685_v1 = vld [vmem:[#allocation2 + $0x18] sm:$0xf] }
 0x1ff   : > { %v12682_v28 = vpop.f32.mrf.mxu0 }
 0x200   : > { %v11814_v29 = vpack.c.bf16 %v5169_v42, %v5169_v42  ;;  %v5167_v31 = vmax.f32 %v5135_v60, 0.0  ;;  %v5138_v49 = vadd.f32 %v15676_v32, %v5099_v16  ;;  %v5097_v4 = vmul.f32 %v15647_v0, %v5058_v13  ;;  %v5676_v16 = vld [vmem:[#allocation2 + $0xc] sm:$0xf] }
 0x201   : > { %v5063_v52 = vadd.f32 %v12682_v28, %v4565_v17  ;;  %v4946_v53 = vpop.f32.mrf.mxu0 }
 0x202   : > { %v5370_v35 = vshrl.u32 %v11814_v29, 16  ;;  %v11812_v58 = vpack.c.bf16 %v5167_v31, %v5167_v31  ;;  %v5170_v40 = vmax.f32 %v5138_v49, 0.0  ;;  %v5373_v61 = vshll.u32 %v11814_v29, 16 }
 0x203   : > { %v5136_v14 = vadd.f32 %v15676_v32, %v5097_v4  ;;  %v5102_v57 = vmul.f32 %v15647_v0, %v5063_v52  ;;  %v5061_v15 = vadd.f32 %v4946_v53, %v15629_v3  ;;  %v12683_v44 = vpop.f32.mrf.mxu0  ;;  %v5689_v53 = vld [vmem:[#allocation2 + $0x20] sm:$0x1] }
 0x204   : > { %v5372_v17 = vrot.slane %v5370_v35, 7  ;;  %v5353_v55 = vshrl.u32 %v11812_v58, 16  ;;  %v5356_v48 = vshll.u32 %v11812_v58, 16  ;;  %v11815_v46 = vpack.c.bf16 %v5170_v40, %v5170_v40 }
 0x205   : > { %v5168_v33 = vmax.f32 %v5136_v14, 0.0  ;;  %v5141_v62 = vadd.f32 %v15676_v32, %v5102_v57  ;;  %v5100_v56 = vmul.f32 %v15647_v0, %v5061_v15  ;;  %v5064_v3 = vadd.f32 %v12683_v44, %v15634_v25  ;;  %v4949_v63 = vpop.f32.mrf.mxu0 }
 0x206   : > { %v5375_v2 = vor.u32 %v5373_v61, %v5372_v17  ;;  %v5376_v39 = vrot.slane %v5372_v17, 4  ;;  %v5355_v42 = vrot.slane %v5353_v55, 7  ;;  %v5378_v60 = vshrl.u32 %v11815_v46, 16 }
 0x207   : > { %v5381_v13 = vshll.u32 %v11815_v46, 16  ;;  %v11813_v26 = vpack.c.bf16 %v5168_v33, %v5168_v33  ;;  %v5173_v8 = vmax.f32 %v5141_v62, 0.0  ;;  %v5139_v45 = vadd.f32 %v15676_v32, %v5100_v56  ;;  %v12686_v28 = vpop.f32.mrf.mxu0 }
 0x208   : > { %v5686_v29 = vsel %vm15755_vm11, %v5375_v2, %v5685_v1  ;;  %v5358_v31 = vor.u32 %v5356_v48, %v5355_v42  ;;  %v5359_v49 = vrot.slane %v5355_v42, 4  ;;  %v5380_v4 = vrot.slane %v5378_v60, 7  ;;  %v5682_v2 = vld [vmem:[#allocation2 + $0x14] sm:$0x1] }
 0x209   : > { %5687 = vst [vmem:[#allocation2 + $0x18] sm:$0xf] %v5686_v29  ;;  %v5361_v35 = vshrl.u32 %v11813_v26, 16  ;;  %v5364_v58 = vshll.u32 %v11813_v26, 16  ;;  %v11818_v40 = vpack.c.bf16 %v5173_v8, %v5173_v8  ;;  %v5171_v61 = vmax.f32 %v5139_v45, 0.0  ;;  %v4962_v14 = vpop.f32.mrf.mxu0 }
 0x20a   : > { %v5677_v57 = vsel %vm15755_vm11, %v5358_v31, %v5676_v16  ;;  %v5383_v15 = vor.u32 %v5381_v13, %v5380_v4  ;;  %v5385_v44 = vrot.slane %v5380_v4, 4  ;;  %v5103_v17 = vmul.f32 %v15647_v0, %v5064_v3  ;;  %v5699_v45 = vld [vmem:[#allocation2 + $0x30] sm:$0xf] }
 0x20b   : > { %5678 = vst [vmem:[#allocation2 + $0xc] sm:$0xf] %v5677_v57  ;;  %v5363_v55 = vrot.slane %v5361_v35, 7  ;;  %v5404_v48 = vshrl.u32 %v11818_v40, 16  ;;  %v5407_v46 = vshll.u32 %v11818_v40, 16  ;;  %v11816_v1 = vpack.c.bf16 %v5171_v61, %v5171_v61  ;;  %v12687_v33 = vpop.f32.mrf.mxu0 }
 0x20c   : > { %v5384_v62 = vsel %vm15767_vm12, %v5376_v39, %v5383_v15  ;;  %v5690_v56 = vsel %vm15773_vm13, %v5385_v44, %v5689_v53  ;;  %v5142_v42 = vadd.f32 %v15676_v32, %v5103_v17  ;;  %v5062_v60 = vadd.f32 %v4949_v63, %v15637_v18 }
 0x20d   : > { %5688 = vst [vmem:[#allocation2 + $0x1c] sm:$0xf] %v5384_v62  ;;  %5691 = vst [vmem:[#allocation2 + $0x20] sm:$0x1] %v5690_v56  ;;  %v5366_v3 = vor.u32 %v5364_v58, %v5363_v55  ;;  %v5368_v16 = vrot.slane %v5363_v55, 4  ;;  %v5406_v13 = vrot.slane %v5404_v48, 7  ;;  %v4965_v8 = vpop.f32.mrf.mxu0  ;;  %v5067_v4 = vadd.f32 %v12686_v28, %v15641_v51 }
 0x20e   : > { %v5387_v26 = vshrl.u32 %v11816_v1, 16  ;;  %v5390_v29 = vshll.u32 %v11816_v1, 16  ;;  %v5174_v31 = vmax.f32 %v5142_v42, 0.0  ;;  %v5101_v39 = vmul.f32 %v15647_v0, %v5062_v60  ;;  %v5692_v28 = vld [vmem:[#allocation2 + $0x24] sm:$0xf] }
 0x20f   : > { %v5367_v53 = vsel %vm15767_vm12, %v5359_v49, %v5366_v3  ;;  %v5683_v18 = vsel %vm15773_vm13, %v5368_v16, %v5682_v2  ;;  %v5409_v63 = vor.u32 %v5407_v46, %v5406_v13  ;;  %v5410_v35 = vrot.slane %v5406_v13, 4  ;;  %v12690_v58 = vpop.f32.mrf.mxu0 }
 0x210   : > { %5679 = vst [vmem:[#allocation2 + $0x10] sm:$0xf] %v5367_v53  ;;  %5684 = vst [vmem:[#allocation2 + $0x14] sm:$0x1] %v5683_v18  ;;  %v15792_v40 = vrot.slane %v5387_v26, 7  ;;  %v11819_v61 = vpack.c.bf16 %v5174_v31, %v5174_v31  ;;  %v5140_v57 = vadd.f32 %v15676_v32, %v5101_v39  ;;  %v5106_v15 = vmul.f32 %v15647_v0, %v5067_v4 }
 0x211   : > { %v5700_v51 = vsel %vm15755_vm11, %v5409_v63, %v5699_v45  ;;  %v5065_v49 = vadd.f32 %v4962_v14, %v15651_v54  ;;  %v5068_v44 = vadd.f32 %v12687_v33, %v15655_v5  ;;  %v5066_v17 = vadd.f32 %v4965_v8, %v15658_v50  ;;  %v4978_v62 = vpop.f32.mrf.mxu0  ;;  %v5703_v50 = vld [vmem:[#allocation2 + $0x38] sm:$0x1] }
 0x212   : > { %5701 = vst [vmem:[#allocation2 + $0x30] sm:$0xf] %v5700_v51  ;;  %v5392_v55 = vor.u32 %v5390_v29, %v15792_v40  ;;  %v5393_v48 = vrot.slane %v15792_v40, 4  ;;  %v5412_v46 = vshrl.u32 %v11819_v61, 16  ;;  %v5415_v1 = vshll.u32 %v11819_v61, 16 }
 0x213   : > { %v5172_v56 = vmax.f32 %v5140_v57, 0.0  ;;  %v5145_v2 = vadd.f32 %v15676_v32, %v5106_v15  ;;  %v5104_v42 = vmul.f32 %v15647_v0, %v5065_v49  ;;  %v5107_v60 = vmul.f32 %v15647_v0, %v5068_v44  ;;  %v12691_v39 = vpop.f32.mrf.mxu0  ;;  %v5696_v49 = vld [vmem:[#allocation2 + $0x2c] sm:$0x1] }
 0x214   : > { %v5693_v54 = vsel %vm15755_vm11, %v5392_v55, %v5692_v28  ;;  %v5414_v5 = vrot.slane %v5412_v46, 7  ;;  %v5105_v14 = vmul.f32 %v15647_v0, %v5066_v17  ;;  %v5071_v33 = vadd.f32 %v12690_v58, %v15662_v43 }
 0x215   : > { %5694 = vst [vmem:[#allocation2 + $0x24] sm:$0xf] %v5693_v54  ;;  %v11817_v3 = vpack.c.bf16 %v5172_v56, %v5172_v56  ;;  %v5177_v16 = vmax.f32 %v5145_v2, 0.0  ;;  %v5143_v13 = vadd.f32 %v15676_v32, %v5104_v42  ;;  %v5146_v26 = vadd.f32 %v15676_v32, %v5107_v60  ;;  %v5713_v60 = vld [vmem:[#allocation2 + $0x48] sm:$0xf] }
 0x216   : > { %v5417_v8 = vor.u32 %v5415_v1, %v5414_v5  ;;  %v5419_v45 = vrot.slane %v5414_v5, 4  ;;  %v5144_v29 = vadd.f32 %v15676_v32, %v5105_v14  ;;  %v5110_v31 = vmul.f32 %v15647_v0, %v5071_v33  ;;  %v4981_v1 = vpop.f32.mrf.mxu0 }
 0x217   : > { %v5395_v4 = vshrl.u32 %v11817_v3, 16  ;;  %v5398_v53 = vshll.u32 %v11817_v3, 16  ;;  %v11822_v18 = vpack.c.bf16 %v5177_v16, %v5177_v16  ;;  %v5175_v63 = vmax.f32 %v5143_v13, 0.0 }
 0x218   : > { %v5418_v43 = vsel %vm15767_vm12, %v5410_v35, %v5417_v8  ;;  %v5704_v58 = vsel %vm15773_vm13, %v5419_v45, %v5703_v50  ;;  %v5178_v40 = vmax.f32 %v5146_v26, 0.0  ;;  %v5176_v61 = vmax.f32 %v5144_v29, 0.0  ;;  %v12694_v45 = vpop.f32.mrf.mxu0 }
 0x219   : > { %5702 = vst [vmem:[#allocation2 + $0x34] sm:$0xf] %v5418_v43  ;;  %5705 = vst [vmem:[#allocation2 + $0x38] sm:$0x1] %v5704_v58  ;;  %v5397_v57 = vrot.slane %v5395_v4, 7  ;;  %v5438_v15 = vshrl.u32 %v11822_v18, 16  ;;  %v11820_v28 = vpack.c.bf16 %v5175_v63, %v5175_v63  ;;  %v5149_v55 = vadd.f32 %v15676_v32, %v5110_v31 }
 0x21a   : > { %v5441_v51 = vshll.u32 %v11822_v18, 16  ;;  %v11823_v44 = vpack.c.bf16 %v5178_v40, %v5178_v40  ;;  %v11821_v17 = vpack.c.bf16 %v5176_v61, %v5176_v61  ;;  %v5069_v46 = vadd.f32 %v4978_v62, %v15666_v27  ;;  %v5706_v31 = vld [vmem:[#allocation2 + $0x3c] sm:$0xf]  ;;  %v5717_v4 = vld [vmem:[#allocation2 + $0x50] sm:$0x1] }
 0x21b   : > { %v5400_v35 = vor.u32 %v5398_v53, %v5397_v57  ;;  %v5402_v56 = vrot.slane %v5397_v57, 4  ;;  %v5440_v2 = vrot.slane %v5438_v15, 7  ;;  %v5421_v42 = vshrl.u32 %v11820_v28, 16  ;;  %v5710_v61 = vld [vmem:[#allocation2 + $0x44] sm:$0x1] }
 0x21c   : > { %v5424_v54 = vshll.u32 %v11820_v28, 16  ;;  %v5446_v5 = vshrl.u32 %v11823_v44, 16  ;;  %v5449_v50 = vshll.u32 %v11823_v44, 16  ;;  %v5429_v14 = vshrl.u32 %v11821_v17, 16 }
 0x21d   : > { %v5401_v33 = vsel %vm15767_vm12, %v5393_v48, %v5400_v35  ;;  %v5697_v3 = vsel %vm15773_vm13, %v5402_v56, %v5696_v49  ;;  %v5443_v16 = vor.u32 %v5441_v51, %v5440_v2  ;;  %v5444_v13 = vrot.slane %v5440_v2, 4 }
 0x21e   : > { %5695 = vst [vmem:[#allocation2 + $0x28] sm:$0xf] %v5401_v33  ;;  %5698 = vst [vmem:[#allocation2 + $0x2c] sm:$0x1] %v5697_v3  ;;  %v5423_v27 = vrot.slane %v5421_v42, 7  ;;  %v5448_v62 = vrot.slane %v5446_v5, 7  ;;  %v5108_v48 = vmul.f32 %v15647_v0, %v5069_v46  ;;  %v5072_v18 = vadd.f32 %v12691_v39, %v15670_v6 }
 0x21f   : > { %v5431_v26 = vrot.slane %v5429_v14, 7  ;;  %v5432_v8 = vshll.u32 %v11821_v17, 16  ;;  %v5714_v29 = vsel %vm15755_vm11, %v5443_v16, %v5713_v60  ;;  %v5181_v53 = vmax.f32 %v5149_v55, 0.0  ;;  %v4994_v17 = vpop.f32.mrf.mxu0  ;;  %v5792_v55 = vld [vmem:[#allocation2 + $0xc] sm:$0xf] }
 0x220   : > { %5715 = vst [vmem:[#allocation2 + $0x48] sm:$0xf] %v5714_v29  ;;  %v5426_v63 = vor.u32 %v5424_v54, %v5423_v27  ;;  %v5427_v43 = vrot.slane %v5423_v27, 4  ;;  %v5451_v58 = vor.u32 %v5449_v50, %v5448_v62  ;;  %v5453_v40 = vrot.slane %v5448_v62, 4  ;;  %v5727_v16 = vld [vmem:[#allocation2 + $0x60] sm:$0xf] }
 0x221   : > { %v5434_v57 = vor.u32 %v5432_v8, %v5431_v26  ;;  %v5436_v15 = vrot.slane %v5431_v26, 4  ;;  %v11826_v51 = vpack.c.bf16 %v5181_v53, %v5181_v53  ;;  %v5147_v28 = vadd.f32 %v15676_v32, %v5108_v48  ;;  %v15848_v8 = vpop.f32.mrf.mxu0  ;;  %v15856_v53 = vld [vmem:[#allocation2 + $0x10] sm:$0xf] }
 0x222   : > { %v5707_v49 = vsel %vm15755_vm11, %v5426_v63, %v5706_v31  ;;  %v5452_v44 = vsel %vm15767_vm12, %v5444_v13, %v5451_v58  ;;  %v5718_v6 = vsel %vm15773_vm13, %v5453_v40, %v5717_v4  ;;  %v5111_v39 = vmul.f32 %v15647_v0, %v5072_v18 }
 0x223   : > { %5708 = vst [vmem:[#allocation2 + $0x3c] sm:$0xf] %v5707_v49  ;;  %5716 = vst [vmem:[#allocation2 + $0x4c] sm:$0xf] %v5452_v44  ;;  %v5435_v46 = vsel %vm15767_vm12, %v5427_v43, %v5434_v57  ;;  %v5711_v35 = vsel %vm15773_vm13, %v5436_v15, %v5710_v61  ;;  %v5472_v56 = vshrl.u32 %v11826_v51, 16  ;;  %v5475_v2 = vshll.u32 %v11826_v51, 16  ;;  %v4997_v51 = vpop.f32.mrf.mxu0 }
 0x224   : > { %5719 = vst [vmem:[#allocation2 + $0x50] sm:$0x1] %v5718_v6  ;;  %5709 = vst [vmem:[#allocation2 + $0x40] sm:$0xf] %v5435_v46  ;;  %v5179_v42 = vmax.f32 %v5147_v28, 0.0  ;;  %v5150_v60 = vadd.f32 %v15676_v32, %v5111_v39  ;;  %v5070_v54 = vadd.f32 %v4981_v1, %v15679_v19  ;;  %v5075_v5 = vadd.f32 %v12694_v45, %v15683_v34 }
 0x225   : > { %5712 = vst [vmem:[#allocation2 + $0x44] sm:$0x1] %v5711_v35  ;;  %v15843_v50 = vrot.slane %v5472_v56, 7  ;;  %v5073_v14 = vadd.f32 %v4994_v17, %v15688_v30  ;;  %v5879_v33 = vshrl.u32 %v5792_v55, 16  ;;  %v5882_v3 = vshll.u32 %v5792_v55, 16  ;;  %v13302_v17 = vld [vmem:[%s18360_s4 + $0xf0] sm:$0xff]  }
 0x226   : > { %v11824_v13 = vpack.c.bf16 %v5179_v42, %v5179_v42  ;;  %v5182_v27 = vmax.f32 %v5150_v60, 0.0  ;;  %v5109_v62 = vmul.f32 %v15647_v0, %v5070_v54  ;;  %v5114_v26 = vmul.f32 %v15647_v0, %v5075_v5  ;;  %v5794_v15 = vld [vmem:[#allocation2 + $0x18] sm:$0xf]  ;;  %v5720_v28 = vld [vmem:[#allocation2 + $0x54] sm:$0xf] }
 0x227   : > { %v5477_v29 = vor.u32 %v5475_v2, %v15843_v50  ;;  %v5478_v19 = vrot.slane %v15843_v50, 4  ;;  %v5112_v34 = vmul.f32 %v15647_v0, %v5073_v14  ;;  %v15853_v1 = vrot.slane %v5879_v33, 4  ;;  %v5731_v2 = vld [vmem:[#allocation2 + $0x68] sm:$0x1] }
 0x228   : > { %v5455_v30 = vshrl.u32 %v11824_v13, 16  ;;  %v5458_v45 = vshll.u32 %v11824_v13, 16  ;;  %v11827_v31 = vpack.c.bf16 %v5182_v27, %v5182_v27  ;;  %v5148_v4 = vadd.f32 %v15676_v32, %v5109_v62  ;;  %v12698_v13 = vpop.f32.mrf.mxu0  ;;  %v5724_v62 = vld [vmem:[#allocation2 + $0x5c] sm:$0x1] }
 0x229   : > { %v5728_v48 = vsel %vm15755_vm11, %v5477_v29, %v5727_v16  ;;  %v5153_v18 = vadd.f32 %v15676_v32, %v5114_v26  ;;  %v5151_v63 = vadd.f32 %v15676_v32, %v5112_v34  ;;  %v15862_v43 = vrot.slane %v5882_v3, 5 }
 0x22a   : > { %5729 = vst [vmem:[#allocation2 + $0x60] sm:$0xf] %v5728_v48  ;;  %v15864_v58 = vrot.slane %v5455_v30, 7  ;;  %v5480_v40 = vshrl.u32 %v11827_v31, 16  ;;  %v5483_v61 = vshll.u32 %v11827_v31, 16  ;;  %v5180_v57 = vmax.f32 %v5148_v4, 0.0 }
 0x22b   : > { %v5185_v49 = vmax.f32 %v5153_v18, 0.0  ;;  %v5183_v44 = vmax.f32 %v5151_v63, 0.0  ;;  %v5892_v6 = vshrl.u32 %v15856_v53, 16  ;;  %v11456_v39 = vcombine.low %v5792_v55, %v15856_v53  ;;  %v13304_v55 = vld [vmem:[%s18360_s4 + $0xe8] sm:$0xff]   ;;  %v15879_v30 = vld [vmem:[#allocation2 + $0x1c] sm:$0xf] }
 0x22c   : > { %v5460_v46 = vor.u32 %v5458_v45, %v15864_v58  ;;  %v5461_v35 = vrot.slane %v15864_v58, 4  ;;  %v5482_v56 = vrot.slane %v5480_v40, 7  ;;  %v11825_v42 = vpack.c.bf16 %v5180_v57, %v5180_v57  ;;  %v5741_v48 = vld [vmem:[#allocation2 + $0x78] sm:$0xf]  ;;  %v5734_v63 = vld [vmem:[#allocation2 + $0x6c] sm:$0xf] }
 0x22d   : > { %v11830_v60 = vpack.c.bf16 %v5185_v49, %v5185_v49  ;;  %v11828_v54 = vpack.c.bf16 %v5183_v44, %v5183_v44  ;;  %12773 = vmatmul.mubr.bf16.vlgmr.msra.gmra.mxu0 %v11456_v39  ;;  %v5903_v5 = vshrl.u32 %v5794_v15, 16  ;;  %v5906_v50 = vshll.u32 %v5794_v15, 16  ;;  %v5010_v39 = vpop.f32.mrf.mxu0 }
 0x22e   : > { %v5721_v14 = vsel %vm15755_vm11, %v5460_v46, %v5720_v28  ;;  %v5485_v33 = vor.u32 %v5483_v61, %v5482_v56  ;;  %v5487_v3 = vrot.slane %v5482_v56, 4  ;;  %v5463_v16 = vshrl.u32 %v11825_v42, 16  ;;  %12853 = vmatpush3.bf16.msra.mxu0 %v15747_v9  ;;  %v5796_v46 = vld [vmem:[#allocation2 + $0x24] sm:$0xf] }
 0x22f   : > { %5722 = vst [vmem:[#allocation2 + $0x54] sm:$0xf] %v5721_v14  ;;  %v5466_v27 = vshll.u32 %v11825_v42, 16  ;;  %v5506_v26 = vshrl.u32 %v11830_v60, 16  ;;  %v5509_v29 = vshll.u32 %v11830_v60, 16  ;;  %v5489_v34 = vshrl.u32 %v11828_v54, 16  ;;  %12854 = vmatprep.subr.bf16.mxu0 %v13302_v17 }
 0x230   : > { %v5486_v45 = vsel %vm15767_vm12, %v5478_v19, %v5485_v33  ;;  %v5732_v31 = vsel %vm15773_vm13, %v5487_v3, %v5731_v2  ;;  %v5465_v4 = vrot.slane %v5463_v16, 7  ;;  %v5492_v18 = vshll.u32 %v11828_v54, 16  ;;  %v13307_v19 = vld [vmem:[%s18360_s4 + $0xe0] sm:$0xff]   ;;  %v15902_v54 = vld [vmem:[#allocation2 + $0x28] sm:$0xf] }
 0x231   : > { %5730 = vst [vmem:[#allocation2 + $0x64] sm:$0xf] %v5486_v45  ;;  %5733 = vst [vmem:[#allocation2 + $0x68] sm:$0x1] %v5732_v31  ;;  %v15885_v9 = vrot.slane %v5506_v26, 7  ;;  %v15887_v58 = vrot.slane %v5489_v34, 7  ;;  %v11457_v44 = vcombine.low %v5794_v15, %v15879_v30  ;;  %v5079_v3 = vadd.f32 %v12698_v13, %v15700_v47 }
 0x232   : > { %v15889_v40 = vrot.slane %v5903_v5, 4  ;;  %v15891_v61 = vrot.slane %v5906_v50, 5  ;;  %v5468_v57 = vor.u32 %v5466_v27, %v5465_v4  ;;  %v5470_v28 = vrot.slane %v5465_v4, 4  ;;  %12855 = vmatpush3.bf16.msra.mxu0 %v13302_v17  ;;  %v5839_v47 = vld [vmem:[#allocation2 + $0x14] sm:$0x1] }
 0x233   : > { %v5916_v49 = vshrl.u32 %v15879_v30, 16  ;;  %v5511_v56 = vor.u32 %v5509_v29, %v15885_v9  ;;  %v5512_v2 = vrot.slane %v15885_v9, 4  ;;  %v5494_v42 = vor.u32 %v5492_v18, %v15887_v58  ;;  %12856 = vmatprep.subr.bf16.mxu0 %v13304_v55  ;;  %12776 = vmatprep.mubr.bf16.mxu0 %v11457_v44  ;;  %v15937_v18 = vld [vmem:[#allocation2 + $0x30] sm:$0xf] }
 0x234   : > { %v5495_v60 = vrot.slane %v15887_v58, 4  ;;  %v5469_v5 = vsel %vm15767_vm12, %v5461_v35, %v5468_v57  ;;  %v5725_v15 = vsel %vm15773_vm13, %v5470_v28, %v5724_v62  ;;  %v5076_v17 = vadd.f32 %v15848_v8, %v15692_v23 }
 0x235   : > { %v5074_v50 = vadd.f32 %v4997_v51, %v15695_v20  ;;  %5723 = vst [vmem:[#allocation2 + $0x58] sm:$0xf] %v5469_v5  ;;  %5726 = vst [vmem:[#allocation2 + $0x5c] sm:$0x1] %v5725_v15  ;;  %v5742_v14 = vsel %vm15755_vm11, %v5511_v56, %v5741_v48  ;;  %v5735_v33 = vsel %vm15755_vm11, %v5494_v42, %v5734_v63  ;;  %v5927_v8 = vshrl.u32 %v5796_v46, 16  ;;  %v15939_v63 = vpop.f32.mrf.mxu0 }
 0x236   : > { %v5077_v35 = vadd.f32 %v5010_v39, %v15706_v11  ;;  %5743 = vst [vmem:[#allocation2 + $0x78] sm:$0xf] %v5742_v14  ;;  %5736 = vst [vmem:[#allocation2 + $0x6c] sm:$0xf] %v5735_v33  ;;  %v5115_v16 = vmul.f32 %v15647_v0, %v5076_v17  ;;  %v5930_v20 = vshll.u32 %v5796_v46, 16  ;;  %12857 = vmatpush3.bf16.msra.mxu0 %v13304_v55  ;;  %v5940_v62 = vshrl.u32 %v15902_v54, 16 }
 0x237   : > { %v5113_v23 = vmul.f32 %v15647_v0, %v5074_v50  ;;  %v5118_v51 = vmul.f32 %v15647_v0, %v5079_v3  ;;  %v11458_v26 = vcombine.low %v5796_v46, %v15902_v54  ;;  %12858 = vmatprep.subr.bf16.mxu0 %v13307_v19  ;;  %v13309_v11 = vld [vmem:[%s18360_s4 + $0xd8] sm:$0xff]   ;;  %v15928_v34 = vrot.slane %v5927_v8, 4  ;;  %v15956_v3 = vpop.f32.mrf.mxu0 }
 0x238   : > { %v5116_v27 = vmul.f32 %v15647_v0, %v5077_v35  ;;  %v5154_v13 = vadd.f32 %v15676_v32, %v5115_v16  ;;  %v15930_v55 = vrot.slane %v5930_v20, 5  ;;  %v5885_v4 = vor.u32 %v15862_v43, %v15853_v1  ;;  %v13312_v1 = vld [vmem:[%s18360_s4 + $0xd0] sm:$0xff]   ;;  %v13314_v35 = vld [vmem:[%s18360_s4 + $0xc8] sm:$0xff]  }
 0x239   : > { %v5152_v29 = vadd.f32 %v15676_v32, %v5113_v23  ;;  %v5157_v45 = vadd.f32 %v15676_v32, %v5118_v51  ;;  %12777 = vmatmul.mubr.bf16.gmra.mxu0 %v11458_v26  ;;  %v5888_v48 = vshll.u32 %v15856_v53, 16  ;;  %v5894_v44 = vrot.slane %v5892_v6, 4  ;;  %v15961_v51 = vld [vmem:[#allocation2 + $0x34] sm:$0xf] }
 0x23a   : > { %v5155_v31 = vadd.f32 %v15676_v32, %v5116_v27  ;;  %v5186_v57 = vmax.f32 %v5154_v13, 0.0  ;;  %v5898_v39 = vshll.u32 %v5839_v47, 16  ;;  %12859 = vmatpush3.bf16.msra.mxu0 %v13307_v19  ;;  %v15943_v42 = vrot.slane %v5885_v4, 4  ;;  %v5745_v27 = vld [vmem:[#allocation2 + $0x80] sm:$0x1] }
 0x23b   : > { %v5184_v28 = vmax.f32 %v5152_v29, 0.0  ;;  %v5189_v46 = vmax.f32 %v5157_v45, 0.0  ;;  %v15945_v5 = vrot.slane %v5888_v48, 5  ;;  %12860 = vmatprep.subr.bf16.mxu0 %v13309_v11  ;;  %v5951_v50 = vshrl.u32 %v15937_v18, 16  ;;  %v5738_v4 = vld [vmem:[#allocation2 + $0x74] sm:$0x1] }
 0x23c   : > { %v5187_v56 = vmax.f32 %v5155_v31, 0.0  ;;  %v11831_v43 = vpack.c.bf16 %v5186_v57, %v5186_v57  ;;  %v5900_v17 = vrot.slane %v5898_v39, 5  ;;  %v5954_v39 = vshll.u32 %v15937_v18, 16 }
 0x23d   : > { %v11829_v15 = vpack.c.bf16 %v5184_v28, %v5184_v28  ;;  %v11834_v53 = vpack.c.bf16 %v5189_v46, %v5189_v46  ;;  %v5891_v14 = vsel %vm13543_vm2, %v15943_v42, %v15945_v5  ;;  %v5895_v33 = vor.u32 %v5894_v44, %v15945_v5  ;;  %v12702_v46 = vpop.f32.mrf.mxu0 }
 0x23e   : > { %v11832_v6 = vpack.c.bf16 %v5187_v56, %v5187_v56  ;;  %v5514_v16 = vshrl.u32 %v11831_v43, 16  ;;  %v5517_v23 = vshll.u32 %v11831_v43, 16  ;;  %12861 = vmatpush3.bf16.msra.mxu0 %v13309_v11  ;;  %v15963_v57 = vrot.slane %v5951_v50, 4 }
 0x23f   : > { %v5497_v8 = vshrl.u32 %v11829_v15, 16  ;;  %v5500_v20 = vshll.u32 %v11829_v15, 16  ;;  %v5540_v26 = vshrl.u32 %v11834_v53, 16  ;;  %v5543_v47 = vshll.u32 %v11834_v53, 16  ;;  %12862 = vmatprep.subr.bf16.mxu0 %v13312_v1  ;;  %v5755_v15 = vld [vmem:[#allocation2 + $0x90] sm:$0xf] }
 0x240   : > { %v5523_v13 = vshrl.u32 %v11832_v6, 16  ;;  %v5526_v29 = vshll.u32 %v11832_v6, 16  ;;  %v5516_v45 = vrot.slane %v5514_v16, 7  ;;  %v5896_v48 = vrot.slane %v5895_v33, 4  ;;  %v5748_v53 = vld [vmem:[#allocation2 + $0x84] sm:$0xf] }
 0x241   : > { %v5499_v31 = vrot.slane %v5497_v8, 7  ;;  %v15965_v28 = vrot.slane %v5540_v26, 7  ;;  %v5964_v11 = vshrl.u32 %v15961_v51, 16  ;;  %v13317_v8 = vld [vmem:[%s18360_s4 + $0xc0] sm:$0xff]  }
 0x242   : > { %v15967_v44 = vrot.slane %v5523_v13, 7  ;;  %v5519_v56 = vor.u32 %v5517_v23, %v5516_v45  ;;  %v5521_v42 = vrot.slane %v5516_v45, 4  ;;  %12863 = vmatpush3.bf16.msra.mxu0 %v13312_v1  ;;  %v5901_v58 = vsel %vm13543_vm2, %v5896_v48, %v5900_v17  ;;  %v13294_v17 = vld [vmem:[%s18360_s4 + $0xb0] sm:$0xff]  }
 0x243   : > { %v5502_v5 = vor.u32 %v5500_v20, %v5499_v31  ;;  %v5504_v43 = vrot.slane %v5499_v31, 4  ;;  %v5545_v6 = vor.u32 %v5543_v47, %v15965_v28  ;;  %v5546_v50 = vrot.slane %v15965_v28, 4  ;;  %12864 = vmatprep.subr.bf16.mxu0 %v13314_v35  ;;  %v5840_v47 = vld [vmem:[#allocation2 + $0x20] sm:$0x1] }
 0x244   : > { %v5528_v33 = vor.u32 %v5526_v29, %v15967_v44  ;;  %v5529_v16 = vrot.slane %v15967_v44, 4  ;;  %v5520_v23 = vsel %vm15767_vm12, %v5512_v2, %v5519_v56  ;;  %v5746_v1 = vsel %vm15773_vm13, %v5521_v42, %v5745_v27 }
 0x245   : > { %v5503_v20 = vsel %vm15767_vm12, %v5495_v60, %v5502_v5  ;;  %v5739_v26 = vsel %vm15773_vm13, %v5504_v43, %v5738_v4  ;;  %5744 = vst [vmem:[#allocation2 + $0x7c] sm:$0xf] %v5520_v23  ;;  %5747 = vst [vmem:[#allocation2 + $0x80] sm:$0x1] %v5746_v1  ;;  %v5756_v9 = vsel %vm15755_vm11, %v5545_v6, %v5755_v15  ;;  %v15996_v27 = vrot.slane %v5954_v39, 5  ;;  %v5026_v60 = vpop.f32.mrf.mxu0 }
 0x246   : > { %5737 = vst [vmem:[#allocation2 + $0x70] sm:$0xf] %v5503_v20  ;;  %5740 = vst [vmem:[#allocation2 + $0x74] sm:$0x1] %v5739_v26  ;;  %v5749_v2 = vsel %vm15755_vm11, %v5528_v33, %v5748_v53  ;;  %v11432_v13 = vcombine.low %v5891_v14, %v5901_v58  ;;  %v11459_v29 = vcombine.low %v15937_v18, %v15961_v51  ;;  %v5800_v4 = vld [vmem:[#allocation2 + $0x3c] sm:$0xf]  ;;  %12865 = vmatpush3.bf16.msra.mxu0 %v13314_v35 }
 0x247   : > { %5757 = vst [vmem:[#allocation2 + $0x90] sm:$0xf] %v5756_v9  ;;  %5750 = vst [vmem:[#allocation2 + $0x84] sm:$0xf] %v5749_v2  ;;  %v5080_v45 = vadd.f32 %v15939_v63, %v15710_v24  ;;  %v5909_v31 = vor.u32 %v15891_v61, %v15889_v40  ;;  %v5912_v48 = vshll.u32 %v15879_v30, 16  ;;  %v5918_v14 = vrot.slane %v5916_v49, 4  ;;  %12866 = vmatprep.subr.bf16.mxu0 %v13317_v8 }
 0x248   : > { %v5922_v39 = vshll.u32 %v5840_v47, 16  ;;  %v5078_v18 = vadd.f32 %v15956_v3, %v15713_v10  ;;  %v16015_v24 = vld [vmem:[%s18360_s4 + $0x178] sm:$0xff]   ;;  %12725 = vmatmul.mubr.bf16.vlgmr.msra.gmra.mxu1 %v11432_v13  ;;  %12780 = vmatprep.mubr.bf16.mxu0 %v11459_v29  ;;  %v5083_v63 = vadd.f32 %v12702_v46, %v15719_v22  ;;  %v5081_v30 = vadd.f32 %v5026_v60, %v15723_v21  ;;  %v16027_v15 = vld [vmem:[#allocation2 + $0x40] sm:$0xf]  ;;  %v13297_v21 = vld [vmem:[%s18360_s4 + $0xa8] sm:$0xff]   ;;  %v16046_v29 = vpop.f32.mrf.mxu0 }
 0x249   : > { %v5119_v40 = vmul.f32 %v15647_v0, %v5080_v45  ;;  %v5910_v61 = vrot.slane %v5909_v31, 4  ;;  %v5914_v49 = vrot.slane %v5912_v48, 5  ;;  %v13397_v10 = vld [vmem:[%s18360_s4 + $0xb8] sm:$0xff]   ;;  %v5975_v56 = vshrl.u32 %v5800_v4, 16 }
 0x24a   : > { %v5924_v35 = vrot.slane %v5922_v39, 5  ;;  %12805 = vmatpush3.bf16.msra.mxu1 %v13397_v10  ;;  %v5117_v3 = vmul.f32 %v15647_v0, %v5078_v18  ;;  %v5122_v5 = vmul.f32 %v15647_v0, %v5083_v63  ;;  %v5120_v43 = vmul.f32 %v15647_v0, %v5081_v30  ;;  %12867 = vmatpush3.bf16.msra.mxu0 %v13317_v8  ;;  %v16056_v39 = vld [vmem:[#allocation2 + $0x2c] sm:$0x1]  ;;  %v13306_v30 = vld [vmem:[%s18360_s4 + $0x98] sm:$0xff]   ;;  %v16063_v10 = vpop.f32.mrf.mxu0 }
 0x24b   : > { %v5158_v42 = vadd.f32 %v15676_v32, %v5119_v40  ;;  %v5978_v22 = vshll.u32 %v5800_v4, 16  ;;  %12806 = vmatprep.subr.bf16.mxu1 %v13294_v17  ;;  %v5915_v46 = vsel %vm13543_vm2, %v5910_v61, %v5914_v49  ;;  %v5919_v53 = vor.u32 %v5918_v14, %v5914_v49  ;;  %12948 = vmatprep.subr.bf16.mxu0 %v16015_v24 }
 0x24c   : > { %v5156_v6 = vadd.f32 %v15676_v32, %v5117_v3  ;;  %v16035_v33 = vrot.slane %v5975_v56, 4  ;;  %v5161_v23 = vadd.f32 %v15676_v32, %v5122_v5  ;;  %v5159_v1 = vadd.f32 %v15676_v32, %v5120_v43  ;;  %v13301_v32 = vld [vmem:[%s18360_s4 + $0xa0] sm:$0xff]   ;;  %v5759_v3 = vld [vmem:[#allocation2 + $0x98] sm:$0x1] }
 0x24d   : > { %v5190_v0 = vmax.f32 %v5158_v42, 0.0  ;;  %v16040_v20 = vrot.slane %v5978_v22, 5  ;;  %v5920_v26 = vrot.slane %v5919_v53, 4  ;;  %v5988_v8 = vshrl.u32 %v16027_v15, 16 }
 0x24e   : > { %v5188_v47 = vmax.f32 %v5156_v6, 0.0  ;;  %v11460_v9 = vcombine.low %v5800_v4, %v16027_v15  ;;  %12807 = vmatpush3.bf16.msra.mxu1 %v13294_v17  ;;  %v5193_v58 = vmax.f32 %v5161_v23, 0.0  ;;  %v5191_v60 = vmax.f32 %v5159_v1, 0.0  ;;  %v5769_v1 = vld [vmem:[#allocation2 + $0xa8] sm:$0xf] }
 0x24f   : > { %v11835_v2 = vpack.c.bf16 %v5190_v0, %v5190_v0  ;;  %v5933_v13 = vor.u32 %v15930_v55, %v15928_v34  ;;  %12808 = vmatprep.subr.bf16.mxu1 %v13297_v21  ;;  %v5925_v45 = vsel %vm13543_vm2, %v5920_v26, %v5924_v35  ;;  %v5936_v4 = vshll.u32 %v15902_v54, 16 }
 0x250   : > { %v11833_v31 = vpack.c.bf16 %v5188_v47, %v5188_v47  ;;  %12781 = vmatmul.mubr.bf16.gmra.mxu0 %v11460_v9  ;;  %v5942_v17 = vrot.slane %v5940_v62, 4  ;;  %v11433_v34 = vcombine.low %v5915_v46, %v5925_v45  ;;  %v11838_v55 = vpack.c.bf16 %v5193_v58, %v5193_v58  ;;  %v5752_v46 = vld [vmem:[#allocation2 + $0x8c] sm:$0x1]  ;;  %v5802_v9 = vld [vmem:[#allocation2 + $0x48] sm:$0xf] }
 0x251   : > { %v5548_v48 = vshrl.u32 %v11835_v2, 16  ;;  %v5551_v14 = vshll.u32 %v11835_v2, 16  ;;  %v11836_v61 = vpack.c.bf16 %v5191_v60, %v5191_v60  ;;  %v16058_v63 = vrot.slane %v5933_v13, 4  ;;  %v5762_v45 = vld [vmem:[#allocation2 + $0x9c] sm:$0xf] }
 0x252   : > { %v5531_v18 = vshrl.u32 %v11833_v31, 16  ;;  %v5534_v40 = vshll.u32 %v11833_v31, 16  ;;  %12809 = vmatpush3.bf16.msra.mxu1 %v13297_v21  ;;  %12728 = vmatprep.mubr.bf16.mxu1 %v11433_v34  ;;  %v5574_v54 = vshrl.u32 %v11838_v55, 16  ;;  %v5577_v62 = vshll.u32 %v11838_v55, 16  ;;  %v16081_v31 = vld [vmem:[#allocation2 + $0x4c] sm:$0xf] }
 0x253   : > { %v5550_v49 = vrot.slane %v5548_v48, 7  ;;  %v5938_v35 = vrot.slane %v5936_v4, 5  ;;  %12810 = vmatprep.subr.bf16.mxu1 %v13301_v32  ;;  %v5557_v42 = vshrl.u32 %v11836_v61, 16  ;;  %v5560_v5 = vshll.u32 %v11836_v61, 16  ;;  %v12706_v4 = vpop.f32.mrf.mxu0 }
 0x254   : > { %v5533_v56 = vrot.slane %v5531_v18, 7  ;;  %v5946_v43 = vshll.u32 %v16056_v39, 16  ;;  %v16066_v53 = vrot.slane %v5574_v54, 7  ;;  %v5999_v18 = vshrl.u32 %v5802_v9, 16 }
 0x255   : > { %v5553_v22 = vor.u32 %v5551_v14, %v5550_v49  ;;  %v5555_v21 = vrot.slane %v5550_v49, 4  ;;  %v5939_v6 = vsel %vm13543_vm2, %v16058_v63, %v5938_v35  ;;  %v16071_v26 = vrot.slane %v5557_v42, 7  ;;  %v16100_v63 = vld [vmem:[#allocation2 + $0x38] sm:$0x1] }
 0x256   : > { %v5536_v0 = vor.u32 %v5534_v40, %v5533_v56  ;;  %v5538_v23 = vrot.slane %v5533_v56, 4  ;;  %v5943_v47 = vor.u32 %v5942_v17, %v5938_v35  ;;  %12811 = vmatpush3.bf16.msra.mxu1 %v13301_v32  ;;  %v5579_v60 = vor.u32 %v5577_v62, %v16066_v53  ;;  %v13311_v32 = vld [vmem:[%s18360_s4 + $0x90] sm:$0xff]  }
 0x257   : > { %v5554_v2 = vsel %vm15767_vm12, %v5546_v50, %v5553_v22  ;;  %v5760_v58 = vsel %vm15773_vm13, %v5555_v21, %v5759_v3  ;;  %v5580_v13 = vrot.slane %v16066_v53, 4  ;;  %12812 = vmatprep.subr.bf16.mxu1 %v13306_v30  ;;  %v5562_v17 = vor.u32 %v5560_v5, %v16071_v26  ;;  %v5042_v3 = vpop.f32.mrf.mxu0  ;;  %v5804_v56 = vld [vmem:[#allocation2 + $0x54] sm:$0xf]  ;;  %v13315_v22 = vld [vmem:[%s18360_s4 + $0x88] sm:$0xff]  }
 0x258   : > { %5758 = vst [vmem:[#allocation2 + $0x94] sm:$0xf] %v5554_v2  ;;  %5761 = vst [vmem:[#allocation2 + $0x98] sm:$0x1] %v5760_v58  ;;  %v5537_v28 = vsel %vm15767_vm12, %v5529_v16, %v5536_v0  ;;  %v5753_v50 = vsel %vm15773_vm13, %v5538_v23, %v5752_v46  ;;  %v5563_v48 = vrot.slane %v16071_v26, 4  ;;  %v5770_v14 = vsel %vm15755_vm11, %v5579_v60, %v5769_v1  ;;  %v13319_v58 = vld [vmem:[%s18360_s4 + $0x80] sm:$0xff]  }
 0x259   : > { %5751 = vst [vmem:[#allocation2 + $0x88] sm:$0xf] %v5537_v28  ;;  %5754 = vst [vmem:[#allocation2 + $0x8c] sm:$0x1] %v5753_v50  ;;  %v5944_v34 = vrot.slane %v5943_v47, 4  ;;  %v5948_v55 = vrot.slane %v5946_v43, 5  ;;  %v5763_v44 = vsel %vm15755_vm11, %v5562_v17, %v5762_v45  ;;  %v11461_v61 = vcombine.low %v5802_v9, %v16081_v31 }
 0x25a   : > { %5771 = vst [vmem:[#allocation2 + $0xa8] sm:$0xf] %v5770_v14  ;;  %v6002_v16 = vshll.u32 %v5802_v9, 16  ;;  %v6012_v40 = vshrl.u32 %v16081_v31, 16  ;;  %12813 = vmatpush3.bf16.msra.mxu1 %v13306_v30  ;;  %5764 = vst [vmem:[#allocation2 + $0x9c] sm:$0xf] %v5763_v44  ;;  %v5084_v62 = vadd.f32 %v16046_v29, %v15727_v7  ;;  %v5957_v35 = vor.u32 %v15996_v27, %v15963_v57 }
 0x25b   : > { %v5949_v49 = vsel %vm13543_vm2, %v5944_v34, %v5948_v55  ;;  %v16104_v54 = vrot.slane %v5999_v18, 4  ;;  %12814 = vmatprep.subr.bf16.mxu1 %v13311_v32  ;;  %12784 = vmatprep.mubr.bf16.mxu0 %v11461_v61  ;;  %v5960_v30 = vshll.u32 %v15961_v51, 16  ;;  %v5966_v43 = vrot.slane %v5964_v11, 4  ;;  %v16121_v7 = vld [vmem:[%s18358_s2] ss:$0 sm:$0xff] }
 0x25c   : > { %v11434_v42 = vcombine.low %v5939_v6, %v5949_v49  ;;  %v16110_v5 = vrot.slane %v6002_v16, 5  ;;  %v5123_v57 = vmul.f32 %v16121_v7, %v5084_v62  ;;  %v5958_v27 = vrot.slane %v5957_v35, 4  ;;  %v16132_v0 = vld [vmem:[%s18359_s3] ss:$0 sm:$0xff]  ;;  %v16136_v9 = vld [vmem:[#allocation2 + $0x58] sm:$0xf] }
 0x25d   : > { %v5970_v29 = vshll.u32 %v16100_v63, 16  ;;  %v5082_v21 = vadd.f32 %v16063_v10, %v15729_v59  ;;  %v5962_v51 = vrot.slane %v5960_v30, 5  ;;  %v5087_v11 = vadd.f32 %v12706_v4, %v15734_v41  ;;  %v16162_v35 = vld [vmem:[%s18360_s4 + $0x138] sm:$0xff]  }
 0x25e   : > { %12729 = vmatmul.mubr.bf16.gmra.mxu1 %v11434_v42  ;;  %v5085_v46 = vadd.f32 %v5042_v3, %v15737_v37  ;;  %v6023_v6 = vshrl.u32 %v5804_v56, 16  ;;  %v5162_v23 = vadd.f32 %v16132_v0, %v5123_v57  ;;  %v6026_v59 = vshll.u32 %v5804_v56, 16 }
 0x25f   : > { %v5972_v1 = vrot.slane %v5970_v29, 5  ;;  %v5121_v47 = vmul.f32 %v16121_v7, %v5082_v21  ;;  %12815 = vmatpush3.bf16.msra.mxu1 %v13311_v32  ;;  %v5963_v41 = vsel %vm13543_vm2, %v5958_v27, %v5962_v51  ;;  %v5967_v10 = vor.u32 %v5966_v43, %v5962_v51  ;;  %v16164_v21 = vld [vmem:[#allocation2 + $0x44] sm:$0x1] }
 0x260   : > { %v5126_v37 = vmul.f32 %v16121_v7, %v5087_v11  ;;  %v5124_v2 = vmul.f32 %v16121_v7, %v5085_v46  ;;  %12816 = vmatprep.subr.bf16.mxu1 %v13315_v22  ;;  %v5194_v60 = vmax.f32 %v5162_v23, 0.0  ;;  %v16146_v4 = vrot.slane %v6023_v6, 4  ;;  %v5773_v11 = vld [vmem:[#allocation2 + $0xb0] sm:$0x1] }
 0x261   : > { %v5160_v45 = vadd.f32 %v16132_v0, %v5121_v47  ;;  %v16148_v28 = vrot.slane %v6026_v59, 5  ;;  %v5968_v32 = vrot.slane %v5967_v10, 4  ;;  %v6036_v14 = vshrl.u32 %v16136_v9, 16  ;;  %v5766_v10 = vld [vmem:[#allocation2 + $0xa4] sm:$0x1] }
 0x262   : > { %v5165_v50 = vadd.f32 %v16132_v0, %v5126_v37  ;;  %v5163_v17 = vadd.f32 %v16132_v0, %v5124_v2  ;;  %v11839_v34 = vpack.c.bf16 %v5194_v60, %v5194_v60  ;;  %v11462_v18 = vcombine.low %v5804_v56, %v16136_v9  ;;  %v5783_v60 = vld [vmem:[#allocation2 + $0xc0] sm:$0xf] }
 0x263   : > { %v5192_v55 = vmax.f32 %v5160_v45, 0.0  ;;  %v5981_v44 = vor.u32 %v16040_v20, %v16035_v33  ;;  %12817 = vmatpush3.bf16.msra.mxu1 %v13315_v22  ;;  %v5973_v16 = vsel %vm13543_vm2, %v5968_v32, %v5972_v1  ;;  %v5984_v62 = vshll.u32 %v16027_v15, 16 }
 0x264   : > { %v5197_v61 = vmax.f32 %v5165_v50, 0.0  ;;  %v5195_v49 = vmax.f32 %v5163_v17, 0.0  ;;  %12818 = vmatprep.subr.bf16.mxu1 %v13319_v58  ;;  %v5582_v3 = vshrl.u32 %v11839_v34, 16  ;;  %v5585_v42 = vshll.u32 %v11839_v34, 16  ;;  %12785 = vmatmul.mubr.bf16.gmra.mxu0 %v11462_v18  ;;  %v5776_v34 = vld [vmem:[#allocation2 + $0xb4] sm:$0xf]  ;;  %v12707_v18 = vpop.f32.mrf.mxu0 }
 0x265   : > { %v11435_v56 = vcombine.low %v5963_v41, %v5973_v16  ;;  %v11837_v30 = vpack.c.bf16 %v5192_v55, %v5192_v55  ;;  %v5982_v43 = vrot.slane %v5981_v44, 4  ;;  %v5986_v22 = vrot.slane %v5984_v62, 5  ;;  %v5806_v55 = vld [vmem:[#allocation2 + $0x60] sm:$0xf] }
 0x266   : > { %v11842_v33 = vpack.c.bf16 %v5197_v61, %v5197_v61  ;;  %v11840_v20 = vpack.c.bf16 %v5195_v49, %v5195_v49  ;;  %v5584_v57 = vrot.slane %v5582_v3, 7  ;;  %v5990_v51 = vrot.slane %v5988_v8, 4  ;;  %v16186_v49 = vld [vmem:[#allocation2 + $0x64] sm:$0xf] }
 0x267   : > { %12732 = vmatprep.mubr.bf16.mxu1 %v11435_v56  ;;  %v5565_v27 = vshrl.u32 %v11837_v30, 16  ;;  %v5568_v29 = vshll.u32 %v11837_v30, 16  ;;  %12819 = vmatpush3.bf16.msra.mxu1 %v13319_v58  ;;  %v5987_v37 = vsel %vm13543_vm2, %v5982_v43, %v5986_v22  ;;  %v5994_v58 = vshll.u32 %v16164_v21, 16  ;;  %v16194_v56 = vld [vmem:[#allocation2 + $0x50] sm:$0x1] }
 0x268   : > { %v5608_v46 = vshrl.u32 %v11842_v33, 16  ;;  %v5611_v6 = vshll.u32 %v11842_v33, 16  ;;  %v5591_v23 = vshrl.u32 %v11840_v20, 16  ;;  %v5594_v1 = vshll.u32 %v11840_v20, 16  ;;  %12900 = vmatprep.subr.bf16.mxu1 %v16162_v35 }
 0x269   : > { %v5587_v47 = vor.u32 %v5585_v42, %v5584_v57  ;;  %v5589_v59 = vrot.slane %v5584_v57, 4  ;;  %v5567_v41 = vrot.slane %v5565_v27, 7  ;;  %v5991_v8 = vor.u32 %v5990_v51, %v5986_v22  ;;  %v5045_v27 = vpop.f32.mrf.mxu0 }
 0x26a   : > { %v16171_v2 = vrot.slane %v5608_v46, 7  ;;  %v16173_v15 = vrot.slane %v5591_v23, 7  ;;  %v5996_v42 = vrot.slane %v5994_v58, 5  ;;  %v6047_v20 = vshrl.u32 %v5806_v55, 16  ;;  %v16221_v58 = vld [vmem:[#allocation2 + $0x5c] sm:$0x1] }
 0x26b   : > { %v5588_v45 = vsel %vm15767_vm12, %v5580_v13, %v5587_v47  ;;  %v5774_v32 = vsel %vm15773_vm13, %v5589_v59, %v5773_v11  ;;  %v5570_v50 = vor.u32 %v5568_v29, %v5567_v41  ;;  %v5572_v17 = vrot.slane %v5567_v41, 4  ;;  %v5808_v29 = vld [vmem:[#allocation2 + $0x6c] sm:$0xf] }
 0x26c   : > { %5772 = vst [vmem:[#allocation2 + $0xac] sm:$0xf] %v5588_v45  ;;  %5775 = vst [vmem:[#allocation2 + $0xb0] sm:$0x1] %v5774_v32  ;;  %v5613_v44 = vor.u32 %v5611_v6, %v16171_v2  ;;  %v5614_v16 = vrot.slane %v16171_v2, 4  ;;  %v5596_v61 = vor.u32 %v5594_v1, %v16173_v15  ;;  %v5597_v53 = vrot.slane %v16173_v15, 4 }
 0x26d   : > { %v5571_v13 = vsel %vm15767_vm12, %v5563_v48, %v5570_v50  ;;  %v5767_v62 = vsel %vm15773_vm13, %v5572_v17, %v5766_v10  ;;  %v5992_v3 = vrot.slane %v5991_v8, 4  ;;  %v6050_v26 = vshll.u32 %v5806_v55, 16  ;;  %v16211_v6 = vld [vmem:[#allocation2 + $0x70] sm:$0xf]  ;;  %v5810_v17 = vld [vmem:[#allocation2 + $0x78] sm:$0xf] }
 0x26e   : > { %5765 = vst [vmem:[#allocation2 + $0xa0] sm:$0xf] %v5571_v13  ;;  %5768 = vst [vmem:[#allocation2 + $0xa4] sm:$0x1] %v5767_v62  ;;  %v5784_v30 = vsel %vm15755_vm11, %v5613_v44, %v5783_v60  ;;  %v5777_v33 = vsel %vm15755_vm11, %v5596_v61, %v5776_v34  ;;  %v6060_v43 = vshrl.u32 %v16186_v49, 16  ;;  %v11463_v22 = vcombine.low %v5806_v55, %v16186_v49 }
 0x26f   : > { %5785 = vst [vmem:[#allocation2 + $0xc0] sm:$0xf] %v5784_v30  ;;  %5778 = vst [vmem:[#allocation2 + $0xb4] sm:$0xf] %v5777_v33  ;;  %v5997_v48 = vsel %vm13543_vm2, %v5992_v3, %v5996_v42  ;;  %v5088_v57 = vadd.f32 %v12707_v18, %v15740_v36  ;;  %v16205_v11 = vrot.slane %v6047_v20, 4  ;;  %v16207_v38 = vrot.slane %v6050_v26, 5 }
 0x270   : > { %v11436_v51 = vcombine.low %v5987_v37, %v5997_v48  ;;  %v6005_v46 = vor.u32 %v16110_v5, %v16104_v54  ;;  %12788 = vmatprep.mubr.bf16.mxu0 %v11463_v22  ;;  %v6008_v1 = vshll.u32 %v16081_v31, 16  ;;  %v6014_v36 = vrot.slane %v6012_v40, 4  ;;  %v16238_v62 = vld [vmem:[#allocation2 + $0x7c] sm:$0xf] }
 0x271   : > { %v5127_v23 = vmul.f32 %v16121_v7, %v5088_v57  ;;  %v6018_v47 = vshll.u32 %v16194_v56, 16  ;;  %v5086_v41 = vadd.f32 %v5045_v27, %v15742_v12  ;;  %v6071_v10 = vshrl.u32 %v5808_v29, 16  ;;  %v5816_v15 = vld [vmem:[#allocation2 + $0x9c] sm:$0xf] }
 0x272   : > { %12733 = vmatmul.mubr.bf16.gmra.mxu1 %v11436_v51  ;;  %v6006_v59 = vrot.slane %v6005_v46, 4  ;;  %v6074_v37 = vshll.u32 %v5808_v29, 16  ;;  %v6010_v5 = vrot.slane %v6008_v1, 5  ;;  %v6084_v8 = vshrl.u32 %v16211_v6, 16 }
 0x273   : > { %v5166_v54 = vadd.f32 %v16132_v0, %v5127_v23  ;;  %v6020_v60 = vrot.slane %v6018_v47, 5  ;;  %v5125_v45 = vmul.f32 %v16121_v7, %v5086_v41  ;;  %v16224_v32 = vrot.slane %v6071_v10, 4  ;;  %v16250_v47 = vld [vmem:[#allocation2 + $0x68] sm:$0x1] }
 0x274   : > { %v16226_v40 = vrot.slane %v6074_v37, 5  ;;  %v11464_v50 = vcombine.low %v5808_v29, %v16211_v6  ;;  %v6011_v34 = vsel %vm13543_vm2, %v6006_v59, %v6010_v5  ;;  %v6015_v55 = vor.u32 %v6014_v36, %v6010_v5  ;;  %v5787_v59 = vld [vmem:[#allocation2 + $0xc8] sm:$0x1] }
 0x275   : > { %v5198_v12 = vmax.f32 %v5166_v54, 0.0  ;;  %v6029_v18 = vor.u32 %v16148_v28, %v16146_v4  ;;  %v5164_v44 = vadd.f32 %v16132_v0, %v5125_v45  ;;  %v6032_v7 = vshll.u32 %v16136_v9, 16 }
 0x276   : > { %12789 = vmatmul.mubr.bf16.gmra.mxu0 %v11464_v50  ;;  %v6038_v61 = vrot.slane %v6036_v14, 4  ;;  %v6042_v13 = vshll.u32 %v16221_v58, 16  ;;  %v6016_v42 = vrot.slane %v6015_v55, 4  ;;  %v6095_v33 = vshrl.u32 %v5810_v17, 16 }
 0x277   : > { %v11843_v3 = vpack.c.bf16 %v5198_v12, %v5198_v12  ;;  %v6030_v30 = vrot.slane %v6029_v18, 4  ;;  %v5196_v20 = vmax.f32 %v5164_v44, 0.0  ;;  %v6034_v26 = vrot.slane %v6032_v7, 5  ;;  %v5812_v12 = vld [vmem:[#allocation2 + $0x84] sm:$0xf] }
 0x278   : > { %v6044_v48 = vrot.slane %v6042_v13, 5  ;;  %v6098_v4 = vshll.u32 %v5810_v17, 16  ;;  %v6021_v22 = vsel %vm13543_vm2, %v6016_v42, %v6020_v60  ;;  %v16242_v57 = vrot.slane %v6095_v33, 4  ;;  %v16260_v44 = vld [vmem:[#allocation2 + $0x88] sm:$0xf] }
 0x279   : > { %v5616_v28 = vshrl.u32 %v11843_v3, 16  ;;  %v5619_v0 = vshll.u32 %v11843_v3, 16  ;;  %v11437_v14 = vcombine.low %v6011_v34, %v6021_v22  ;;  %v11841_v27 = vpack.c.bf16 %v5196_v20, %v5196_v20  ;;  %v5780_v7 = vld [vmem:[#allocation2 + $0xbc] sm:$0x1]  ;;  %v16268_v13 = vld [vmem:[#allocation2 + $0x74] sm:$0x1] }
 0x27a   : > { %v6035_v29 = vsel %vm13543_vm2, %v6030_v30, %v6034_v26  ;;  %v6039_v51 = vor.u32 %v6038_v61, %v6034_v26  ;;  %v16246_v23 = vrot.slane %v6098_v4, 5  ;;  %v6108_v1 = vshrl.u32 %v16238_v62, 16  ;;  %v5814_v20 = vld [vmem:[#allocation2 + $0x90] sm:$0xf]  ;;  %v16273_v4 = vld [vmem:[#allocation2 + $0x94] sm:$0xf] }
 0x27b   : > { %v5618_v46 = vrot.slane %v5616_v28, 7  ;;  %v11465_v36 = vcombine.low %v5810_v17, %v16238_v62  ;;  %12736 = vmatprep.mubr.bf16.mxu1 %v11437_v14  ;;  %v5599_v41 = vshrl.u32 %v11841_v27, 16  ;;  %v5602_v10 = vshll.u32 %v11841_v27, 16 }
 0x27c   : > { %v6040_v37 = vrot.slane %v6039_v51, 4  ;;  %v6053_v54 = vor.u32 %v16207_v38, %v16205_v11  ;;  %v6056_v45 = vshll.u32 %v16186_v49, 16  ;;  %v6062_v50 = vrot.slane %v6060_v43, 4 }
 0x27d   : > { %v5621_v5 = vor.u32 %v5619_v0, %v5618_v46  ;;  %v5623_v60 = vrot.slane %v5618_v46, 4  ;;  %12792 = vmatprep.mubr.bf16.mxu0 %v11465_v36  ;;  %v5601_v17 = vrot.slane %v5599_v41, 7  ;;  %v6066_v18 = vshll.u32 %v16250_v47, 16  ;;  %v16285_v36 = vld [vmem:[#allocation2 + $0x80] sm:$0x1] }
 0x27e   : > { %v6045_v34 = vsel %vm13543_vm2, %v6040_v37, %v6044_v48  ;;  %v6054_v55 = vrot.slane %v6053_v54, 4  ;;  %v6058_v61 = vrot.slane %v6056_v45, 5  ;;  %v6119_v33 = vshrl.u32 %v5812_v12, 16 }
 0x27f   : > { %v5622_v11 = vsel %vm15767_vm12, %v5614_v16, %v5621_v5  ;;  %v5788_v38 = vsel %vm15773_vm13, %v5623_v60, %v5787_v59  ;;  %v11438_v43 = vcombine.low %v6035_v29, %v6045_v34  ;;  %v5604_v3 = vor.u32 %v5602_v10, %v5601_v17 }
 0x280   : > { %5786 = vst [vmem:[#allocation2 + $0xc4] sm:$0xf] %v5622_v11  ;;  %5789 = vst [vmem:[#allocation2 + $0xc8] sm:$0x1] %v5788_v38  ;;  %v5606_v42 = vrot.slane %v5601_v17, 4  ;;  %v6068_v30 = vrot.slane %v6066_v18, 5  ;;  %v6059_v2 = vsel %vm13543_vm2, %v6054_v55, %v6058_v61  ;;  %v6063_v16 = vor.u32 %v6062_v50, %v6058_v61 }
 0x281   : > { %12737 = vmatmul.mubr.bf16.gmra.mxu1 %v11438_v43  ;;  %v6122_v26 = vshll.u32 %v5812_v12, 16  ;;  %v6132_v48 = vshrl.u32 %v16260_v44, 16  ;;  %v5605_v28 = vsel %vm15767_vm12, %v5597_v53, %v5604_v3  ;;  %v6121_v22 = vrot.slane %v6119_v33, 4  ;;  %v16305_v3 = vld [vmem:[#allocation2 + $0x8c] sm:$0x1] }
 0x282   : > { %v5781_v0 = vsel %vm15773_vm13, %v5606_v42, %v5780_v7  ;;  %v11466_v14 = vcombine.low %v5812_v12, %v16260_v44  ;;  %5779 = vst [vmem:[#allocation2 + $0xb8] sm:$0xf] %v5605_v28  ;;  %v6064_v27 = vrot.slane %v6063_v16, 4  ;;  %v6077_v51 = vor.u32 %v16226_v40, %v16224_v32  ;;  %v16293_v40 = vld [vmem:[#allocation2 + $0xa0] sm:$0xf] }
 0x283   : > { %5782 = vst [vmem:[#allocation2 + $0xbc] sm:$0x1] %v5781_v0  ;;  %v6124_v29 = vrot.slane %v6122_v26, 5  ;;  %v6080_v46 = vshll.u32 %v16211_v6, 16  ;;  %v6086_v25 = vrot.slane %v6084_v8, 4  ;;  %v6090_v52 = vshll.u32 %v16268_v13, 16 }
 0x284   : > { %12793 = vmatmul.mubr.bf16.gmra.mxu0 %v11466_v14  ;;  %v6143_v53 = vshrl.u32 %v5814_v20, 16  ;;  %v6146_v59 = vshll.u32 %v5814_v20, 16  ;;  %v6069_v41 = vsel %vm13543_vm2, %v6064_v27, %v6068_v30  ;;  %v6078_v10 = vrot.slane %v6077_v51, 4  ;;  %v5818_v33 = vld [vmem:[#allocation2 + $0xa8] sm:$0xf] }
 0x285   : > { %v6082_v37 = vrot.slane %v6080_v46, 5  ;;  %v6156_v32 = vshrl.u32 %v16273_v4, 16  ;;  %v11439_v54 = vcombine.low %v6059_v2, %v6069_v41  ;;  %v6092_v5 = vrot.slane %v6090_v52, 5  ;;  %v16313_v26 = vld [vmem:[#allocation2 + $0xac] sm:$0xf] }
 0x286   : > { %v6145_v60 = vrot.slane %v6143_v53, 4  ;;  %v6148_v45 = vrot.slane %v6146_v59, 5  ;;  %v11467_v12 = vcombine.low %v5814_v20, %v16273_v4  ;;  %v6101_v17 = vor.u32 %v16246_v23, %v16242_v57  ;;  %v16320_v59 = vld [vmem:[#allocation2 + $0x98] sm:$0x1] }
 0x287   : > { %v6083_v8 = vsel %vm13543_vm2, %v6078_v10, %v6082_v37  ;;  %v6087_v50 = vor.u32 %v6086_v25, %v6082_v37  ;;  %12740 = vmatprep.mubr.bf16.mxu1 %v11439_v54  ;;  %v6104_v34 = vshll.u32 %v16238_v62, 16  ;;  %v6110_v55 = vrot.slane %v6108_v1, 4  ;;  %v5820_v54 = vld [vmem:[#allocation2 + $0xb4] sm:$0xf] }
 0x288   : > { %v6114_v18 = vshll.u32 %v16285_v36, 16  ;;  %v6167_v11 = vshrl.u32 %v5816_v15, 16  ;;  %12796 = vmatprep.mubr.bf16.mxu0 %v11467_v12  ;;  %v6102_v7 = vrot.slane %v6101_v17, 4  ;;  %v6170_v43 = vshll.u32 %v5816_v15, 16 }
 0x289   : > { %v6088_v38 = vrot.slane %v6087_v50, 4  ;;  %v6180_v61 = vshrl.u32 %v16293_v40, 16  ;;  %v6106_v42 = vrot.slane %v6104_v34, 5  ;;  %v11468_v23 = vcombine.low %v5816_v15, %v16293_v40  ;;  %v16327_v17 = vld [vmem:[#allocation2 + $0xb8] sm:$0xf] }
 0x28a   : > { %v6116_v30 = vrot.slane %v6114_v18, 5  ;;  %v16307_v57 = vrot.slane %v6167_v11, 4  ;;  %v6172_v20 = vrot.slane %v6170_v43, 5  ;;  %v6125_v2 = vor.u32 %v6124_v29, %v6121_v22 }
 0x28b   : > { %v6093_v1 = vsel %vm13543_vm2, %v6088_v38, %v6092_v5  ;;  %v6128_v16 = vshll.u32 %v16260_v44, 16  ;;  %v6107_v0 = vsel %vm13543_vm2, %v6102_v7, %v6106_v42  ;;  %v6111_v14 = vor.u32 %v6110_v55, %v6106_v42 }
 0x28c   : > { %v11440_v28 = vcombine.low %v6083_v8, %v6093_v1  ;;  %12797 = vmatmul.mubr.bf16.gmra.mxu0 %v11468_v23  ;;  %v6134_v27 = vrot.slane %v6132_v48, 4  ;;  %v6126_v51 = vrot.slane %v6125_v2, 4  ;;  %v6138_v15 = vshll.u32 %v16305_v3, 16  ;;  %v16336_v1 = vld [vmem:[#allocation2 + $0xb0] sm:$0x1] }
 0x28d   : > { %v6130_v46 = vrot.slane %v6128_v16, 5  ;;  %v6191_v25 = vshrl.u32 %v5818_v33, 16  ;;  %v6112_v52 = vrot.slane %v6111_v14, 4  ;;  %v6194_v53 = vshll.u32 %v5818_v33, 16 }
 0x28e   : > { %12741 = vmatmul.mubr.bf16.gmra.mxu1 %v11440_v28  ;;  %v6204_v22 = vshrl.u32 %v16313_v26, 16  ;;  %v11469_v29 = vcombine.low %v5818_v33, %v16313_v26  ;;  %v6140_v37 = vrot.slane %v6138_v15, 5  ;;  %v6149_v50 = vor.u32 %v6148_v45, %v6145_v60  ;;  %v16334_v33 = vld [vmem:[#allocation2 + $0xa4] sm:$0x1] }
 0x28f   : > { %v6131_v41 = vsel %vm13543_vm2, %v6126_v51, %v6130_v46  ;;  %v6135_v10 = vor.u32 %v6134_v27, %v6130_v46  ;;  %v6193_v48 = vrot.slane %v6191_v25, 4  ;;  %v6117_v5 = vsel %vm13543_vm2, %v6112_v52, %v6116_v30 }
 0x290   : > { %v6196_v8 = vrot.slane %v6194_v53, 5  ;;  %12800 = vmatprep.mubr.bf16.mxu0 %v11469_v29  ;;  %v6152_v12 = vshll.u32 %v16273_v4, 16  ;;  %v11441_v34 = vcombine.low %v6107_v0, %v6117_v5  ;;  %v6158_v18 = vrot.slane %v6156_v32, 4  ;;  %v13316_v0 = vld [vmem:[#allocation2 + $0xc] sm:$0xff]  }
 0x291   : > { %v6136_v55 = vrot.slane %v6135_v10, 4  ;;  %v6162_v11 = vshll.u32 %v16320_v59, 16  ;;  %v6150_v38 = vrot.slane %v6149_v50, 4  ;;  %v6215_v43 = vshrl.u32 %v5820_v54, 16  ;;  %v16347_v50 = vld [vmem:[#allocation2 + $0xbc] sm:$0x1] }
 0x292   : > { %v6154_v7 = vrot.slane %v6152_v12, 5  ;;  %v6218_v42 = vshll.u32 %v5820_v54, 16  ;;  %12744 = vmatprep.mubr.bf16.mxu1 %v11441_v34  ;;  %v6228_v60 = vshrl.u32 %v16327_v17, 16  ;;  %v11470_v45 = vcombine.low %v5820_v54, %v16327_v17  ;;  %v6833_v54 = vld [vmem:[#allocation2] sm:$0xe] }
 0x293   : > { %v6141_v30 = vsel %vm13543_vm2, %v6136_v55, %v6140_v37  ;;  %v6164_v23 = vrot.slane %v6162_v11, 5  ;;  %v6217_v28 = vrot.slane %v6215_v43, 4  ;;  %v6173_v27 = vor.u32 %v6172_v20, %v16307_v57  ;;  %v13318_v43 = vld [vmem:[#allocation2 + $0x18] sm:$0xff]  }
 0x294   : > { %v11442_v32 = vcombine.low %v6131_v41, %v6141_v30  ;;  %v6155_v2 = vsel %vm13543_vm2, %v6150_v38, %v6154_v7  ;;  %v6159_v16 = vor.u32 %v6158_v18, %v6154_v7  ;;  %v6220_v14 = vrot.slane %v6218_v42, 5  ;;  %12801 = vmatmul.mubr.bf16.gmra.mxu0 %v11470_v45  ;;  %v6834_v38 = vld [vmem:[#allocation2 + $0xc] sm:$0xe] }
 0x295   : > { %v6176_v51 = vshll.u32 %v16293_v40, 16  ;;  %v6182_v46 = vrot.slane %v6180_v61, 4  ;;  %v6186_v25 = vshll.u32 %v16334_v33, 16  ;;  %12868 = vmatprep.mubr.bf16.mxu0 %v13316_v0  ;;  %v6197_v52 = vor.u32 %v6196_v8, %v6193_v48  ;;  %v13400_v0 = vld [vmem:[#allocation2 + $0x4] sm:$0xf] }
 0x296   : > { %12745 = vmatmul.mubr.bf16.gmra.mxu1 %v11442_v32  ;;  %v6160_v15 = vrot.slane %v6159_v16, 4  ;;  %v6200_v53 = vshll.u32 %v16313_v26, 16  ;;  %v6174_v29 = vrot.slane %v6173_v27, 4  ;;  %v6206_v10 = vrot.slane %v6204_v22, 4  ;;  %v13320_v16 = vld [vmem:[#allocation2 + $0x24] sm:$0xff]  }
 0x297   : > { %v6178_v41 = vrot.slane %v6176_v51, 5  ;;  %v6210_v37 = vshll.u32 %v16336_v1, 16  ;;  %v6188_v20 = vrot.slane %v6186_v25, 5  ;;  %v6198_v5 = vrot.slane %v6197_v52, 4  ;;  %v6835_v25 = vld [vmem:[#allocation2 + $0x18] sm:$0xe] }
 0x298   : > { %v6165_v57 = vsel %vm13543_vm2, %v6160_v15, %v6164_v23  ;;  %v6202_v61 = vrot.slane %v6200_v53, 5  ;;  %v6221_v18 = vor.u32 %v6220_v14, %v6217_v28  ;;  %v6224_v11 = vshll.u32 %v16327_v17, 16  ;;  %v13334_v28 = vld [vmem:[%s18360_s4 + $0x170] sm:$0xff]  }
 0x299   : > { %v11443_v12 = vcombine.low %v6155_v2, %v6165_v57  ;;  %v6179_v48 = vsel %vm13543_vm2, %v6174_v29, %v6178_v41  ;;  %v6183_v8 = vor.u32 %v6182_v46, %v6178_v41  ;;  %v6212_v34 = vrot.slane %v6210_v37, 5  ;;  %v13401_v46 = vld [vmem:[#allocation2 + $0x8] sm:$0x1] }
 0x29a   : > { %v6203_v22 = vsel %vm13543_vm2, %v6198_v5, %v6202_v61  ;;  %v6207_v55 = vor.u32 %v6206_v10, %v6202_v61  ;;  %v6230_v42 = vrot.slane %v6228_v60, 4  ;;  %v6234_v30 = vshll.u32 %v16347_v50, 16  ;;  %v6836_v61 = vld [vmem:[#allocation2 + $0x24] sm:$0xe] }
 0x29b   : > { %12748 = vmatprep.mubr.bf16.mxu1 %v11443_v12  ;;  %v6184_v7 = vrot.slane %v6183_v8, 4  ;;  %v11479_v23 = vrot.slane %v6833_v54, 9  ;;  %v6222_v32 = vrot.slane %v6221_v18, 4  ;;  %v6226_v2 = vrot.slane %v6224_v11, 5 }
 0x29c   : > { %v6208_v45 = vrot.slane %v6207_v55, 4  ;;  %v6883_v27 = vrot.slane %v13400_v0, 5  ;;  %12869 = vmatmul.mubr.bf16.vlgmr.msra.gmra.mxu0 %v13318_v43  ;;  %v6236_v51 = vrot.slane %v6234_v30, 5  ;;  %v6886_v60 = vrot.slane %v13401_v46, 5  ;;  %v13404_v55 = vld [vmem:[#allocation2 + $0x1c] sm:$0xf] }
 0x29d   : > { %v6189_v14 = vsel %vm13543_vm2, %v6184_v7, %v6188_v20  ;;  %v11480_v15 = vrot.slane %v6834_v38, 9  ;;  %v6227_v29 = vsel %vm13543_vm2, %v6222_v32, %v6226_v2  ;;  %v6231_v41 = vor.u32 %v6230_v42, %v6226_v2  ;;  %12872 = vmatprep.mubr.bf16.mxu0 %v13320_v16  ;;  %v13402_v20 = vld [vmem:[#allocation2 + $0x10] sm:$0xf]  ;;  %12949 = vmatpush3.bf16.msra.mxu0 %v16015_v24  ;;  %v13405_v7 = vld [vmem:[#allocation2 + $0x20] sm:$0x1] }
 0x29e   : > { %v11444_v52 = vcombine.low %v6179_v48, %v6189_v14  ;;  %v6213_v53 = vsel %vm13543_vm2, %v6208_v45, %v6212_v34  ;;  %v16366_v54 = vsel %vm13895_vm5, %v11479_v23, %v6883_v27  ;;  %v6885_v57 = vrot.slane %v6883_v27, 4  ;;  %v13403_v48 = vld [vmem:[#allocation2 + $0x14] sm:$0x1]  ;;  %12950 = vmatprep.subr.bf16.mxu0 %v13334_v28  ;;  %v6837_v42 = vld [vmem:[#allocation2 + $0x30] sm:$0xe] }
 0x29f   : > { %v11445_v10 = vcombine.low %v6203_v22, %v6213_v53  ;;  %v6890_v5 = vrot.slane %v13402_v20, 5  ;;  %v6232_v12 = vrot.slane %v6231_v41, 4  ;;  %v6893_v8 = vrot.slane %v13403_v48, 5  ;;  %v13336_v22 = vld [vmem:[%s18360_s4 + $0x168] sm:$0xff]   ;;  %v13321_v16 = vld [vmem:[#allocation2 + $0x30] sm:$0xff]   ;;  %v13339_v41 = vld [vmem:[%s18360_s4 + $0x160] sm:$0xff]  }
 0x2a0   : > { %12749 = vmatmul.mubr.bf16.gmra.mxu1 %v11444_v52  ;;  %v11481_v34 = vrot.slane %v6835_v25, 9  ;;  %v6897_v18 = vrot.slane %v13404_v55, 5  ;;  %v6887_v11 = vsel %vm13895_vm5, %v6885_v57, %v6886_v60  ;;  %v6900_v43 = vrot.slane %v13405_v7, 5  ;;  %v13406_v14 = vld [vmem:[#allocation2 + $0x28] sm:$0xf] }
 0x2a1   : > { %12752 = vmatprep.mubr.bf16.mxu1 %v11445_v10  ;;  %v16376_v38 = vsel %vm13895_vm5, %v11480_v15, %v6890_v5  ;;  %v6892_v24 = vrot.slane %v6890_v5, 4  ;;  %v6237_v30 = vsel %vm13543_vm2, %v6232_v12, %v6236_v51  ;;  %v11511_v23 = vcombine.low %v16366_v54, %v6887_v11  ;;  %v6838_v60 = vld [vmem:[#allocation2 + $0x3c] sm:$0xe]  ;;  %12951 = vmatpush3.bf16.msra.mxu0 %v13334_v28  ;;  %v13407_v57 = vld [vmem:[#allocation2 + $0x34] sm:$0xf] }
 0x2a2   : > { %v16383_v45 = vsel %vm13895_vm5, %v11481_v34, %v6897_v18  ;;  %v6899_v32 = vrot.slane %v6897_v18, 4  ;;  %v11446_v2 = vcombine.low %v6227_v29, %v6237_v30  ;;  %v11482_v27 = vrot.slane %v6836_v61, 9  ;;  %v13322_v15 = vld [vmem:[#allocation2 + $0x3c] sm:$0xff]   ;;  %v6839_v29 = vld [vmem:[#allocation2 + $0x48] sm:$0xe]  ;;  %12952 = vmatprep.subr.bf16.mxu0 %v13336_v22 }
 0x2a3   : > { %v16387_v0 = vsel %vm13895_vm5, %v6892_v24, %v6893_v8  ;;  %v6904_v46 = vrot.slane %v13406_v14, 5  ;;  %v6907_v52 = vrot.slane %v16056_v39, 5  ;;  %v11483_v53 = vrot.slane %v6837_v42, 9  ;;  %v13408_v61 = vld [vmem:[#allocation2 + $0x40] sm:$0xf] }
 0x2a4   : > { %v11512_v51 = vcombine.low %v16376_v38, %v16387_v0  ;;  %v16393_v25 = vsel %vm13895_vm5, %v6899_v32, %v6900_v43  ;;  %12873 = vmatmul.mubr.bf16.gmra.mxu0 %v13321_v16  ;;  %v6911_v20 = vrot.slane %v13407_v57, 5  ;;  %v6914_v39 = vrot.slane %v16100_v63, 5  ;;  %v6840_v8 = vld [vmem:[#allocation2 + $0x54] sm:$0xe]  ;;  %v13341_v43 = vld [vmem:[%s18360_s4 + $0x158] sm:$0xff]  }
 0x2a5   : > { %v11513_v28 = vcombine.low %v16383_v45, %v16393_v25  ;;  %v16403_v10 = vsel %vm13895_vm5, %v11482_v27, %v6904_v46  ;;  %v6906_v54 = vrot.slane %v6904_v46, 4  ;;  %12876 = vmatprep.mubr.bf16.mxu0 %v13322_v15  ;;  %v11484_v5 = vrot.slane %v6838_v60, 9  ;;  %12953 = vmatpush3.bf16.msra.mxu0 %v13336_v22  ;;  %v6842_v14 = vld [vmem:[#allocation2 + $0x6c] sm:$0xe]  ;;  %v13325_v60 = vld [vmem:[#allocation2 + $0x54] sm:$0xff]  }
 0x2a6   : > { %v6918_v12 = vrot.slane %v13408_v61, 5  ;;  %v6921_v48 = vrot.slane %v16164_v21, 5  ;;  %v16413_v55 = vsel %vm13895_vm5, %v11483_v53, %v6911_v20  ;;  %v6913_v18 = vrot.slane %v6911_v20, 4  ;;  %12954 = vmatprep.subr.bf16.mxu0 %v13339_v41  ;;  %v13324_v46 = vld [vmem:[#allocation2 + $0x48] sm:$0xff]   ;;  %v6843_v20 = vld [vmem:[#allocation2 + $0x78] sm:$0xe] }
 0x2a7   : > { %v16409_v34 = vsel %vm13895_vm5, %v6906_v54, %v6907_v52  ;;  %v11485_v11 = vrot.slane %v6839_v29, 9  ;;  %v6925_v7 = vrot.slane %v16081_v31, 5  ;;  %v6928_v42 = vrot.slane %v16194_v56, 5  ;;  %v13329_v45 = vld [vmem:[%s18360_s4 + $0x128] sm:$0xff]  }
 0x2a8   : > { %12753 = vmatmul.mubr.bf16.gmra.mxu1 %v11446_v2  ;;  %v11514_v63 = vcombine.low %v16403_v10, %v16409_v34  ;;  %v16419_v24 = vsel %vm13895_vm5, %v11484_v5, %v6918_v12  ;;  %v6920_v21 = vrot.slane %v6918_v12, 4  ;;  %v16427_v22 = vsel %vm13895_vm5, %v6913_v18, %v6914_v39  ;;  %v6841_v2 = vld [vmem:[#allocation2 + $0x60] sm:$0xe]  ;;  %v13344_v39 = vld [vmem:[%s18360_s4 + $0x150] sm:$0xff]  }
 0x2a9   : > { %12820 = vmatprep.mubr.bf16.mxu1 %v11511_v23  ;;  %v11486_v30 = vrot.slane %v6840_v8, 9  ;;  %v6932_v32 = vrot.slane %v16136_v9, 5  ;;  %v11515_v16 = vcombine.low %v16413_v55, %v16427_v22  ;;  %v16439_v23 = vsel %vm13895_vm5, %v11485_v11, %v6925_v7  ;;  %12955 = vmatpush3.bf16.msra.mxu0 %v13339_v41 }
 0x2aa   : > { %v16435_v31 = vsel %vm13895_vm5, %v6920_v21, %v6921_v48  ;;  %v6927_v27 = vrot.slane %v6925_v7, 4  ;;  %v6935_v52 = vrot.slane %v16221_v58, 5  ;;  %v11487_v29 = vrot.slane %v6841_v2, 9  ;;  %12956 = vmatprep.subr.bf16.mxu0 %v13341_v43  ;;  %v6845_v2 = vld [vmem:[#allocation2 + $0x90] sm:$0xe] }
 0x2ab   : > { %v11516_v56 = vcombine.low %v16419_v24, %v16435_v31  ;;  %v16445_v9 = vsel %vm13895_vm5, %v11486_v30, %v6932_v32  ;;  %v6934_v15 = vrot.slane %v6932_v32, 4  ;;  %v6939_v54 = vrot.slane %v16186_v49, 5  ;;  %v6844_v49 = vld [vmem:[#allocation2 + $0x84] sm:$0xe] }
 0x2ac   : > { %v16450_v53 = vsel %vm13895_vm5, %v6927_v27, %v6928_v42  ;;  %v6942_v57 = vrot.slane %v16250_v47, 5  ;;  %12877 = vmatmul.mubr.bf16.gmra.mxu0 %v13324_v46  ;;  %v11488_v5 = vrot.slane %v6842_v14, 9  ;;  %v6946_v61 = vrot.slane %v16211_v6, 5  ;;  %v13326_v47 = vld [vmem:[%s18360_s4 + $0x130] sm:$0xff]   ;;  %v13327_v46 = vld [vmem:[#allocation2 + $0x60] sm:$0xff]  }
 0x2ad   : > { %v11517_v58 = vcombine.low %v16439_v23, %v16450_v53  ;;  %v16461_v41 = vsel %vm13895_vm5, %v6934_v15, %v6935_v52  ;;  %12880 = vmatprep.mubr.bf16.mxu0 %v13325_v60  ;;  %v16471_v48 = vsel %vm13895_vm5, %v11487_v29, %v6939_v54  ;;  %v6941_v8 = vrot.slane %v6939_v54, 4  ;;  %12957 = vmatpush3.bf16.msra.mxu0 %v13341_v43  ;;  %v8455_v43 = vld [vmem:[#allocation2 + $0xc] sm:$0xe]  ;;  %v16515_v14 = vld [vmem:[#allocation2 + $0x10] sm:$0xf] }
 0x2ae   : > { %v11518_v12 = vcombine.low %v16445_v9, %v16461_v41  ;;  %v6949_v18 = vrot.slane %v16268_v13, 5  ;;  %v16476_v11 = vsel %vm13895_vm5, %v11488_v5, %v6946_v61  ;;  %v6948_v6 = vrot.slane %v6946_v61, 4  ;;  %12958 = vmatprep.subr.bf16.mxu0 %v13344_v39  ;;  %v16523_v54 = vld [vmem:[#allocation2 + $0x14] sm:$0x1] }
 0x2af   : > { %v11489_v21 = vrot.slane %v6843_v20, 9  ;;  %v6953_v7 = vrot.slane %v16238_v62, 5  ;;  %v16484_v42 = vsel %vm13895_vm5, %v6941_v8, %v6942_v57  ;;  %v6956_v30 = vrot.slane %v16285_v36, 5  ;;  %v13346_v62 = vld [vmem:[%s18360_s4 + $0x148] sm:$0xff]  }
 0x2b0   : > { %12821 = vmatmul.mubr.bf16.vlgmr.msra.gmra.mxu1 %v11512_v51  ;;  %v11490_v13 = vrot.slane %v6844_v49, 9  ;;  %v6960_v32 = vrot.slane %v16260_v44, 5  ;;  %v11519_v38 = vcombine.low %v16471_v48, %v16484_v42  ;;  %v16499_v36 = vsel %vm13895_vm5, %v6948_v6, %v6949_v18  ;;  %v6846_v51 = vld [vmem:[#allocation2 + $0x9c] sm:$0xe]  ;;  %v13328_v57 = vld [vmem:[#allocation2 + $0x6c] sm:$0xff]  }
 0x2b1   : > { %12824 = vmatprep.mubr.bf16.mxu1 %v11513_v28  ;;  %12901 = vmatpush3.bf16.msra.mxu1 %v16162_v35  ;;  %v16503_v44 = vsel %vm13895_vm5, %v11489_v21, %v6953_v7  ;;  %v6955_v0 = vrot.slane %v6953_v7, 4  ;;  %v11520_v35 = vcombine.low %v16476_v11, %v16499_v36  ;;  %v6963_v27 = vrot.slane %v16305_v3, 5  ;;  %v6847_v49 = vld [vmem:[#allocation2 + $0xa8] sm:$0xe]  ;;  %v8456_v6 = vld [vmem:[#allocation2 + $0x18] sm:$0xe] }
 0x2b2   : > { %12902 = vmatprep.subr.bf16.mxu1 %v13326_v47  ;;  %v16512_v25 = vsel %vm13895_vm5, %v11490_v13, %v6960_v32  ;;  %v6962_v28 = vrot.slane %v6960_v32, 4  ;;  %v11491_v15 = vrot.slane %v6845_v2, 9  ;;  %v6967_v52 = vrot.slane %v16273_v4, 5  ;;  %12959 = vmatpush3.bf16.msra.mxu0 %v13344_v39  ;;  %v13348_v4 = vld [vmem:[%s18360_s4 + $0x140] sm:$0xff]   ;;  %v16550_v13 = vld [vmem:[#allocation2 + $0x1c] sm:$0xf] }
 0x2b3   : > { %v16519_v60 = vsel %vm13895_vm5, %v6955_v0, %v6956_v30  ;;  %v6970_v29 = vrot.slane %v16320_v59, 5  ;;  %12960 = vmatprep.subr.bf16.mxu0 %v13346_v62  ;;  %v11492_v5 = vrot.slane %v6846_v51, 9  ;;  %v6974_v61 = vrot.slane %v16293_v40, 5  ;;  %v13333_v40 = vld [vmem:[%s18360_s4 + $0x120] sm:$0xff]   ;;  %v16706_v48 = vld [vmem:[%s18360_s4 + $0x1b8] sm:$0xff]  }
 0x2b4   : > { %v11521_v20 = vcombine.low %v16503_v44, %v16519_v60  ;;  %v16529_v3 = vsel %vm13895_vm5, %v6962_v28, %v6963_v27  ;;  %12881 = vmatmul.mubr.bf16.gmra.mxu0 %v13327_v46  ;;  %v16539_v39 = vsel %vm13895_vm5, %v11491_v15, %v6967_v52  ;;  %v6969_v8 = vrot.slane %v6967_v52, 4  ;;  %v16558_v51 = vld [vmem:[#allocation2 + $0x20] sm:$0x1]  ;;  %v16576_v46 = vld [vmem:[%s18360_s4 + $0x1f8] sm:$0xff]   ;;  %v8457_v52 = vld [vmem:[#allocation2 + $0x24] sm:$0xe] }
 0x2b5   : > { %12903 = vmatpush3.bf16.msra.mxu1 %v13326_v47  ;;  %v11522_v59 = vcombine.low %v16512_v25, %v16529_v3  ;;  %v6977_v18 = vrot.slane %v16334_v33, 5  ;;  %12884 = vmatprep.mubr.bf16.mxu0 %v13328_v57  ;;  %v16547_v47 = vsel %vm13895_vm5, %v11492_v5, %v6974_v61  ;;  %v6976_v21 = vrot.slane %v6974_v61, 4  ;;  %v13338_v57 = vld [vmem:[%s18360_s4 + $0x118] sm:$0xff]   ;;  %v16597_v5 = vld [vmem:[#allocation2 + $0x28] sm:$0xf] }
 0x2b6   : > { %12904 = vmatprep.subr.bf16.mxu1 %v13329_v45  ;;  %v11615_v7 = vrot.slane %v8455_v43, 9  ;;  %v8521_v30 = vrot.slane %v16515_v14, 5  ;;  %v16554_v33 = vsel %vm13895_vm5, %v6969_v8, %v6970_v29  ;;  %12961 = vmatpush3.bf16.msra.mxu0 %v13346_v62  ;;  %v8524_v32 = vrot.slane %v16523_v54, 5  ;;  %v7701_v29 = vld [vmem:[#allocation2 + $0xc] sm:$0xf]  ;;  %v13330_v61 = vld [vmem:[#allocation2 + $0x78] sm:$0xff]  }
 0x2b7   : > { %v11493_v2 = vrot.slane %v6847_v49, 9  ;;  %v6981_v0 = vrot.slane %v16313_v26, 5  ;;  %v16567_v28 = vsel %vm13895_vm5, %v6976_v21, %v6977_v18  ;;  %12962 = vmatprep.subr.bf16.mxu0 %v13348_v4  ;;  %v6848_v26 = vld [vmem:[#allocation2 + $0xb4] sm:$0xe]  ;;  %v6984_v15 = vrot.slane %v16336_v1, 5 }
 0x2b8   : > { %12825 = vmatmul.mubr.bf16.gmra.mxu1 %v11514_v63  ;;  %v16571_v62 = vsel %vm13895_vm5, %v11615_v7, %v8521_v30  ;;  %v8523_v27 = vrot.slane %v8521_v30, 4  ;;  %v11616_v22 = vrot.slane %v8456_v6, 9  ;;  %v11494_v8 = vrot.slane %v6848_v26, 9  ;;  %v16606_v21 = vld [vmem:[#allocation2 + $0x2c] sm:$0x1]  ;;  %v13332_v6 = vld [vmem:[#allocation2 + $0x84] sm:$0xff]  }
 0x2b9   : > { %12828 = vmatprep.mubr.bf16.mxu1 %v11515_v16  ;;  %12905 = vmatpush3.bf16.msra.mxu1 %v13329_v45  ;;  %v16585_v34 = vsel %vm13895_vm5, %v11493_v2, %v6981_v0  ;;  %v6983_v63 = vrot.slane %v6981_v0, 4  ;;  %v8528_v16 = vrot.slane %v16550_v13, 5  ;;  %v8531_v45 = vrot.slane %v16558_v51, 5  ;;  %v13343_v26 = vld [vmem:[%s18360_s4 + $0x110] sm:$0xff]   ;;  %v16708_v42 = vld [vmem:[#allocation2 + $0x4c] sm:$0xf] }
 0x2ba   : > { %12906 = vmatprep.subr.bf16.mxu1 %v13333_v40  ;;  %v16593_v55 = vsel %vm13895_vm5, %v8523_v27, %v8524_v32  ;;  %12963 = vmatpush3.bf16.msra.mxu0 %v13348_v4  ;;  %v6988_v18 = vrot.slane %v16327_v17, 5  ;;  %v6991_v2 = vrot.slane %v16347_v50, 5  ;;  %v11617_v0 = vrot.slane %v8457_v52, 9  ;;  %v16742_v11 = vld [vmem:[#allocation2 + $0x58] sm:$0xf] }
 0x2bb   : > { %v11647_v1 = vcombine.low %v16571_v62, %v16593_v55  ;;  %v16603_v49 = vsel %vm13895_vm5, %v6983_v63, %v6984_v15  ;;  %v16612_v30 = vsel %vm13895_vm5, %v11616_v22, %v8528_v16  ;;  %v8530_v32 = vrot.slane %v8528_v16, 4  ;;  %13044 = vmatprep.subr.bf16.mxu0 %v16576_v46  ;;  %v8458_v22 = vld [vmem:[#allocation2 + $0x30] sm:$0xe] }
 0x2bc   : > { %12885 = vmatmul.mubr.bf16.gmra.mxu0 %v13330_v61  ;;  %v16618_v17 = vsel %vm13895_vm5, %v11494_v8, %v6988_v18  ;;  %v6990_v4 = vrot.slane %v6988_v18, 4  ;;  %v8535_v27 = vrot.slane %v16597_v5, 5  ;;  %v7750_v63 = vshrl.u32 %v7701_v29, 16  ;;  %v16639_v18 = vld [vmem:[#allocation2 + $0x34] sm:$0xf] }
 0x2bd   : > { %12907 = vmatpush3.bf16.msra.mxu1 %v13333_v40  ;;  %12888 = vmatprep.mubr.bf16.mxu0 %v13332_v6  ;;  %v16626_v50 = vsel %vm13895_vm5, %v8530_v32, %v8531_v45  ;;  %v8538_v40 = vrot.slane %v16606_v21, 5  ;;  %v7753_v15 = vshll.u32 %v7701_v29, 16  ;;  %v7704_v45 = vld [vmem:[#allocation2 + $0x18] sm:$0xf]  ;;  %v7763_v24 = vshrl.u32 %v16515_v14, 16 }
 0x2be   : > { %12908 = vmatprep.subr.bf16.mxu1 %v13338_v57  ;;  %v16633_v16 = vsel %vm13895_vm5, %v6990_v4, %v6991_v2  ;;  %v16637_v61 = vsel %vm13895_vm5, %v11617_v0, %v8535_v27  ;;  %v8537_v8 = vrot.slane %v8535_v27, 4  ;;  %v7752_v6 = vrot.slane %v7750_v63, 4  ;;  %v16647_v4 = vld [vmem:[#allocation2 + $0x38] sm:$0x1]  ;;  %v13347_v27 = vld [vmem:[%s18360_s4 + $0x108] sm:$0xff]  }
 0x2bf   : > { %v7755_v32 = vrot.slane %v7753_v15, 5  ;;  %v7759_v2 = vshll.u32 %v16515_v14, 16  ;;  %v7769_v31 = vshll.u32 %v16523_v54, 16  ;;  %v8545_v14 = vrot.slane %v16647_v4, 5  ;;  %v8459_v54 = vld [vmem:[#allocation2 + $0x3c] sm:$0xe] }
 0x2c0   : > { %12829 = vmatmul.mubr.bf16.gmra.mxu1 %v11516_v56  ;;  %v16654_v0 = vsel %vm13895_vm5, %v8537_v8, %v8538_v40  ;;  %v11618_v56 = vrot.slane %v8458_v22, 9  ;;  %v7765_v40 = vrot.slane %v7763_v24, 4  ;;  %v7774_v8 = vshrl.u32 %v7704_v45, 16  ;;  %v13337_v22 = vld [vmem:[#allocation2 + $0x9c] sm:$0xff]   ;;  %v7707_v63 = vld [vmem:[#allocation2 + $0x24] sm:$0xf] }
 0x2c1   : > { %12832 = vmatprep.mubr.bf16.mxu1 %v11517_v58  ;;  %12909 = vmatpush3.bf16.msra.mxu1 %v13338_v57  ;;  %v7756_v23 = vor.u32 %v7755_v32, %v7752_v6  ;;  %v7761_v53 = vrot.slane %v7759_v2, 5  ;;  %v8542_v58 = vrot.slane %v16639_v18, 5  ;;  %v13335_v57 = vld [vmem:[#allocation2 + $0x90] sm:$0xff]   ;;  %v7771_v15 = vrot.slane %v7769_v31, 5  ;;  %v16671_v31 = vld [vmem:[#allocation2 + $0x40] sm:$0xf] }
 0x2c2   : > { %12910 = vmatprep.subr.bf16.mxu1 %v13343_v26  ;;  %v7777_v52 = vshll.u32 %v7704_v45, 16  ;;  %v7776_v32 = vrot.slane %v7774_v8, 4  ;;  %v7783_v2 = vshll.u32 %v16550_v13, 16  ;;  %v7787_v24 = vshrl.u32 %v16550_v13, 16 }
 0x2c3   : > { %v7757_v29 = vrot.slane %v7756_v23, 4  ;;  %v16667_v7 = vsel %vm13895_vm5, %v11618_v56, %v8542_v58  ;;  %v8544_v10 = vrot.slane %v8542_v58, 4  ;;  %v7766_v6 = vor.u32 %v7765_v40, %v7761_v53  ;;  %v13349_v56 = vld [vmem:[%s18360_s4 + $0x100] sm:$0xff]  }
 0x2c4   : > { %12889 = vmatmul.mubr.bf16.gmra.mxu0 %v13335_v57  ;;  %v7779_v23 = vrot.slane %v7777_v52, 5  ;;  %v7793_v58 = vshll.u32 %v16558_v51, 16  ;;  %v16683_v57 = vld [vmem:[#allocation2 + $0x44] sm:$0x1]  ;;  %v7785_v8 = vrot.slane %v7783_v2, 5  ;;  %v11619_v43 = vrot.slane %v8459_v54, 9 }
 0x2c5   : > { %12911 = vmatpush3.bf16.msra.mxu1 %v13343_v26  ;;  %12892 = vmatprep.mubr.bf16.mxu0 %v13337_v22  ;;  %v7762_v45 = vsel %vm13543_vm2, %v7757_v29, %v7761_v53  ;;  %v16680_v26 = vsel %vm13895_vm5, %v8544_v10, %v8545_v14  ;;  %v7767_v13 = vrot.slane %v7766_v6, 4  ;;  %v7789_v22 = vrot.slane %v7787_v24, 4 }
 0x2c6   : > { %12912 = vmatprep.subr.bf16.mxu1 %v13347_v27  ;;  %v11650_v40 = vcombine.low %v16667_v7, %v16680_v26  ;;  %v7780_v29 = vor.u32 %v7779_v23, %v7776_v32  ;;  %v7795_v53 = vrot.slane %v7793_v58, 5  ;;  %v8549_v10 = vrot.slane %v16671_v31, 5  ;;  %v13342_v23 = vld [vmem:[#allocation2 + $0xb4] sm:$0xff]  }
 0x2c7   : > { %v7772_v51 = vsel %vm13543_vm2, %v7767_v13, %v7771_v15  ;;  %v7790_v52 = vor.u32 %v7789_v22, %v7785_v8  ;;  %v8552_v14 = vrot.slane %v16683_v57, 5  ;;  %v7798_v6 = vshrl.u32 %v7707_v63, 16  ;;  %v13340_v15 = vld [vmem:[#allocation2 + $0xa8] sm:$0xff]  }
 0x2c8   : > { %12833 = vmatmul.mubr.bf16.gmra.mxu1 %v11518_v12  ;;  %v16697_v9 = vcombine.low %v7762_v45, %v7772_v51  ;;  %v7781_v41 = vrot.slane %v7780_v29, 4  ;;  %v16701_v12 = vsel %vm13895_vm5, %v11619_v43, %v8549_v10  ;;  %v8551_v54 = vrot.slane %v8549_v10, 4  ;;  %v16719_v29 = vld [vmem:[#allocation2 + $0x50] sm:$0x1] }
 0x2c9   : > { %12836 = vmatprep.mubr.bf16.mxu1 %v11519_v38  ;;  %12913 = vmatpush3.bf16.msra.mxu1 %v13347_v27  ;;  %v8460_v38 = vld [vmem:[#allocation2 + $0x48] sm:$0xe]  ;;  %v7710_v27 = vld [vmem:[#allocation2 + $0x30] sm:$0xf]  ;;  %v7791_v32 = vrot.slane %v7790_v52, 4  ;;  %v7800_v2 = vrot.slane %v7798_v6, 4 }
 0x2ca   : > { %12914 = vmatprep.subr.bf16.mxu1 %v13349_v56  ;;  %v7801_v24 = vshll.u32 %v7707_v63, 16  ;;  %v7807_v45 = vshll.u32 %v16597_v5, 16  ;;  %v7786_v43 = vsel %vm13543_vm2, %v7781_v41, %v7785_v8  ;;  %v16715_v58 = vsel %vm13895_vm5, %v8551_v54, %v8552_v14 }
 0x2cb   : > { %v7811_v13 = vshrl.u32 %v16597_v5, 16  ;;  %v7817_v22 = vshll.u32 %v16606_v21, 16  ;;  %v7796_v63 = vsel %vm13543_vm2, %v7791_v32, %v7795_v53  ;;  %v11651_v10 = vcombine.low %v16701_v12, %v16715_v58  ;;  %v13359_v12 = vld [vmem:[%s18360_s4 + $0x1d8] sm:$0xff]  }
 0x2cc   : > { %12893 = vmatmul.mubr.bf16.gmra.mxu0 %v13340_v15  ;;  %v7803_v51 = vrot.slane %v7801_v24, 5  ;;  %v7809_v8 = vrot.slane %v7807_v45, 5  ;;  %v16725_v52 = vcombine.low %v7786_v43, %v7796_v63  ;;  %v11620_v21 = vrot.slane %v8460_v38, 9  ;;  %v8461_v45 = vld [vmem:[#allocation2 + $0x54] sm:$0xe] }
 0x2cd   : > { %12915 = vmatpush3.bf16.msra.mxu1 %v13349_v56  ;;  %12896 = vmatprep.mubr.bf16.mxu0 %v13342_v23  ;;  %v7813_v5 = vrot.slane %v7811_v13, 4  ;;  %v7819_v14 = vrot.slane %v7817_v22, 5  ;;  %v8556_v41 = vrot.slane %v16708_v42, 5  ;;  %v8559_v56 = vrot.slane %v16719_v29, 5  ;;  %v16744_v22 = vld [vmem:[#allocation2 + $0x5c] sm:$0x1] }
 0x2ce   : > { %12996 = vmatprep.subr.bf16.mxu1 %v16706_v48  ;;  %v7804_v6 = vor.u32 %v7803_v51, %v7800_v2  ;;  %v7822_v54 = vshrl.u32 %v7710_v27, 16  ;;  %v7825_v15 = vshll.u32 %v7710_v27, 16  ;;  %v7831_v32 = vshll.u32 %v16639_v18, 16  ;;  %v7713_v51 = vld [vmem:[#allocation2 + $0x3c] sm:$0xf] }
 0x2cf   : > { %v7814_v53 = vor.u32 %v7813_v5, %v7809_v8  ;;  %v7835_v24 = vshrl.u32 %v16639_v18, 16  ;;  %v16740_v2 = vsel %vm13895_vm5, %v11620_v21, %v8556_v41  ;;  %v8558_v23 = vrot.slane %v8556_v41, 4  ;;  %v13345_v18 = vld [vmem:[#allocation2 + $0xc0] sm:$0xff]  }
 0x2d0   : > { %12837 = vmatmul.mubr.bf16.gmra.mxu1 %v11520_v35  ;;  %v7805_v38 = vrot.slane %v7804_v6, 4  ;;  %v7824_v43 = vrot.slane %v7822_v54, 4  ;;  %v7827_v35 = vrot.slane %v7825_v15, 5  ;;  %v7833_v27 = vrot.slane %v7831_v32, 5 }
 0x2d1   : > { %12840 = vmatprep.mubr.bf16.mxu1 %v11521_v20  ;;  %v7815_v36 = vrot.slane %v7814_v53, 4  ;;  %v7837_v13 = vrot.slane %v7835_v24, 4  ;;  %v16750_v60 = vsel %vm13895_vm5, %v8558_v23, %v8559_v56  ;;  %v7841_v20 = vshll.u32 %v16647_v4, 16  ;;  %v7716_v24 = vld [vmem:[#allocation2 + $0x48] sm:$0xf] }
 0x2d2   : > { %v7810_v44 = vsel %vm13543_vm2, %v7805_v38, %v7809_v8  ;;  %v11621_v63 = vrot.slane %v8461_v45, 9  ;;  %v11652_v21 = vcombine.low %v16740_v2, %v16750_v60  ;;  %v7828_v6 = vor.u32 %v7827_v35, %v7824_v43 }
 0x2d3   : > { %v7820_v5 = vsel %vm13543_vm2, %v7815_v36, %v7819_v14  ;;  %v7838_v41 = vor.u32 %v7837_v13, %v7833_v27  ;;  %v7843_v8 = vrot.slane %v7841_v20, 5  ;;  %v8563_v53 = vrot.slane %v16742_v11, 5  ;;  %v8462_v36 = vld [vmem:[#allocation2 + $0x60] sm:$0xe]  ;;  %v16777_v13 = vld [vmem:[#allocation2 + $0x64] sm:$0xf] }
 0x2d4   : > { %12897 = vmatmul.mubr.bf16.gmra.mxu0 %v13345_v18  ;;  %v16757_v54 = vcombine.low %v7810_v44, %v7820_v5  ;;  %v8566_v56 = vrot.slane %v16744_v22, 5  ;;  %v7829_v4 = vrot.slane %v7828_v6, 4  ;;  %v7846_v14 = vshrl.u32 %v7713_v51, 16  ;;  %v16779_v18 = vld [vmem:[#allocation2 + $0x68] sm:$0x1] }
 0x2d5   : > { %12964 = vmatprep.mubr.bf16.mxu0 %v11647_v1  ;;  %v7839_v15 = vrot.slane %v7838_v41, 4  ;;  %v7849_v32 = vshll.u32 %v7713_v51, 16  ;;  %v16766_v45 = vsel %vm13895_vm5, %v11621_v63, %v8563_v53  ;;  %v8565_v38 = vrot.slane %v8563_v53, 4  ;;  %v13355_v41 = vld [vmem:[%s18360_s4 + $0x1f0] sm:$0xff]  }
 0x2d6   : > { %v7855_v23 = vshll.u32 %v16671_v31, 16  ;;  %v7859_v43 = vshrl.u32 %v16671_v31, 16  ;;  %v7834_v62 = vsel %vm13543_vm2, %v7829_v4, %v7833_v27  ;;  %v7848_v1 = vrot.slane %v7846_v14, 4  ;;  %v7719_v14 = vld [vmem:[#allocation2 + $0x54] sm:$0xf] }
 0x2d7   : > { %v7844_v55 = vsel %vm13543_vm2, %v7839_v15, %v7843_v8  ;;  %v7851_v35 = vrot.slane %v7849_v32, 5  ;;  %v18549_v31 = vcombine.low %v16539_v39, %v16554_v33  ;;  %v16788_v25 = vsel %vm13895_vm5, %v8565_v38, %v8566_v56  ;;  %v8463_v15 = vld [vmem:[#allocation2 + $0x6c] sm:$0xe] }
 0x2d8   : > { %12841 = vmatmul.mubr.bf16.gmra.mxu1 %v11522_v59  ;;  %v16784_v44 = vcombine.low %v7834_v62, %v7844_v55  ;;  %v7857_v3 = vrot.slane %v7855_v23, 5  ;;  %v7861_v59 = vrot.slane %v7859_v43, 4  ;;  %v11653_v27 = vcombine.low %v16766_v45, %v16788_v25 }
 0x2d9   : > { %12844 = vmatprep.mubr.bf16.mxu1 %v18549_v31  ;;  %v7852_v20 = vor.u32 %v7851_v35, %v7848_v1  ;;  %v7865_v63 = vshll.u32 %v16683_v57, 16  ;;  %v11622_v51 = vrot.slane %v8462_v36, 9  ;;  %v8570_v6 = vrot.slane %v16777_v13, 5  ;;  %v16806_v36 = vld [vmem:[#allocation2 + $0x70] sm:$0xf] }
 0x2da   : > { %v7862_v5 = vor.u32 %v7861_v59, %v7857_v3  ;;  %v8573_v39 = vrot.slane %v16779_v18, 5  ;;  %v7870_v33 = vshrl.u32 %v7716_v24, 16  ;;  %v7873_v56 = vshll.u32 %v7716_v24, 16 }
 0x2db   : > { %v7853_v8 = vrot.slane %v7852_v20, 4  ;;  %v7867_v53 = vrot.slane %v7865_v63, 5  ;;  %v7879_v4 = vshll.u32 %v16708_v42, 16  ;;  %v18550_v57 = vcombine.low %v16612_v30, %v16626_v50  ;;  %v16814_v50 = vld [vmem:[#allocation2 + $0x74] sm:$0x1] }
 0x2dc   : > { %v7863_v32 = vrot.slane %v7862_v5, 4  ;;  %v16804_v38 = vsel %vm13895_vm5, %v11622_v51, %v8570_v6  ;;  %v8572_v23 = vrot.slane %v8570_v6, 4  ;;  %v7872_v43 = vrot.slane %v7870_v33, 4 }
 0x2dd   : > { %12965 = vmatmul.mubr.bf16.vlgmr.msra.gmra.mxu0 %v18550_v57  ;;  %v18551_v24 = vcombine.low %v16637_v61, %v16654_v0  ;;  %v7858_v62 = vsel %vm13543_vm2, %v7853_v8, %v7857_v3  ;;  %v7875_v55 = vrot.slane %v7873_v56, 5  ;;  %v7881_v1 = vrot.slane %v7879_v4, 5  ;;  %v13356_v3 = vld [vmem:[%s18360_s4 + $0x1e8] sm:$0xff]   ;;  %v13358_v57 = vld [vmem:[%s18360_s4 + $0x1e0] sm:$0xff]  }
 0x2de   : > { %v7883_v30 = vshrl.u32 %v16708_v42, 16  ;;  %13045 = vmatpush3.bf16.msra.mxu0 %v16576_v46  ;;  %v7868_v35 = vsel %vm13543_vm2, %v7863_v32, %v7867_v53  ;;  %v16821_v31 = vsel %vm13895_vm5, %v8572_v23, %v8573_v39  ;;  %v7889_v61 = vshll.u32 %v16719_v29, 16  ;;  %v8464_v53 = vld [vmem:[#allocation2 + $0x78] sm:$0xe] }
 0x2df   : > { %12968 = vmatprep.mubr.bf16.mxu0 %v18551_v24  ;;  %v11623_v0 = vrot.slane %v8463_v15, 9  ;;  %13046 = vmatprep.subr.bf16.mxu0 %v13355_v41  ;;  %v18552_v42 = vcombine.low %v16547_v47, %v16567_v28  ;;  %v16830_v46 = vcombine.low %v7858_v62, %v7868_v35  ;;  %v11654_v59 = vcombine.low %v16804_v38, %v16821_v31  ;;  %v16845_v15 = vld [vmem:[#allocation2 + $0x7c] sm:$0xf] }
 0x2e0   : > { %v7876_v20 = vor.u32 %v7875_v55, %v7872_v43  ;;  %v7885_v63 = vrot.slane %v7883_v30, 4  ;;  %v18553_v29 = vcombine.low %v16585_v34, %v16603_v49  ;;  %v7891_v51 = vrot.slane %v7889_v61, 5  ;;  %v16852_v43 = vld [vmem:[#allocation2 + $0x80] sm:$0x1] }
 0x2e1   : > { %12845 = vmatmul.mubr.bf16.gmra.mxu1 %v18552_v42  ;;  %v8577_v5 = vrot.slane %v16806_v36, 5  ;;  %v8580_v6 = vrot.slane %v16814_v50, 5  ;;  %v7894_v39 = vshrl.u32 %v7719_v14, 16  ;;  %v7897_v28 = vshll.u32 %v7719_v14, 16  ;;  %v7722_v30 = vld [vmem:[#allocation2 + $0x60] sm:$0xf] }
 0x2e2   : > { %12848 = vmatprep.mubr.bf16.mxu1 %v18553_v29  ;;  %v7877_v33 = vrot.slane %v7876_v20, 4  ;;  %v7886_v47 = vor.u32 %v7885_v63, %v7881_v1  ;;  %v7903_v8 = vshll.u32 %v16742_v11, 16  ;;  %13047 = vmatpush3.bf16.msra.mxu0 %v13355_v41  ;;  %v7907_v49 = vshrl.u32 %v16742_v11, 16  ;;  %v8465_v63 = vld [vmem:[#allocation2 + $0x84] sm:$0xe] }
 0x2e3   : > { %v16842_v56 = vsel %vm13895_vm5, %v11623_v0, %v8577_v5  ;;  %v8579_v4 = vrot.slane %v8577_v5, 4  ;;  %v7896_v34 = vrot.slane %v7894_v39, 4  ;;  %13048 = vmatprep.subr.bf16.mxu0 %v13356_v3  ;;  %v7899_v41 = vrot.slane %v7897_v28, 5  ;;  %v7725_v39 = vld [vmem:[#allocation2 + $0x6c] sm:$0xf] }
 0x2e4   : > { %v7882_v14 = vsel %vm13543_vm2, %v7877_v33, %v7881_v1  ;;  %v7887_v32 = vrot.slane %v7886_v47, 4  ;;  %v7905_v23 = vrot.slane %v7903_v8, 5  ;;  %v7909_v24 = vrot.slane %v7907_v49, 4  ;;  %v16893_v28 = vld [vmem:[#allocation2 + $0x88] sm:$0xf] }
 0x2e5   : > { %12969 = vmatmul.mubr.bf16.gmra.mxu0 %v11650_v40  ;;  %v16859_v11 = vsel %vm13895_vm5, %v8579_v4, %v8580_v6  ;;  %v7913_v62 = vshll.u32 %v16744_v22, 16  ;;  %v11624_v55 = vrot.slane %v8464_v53, 9  ;;  %v7900_v26 = vor.u32 %v7899_v41, %v7896_v34  ;;  %v13361_v34 = vld [vmem:[%s18360_s4 + $0x1d0] sm:$0xff]  }
 0x2e6   : > { %12972 = vmatprep.mubr.bf16.mxu0 %v11651_v10  ;;  %v7892_v1 = vsel %vm13543_vm2, %v7887_v32, %v7891_v51  ;;  %v11655_v7 = vcombine.low %v16842_v56, %v16859_v11  ;;  %v8584_v40 = vrot.slane %v16845_v15, 5  ;;  %13049 = vmatpush3.bf16.msra.mxu0 %v13356_v3  ;;  %v7910_v61 = vor.u32 %v7909_v24, %v7905_v23 }
 0x2e7   : > { %v16870_v35 = vcombine.low %v7882_v14, %v7892_v1  ;;  %v7915_v22 = vrot.slane %v7913_v62, 5  ;;  %v8587_v0 = vrot.slane %v16852_v43, 5  ;;  %13050 = vmatprep.subr.bf16.mxu0 %v13358_v57  ;;  %v18554_v58 = vcombine.low %v16618_v17, %v16633_v16  ;;  %v8466_v62 = vld [vmem:[#allocation2 + $0x90] sm:$0xe] }
 0x2e8   : > { %v7901_v10 = vrot.slane %v7900_v26, 4  ;;  %v16881_v42 = vsel %vm13895_vm5, %v11624_v55, %v8584_v40  ;;  %v8586_v3 = vrot.slane %v8584_v40, 4  ;;  %v7918_v20 = vshrl.u32 %v7722_v30, 16  ;;  %v13351_v55 = vld [vmem:[%s18360_s4 + $0x1b0] sm:$0xff]  }
 0x2e9   : > { %12849 = vmatmul.mubr.bf16.gmra.mxu1 %v18554_v58  ;;  %v7911_v29 = vrot.slane %v7910_v61, 4  ;;  %v7921_v51 = vshll.u32 %v7722_v30, 16  ;;  %v7927_v5 = vshll.u32 %v16777_v13, 16  ;;  %v7931_v6 = vshrl.u32 %v16777_v13, 16 }
 0x2ea   : > { %12916 = vmatprep.mubr.bf16.mxu1 %v16697_v9  ;;  %v7906_v17 = vsel %vm13543_vm2, %v7901_v10, %v7905_v23  ;;  %v16890_v16 = vsel %vm13895_vm5, %v8586_v3, %v8587_v0  ;;  %v7920_v33 = vrot.slane %v7918_v20, 4  ;;  %v7937_v47 = vshll.u32 %v16779_v18, 16  ;;  %v16895_v9 = vld [vmem:[#allocation2 + $0x8c] sm:$0x1]  ;;  %13051 = vmatpush3.bf16.msra.mxu0 %v13358_v57  ;;  %v7728_v20 = vld [vmem:[#allocation2 + $0x78] sm:$0xf] }
 0x2eb   : > { %v7916_v8 = vsel %vm13543_vm2, %v7911_v29, %v7915_v22  ;;  %v11656_v13 = vcombine.low %v16881_v42, %v16890_v16  ;;  %v7923_v53 = vrot.slane %v7921_v51, 5  ;;  %v7929_v4 = vrot.slane %v7927_v5, 5  ;;  %13052 = vmatprep.subr.bf16.mxu0 %v13359_v12 }
 0x2ec   : > { %v16904_v49 = vcombine.low %v7906_v17, %v7916_v8  ;;  %v7933_v18 = vrot.slane %v7931_v6, 4  ;;  %v7939_v14 = vrot.slane %v7937_v47, 5  ;;  %v11625_v32 = vrot.slane %v8465_v63, 9  ;;  %v13352_v63 = vld [vmem:[%s18360_s4 + $0x1a8] sm:$0xff]  }
 0x2ed   : > { %12973 = vmatmul.mubr.bf16.gmra.mxu0 %v11652_v21  ;;  %v7924_v57 = vor.u32 %v7923_v53, %v7920_v33  ;;  %v8591_v41 = vrot.slane %v16893_v28, 5  ;;  %v8594_v23 = vrot.slane %v16895_v9, 5  ;;  %v7942_v24 = vshrl.u32 %v7725_v39, 16  ;;  %v16919_v21 = vld [vmem:[#allocation2 + $0x94] sm:$0xf] }
 0x2ee   : > { %12976 = vmatprep.mubr.bf16.mxu0 %v11653_v27  ;;  %v7934_v30 = vor.u32 %v7933_v18, %v7929_v4  ;;  %v7945_v1 = vshll.u32 %v7725_v39, 16  ;;  %v7951_v2 = vshll.u32 %v16806_v36, 16  ;;  %v7955_v60 = vshrl.u32 %v16806_v36, 16  ;;  %13053 = vmatpush3.bf16.msra.mxu0 %v13359_v12  ;;  %v16925_v27 = vld [vmem:[#allocation2 + $0x98] sm:$0x1]  ;;  %v13362_v36 = vld [vmem:[%s18360_s4 + $0x1c8] sm:$0xff]  }
 0x2ef   : > { %v7925_v26 = vrot.slane %v7924_v57, 4  ;;  %v16923_v40 = vsel %vm13895_vm5, %v11625_v32, %v8591_v41  ;;  %v8593_v45 = vrot.slane %v8591_v41, 4  ;;  %v7944_v25 = vrot.slane %v7942_v24, 4  ;;  %13054 = vmatprep.subr.bf16.mxu0 %v13361_v34  ;;  %v7731_v53 = vld [vmem:[#allocation2 + $0x84] sm:$0xf] }
 0x2f0   : > { %v7935_v61 = vrot.slane %v7934_v30, 4  ;;  %v7947_v22 = vrot.slane %v7945_v1, 5  ;;  %v7953_v0 = vrot.slane %v7951_v2, 5  ;;  %v7957_v58 = vrot.slane %v7955_v60, 4  ;;  %v13354_v18 = vld [vmem:[%s18360_s4 + $0x1a0] sm:$0xff]  }
 0x2f1   : > { %12917 = vmatmul.mubr.bf16.vlgmr.msra.gmra.mxu1 %v16725_v52  ;;  %v7930_v12 = vsel %vm13543_vm2, %v7925_v26, %v7929_v4  ;;  %v16937_v10 = vsel %vm13895_vm5, %v8593_v45, %v8594_v23  ;;  %v7961_v52 = vshll.u32 %v16814_v50, 16  ;;  %v11626_v3 = vrot.slane %v8466_v62, 9  ;;  %v13364_v4 = vld [vmem:[%s18360_s4 + $0x1c0] sm:$0xff]   ;;  %v8467_v41 = vld [vmem:[#allocation2 + $0x9c] sm:$0xe] }
 0x2f2   : > { %12920 = vmatprep.mubr.bf16.mxu1 %v16757_v54  ;;  %12997 = vmatpush3.bf16.msra.mxu1 %v16706_v48  ;;  %v7940_v54 = vsel %vm13543_vm2, %v7935_v61, %v7939_v14  ;;  %v11657_v48 = vcombine.low %v16923_v40, %v16937_v10  ;;  %v7948_v29 = vor.u32 %v7947_v22, %v7944_v25  ;;  %v8598_v50 = vrot.slane %v16919_v21, 5  ;;  %v16973_v24 = vld [vmem:[#allocation2 + $0xa0] sm:$0xf]  ;;  %v16975_v62 = vld [vmem:[#allocation2 + $0xa4] sm:$0x1] }
 0x2f3   : > { %12998 = vmatprep.subr.bf16.mxu1 %v13351_v55  ;;  %v7958_v51 = vor.u32 %v7957_v58, %v7953_v0  ;;  %v16947_v5 = vcombine.low %v7930_v12, %v7940_v54  ;;  %v7963_v6 = vrot.slane %v7961_v52, 5  ;;  %v8601_v39 = vrot.slane %v16925_v27, 5  ;;  %13055 = vmatpush3.bf16.msra.mxu0 %v13361_v34  ;;  %v8468_v22 = vld [vmem:[#allocation2 + $0xa8] sm:$0xe]  ;;  %v13357_v58 = vld [vmem:[%s18360_s4 + $0x198] sm:$0xff]  }
 0x2f4   : > { %v7949_v17 = vrot.slane %v7948_v29, 4  ;;  %v7966_v47 = vshrl.u32 %v7728_v20, 16  ;;  %v7969_v8 = vshll.u32 %v7728_v20, 16  ;;  %13056 = vmatprep.subr.bf16.mxu0 %v13362_v36  ;;  %v16962_v34 = vsel %vm13895_vm5, %v11626_v3, %v8598_v50  ;;  %v7734_v12 = vld [vmem:[#allocation2 + $0x90] sm:$0xf] }
 0x2f5   : > { %v7959_v33 = vrot.slane %v7958_v51, 4  ;;  %12977 = vmatmul.mubr.bf16.gmra.mxu0 %v11654_v59  ;;  %v8600_v14 = vrot.slane %v8598_v50, 4  ;;  %v7975_v32 = vshll.u32 %v16845_v15, 16  ;;  %v7979_v57 = vshrl.u32 %v16845_v15, 16  ;;  %v17002_v54 = vld [vmem:[#allocation2 + $0xac] sm:$0xf] }
 0x2f6   : > { %12999 = vmatpush3.bf16.msra.mxu1 %v13351_v55  ;;  %12980 = vmatprep.mubr.bf16.mxu0 %v11655_v7  ;;  %v7954_v38 = vsel %vm13543_vm2, %v7949_v17, %v7953_v0  ;;  %v7968_v59 = vrot.slane %v7966_v47, 4  ;;  %v7971_v23 = vrot.slane %v7969_v8, 5  ;;  %v16977_v55 = vpop.f32.mrf.mxu0  ;;  %v7985_v2 = vshll.u32 %v16852_v43, 16 }
 0x2f7   : > { %13000 = vmatprep.subr.bf16.mxu1 %v13352_v63  ;;  %v7964_v31 = vsel %vm13543_vm2, %v7959_v33, %v7963_v6  ;;  %v16983_v56 = vsel %vm13895_vm5, %v8600_v14, %v8601_v39  ;;  %v7977_v11 = vrot.slane %v7975_v32, 5  ;;  %v7981_v7 = vrot.slane %v7979_v57, 4  ;;  %13057 = vmatpush3.bf16.msra.mxu0 %v13362_v36  ;;  %v17007_v39 = vld [vmem:[#allocation2 + $0xb0] sm:$0x1] }
 0x2f8   : > { %v16979_v15 = vcombine.low %v7954_v38, %v7964_v31  ;;  %v11658_v30 = vcombine.low %v16962_v34, %v16983_v56  ;;  %v7972_v1 = vor.u32 %v7971_v23, %v7968_v59  ;;  %v11627_v60 = vrot.slane %v8467_v41, 9  ;;  %13058 = vmatprep.subr.bf16.mxu0 %v13364_v4  ;;  %v8469_v41 = vld [vmem:[#allocation2 + $0xb4] sm:$0xe]  ;;  %v13365_v34 = vld [vmem:[%s18360_s4 + $0x180] sm:$0xff]  }
 0x2f9   : > { %12921 = vmatmul.mubr.bf16.gmra.mxu1 %v16784_v44  ;;  %v7982_v26 = vor.u32 %v7981_v7, %v7977_v11  ;;  %v8605_v45 = vrot.slane %v16973_v24, 5  ;;  %v8608_v25 = vrot.slane %v16975_v62, 5  ;;  %v7990_v61 = vshrl.u32 %v7731_v53, 16 }
 0x2fa   : > { %12924 = vmatprep.mubr.bf16.mxu1 %v16830_v46  ;;  %13001 = vmatpush3.bf16.msra.mxu1 %v13352_v63  ;;  %v7973_v44 = vrot.slane %v7972_v1, 4  ;;  %v7987_v0 = vrot.slane %v7985_v2, 5  ;;  %v7993_v43 = vshll.u32 %v7731_v53, 16  ;;  %v7999_v36 = vshll.u32 %v16893_v28, 16  ;;  %v16996_v46 = vpop.f32.mrf.mxu0 }
 0x2fb   : > { %13002 = vmatprep.subr.bf16.mxu1 %v13354_v18  ;;  %v7983_v52 = vrot.slane %v7982_v26, 4  ;;  %v17000_v3 = vsel %vm13895_vm5, %v11627_v60, %v8605_v45  ;;  %v8607_v20 = vrot.slane %v8605_v45, 4  ;;  %v7992_v63 = vrot.slane %v7990_v61, 4  ;;  %13059 = vmatpush3.bf16.msra.mxu0 %v13364_v4  ;;  %v17042_v60 = vld [vmem:[#allocation2 + $0xbc] sm:$0x1] }
 0x2fc   : > { %v7978_v29 = vsel %vm13543_vm2, %v7973_v44, %v7977_v11  ;;  %v7995_v51 = vrot.slane %v7993_v43, 5  ;;  %v8001_v6 = vrot.slane %v7999_v36, 5  ;;  %v8003_v50 = vshrl.u32 %v16893_v28, 16  ;;  %v17026_v4 = vpop.f32.mrf.mxu0  ;;  %v17038_v11 = vld [vmem:[#allocation2 + $0xb8] sm:$0xf] }
 0x2fd   : > { %12981 = vmatmul.mubr.bf16.gmra.mxu0 %v11656_v13  ;;  %v7988_v17 = vsel %vm13543_vm2, %v7983_v52, %v7987_v0  ;;  %v8609_v33 = vsel %vm13895_vm5, %v8607_v20, %v8608_v25  ;;  %v8009_v47 = vshll.u32 %v16895_v9, 16  ;;  %v11628_v8 = vrot.slane %v8468_v22, 9  ;;  %v13360_v13 = vld [vmem:[%s18360_s4 + $0x190] sm:$0xff]   ;;  %v7737_v22 = vld [vmem:[#allocation2 + $0x9c] sm:$0xf] }
 0x2fe   : > { %13003 = vmatpush3.bf16.msra.mxu1 %v13354_v18  ;;  %12984 = vmatprep.mubr.bf16.mxu0 %v11657_v48  ;;  %v17020_v28 = vcombine.low %v7978_v29, %v7988_v17  ;;  %v11659_v53 = vcombine.low %v17000_v3, %v8609_v33  ;;  %v7996_v42 = vor.u32 %v7995_v51, %v7992_v63  ;;  %v8005_v16 = vrot.slane %v8003_v50, 4  ;;  %v17047_v26 = vpop.f32.mrf.mxu0  ;;  %v8470_v51 = vld [vmem:[#allocation2 + $0xc0] sm:$0xe]  ;;  %v7740_v33 = vld [vmem:[#allocation2 + $0xa8] sm:$0xf] }
 0x2ff   : > { %13004 = vmatprep.subr.bf16.mxu1 %v13357_v58  ;;  %v8011_v18 = vrot.slane %v8009_v47, 5  ;;  %v8612_v9 = vrot.slane %v17002_v54, 5  ;;  %v8615_v14 = vrot.slane %v17007_v39, 5  ;;  %v8014_v40 = vshrl.u32 %v7734_v12, 16 }
 0x300   : > { %v7997_v10 = vrot.slane %v7996_v42, 4  ;;  %v8006_v48 = vor.u32 %v8005_v16, %v8001_v6  ;;  %v8017_v32 = vshll.u32 %v7734_v12, 16  ;;  %v8023_v57 = vshll.u32 %v16919_v21, 16  ;;  %v17067_v56 = vpop.f32.mrf.mxu0  ;;  %v17077_v16 = vld [vmem:[#allocation2 + $0xc4] sm:$0xf] }
 0x301   : > { %12925 = vmatmul.mubr.bf16.gmra.mxu1 %v16870_v35  ;;  %v17035_v38 = vsel %vm13895_vm5, %v11628_v8, %v8612_v9  ;;  %v8614_v31 = vrot.slane %v8612_v9, 4  ;;  %v8016_v59 = vrot.slane %v8014_v40, 4  ;;  %v8027_v23 = vshrl.u32 %v16919_v21, 16 }
 0x302   : > { %12928 = vmatprep.mubr.bf16.mxu1 %v16904_v49  ;;  %13005 = vmatpush3.bf16.msra.mxu1 %v13357_v58  ;;  %v8002_v35 = vsel %vm13543_vm2, %v7997_v10, %v8001_v6  ;;  %v8007_v7 = vrot.slane %v8006_v48, 4  ;;  %v8019_v1 = vrot.slane %v8017_v32, 5  ;;  %v8025_v2 = vrot.slane %v8023_v57, 5  ;;  %v13363_v49 = vld [vmem:[%s18360_s4 + $0x188] sm:$0xff]   ;;  %v17091_v32 = vpop.f32.mrf.mxu0 }
 0x303   : > { %13006 = vmatprep.subr.bf16.mxu1 %v13360_v13  ;;  %v8616_v21 = vsel %vm13895_vm5, %v8614_v31, %v8615_v14  ;;  %v8029_v45 = vrot.slane %v8027_v23, 4  ;;  %v8033_v25 = vshll.u32 %v16925_v27, 16  ;;  %v11629_v61 = vrot.slane %v8469_v41, 9 }
 0x304   : > { %v8012_v44 = vsel %vm13543_vm2, %v8007_v7, %v8011_v18  ;;  %v11660_v0 = vcombine.low %v17035_v38, %v8616_v21  ;;  %v8020_v58 = vor.u32 %v8019_v1, %v8016_v59  ;;  %v8619_v43 = vrot.slane %v17038_v11, 5  ;;  %v9340_v7 = vld [vmem:[#allocation2 + $0x18] sm:$0xf] }
 0x305   : > { %12985 = vmatmul.mubr.bf16.gmra.mxu0 %v11658_v30  ;;  %v17059_v36 = vcombine.low %v8002_v35, %v8012_v44  ;;  %v8030_v12 = vor.u32 %v8029_v45, %v8025_v2  ;;  %v8035_v52 = vrot.slane %v8033_v25, 5  ;;  %v8622_v27 = vrot.slane %v17042_v60, 5  ;;  %v17100_v44 = vpop.f32.mrf.mxu0 }
 0x306   : > { %13007 = vmatpush3.bf16.msra.mxu1 %v13360_v13  ;;  %12988 = vmatprep.mubr.bf16.mxu0 %v11659_v53  ;;  %v8021_v3 = vrot.slane %v8020_v58, 4  ;;  %v8620_v20 = vsel %vm13895_vm5, %v11629_v61, %v8619_v43  ;;  %v8621_v63 = vrot.slane %v8619_v43, 4  ;;  %v8038_v29 = vshrl.u32 %v7737_v22, 16  ;;  %v17079_v13 = vld [vmem:[#allocation2 + $0xc8] sm:$0x1] }
 0x307   : > { %13008 = vmatprep.subr.bf16.mxu1 %v13363_v49  ;;  %v8031_v30 = vrot.slane %v8030_v12, 4  ;;  %v8041_v6 = vshll.u32 %v7737_v22, 16  ;;  %v8047_v50 = vshll.u32 %v16973_v24, 16  ;;  %v8051_v17 = vshrl.u32 %v16973_v24, 16  ;;  %v17107_v43 = vld [vmem:[#allocation2 + $0x1c] sm:$0xf] }
 0x308   : > { %v8026_v47 = vsel %vm13543_vm2, %v8021_v3, %v8025_v2  ;;  %v8623_v8 = vsel %vm13895_vm5, %v8621_v63, %v8622_v27  ;;  %v8040_v53 = vrot.slane %v8038_v29, 4  ;;  %v8057_v42 = vshll.u32 %v16975_v62, 16  ;;  %v17089_v62 = vld [vmem:[%s18360_s4 + $0x238] sm:$0xff]   ;;  %v17112_v63 = vld [vmem:[#allocation2 + $0x20] sm:$0x1] }
 0x309   : > { %12929 = vmatmul.mubr.bf16.gmra.mxu1 %v16947_v5  ;;  %v8036_v24 = vsel %vm13543_vm2, %v8031_v30, %v8035_v52  ;;  %v11661_v18 = vcombine.low %v8620_v20, %v8623_v8  ;;  %v8043_v5 = vrot.slane %v8041_v6, 5  ;;  %v8049_v9 = vrot.slane %v8047_v50, 5  ;;  %v7743_v29 = vld [vmem:[#allocation2 + $0xb4] sm:$0xf] }
 0x30a   : > { %12932 = vmatprep.mubr.bf16.mxu1 %v16979_v15  ;;  %13009 = vmatpush3.bf16.msra.mxu1 %v13363_v49  ;;  %v17084_v14 = vcombine.low %v8026_v47, %v8036_v24  ;;  %v8053_v40 = vrot.slane %v8051_v17, 4  ;;  %v8059_v10 = vrot.slane %v8057_v42, 5  ;;  %v11630_v48 = vrot.slane %v8470_v51, 9  ;;  %v17119_v47 = vpop.f32.mrf.mxu0 }
 0x30b   : > { %13010 = vmatprep.subr.bf16.mxu1 %v13365_v34  ;;  %v8044_v15 = vor.u32 %v8043_v5, %v8040_v53  ;;  %v8626_v57 = vrot.slane %v17077_v16, 5  ;;  %v8629_v41 = vrot.slane %v17079_v13, 5  ;;  %v8062_v38 = vshrl.u32 %v7740_v33, 16  ;;  %18555 = vst [vmem:[#allocation12_spill] sm:$0xff] %v17119_v47 }
 0x30c   : > { %v8054_v31 = vor.u32 %v8053_v40, %v8049_v9  ;;  %v8065_v59 = vshll.u32 %v7740_v33, 16  ;;  %v8071_v23 = vshll.u32 %v17002_v54, 16  ;;  %v8075_v35 = vshrl.u32 %v17002_v54, 16  ;;  %v17117_v33 = vpop.f32.mrf.mxu1  ;;  %v9343_v40 = vld [vmem:[#allocation2 + $0x24] sm:$0xf] }
 0x30d   : > { %12989 = vmatmul.mubr.bf16.gmra.mxu0 %v11660_v0  ;;  %v8045_v1 = vrot.slane %v8044_v15, 4  ;;  %v8627_v2 = vsel %vm13895_vm5, %v11630_v48, %v8626_v57  ;;  %v8628_v49 = vrot.slane %v8626_v57, 4  ;;  %v8064_v21 = vrot.slane %v8062_v38, 4 }
 0x30e   : > { %13011 = vmatpush3.bf16.msra.mxu1 %v13365_v34  ;;  %12992 = vmatprep.mubr.bf16.mxu0 %v11661_v18  ;;  %v8055_v45 = vrot.slane %v8054_v31, 4  ;;  %v8067_v25 = vrot.slane %v8065_v59, 5  ;;  %v8073_v61 = vrot.slane %v8071_v23, 5  ;;  %v8077_v22 = vrot.slane %v8075_v35, 4  ;;  %v17128_v23 = vpop.f32.mrf.mxu1 }
 0x30f   : > { %13092 = vmatprep.subr.bf16.mxu1 %v17089_v62  ;;  %v8050_v54 = vsel %vm13543_vm2, %v8045_v1, %v8049_v9  ;;  %v8630_v0 = vsel %vm13895_vm5, %v8628_v49, %v8629_v41  ;;  %v8081_v58 = vshll.u32 %v17007_v39, 16  ;;  %v9389_v12 = vshrl.u32 %v9340_v7, 16 }
 0x310   : > { %v8060_v52 = vsel %vm13543_vm2, %v8055_v45, %v8059_v10  ;;  %v11662_v27 = vcombine.low %v8627_v2, %v8630_v0  ;;  %v8068_v3 = vor.u32 %v8067_v25, %v8064_v21  ;;  %v8078_v20 = vor.u32 %v8077_v22, %v8073_v61  ;;  %v17130_v35 = vpop.f32.mrf.mxu0  ;;  %v17133_v2 = vld [vmem:[#allocation2 + $0x28] sm:$0xf] }
 0x311   : > { %12933 = vmatmul.mubr.bf16.gmra.mxu1 %v17020_v28  ;;  %v11603_v51 = vcombine.low %v8050_v54, %v8060_v52  ;;  %v8083_v34 = vrot.slane %v8081_v58, 5  ;;  %v9391_v30 = vrot.slane %v9389_v12, 4  ;;  %v9392_v39 = vshll.u32 %v9340_v7, 16  ;;  %v17136_v54 = vld [vmem:[#allocation2 + $0x2c] sm:$0x1] }
 0x312   : > { %12936 = vmatprep.mubr.bf16.mxu1 %v17059_v36  ;;  %v8069_v6 = vrot.slane %v8068_v3, 4  ;;  %v8079_v50 = vrot.slane %v8078_v20, 4  ;;  %v9398_v17 = vshll.u32 %v17107_v43, 16  ;;  %v9402_v28 = vshrl.u32 %v17107_v43, 16  ;;  %v17143_v20 = vpop.f32.mrf.mxu1 }
 0x313   : > { %v9394_v8 = vrot.slane %v9392_v39, 5  ;;  %v9408_v53 = vshll.u32 %v17112_v63, 16  ;;  %v8086_v42 = vshrl.u32 %v7743_v29, 16  ;;  %v8089_v24 = vshll.u32 %v7743_v29, 16  ;;  %v17145_v29 = vpop.f32.mrf.mxu0 }
 0x314   : > { %v8074_v36 = vsel %vm13543_vm2, %v8069_v6, %v8073_v61  ;;  %v8084_v18 = vsel %vm13543_vm2, %v8079_v50, %v8083_v34  ;;  %v9400_v5 = vrot.slane %v9398_v17, 5  ;;  %v9404_v9 = vrot.slane %v9402_v28, 4 }
 0x315   : > { %12993 = vmatmul.mubr.bf16.gmra.mxu0 %v11662_v27  ;;  %v11604_v10 = vcombine.low %v8074_v36, %v8084_v18  ;;  %v9395_v48 = vor.u32 %v9394_v8, %v9391_v30  ;;  %v9410_v15 = vrot.slane %v9408_v53, 5  ;;  %v8088_v57 = vrot.slane %v8086_v42, 4  ;;  %v9346_v36 = vld [vmem:[#allocation2 + $0x30] sm:$0xf] }
 0x316   : > { %v9405_v41 = vor.u32 %v9404_v9, %v9400_v5  ;;  %v8091_v38 = vrot.slane %v8089_v24, 5  ;;  %v8095_v31 = vshll.u32 %v17038_v11, 16  ;;  %v8099_v59 = vshrl.u32 %v17038_v11, 16 }
 0x317   : > { %v9396_v7 = vrot.slane %v9395_v48, 4  ;;  %v8105_v1 = vshll.u32 %v17042_v60, 16  ;;  %v9413_v49 = vshrl.u32 %v9343_v40, 16  ;;  %v9416_v21 = vshll.u32 %v9343_v40, 16  ;;  %v7746_v60 = vld [vmem:[#allocation2 + $0xc0] sm:$0xf] }
 0x318   : > { %v9406_v45 = vrot.slane %v9405_v41, 4  ;;  %v8092_v25 = vor.u32 %v8091_v38, %v8088_v57  ;;  %v8097_v61 = vrot.slane %v8095_v31, 5  ;;  %v8101_v22 = vrot.slane %v8099_v59, 4  ;;  %v17155_v48 = vld [vmem:[#allocation2 + $0x34] sm:$0xf]  ;;  %v17159_v57 = vpop.f32.mrf.mxu0 }
 0x319   : > { %12937 = vmatmul.mubr.bf16.gmra.mxu1 %v17084_v14  ;;  %v9401_v11 = vsel %vm13543_vm2, %v9396_v7, %v9400_v5  ;;  %v8107_v0 = vrot.slane %v8105_v1, 5  ;;  %v9415_v58 = vrot.slane %v9413_v49, 4  ;;  %v9418_v12 = vrot.slane %v9416_v21, 5 }
 0x31a   : > { %12940 = vmatprep.mubr.bf16.mxu1 %v11603_v51  ;;  %v9411_v52 = vsel %vm13543_vm2, %v9406_v45, %v9410_v15  ;;  %v8093_v27 = vrot.slane %v8092_v25, 4  ;;  %v8102_v3 = vor.u32 %v8101_v22, %v8097_v61  ;;  %v9422_v14 = vshll.u32 %v17133_v2, 16  ;;  %v17157_v15 = vpop.f32.mrf.mxu1  ;;  %v17164_v25 = vld [vmem:[#allocation2 + $0x38] sm:$0x1] }
 0x31b   : > { %v11727_v34 = vcombine.low %v9401_v11, %v9411_v52  ;;  %v9419_v51 = vor.u32 %v9418_v12, %v9415_v58  ;;  %v9426_v30 = vshrl.u32 %v17133_v2, 16  ;;  %v9432_v39 = vshll.u32 %v17136_v54, 16  ;;  %v17170_v52 = vpop.f32.mrf.mxu0 }
 0x31c   : > { %v8098_v6 = vsel %vm13543_vm2, %v8093_v27, %v8097_v61  ;;  %v8103_v50 = vrot.slane %v8102_v3, 4  ;;  %v9424_v17 = vrot.slane %v9422_v14, 5  ;;  %v8110_v28 = vshrl.u32 %v7746_v60, 16 }
 0x31d   : > { %13060 = vmatprep.mubr.bf16.mxu0 %v11727_v34  ;;  %v9420_v8 = vrot.slane %v9419_v51, 4  ;;  %v9428_v53 = vrot.slane %v9426_v30, 4  ;;  %v9434_v42 = vrot.slane %v9432_v39, 5  ;;  %v8113_v24 = vshll.u32 %v7746_v60, 16  ;;  %v9349_v60 = vld [vmem:[#allocation2 + $0x3c] sm:$0xf] }
 0x31e   : > { %v8108_v18 = vsel %vm13543_vm2, %v8103_v50, %v8107_v0  ;;  %v8112_v5 = vrot.slane %v8110_v28, 4  ;;  %v8119_v9 = vshll.u32 %v17077_v16, 16  ;;  %v8123_v40 = vshrl.u32 %v17077_v16, 16  ;;  %v17174_v34 = vld [vmem:[#allocation2 + $0x40] sm:$0xf] }
 0x31f   : > { %v11605_v41 = vcombine.low %v8098_v6, %v8108_v18  ;;  %v9425_v38 = vsel %vm13543_vm2, %v9420_v8, %v9424_v17  ;;  %v9429_v31 = vor.u32 %v9428_v53, %v9424_v17  ;;  %v8115_v59 = vrot.slane %v8113_v24, 5  ;;  %v17181_v24 = vld [vmem:[#allocation2 + $0x44] sm:$0x1]  ;;  %v9352_v18 = vld [vmem:[#allocation2 + $0x48] sm:$0xf] }
 0x320   : > { %v8121_v7 = vrot.slane %v8119_v9, 5  ;;  %v8125_v1 = vrot.slane %v8123_v40, 4  ;;  %v8129_v49 = vshll.u32 %v17079_v13, 16  ;;  %v9437_v21 = vshrl.u32 %v9346_v36, 16 }
 0x321   : > { %12941 = vmatmul.mubr.bf16.gmra.mxu1 %v11604_v10  ;;  %v9430_v16 = vrot.slane %v9429_v31, 4  ;;  %v8116_v45 = vor.u32 %v8115_v59, %v8112_v5  ;;  %v9440_v61 = vshll.u32 %v9346_v36, 16  ;;  %v9446_v22 = vshll.u32 %v17155_v48, 16  ;;  %v17168_v10 = vpop.f32.mrf.mxu1 }
 0x322   : > { %12944 = vmatprep.mubr.bf16.mxu1 %v11605_v41  ;;  %v8126_v11 = vor.u32 %v8125_v1, %v8121_v7  ;;  %v8131_v0 = vrot.slane %v8129_v49, 5  ;;  %v9439_v58 = vrot.slane %v9437_v21, 4  ;;  %v9450_v12 = vshrl.u32 %v17155_v48, 16 }
 0x323   : > { %v9435_v13 = vsel %vm13543_vm2, %v9430_v16, %v9434_v42  ;;  %v8117_v27 = vrot.slane %v8116_v45, 4  ;;  %v9442_v3 = vrot.slane %v9440_v61, 5  ;;  %v9448_v14 = vrot.slane %v9446_v22, 5  ;;  %v17184_v5 = vpop.f32.mrf.mxu1  ;;  %v17189_v16 = vld [vmem:[#allocation2 + $0x4c] sm:$0xf] }
 0x324   : > { %v11728_v51 = vcombine.low %v9425_v38, %v9435_v13  ;;  %v8127_v30 = vrot.slane %v8126_v11, 4  ;;  %v9452_v39 = vrot.slane %v9450_v12, 4  ;;  %v9456_v6 = vshll.u32 %v17164_v25, 16  ;;  %v17186_v9 = vpop.f32.mrf.mxu0  ;;  %v13366_v38 = vld [vmem:[#allocation2 + $0x18] sm:$0xff]   ;;  %v17196_v11 = vld [vmem:[#allocation2 + $0x50] sm:$0x1] }
 0x325   : > { %v9443_v50 = vor.u32 %v9442_v3, %v9439_v58  ;;  %v9461_v17 = vshrl.u32 %v9349_v60, 16  ;;  %v9464_v28 = vshll.u32 %v9349_v60, 16  ;;  %v8122_v8 = vsel %vm13543_vm2, %v8117_v27, %v8121_v7  ;;  %v17202_v27 = vpop.f32.mrf.mxu1 }
 0x326   : > { %13061 = vmatmul.mubr.bf16.vlgmr.msra.gmra.mxu0 %v11728_v51  ;;  %v8132_v53 = vsel %vm13543_vm2, %v8127_v30, %v8131_v0  ;;  %v9453_v42 = vor.u32 %v9452_v39, %v9448_v14  ;;  %v9470_v36 = vshll.u32 %v17174_v34, 16  ;;  %v9458_v7 = vrot.slane %v9456_v6, 5  ;;  %v17204_v3 = vpop.f32.mrf.mxu0  ;;  %v9355_v39 = vld [vmem:[#allocation2 + $0x54] sm:$0xf] }
 0x327   : > { %v11606_v40 = vcombine.low %v8122_v8, %v8132_v53  ;;  %v9444_v41 = vrot.slane %v9443_v50, 4  ;;  %v9463_v31 = vrot.slane %v9461_v17, 4  ;;  %v9466_v59 = vrot.slane %v9464_v28, 5  ;;  %v17209_v28 = vld [vmem:[#allocation2 + $0x58] sm:$0xf] }
 0x328   : > { %v9454_v1 = vrot.slane %v9453_v42, 4  ;;  %v9472_v49 = vrot.slane %v9470_v36, 5  ;;  %v9474_v21 = vshrl.u32 %v17174_v34, 16  ;;  %v9480_v61 = vshll.u32 %v17181_v24, 16 }
 0x329   : > { %12945 = vmatmul.mubr.bf16.gmra.mxu1 %v11606_v40  ;;  %v9467_v45 = vor.u32 %v9466_v59, %v9463_v31  ;;  %v17194_v22 = vadd.f32 %v16977_v55, %v17117_v33  ;;  %v9485_v0 = vshrl.u32 %v9352_v18, 16  ;;  %v9449_v58 = vsel %vm13543_vm2, %v9444_v41, %v9448_v14  ;;  %v17221_v31 = vld [vmem:[#allocation2 + $0x5c] sm:$0x1]  ;;  %v17223_v59 = vpop.f32.mrf.mxu1 }
 0x32a   : > { %v9459_v12 = vsel %vm13543_vm2, %v9454_v1, %v9458_v7  ;;  %13012 = vmatprep.mubr.bf16.mxu1 %v13366_v38  ;;  %v9476_v60 = vrot.slane %v9474_v21, 4  ;;  %v9488_v13 = vshll.u32 %v9352_v18, 16  ;;  %v9494_v33 = vshll.u32 %v17189_v16, 16  ;;  %18557 = vst [vmem:[#allocation19_spill] sm:$0xff] %v17223_v59  ;;  %v17225_v1 = vpop.f32.mrf.mxu0  ;;  %v13367_v7 = vld [vmem:[#allocation2 + $0x24] sm:$0xff]  }
 0x32b   : > { %v11729_v51 = vcombine.low %v9449_v58, %v9459_v12  ;;  %v9468_v30 = vrot.slane %v9467_v45, 4  ;;  %v9487_v55 = vrot.slane %v9485_v0, 4  ;;  %v9498_v14 = vshrl.u32 %v17189_v16, 16  ;;  %v13369_v0 = vld [vmem:[#allocation2 + $0x30] sm:$0xff]   ;;  %v9358_v12 = vld [vmem:[#allocation2 + $0x60] sm:$0xf] }
 0x32c   : > { %v9477_v6 = vor.u32 %v9476_v60, %v9472_v49  ;;  %v9490_v50 = vrot.slane %v9488_v13, 5  ;;  %v9504_v17 = vshll.u32 %v17196_v11, 16  ;;  %v9482_v8 = vrot.slane %v9480_v61, 5 }
 0x32d   : > { %13064 = vmatprep.mubr.bf16.mxu0 %v11729_v51  ;;  %v9496_v53 = vrot.slane %v9494_v33, 5  ;;  %v17213_v42 = vadd.f32 %v16996_v46, %v17128_v23  ;;  %v17217_v36 = vadd.f32 %v17026_v4, %v17143_v20  ;;  %v9473_v18 = vsel %vm13543_vm2, %v9468_v30, %v9472_v49  ;;  %v13371_v4 = vld [vmem:[%s18360_s4 + $0x230] sm:$0xff]  }
 0x32e   : > { %v9478_v40 = vrot.slane %v9477_v6, 4  ;;  %v9491_v41 = vor.u32 %v9490_v50, %v9487_v55  ;;  %v9500_v38 = vrot.slane %v9498_v14, 4  ;;  %v9506_v21 = vrot.slane %v9504_v17, 5  ;;  %v17234_v55 = vld [vmem:[#allocation2 + $0x64] sm:$0xf]  ;;  %v17240_v17 = vpop.f32.mrf.mxu0 }
 0x32f   : > { %18556 = vst [vmem:[#allocation10_spill] sm:$0xff] %v17217_v36  ;;  %v9509_v46 = vshrl.u32 %v9355_v39, 16  ;;  %v9512_v23 = vshll.u32 %v9355_v39, 16  ;;  %v9518_v45 = vshll.u32 %v17209_v28, 16  ;;  %v9522_v58 = vshrl.u32 %v17209_v28, 16  ;;  %v13375_v36 = vld [vmem:[#allocation2 + $0x60] sm:$0xff]  }
 0x330   : > { %v9483_v20 = vsel %vm13543_vm2, %v9478_v40, %v9482_v8  ;;  %v9492_v49 = vrot.slane %v9491_v41, 4  ;;  %v9501_v61 = vor.u32 %v9500_v38, %v9496_v53  ;;  %v9528_v50 = vshll.u32 %v17221_v31, 16  ;;  %v17246_v40 = vld [vmem:[#allocation2 + $0x68] sm:$0x1] }
 0x331   : > { %v11730_v60 = vcombine.low %v9473_v18, %v9483_v20  ;;  %13013 = vmatmul.mubr.bf16.vlgmr.msra.gmra.mxu1 %v13367_v7  ;;  %v9511_v13 = vrot.slane %v9509_v46, 4  ;;  %v9514_v51 = vrot.slane %v9512_v23, 5  ;;  %v9520_v30 = vrot.slane %v9518_v45, 5  ;;  %v13374_v23 = vld [vmem:[%s18360_s4 + $0x228] sm:$0xff]  }
 0x332   : > { %v9497_v33 = vsel %vm13543_vm2, %v9492_v49, %v9496_v53  ;;  %v9502_v39 = vrot.slane %v9501_v61, 4  ;;  %13016 = vmatprep.mubr.bf16.mxu1 %v13369_v0  ;;  %13093 = vmatpush3.bf16.msra.mxu1 %v17089_v62  ;;  %v9524_v6 = vrot.slane %v9522_v58, 4  ;;  %v12734_v14 = vpop.f32.mrf.mxu1  ;;  %v17244_v18 = vadd.f32 %v17067_v56, %v17168_v10  ;;  %v13370_v56 = vld [vmem:[#allocation2 + $0x3c] sm:$0xff]  }
 0x333   : > { %13065 = vmatmul.mubr.bf16.gmra.mxu0 %v11730_v60  ;;  %v9515_v8 = vor.u32 %v9514_v51, %v9511_v13  ;;  %v9533_v41 = vshrl.u32 %v9358_v12, 16  ;;  %v9536_v53 = vshll.u32 %v9358_v12, 16  ;;  %13094 = vmatprep.subr.bf16.mxu1 %v13371_v4  ;;  %v9530_v7 = vrot.slane %v9528_v50, 5  ;;  %v9361_v60 = vld [vmem:[#allocation2 + $0x6c] sm:$0xf] }
 0x334   : > { %18558 = vst [vmem:[#allocation17_spill] sm:$0xff] %v17244_v18  ;;  %v9507_v62 = vsel %vm13543_vm2, %v9502_v39, %v9506_v21  ;;  %v9525_v38 = vor.u32 %v9524_v6, %v9520_v30  ;;  %v9542_v46 = vshll.u32 %v17234_v55, 16  ;;  %v17254_v61 = vpop.f32.mrf.mxu1  ;;  %v9546_v12 = vshrl.u32 %v17234_v55, 16  ;;  %v17268_v6 = vld [vmem:[#allocation2 + $0x70] sm:$0xf] }
 0x335   : > { %v11731_v45 = vcombine.low %v9497_v33, %v9507_v62  ;;  %v9516_v20 = vrot.slane %v9515_v8, 4  ;;  %v9535_v10 = vrot.slane %v9533_v41, 4  ;;  %v9538_v49 = vrot.slane %v9536_v53, 5  ;;  %v17270_v50 = vld [vmem:[#allocation2 + $0x74] sm:$0x1]  ;;  %v13372_v53 = vld [vmem:[#allocation2 + $0x48] sm:$0xff]  }
 0x336   : > { %v9526_v0 = vrot.slane %v9525_v38, 4  ;;  %v9544_v58 = vrot.slane %v9542_v46, 5  ;;  %v9552_v21 = vshll.u32 %v17246_v40, 16  ;;  %13095 = vmatpush3.bf16.msra.mxu1 %v13371_v4  ;;  %v17258_v13 = vpop.f32.mrf.mxu0  ;;  %v17262_v33 = vadd.f32 %v17091_v32, %v17184_v5  ;;  %18561 = vst [vmem:[#allocation30_spill] sm:$0xff] %v17270_v50  ;;  %v13377_v4 = vld [vmem:[%s18360_s4 + $0x220] sm:$0xff]  }
 0x337   : > { %13068 = vmatprep.mubr.bf16.mxu0 %v11731_v45  ;;  %v9539_v51 = vor.u32 %v9538_v49, %v9535_v10  ;;  %v17266_v39 = vadd.f32 %v17100_v44, %v17202_v27  ;;  %v9521_v8 = vsel %vm13543_vm2, %v9516_v20, %v9520_v30  ;;  %v9548_v32 = vrot.slane %v9546_v12, 4  ;;  %13096 = vmatprep.subr.bf16.mxu1 %v13374_v23  ;;  %v9364_v45 = vld [vmem:[#allocation2 + $0x78] sm:$0xf]  ;;  %v12735_v10 = vpop.f32.mrf.mxu1 }
 0x338   : > { %18559 = vst [vmem:[#allocation28_spill] sm:$0xff] %v17262_v33  ;;  %v9531_v41 = vsel %vm13543_vm2, %v9526_v0, %v9530_v7  ;;  %v9554_v5 = vrot.slane %v9552_v21, 5  ;;  %v17279_v44 = vpop.f32.mrf.mxu0  ;;  %v9557_v38 = vshrl.u32 %v9361_v60, 16  ;;  %v9560_v46 = vshll.u32 %v9361_v60, 16  ;;  %v17284_v0 = vld [vmem:[#allocation2 + $0x7c] sm:$0xf] }
 0x339   : > { %18560 = vst [vmem:[#allocation23_spill] sm:$0xff] %v17266_v39  ;;  %v11732_v27 = vcombine.low %v9521_v8, %v9531_v41  ;;  %13017 = vmatmul.mubr.bf16.gmra.mxu1 %v13370_v56  ;;  %v9540_v62 = vrot.slane %v9539_v51, 4  ;;  %v9549_v49 = vor.u32 %v9548_v32, %v9544_v58  ;;  %v9566_v30 = vshll.u32 %v17268_v6, 16  ;;  %v17291_v51 = vld [vmem:[#allocation2 + $0x80] sm:$0x1]  ;;  %v13380_v8 = vld [vmem:[%s18360_s4 + $0x218] sm:$0xff]  }
 0x33a   : > { %13020 = vmatprep.mubr.bf16.mxu1 %v13372_v53  ;;  %v9570_v20 = vshrl.u32 %v17268_v6, 16  ;;  %v9576_v7 = vshll.u32 %v17270_v50, 16  ;;  %13097 = vmatpush3.bf16.msra.mxu1 %v13374_v23  ;;  %v9559_v12 = vrot.slane %v9557_v38, 4  ;;  %v9562_v21 = vrot.slane %v9560_v46, 5 }
 0x33b   : > { %13069 = vmatmul.mubr.bf16.gmra.mxu0 %v11732_v27  ;;  %v9545_v56 = vsel %vm13543_vm2, %v9540_v62, %v9544_v58  ;;  %v17289_v60 = vadd.f32 %v17130_v35, %v12734_v14  ;;  %13098 = vmatprep.subr.bf16.mxu1 %v13377_v4  ;;  %v9550_v41 = vrot.slane %v9549_v49, 4  ;;  %v9568_v32 = vrot.slane %v9566_v30, 5  ;;  %v17296_v27 = vpop.f32.mrf.mxu0  ;;  %v6436_v35 = vpop.f32.mrf.mxu1  ;;  %v9367_v49 = vld [vmem:[#allocation2 + $0x84] sm:$0xf] }
 0x33c   : > { %v9572_v53 = vrot.slane %v9570_v20, 4  ;;  %v9578_v23 = vrot.slane %v9576_v7, 5  ;;  %v9563_v39 = vor.u32 %v9562_v21, %v9559_v12  ;;  %v9581_v58 = vshrl.u32 %v9364_v45, 16  ;;  %v13373_v7 = vld [vmem:[#allocation2 + $0x54] sm:$0xff]  }
 0x33d   : > { %18562 = vst [vmem:[#allocation29_spill] sm:$0xff] %v17289_v60  ;;  %v9584_v62 = vshll.u32 %v9364_v45, 16  ;;  %v9590_v38 = vshll.u32 %v17284_v0, 16  ;;  %v9555_v14 = vsel %vm13543_vm2, %v9550_v41, %v9554_v5  ;;  %v9594_v60 = vshrl.u32 %v17284_v0, 16  ;;  %v17303_v50 = vpop.f32.mrf.mxu0  ;;  %v13383_v5 = vld [vmem:[%s18360_s4 + $0x210] sm:$0xff]  }
 0x33e   : > { %v9573_v46 = vor.u32 %v9572_v53, %v9568_v32  ;;  %v9600_v47 = vshll.u32 %v17291_v51, 16  ;;  %13099 = vmatpush3.bf16.msra.mxu1 %v13377_v4  ;;  %v11733_v30 = vcombine.low %v9545_v56, %v9555_v14  ;;  %v9564_v20 = vrot.slane %v9563_v39, 4  ;;  %v17314_v41 = vld [vmem:[#allocation2 + $0x88] sm:$0xf] }
 0x33f   : > { %v9583_v59 = vrot.slane %v9581_v58, 4  ;;  %v9586_v12 = vrot.slane %v9584_v62, 5  ;;  %13100 = vmatprep.subr.bf16.mxu1 %v13380_v8  ;;  %v9592_v21 = vrot.slane %v9590_v38, 5  ;;  %v9596_v33 = vrot.slane %v9594_v60, 4 }
 0x340   : > { %v9574_v45 = vrot.slane %v9573_v46, 4  ;;  %v9602_v18 = vrot.slane %v9600_v47, 5  ;;  %13072 = vmatprep.mubr.bf16.mxu0 %v11733_v30  ;;  %v9569_v4 = vsel %vm13543_vm2, %v9564_v20, %v9568_v32  ;;  %v17312_v56 = vadd.f32 %v17145_v29, %v17254_v61  ;;  %v17316_v47 = vld [vmem:[#allocation2 + $0x8c] sm:$0x1]  ;;  %v9370_v32 = vld [vmem:[#allocation2 + $0x90] sm:$0xf] }
 0x341   : > { %13021 = vmatmul.mubr.bf16.gmra.mxu1 %v13373_v7  ;;  %v9587_v39 = vor.u32 %v9586_v12, %v9583_v59  ;;  %v9605_v60 = vshrl.u32 %v9367_v49, 16  ;;  %v12738_v53 = vpop.f32.mrf.mxu1  ;;  %v9597_v62 = vor.u32 %v9596_v33, %v9592_v21  ;;  %v17321_v38 = vadd.f32 %v17159_v57, %v12735_v10  ;;  %v13386_v57 = vld [vmem:[%s18360_s4 + $0x208] sm:$0xff]  }
 0x342   : > { %18563 = vst [vmem:[#allocation31_spill] sm:$0xff] %v17312_v56  ;;  %v9579_v58 = vsel %vm13543_vm2, %v9574_v45, %v9578_v23  ;;  %13024 = vmatprep.mubr.bf16.mxu1 %v13375_v36  ;;  %v17324_v59 = vadd.f32 %v17170_v52, %v6436_v35  ;;  %v9608_v46 = vshll.u32 %v9367_v49, 16  ;;  %13101 = vmatpush3.bf16.msra.mxu1 %v13380_v8  ;;  %v9614_v7 = vshll.u32 %v17314_v41, 16  ;;  %v17339_v35 = vld [vmem:[#allocation2 + $0x94] sm:$0xf] }
 0x343   : > { %18564 = vst [vmem:[#allocation15_spill] sm:$0xff] %v17321_v38  ;;  %v11734_v29 = vcombine.low %v9569_v4, %v9579_v58  ;;  %v9588_v61 = vrot.slane %v9587_v39, 4  ;;  %v9607_v14 = vrot.slane %v9605_v60, 4  ;;  %v6449_v30 = vpop.f32.mrf.mxu1  ;;  %v9598_v20 = vrot.slane %v9597_v62, 4  ;;  %13102 = vmatprep.subr.bf16.mxu1 %v13383_v5  ;;  %v17341_v49 = vld [vmem:[#allocation2 + $0x98] sm:$0x1] }
 0x344   : > { %18565 = vst [vmem:[#allocation5_spill] sm:$0xff] %v17324_v59  ;;  %v9618_v23 = vshrl.u32 %v17314_v41, 16  ;;  %v9624_v36 = vshll.u32 %v17316_v47, 16  ;;  %v17329_v33 = vpop.f32.mrf.mxu0  ;;  %v9610_v10 = vrot.slane %v9608_v46, 5  ;;  %v17337_v8 = vadd.f32 %v17186_v9, %v12738_v53  ;;  %18567 = vst [vmem:[#allocation13_spill] sm:$0xff] %v17341_v49  ;;  %v13378_v53 = vld [vmem:[#allocation2 + $0x78] sm:$0xff]  }
 0x345   : > { %13073 = vmatmul.mubr.bf16.gmra.mxu0 %v11734_v29  ;;  %v9593_v52 = vsel %vm13543_vm2, %v9588_v61, %v9592_v21  ;;  %v9629_v12 = vshrl.u32 %v9370_v32, 16  ;;  %v12739_v45 = vpop.f32.mrf.mxu1  ;;  %v9603_v4 = vsel %vm13543_vm2, %v9598_v20, %v9602_v18  ;;  %v9616_v39 = vrot.slane %v9614_v7, 5  ;;  %v13376_v61 = vld [vmem:[#allocation2 + $0x6c] sm:$0xff]   ;;  %v9373_v20 = vld [vmem:[#allocation2 + $0x9c] sm:$0xf] }
 0x346   : > { %18566 = vst [vmem:[#allocation7_spill] sm:$0xff] %v17337_v8  ;;  %v9620_v60 = vrot.slane %v9618_v23, 4  ;;  %v9626_v58 = vrot.slane %v9624_v36, 5  ;;  %v17345_v62 = vpop.f32.mrf.mxu0  ;;  %v11735_v29 = vcombine.low %v9593_v52, %v9603_v4  ;;  %v9611_v21 = vor.u32 %v9610_v10, %v9607_v14  ;;  %13103 = vmatpush3.bf16.msra.mxu1 %v13383_v5  ;;  %v13389_v14 = vld [vmem:[%s18360_s4 + $0x200] sm:$0xff]  }
 0x347   : > { %v9631_v46 = vrot.slane %v9629_v12, 4  ;;  %v9632_v9 = vshll.u32 %v9370_v32, 16  ;;  %v9638_v59 = vshll.u32 %v17339_v35, 16  ;;  %v9642_v38 = vshrl.u32 %v17339_v35, 16  ;;  %v6452_v18 = vpop.f32.mrf.mxu1  ;;  %13104 = vmatprep.subr.bf16.mxu1 %v13386_v57  ;;  %v17361_v52 = vld [vmem:[#allocation2 + $0xa0] sm:$0xf] }
 0x348   : > { %v9621_v8 = vor.u32 %v9620_v60, %v9616_v39  ;;  %v9648_v56 = vshll.u32 %v17341_v49, 16  ;;  %v17350_v7 = vpop.f32.mrf.mxu0  ;;  %13076 = vmatprep.mubr.bf16.mxu0 %v11735_v29  ;;  %v9612_v32 = vrot.slane %v9611_v21, 4  ;;  %v17356_v23 = vadd.f32 %v17204_v3, %v6449_v30  ;;  %18570 = vst [vmem:[#allocation11_spill] sm:$0xff] %v17361_v52  ;;  %v17370_v3 = vld [vmem:[#allocation2 + $0xa4] sm:$0x1] }
 0x349   : > { %13025 = vmatmul.mubr.bf16.gmra.mxu1 %v13376_v61  ;;  %v9634_v5 = vrot.slane %v9632_v9, 5  ;;  %v17359_v36 = vadd.f32 %v17225_v1, %v12739_v45  ;;  %v9640_v12 = vrot.slane %v9638_v59, 5  ;;  %v9644_v4 = vrot.slane %v9642_v38, 4  ;;  %18572 = vst [vmem:[#allocation18_spill] sm:$0xff] %v17370_v3 }
 0x34a   : > { %18568 = vst [vmem:[#allocation8_spill] sm:$0xff] %v17356_v23  ;;  %v9622_v10 = vrot.slane %v9621_v8, 4  ;;  %v9650_v60 = vrot.slane %v9648_v56, 5  ;;  %13028 = vmatprep.mubr.bf16.mxu1 %v13378_v53  ;;  %v17363_v49 = vpop.f32.mrf.mxu0  ;;  %v9617_v29 = vsel %vm13543_vm2, %v9612_v32, %v9616_v39  ;;  %v17368_v61 = vadd.f32 %v17240_v17, %v6452_v18  ;;  %13105 = vmatpush3.bf16.msra.mxu1 %v13386_v57  ;;  %v9376_v8 = vld [vmem:[#allocation2 + $0xa8] sm:$0xf] }
 0x34b   : > { %18569 = vst [vmem:[#allocation6_spill] sm:$0xff] %v17359_v36  ;;  %v9635_v21 = vor.u32 %v9634_v5, %v9631_v46  ;;  %v9653_v1 = vshrl.u32 %v9373_v20, 16  ;;  %v9645_v59 = vor.u32 %v9644_v4, %v9640_v12  ;;  %v9656_v38 = vshll.u32 %v9373_v20, 16  ;;  %13106 = vmatprep.subr.bf16.mxu1 %v13389_v14  ;;  %v13381_v36 = vld [vmem:[#allocation2 + $0x90] sm:$0xff]  }
 0x34c   : > { %18571 = vst [vmem:[#allocation16_spill] sm:$0xff] %v17368_v61  ;;  %v9627_v30 = vsel %vm13543_vm2, %v9622_v10, %v9626_v58  ;;  %v9662_v56 = vshll.u32 %v17361_v52, 16  ;;  %v17375_v45 = vpop.f32.mrf.mxu0  ;;  %v9666_v17 = vshrl.u32 %v17361_v52, 16  ;;  %v9672_v57 = vshll.u32 %v17370_v3, 16  ;;  %v17379_v58 = vld [vmem:[#allocation2 + $0xac] sm:$0xf] }
 0x34d   : > { %v11736_v39 = vcombine.low %v9617_v29, %v9627_v30  ;;  %v9636_v46 = vrot.slane %v9635_v21, 4  ;;  %v9655_v9 = vrot.slane %v9653_v1, 4  ;;  %v9646_v53 = vrot.slane %v9645_v59, 4  ;;  %18573 = vst [vmem:[#allocation22_spill] sm:$0xff] %v17379_v58  ;;  %v13379_v21 = vld [vmem:[#allocation2 + $0x84] sm:$0xff]  }
 0x34e   : > { %v9658_v18 = vrot.slane %v9656_v38, 5  ;;  %v9664_v32 = vrot.slane %v9662_v56, 5  ;;  %v12742_v5 = vpop.f32.mrf.mxu1  ;;  %v17381_v20 = vpop.f32.mrf.mxu0  ;;  %v9668_v4 = vrot.slane %v9666_v17, 4  ;;  %v17388_v1 = vld [vmem:[#allocation2 + $0xb0] sm:$0x1]  ;;  %v9677_v30 = vshrl.u32 %v9376_v8, 16  ;;  %13107 = vmatpush3.bf16.msra.mxu1 %v13389_v14 }
 0x34f   : > { %13077 = vmatmul.mubr.bf16.gmra.mxu0 %v11736_v39  ;;  %v9641_v10 = vsel %vm13543_vm2, %v9636_v46, %v9640_v12  ;;  %v17386_v29 = vadd.f32 %v17258_v13, %v12742_v5  ;;  %18575 = vst [vmem:[#allocation32_spill] sm:$0xff] %v17388_v1  ;;  %v9651_v59 = vsel %vm13543_vm2, %v9646_v53, %v9650_v60  ;;  %v9674_v56 = vrot.slane %v9672_v57, 5 }
 0x350   : > { %v9659_v38 = vor.u32 %v9658_v18, %v9655_v9  ;;  %v9680_v61 = vshll.u32 %v9376_v8, 16  ;;  %v6465_v39 = vpop.f32.mrf.mxu1  ;;  %v17392_v23 = vpop.f32.mrf.mxu0  ;;  %v11737_v12 = vcombine.low %v9641_v10, %v9651_v59  ;;  %v9669_v46 = vor.u32 %v9668_v4, %v9664_v32  ;;  %v9379_v9 = vld [vmem:[#allocation2 + $0xb4] sm:$0xf]  ;;  %v17405_v4 = vld [vmem:[#allocation2 + $0xb8] sm:$0xf] }
 0x351   : > { %18574 = vst [vmem:[#allocation24_spill] sm:$0xff] %v17386_v29  ;;  %13029 = vmatmul.mubr.bf16.gmra.mxu1 %v13379_v21  ;;  %v9679_v13 = vrot.slane %v9677_v30, 4  ;;  %v9686_v17 = vshll.u32 %v17379_v58, 16  ;;  %v9690_v14 = vshrl.u32 %v17379_v58, 16  ;;  %v9696_v3 = vshll.u32 %v17388_v1, 16  ;;  %18578 = vst [vmem:[#allocation9_spill] sm:$0xff] %v17405_v4 }
 0x352   : > { %v9660_v5 = vrot.slane %v9659_v38, 4  ;;  %v9682_v29 = vrot.slane %v9680_v61, 5  ;;  %13032 = vmatprep.mubr.bf16.mxu1 %v13381_v36  ;;  %v12743_v60 = vpop.f32.mrf.mxu1  ;;  %v17397_v8 = vpop.f32.mrf.mxu0  ;;  %13080 = vmatprep.mubr.bf16.mxu0 %v11737_v12  ;;  %v9670_v53 = vrot.slane %v9669_v46, 4  ;;  %v17400_v57 = vadd.f32 %v17279_v44, %v6465_v39  ;;  %v17414_v12 = vld [vmem:[#allocation2 + $0xbc] sm:$0x1] }
 0x353   : > { %v9688_v18 = vrot.slane %v9686_v17, 5  ;;  %v17403_v10 = vadd.f32 %v17296_v27, %v12743_v60  ;;  %v9692_v36 = vrot.slane %v9690_v14, 4  ;;  %18580 = vst [vmem:[#allocation25_spill] sm:$0xff] %v17414_v12  ;;  %v9701_v44 = vshrl.u32 %v9379_v9, 16  ;;  %v17430_v1 = vld [vmem:[#allocation2 + $0xc8] sm:$0x1] }
 0x354   : > { %18576 = vst [vmem:[#allocation20_spill] sm:$0xff] %v17400_v57  ;;  %v9665_v61 = vsel %vm13543_vm2, %v9660_v5, %v9664_v32  ;;  %v9683_v21 = vor.u32 %v9682_v29, %v9679_v13  ;;  %v6468_v30 = vpop.f32.mrf.mxu1  ;;  %v9675_v59 = vsel %vm13543_vm2, %v9670_v53, %v9674_v56  ;;  %v9704_v39 = vshll.u32 %v9379_v9, 16  ;;  %v17416_v27 = vpop.f32.mrf.mxu0  ;;  %v13382_v13 = vld [vmem:[#allocation2 + $0x9c] sm:$0xff]   ;;  %v17420_v53 = vld [vmem:[#allocation2 + $0xc4] sm:$0xf] }
 0x355   : > { %18577 = vst [vmem:[#allocation21_spill] sm:$0xff] %v17403_v10  ;;  %v17412_v38 = vadd.f32 %v17303_v50, %v6468_v30  ;;  %v11738_v46 = vcombine.low %v9665_v61, %v9675_v59  ;;  %v9693_v60 = vor.u32 %v9692_v36, %v9688_v18  ;;  %v9710_v32 = vshll.u32 %v17405_v4, 16  ;;  %v9382_v5 = vld [vmem:[#allocation2 + $0xc0] sm:$0xf]  ;;  %18581 = vst [vmem:[#allocation27_spill] sm:$0xff] %v17420_v53  ;;  %v13384_v36 = vld [vmem:[#allocation2 + $0xa8] sm:$0xff]  }
 0x356   : > { %v9684_v17 = vrot.slane %v9683_v21, 4  ;;  %v12746_v29 = vpop.f32.mrf.mxu1  ;;  %v9698_v14 = vrot.slane %v9696_v3, 5  ;;  %v9703_v10 = vrot.slane %v9701_v44, 4  ;;  %v9706_v56 = vrot.slane %v9704_v39, 5  ;;  %v17422_v30 = vpop.f32.mrf.mxu0 }
 0x357   : > { %18579 = vst [vmem:[#allocation14_spill] sm:$0xff] %v17412_v38  ;;  %v9714_v50 = vshrl.u32 %v17405_v4, 16  ;;  %13081 = vmatmul.mubr.bf16.gmra.mxu0 %v11738_v46  ;;  %v9694_v9 = vrot.slane %v9693_v60, 4  ;;  %v9712_v38 = vrot.slane %v9710_v32, 5  ;;  %v9720_v61 = vshll.u32 %v17414_v12, 16 }
 0x358   : > { %v17426_v21 = vadd.f32 %v17329_v33, %v12746_v29  ;;  %v6481_v59 = vpop.f32.mrf.mxu1  ;;  %v9689_v3 = vsel %vm13543_vm2, %v9684_v17, %v9688_v18  ;;  %v9707_v44 = vor.u32 %v9706_v56, %v9703_v10  ;;  %v9725_v57 = vshrl.u32 %v9382_v5, 16  ;;  %v17432_v58 = vpop.f32.mrf.mxu0 }
 0x359   : > { %v9716_v39 = vrot.slane %v9714_v50, 4  ;;  %13033 = vmatmul.mubr.bf16.gmra.mxu1 %v13382_v13  ;;  %v9699_v46 = vsel %vm13543_vm2, %v9694_v9, %v9698_v14  ;;  %v9728_v60 = vshll.u32 %v9382_v5, 16  ;;  %v9734_v33 = vshll.u32 %v17420_v53, 16  ;;  %v10094_v14 = vld [vmem:[#allocation2 + $0x18] sm:$0xe] }
 0x35a   : > { %18582 = vst [vmem:[#allocation26_spill] sm:$0xff] %v17426_v21  ;;  %v9738_v32 = vshrl.u32 %v17420_v53, 16  ;;  %13036 = vmatprep.mubr.bf16.mxu1 %v13384_v36  ;;  %v12747_v29 = vpop.f32.mrf.mxu1  ;;  %v11739_v21 = vcombine.low %v9689_v3, %v9699_v46  ;;  %v9708_v18 = vrot.slane %v9707_v44, 4  ;;  %v9727_v17 = vrot.slane %v9725_v57, 4  ;;  %v17438_v13 = vpop.f32.mrf.mxu0  ;;  %v9385_v57 = vld [vmem:[#allocation2 + $0xcc] sm:$0xf] }
 0x35b   : > { %v9717_v10 = vor.u32 %v9716_v39, %v9712_v38  ;;  %v9730_v56 = vrot.slane %v9728_v60, 5  ;;  %v9736_v50 = vrot.slane %v9734_v33, 5  ;;  %v9744_v4 = vshll.u32 %v17430_v1, 16 }
 0x35c   : > { %v9740_v12 = vrot.slane %v9738_v32, 4  ;;  %v6484_v52 = vpop.f32.mrf.mxu1  ;;  %13084 = vmatprep.mubr.bf16.mxu0 %v11739_v21  ;;  %v9722_v9 = vrot.slane %v9720_v61, 5  ;;  %v17442_v53 = vadd.f32 %v17345_v62, %v6481_v59  ;;  %v17445_v36 = vadd.f32 %v17350_v7, %v12747_v29  ;;  %v17447_v3 = vpop.f32.mrf.mxu0  ;;  %v13385_v62 = vld [vmem:[#allocation2 + $0xb4] sm:$0xff]   ;;  %v17459_v32 = vld [vmem:[#allocation2 + $0xd0] sm:$0xf] }
 0x35d   : > { %v9718_v5 = vrot.slane %v9717_v10, 4  ;;  %v9713_v44 = vsel %vm13543_vm2, %v9708_v18, %v9712_v38  ;;  %v9731_v39 = vor.u32 %v9730_v56, %v9727_v17  ;;  %v17452_v60 = vadd.f32 %v17363_v49, %v6484_v52  ;;  %v17465_v56 = vld [vmem:[#allocation2 + $0xd4] sm:$0x1] }
 0x35e   : > { %v9741_v46 = vor.u32 %v9740_v12, %v9736_v50  ;;  %v9746_v21 = vrot.slane %v9744_v4, 5  ;;  %v17456_v59 = vpop.f32.mrf.mxu0  ;;  %v11751_v7 = vrot.slane %v10094_v14, 9  ;;  %v10160_v33 = vrot.slane %v17107_v43, 5  ;;  %v13387_v12 = vld [vmem:[#allocation2 + $0xc0] sm:$0xff]  }
 0x35f   : > { %v9723_v61 = vsel %vm13543_vm2, %v9718_v5, %v9722_v9  ;;  %v9732_v10 = vrot.slane %v9731_v39, 4  ;;  %v9749_v17 = vshrl.u32 %v9385_v57, 16  ;;  %v10163_v4 = vrot.slane %v17112_v63, 5 }
 0x360   : > { %v11740_v29 = vcombine.low %v9713_v44, %v9723_v61  ;;  %v9742_v38 = vrot.slane %v9741_v46, 4  ;;  %v12750_v18 = vpop.f32.mrf.mxu1  ;;  %v10162_v52 = vrot.slane %v10160_v33, 4  ;;  %v9752_v14 = vshll.u32 %v9385_v57, 16  ;;  %v17467_v5 = vpop.f32.mrf.mxu0 }
 0x361   : > { %v17462_v49 = vadd.f32 %v17375_v45, %v12750_v18  ;;  %13037 = vmatmul.mubr.bf16.gmra.mxu1 %v13385_v62  ;;  %v9737_v43 = vsel %vm13543_vm2, %v9732_v10, %v9736_v50  ;;  %v9751_v45 = vrot.slane %v9749_v17, 4  ;;  %v9758_v39 = vshll.u32 %v17459_v32, 16 }
 0x362   : > { %13085 = vmatmul.mubr.bf16.gmra.mxu0 %v11740_v29  ;;  %v9747_v9 = vsel %vm13543_vm2, %v9742_v38, %v9746_v21  ;;  %13040 = vmatprep.mubr.bf16.mxu1 %v13387_v12  ;;  %v6497_v44 = vpop.f32.mrf.mxu1  ;;  %v10164_v57 = vsel %vm13895_vm5, %v10162_v52, %v10163_v4  ;;  %v9754_v61 = vrot.slane %v9752_v14, 5  ;;  %v17479_v62 = vpop.f32.mrf.mxu0  ;;  %v10095_v29 = vld [vmem:[#allocation2 + $0x24] sm:$0xe]  ;;  %v17483_v50 = vadd.f32 %v17047_v26, %v17157_v15  ;;  %v13388_v12 = vld [vmem:[#allocation2 + $0xcc] sm:$0xff]  }
 0x363   : > { %v11741_v46 = vcombine.low %v9737_v43, %v9747_v9  ;;  %v17475_v63 = vadd.f32 %v17381_v20, %v6497_v44  ;;  %v9760_v10 = vrot.slane %v9758_v39, 5  ;;  %v9762_v38 = vshrl.u32 %v17459_v32, 16  ;;  %v10096_v15 = vld [vmem:[#allocation2 + $0x30] sm:$0xe] }
 0x364   : > { %v12751_v21 = vpop.f32.mrf.mxu1  ;;  %v9768_v18 = vshll.u32 %v17465_v56, 16  ;;  %v10161_v17 = vsel %vm13895_vm5, %v11751_v7, %v10160_v33  ;;  %v9755_v52 = vor.u32 %v9754_v61, %v9751_v45  ;;  %v17492_v4 = vpop.f32.mrf.mxu0  ;;  %v10167_v26 = vrot.slane %v17133_v2, 5  ;;  %v10097_v7 = vld [vmem:[#allocation2 + $0x3c] sm:$0xe] }
 0x365   : > { %18583 = vst [vmem:[#allocation33_spill] sm:$0xff] %v17475_v63  ;;  %13088 = vmatprep.mubr.bf16.mxu0 %v11741_v46  ;;  %v17488_v20 = vadd.f32 %v17392_v23, %v12751_v21  ;;  %v11783_v43 = vcombine.low %v10161_v17, %v10164_v57  ;;  %v9764_v9 = vrot.slane %v9762_v38, 4  ;;  %v11752_v39 = vrot.slane %v10095_v29, 9 }
 0x366   : > { %v6500_v14 = vpop.f32.mrf.mxu1  ;;  %v9770_v44 = vrot.slane %v9768_v18, 5  ;;  %v9756_v23 = vrot.slane %v9755_v52, 4  ;;  %v10169_v21 = vrot.slane %v10167_v26, 4  ;;  %v17499_v63 = vpop.f32.mrf.mxu0  ;;  %v11753_v61 = vrot.slane %v10096_v15, 9 }
 0x367   : > { %18584 = vst [vmem:[#allocation34_spill] sm:$0xff] %v17488_v20  ;;  %v17496_v46 = vadd.f32 %v17397_v8, %v6500_v14  ;;  %v10170_v20 = vrot.slane %v17136_v54, 5  ;;  %v9765_v45 = vor.u32 %v9764_v9, %v9760_v10  ;;  %v10168_v2 = vsel %vm13895_vm5, %v11752_v39, %v10167_v26 }
 0x368   : > { %v12754_v33 = vpop.f32.mrf.mxu1  ;;  %v10174_v57 = vrot.slane %v17155_v48, 5  ;;  %v10177_v54 = vrot.slane %v17164_v25, 5  ;;  %v17510_v38 = vpop.f32.mrf.mxu0  ;;  %v10181_v18 = vrot.slane %v17174_v34, 5  ;;  %v9761_v52 = vsel %vm13543_vm2, %v9756_v23, %v9760_v10 }
 0x369   : > { %v17505_v29 = vadd.f32 %v17416_v27, %v12754_v33  ;;  %13041 = vmatmul.mubr.bf16.gmra.mxu1 %v13388_v12  ;;  %v10171_v8 = vsel %vm13895_vm5, %v10169_v21, %v10170_v20  ;;  %v9766_v26 = vrot.slane %v9765_v45, 4  ;;  %v11754_v15 = vrot.slane %v10097_v7, 9  ;;  %v10098_v27 = vld [vmem:[#allocation2 + $0x48] sm:$0xe] }
 0x36a   : > { %13108 = vmatprep.mubr.bf16.mxu1 %v11783_v43  ;;  %v6513_v17 = vpop.f32.mrf.mxu1  ;;  %v10176_v48 = vrot.slane %v10174_v57, 4  ;;  %v11784_v14 = vcombine.low %v10168_v2, %v10171_v8  ;;  %v17518_v20 = vpop.f32.mrf.mxu0  ;;  %v10183_v25 = vrot.slane %v10181_v18, 4  ;;  %v10184_v9 = vrot.slane %v17181_v24, 5 }
 0x36b   : > { %v17516_v12 = vadd.f32 %v17422_v30, %v6513_v17  ;;  %v9771_v34 = vsel %vm13543_vm2, %v9766_v26, %v9770_v44  ;;  %v10175_v10 = vsel %vm13895_vm5, %v11753_v61, %v10174_v57  ;;  %v10188_v23 = vrot.slane %v17189_v16, 5  ;;  %v10099_v44 = vld [vmem:[#allocation2 + $0x54] sm:$0xe]  ;;  %v10100_v57 = vld [vmem:[#allocation2 + $0x60] sm:$0xe] }
 0x36c   : > { %v12755_v43 = vpop.f32.mrf.mxu1  ;;  %v10178_v39 = vsel %vm13895_vm5, %v10176_v48, %v10177_v54  ;;  %v11742_v30 = vcombine.low %v9761_v52, %v9771_v34  ;;  %v17531_v7 = vpop.f32.mrf.mxu0  ;;  %v17535_v24 = vsel %vm13895_vm5, %v10183_v25, %v10184_v9  ;;  %v11755_v19 = vrot.slane %v10098_v27, 9 }
 0x36d   : > { %v17529_v21 = vadd.f32 %v17432_v58, %v12755_v43  ;;  %v11785_v45 = vcombine.low %v10175_v10, %v10178_v39  ;;  %v10182_v2 = vsel %vm13895_vm5, %v11754_v15, %v10181_v18  ;;  %v10190_v61 = vrot.slane %v10188_v23, 4 }
 0x36e   : > { %v6516_v33 = vpop.f32.mrf.mxu1  ;;  %v10191_v16 = vrot.slane %v17196_v11, 5  ;;  %13089 = vmatmul.mubr.bf16.gmra.mxu0 %v11742_v30  ;;  %v11786_v8 = vcombine.low %v10182_v2, %v17535_v24  ;;  %v17544_v54 = vpop.f32.mrf.mxu0  ;;  %v10189_v17 = vsel %vm13895_vm5, %v11755_v19, %v10188_v23  ;;  %v10195_v52 = vrot.slane %v17209_v28, 5  ;;  %v10102_v23 = vld [vmem:[#allocation2 + $0x78] sm:$0xe]  ;;  %v10103_v2 = vld [vmem:[#allocation2 + $0x84] sm:$0xe] }
 0x36f   : > { %18585 = vst [vmem:[#allocation36_spill] sm:$0xff] %v17529_v21  ;;  %v17541_v58 = vadd.f32 %v17438_v13, %v6516_v33  ;;  %v11756_v48 = vrot.slane %v10099_v44, 9  ;;  %v10198_v11 = vrot.slane %v17221_v31, 5  ;;  %v10202_v15 = vrot.slane %v17234_v55, 5  ;;  %v10101_v13 = vld [vmem:[#allocation2 + $0x6c] sm:$0xe] }
 0x370   : > { %v12822_v26 = vpop.f32.mrf.mxu1  ;;  %v10192_v18 = vsel %vm13895_vm5, %v10190_v61, %v10191_v16  ;;  %v17556_v25 = vpop.f32.mrf.mxu0  ;;  %v10197_v9 = vrot.slane %v10195_v52, 4  ;;  %v11757_v34 = vrot.slane %v10100_v57, 9  ;;  %v10205_v28 = vrot.slane %v17246_v40, 5  ;;  %v18587_v33 = vld [vmem:[#allocation30_spill] sm:$0xff]  ;;  %v18597_v44 = vld [vmem:[#allocation9_spill] sm:$0xff] }
 0x371   : > { %18586 = vst [vmem:[#allocation35_spill] sm:$0xff] %v17541_v58  ;;  %v17554_v27 = vadd.f32 %v12822_v26, %v17194_v22  ;;  %13109 = vmatmul.mubr.bf16.vlgmr.msra.gmra.mxu1 %v11784_v14  ;;  %v11787_v10 = vcombine.low %v10189_v17, %v10192_v18  ;;  %v17561_v39 = vsel %vm13895_vm5, %v11756_v48, %v10195_v52  ;;  %v10204_v31 = vrot.slane %v10202_v15, 4  ;;  %v18588_v61 = vld [vmem:[#allocation10_spill] sm:$0xff] }
 0x372   : > { %13112 = vmatprep.mubr.bf16.mxu1 %v11785_v45  ;;  %v7156_v43 = vpop.f32.mrf.mxu1  ;;  %v10209_v55 = vrot.slane %v17268_v6, 5  ;;  %v17567_v14 = vpop.f32.mrf.mxu0  ;;  %v17571_v30 = vsel %vm13895_vm5, %v10197_v9, %v10198_v11  ;;  %v17575_v40 = vsel %vm13895_vm5, %v11757_v34, %v10202_v15  ;;  %v11758_v24 = vrot.slane %v10101_v13, 9  ;;  %v10104_v9 = vld [vmem:[#allocation2 + $0x90] sm:$0xe] }
 0x373   : > { %v17565_v22 = vadd.f32 %v7156_v43, %v17213_v42  ;;  %v17581_v6 = vsel %vm13895_vm5, %v10204_v31, %v10205_v28  ;;  %v10212_v45 = vrot.slane %v18587_v33, 5  ;;  %v11759_v52 = vrot.slane %v10102_v23, 9 }
 0x374   : > { %v12823_v19 = vpop.f32.mrf.mxu1  ;;  %v10211_v42 = vrot.slane %v10209_v55, 4  ;;  %v17587_v57 = vpop.f32.mrf.mxu0  ;;  %v11789_v17 = vcombine.low %v17575_v40, %v17581_v6  ;;  %v10216_v26 = vrot.slane %v17284_v0, 5  ;;  %v17594_v48 = vsel %vm13895_vm5, %v11758_v24, %v10209_v55  ;;  %v18589_v24 = vld [vmem:[#allocation17_spill] sm:$0xff] }
 0x375   : > { %v17585_v16 = vadd.f32 %v12823_v19, %v18588_v61  ;;  %v10219_v15 = vrot.slane %v17291_v51, 5  ;;  %v10223_v13 = vrot.slane %v17314_v41, 5  ;;  %v11760_v31 = vrot.slane %v10103_v2, 9  ;;  %v18590_v61 = vld [vmem:[#allocation13_spill] sm:$0xff] }
 0x376   : > { %v7159_v18 = vpop.f32.mrf.mxu1  ;;  %v17598_v11 = vsel %vm13895_vm5, %v10211_v42, %v10212_v45  ;;  %v17605_v28 = vpop.f32.mrf.mxu0  ;;  %v10218_v43 = vrot.slane %v10216_v26, 4  ;;  %v17611_v23 = vsel %vm13895_vm5, %v11759_v52, %v10216_v26  ;;  %v10226_v51 = vrot.slane %v17316_v47, 5  ;;  %v10105_v45 = vld [vmem:[#allocation2 + $0x9c] sm:$0xe]  ;;  %v18591_v26 = vld [vmem:[#allocation28_spill] sm:$0xff] }
 0x377   : > { %v17603_v34 = vadd.f32 %v7159_v18, %v17483_v50  ;;  %v10225_v40 = vrot.slane %v10223_v13, 4  ;;  %v10230_v41 = vrot.slane %v17339_v35, 5  ;;  %v17624_v42 = vsel %vm13895_vm5, %v11760_v31, %v10223_v13  ;;  %v18594_v31 = vld [vmem:[#allocation12_spill] sm:$0xff]  ;;  %v18596_v13 = vld [vmem:[#allocation18_spill] sm:$0xff] }
 0x378   : > { %v12826_v55 = vpop.f32.mrf.mxu1  ;;  %v17616_v19 = vpop.f32.mrf.mxu0  ;;  %v17620_v6 = vsel %vm13895_vm5, %v10218_v43, %v10219_v15  ;;  %v11761_v33 = vrot.slane %v10104_v9, 9  ;;  %v10233_v52 = vrot.slane %v18590_v61, 5  ;;  %v18592_v9 = vld [vmem:[#allocation11_spill] sm:$0xff] }
 0x379   : > { %v7289_v50 = vadd.f32 %v12826_v55, %v18589_v24  ;;  %13113 = vmatmul.mubr.bf16.gmra.mxu1 %v11786_v8  ;;  %v11791_v47 = vcombine.low %v17611_v23, %v17620_v6  ;;  %v17630_v35 = vsel %vm13895_vm5, %v10225_v40, %v10226_v51  ;;  %v10232_v8 = vrot.slane %v10230_v41, 4  ;;  %v18593_v43 = vld [vmem:[#allocation19_spill] sm:$0xff] }
 0x37a   : > { %13116 = vmatprep.mubr.bf16.mxu1 %v11787_v10  ;;  %v7172_v2 = vpop.f32.mrf.mxu1  ;;  %v17634_v15 = vpop.f32.mrf.mxu0  ;;  %v10237_v10 = vrot.slane %v18592_v9, 5  ;;  %v6726_v55 = vadd.f32 %v18594_v31, %v18593_v43  ;;  %v17643_v40 = vsel %vm13895_vm5, %v11761_v33, %v10230_v41  ;;  %v11762_v24 = vrot.slane %v10105_v45, 9  ;;  %v18595_v6 = vld [vmem:[#allocation23_spill] sm:$0xff]  ;;  %v10107_v31 = vld [vmem:[#allocation2 + $0xb4] sm:$0xe] }
 0x37b   : > { %v7287_v18 = vadd.f32 %v7172_v2, %v18591_v26  ;;  %v17647_v51 = vsel %vm13895_vm5, %v10232_v8, %v10233_v52  ;;  %v10240_v43 = vrot.slane %v18596_v13, 5  ;;  %v10251_v41 = vrot.slane %v18597_v44, 5  ;;  %v18598_v26 = vld [vmem:[#allocation25_spill] sm:$0xff] }
 0x37c   : > { %v12827_v23 = vpop.f32.mrf.mxu1  ;;  %v17650_v61 = vpop.f32.mrf.mxu0  ;;  %v10239_v9 = vrot.slane %v10237_v10, 4  ;;  %v17660_v45 = vsel %vm13895_vm5, %v11762_v24, %v10237_v10  ;;  %v11764_v13 = vrot.slane %v10107_v31, 9  ;;  %v10254_v21 = vrot.slane %v18598_v26, 5  ;;  %v18599_v44 = vld [vmem:[#allocation29_spill] sm:$0xff]  ;;  %v18601_v31 = vld [vmem:[#allocation31_spill] sm:$0xff] }
 0x37d   : > { %v7290_v2 = vadd.f32 %v12827_v23, %v18595_v6  ;;  %v10253_v6 = vrot.slane %v10251_v41, 4 }
 0x37e   : > { %v7175_v0 = vpop.f32.mrf.mxu1  ;;  %v17656_v58 = vpop.f32.mrf.mxu0  ;;  %v17664_v8 = vsel %vm13895_vm5, %v10239_v9, %v10240_v43  ;;  %v17677_v9 = vsel %vm13895_vm5, %v11764_v13, %v10251_v41  ;;  %v17694_v41 = vadd.f32 %v17456_v59, %v17565_v22  ;;  %v18603_v59 = vld [vmem:[#allocation5_spill] sm:$0xff] }
 0x37f   : > { %v7288_v33 = vadd.f32 %v7175_v0, %v6726_v55  ;;  %v18600_v55 = vcombine.low %v17561_v39, %v17571_v30  ;;  %v17681_v43 = vsel %vm13895_vm5, %v10253_v6, %v10254_v21  ;;  %v17701_v6 = vadd.f32 %v17467_v5, %v17585_v16 }
 0x380   : > { %v12830_v52 = vpop.f32.mrf.mxu1  ;;  %v17673_v10 = vpop.f32.mrf.mxu0  ;;  %v11796_v39 = vcombine.low %v17677_v9, %v17681_v43 }
 0x381   : > { %v7293_v0 = vadd.f32 %v12830_v52, %v18599_v44  ;;  %13117 = vmatmul.mubr.bf16.gmra.mxu1 %v18600_v55  ;;  %v18602_v52 = vld [vmem:[#allocation15_spill] sm:$0xff]  ;;  %v17705_v44 = vadd.f32 %v17479_v62, %v17603_v34  ;;  %v17720_v5 = vadd.f32 %v17518_v20, %v7288_v33 }
 0x382   : > { %13120 = vmatprep.mubr.bf16.mxu1 %v11789_v17  ;;  %v7188_v24 = vpop.f32.mrf.mxu1  ;;  %v17684_v23 = vpop.f32.mrf.mxu0  ;;  %v17690_v17 = vadd.f32 %v17447_v3, %v17554_v27  ;;  %v17708_v3 = vadd.f32 %v17492_v4, %v7289_v50  ;;  %v17711_v27 = vadd.f32 %v17499_v63, %v7287_v18  ;;  %v18604_v34 = vld [vmem:[#allocation7_spill] sm:$0xff]  ;;  %v18605_v18 = vcombine.low %v17594_v48, %v17598_v11  ;;  %v18608_v48 = vld [vmem:[#allocation22_spill] sm:$0xff] }
 0x383   : > { %v7291_v26 = vadd.f32 %v7188_v24, %v18601_v31  ;;  %v17717_v31 = vadd.f32 %v17510_v38, %v7290_v2  ;;  %v17723_v62 = vadd.f32 %v17531_v7, %v7293_v0  ;;  %v18606_v2 = vld [vmem:[#allocation8_spill] sm:$0xff]  ;;  %v10244_v11 = vrot.slane %v18608_v48, 5 }
 0x384   : > { %v12831_v30 = vpop.f32.mrf.mxu1  ;;  %v17697_v21 = vpop.f32.mrf.mxu0 }
 0x385   : > { %v7294_v13 = vadd.f32 %v12831_v30, %v18602_v52  ;;  %v17726_v4 = vadd.f32 %v17544_v54, %v7291_v26  ;;  %v18607_v26 = vld [vmem:[#allocation6_spill] sm:$0xff] }
 0x386   : > { %v7191_v55 = vpop.f32.mrf.mxu1  ;;  %v17714_v24 = vpop.f32.mrf.mxu0 }
 0x387   : > { %v7292_v22 = vadd.f32 %v7191_v55, %v18603_v59  ;;  %v17729_v63 = vadd.f32 %v17556_v25, %v7294_v13 }
 0x388   : > { %v12834_v16 = vpop.f32.mrf.mxu1  ;;  %v17735_v38 = vpop.f32.mrf.mxu0 }
 0x389   : > { %v7297_v50 = vadd.f32 %v12834_v16, %v18604_v34  ;;  %13121 = vmatmul.mubr.bf16.gmra.mxu1 %v18605_v18  ;;  %v17738_v20 = vadd.f32 %v17567_v14, %v7292_v22  ;;  %v18610_v16 = vld [vmem:[#allocation24_spill] sm:$0xff]  ;;  %v10106_v18 = vld [vmem:[#allocation2 + $0xa8] sm:$0xe] }
 0x38a   : > { %13124 = vmatprep.mubr.bf16.mxu1 %v11791_v47  ;;  %v7204_v7 = vpop.f32.mrf.mxu1  ;;  %v17741_v54 = vpop.f32.mrf.mxu0  ;;  %v18609_v47 = vld [vmem:[#allocation16_spill] sm:$0xff] }
 0x38b   : > { %v7295_v33 = vadd.f32 %v7204_v7, %v18606_v2  ;;  %v17744_v25 = vadd.f32 %v17587_v57, %v7297_v50  ;;  %v18611_v50 = vcombine.low %v17624_v42, %v17630_v35  ;;  %v10246_v7 = vrot.slane %v10244_v11, 4 }
 0x38c   : > { %v12835_v0 = vpop.f32.mrf.mxu1  ;;  %v17747_v52 = vpop.f32.mrf.mxu0 }
 0x38d   : > { %v7298_v30 = vadd.f32 %v12835_v0, %v18607_v26  ;;  %v17751_v13 = vadd.f32 %v17605_v28, %v7295_v33  ;;  %v18612_v33 = vcombine.low %v17643_v40, %v17647_v51  ;;  %v18613_v0 = vld [vmem:[#allocation20_spill] sm:$0xff]  ;;  %v18616_v40 = vld [vmem:[#allocation27_spill] sm:$0xff] }
 0x38e   : > { %v7207_v14 = vpop.f32.mrf.mxu1  ;;  %v17754_v59 = vpop.f32.mrf.mxu0  ;;  %v10258_v51 = vrot.slane %v18616_v40, 5 }
 0x38f   : > { %v7296_v55 = vadd.f32 %v7207_v14, %v18609_v47  ;;  %v17757_v22 = vadd.f32 %v17616_v19, %v7298_v30  ;;  %v18614_v30 = vld [vmem:[#allocation32_spill] sm:$0xff]  ;;  %v11763_v47 = vrot.slane %v10106_v18, 9 }
 0x390   : > { %v12838_v57 = vpop.f32.mrf.mxu1  ;;  %v17763_v2 = vpop.f32.mrf.mxu0  ;;  %v10247_v48 = vrot.slane %v18614_v30, 5 }
 0x391   : > { %v7301_v34 = vadd.f32 %v12838_v57, %v18610_v16  ;;  %13125 = vmatmul.mubr.bf16.gmra.mxu1 %v18611_v50  ;;  %v17766_v28 = vadd.f32 %v17634_v15, %v7296_v55  ;;  %v18615_v57 = vld [vmem:[#allocation21_spill] sm:$0xff] }
 0x392   : > { %13128 = vmatprep.mubr.bf16.mxu1 %v18612_v33  ;;  %v7220_v19 = vpop.f32.mrf.mxu1  ;;  %v17773_v14 = vpop.f32.mrf.mxu0  ;;  %v10248_v15 = vsel %vm13895_vm5, %v10246_v7, %v10247_v48  ;;  %v18618_v48 = vld [vmem:[#allocation26_spill] sm:$0xff] }
 0x393   : > { %v7299_v26 = vadd.f32 %v7220_v19, %v18613_v0  ;;  %v17776_v42 = vadd.f32 %v17650_v61, %v7301_v34  ;;  %v18617_v19 = vld [vmem:[#allocation14_spill] sm:$0xff]  ;;  %v10245_v61 = vsel %vm13895_vm5, %v11763_v47, %v10244_v11  ;;  %v10108_v47 = vld [vmem:[#allocation2 + $0xc0] sm:$0xe] }
 0x394   : > { %v12839_v35 = vpop.f32.mrf.mxu1  ;;  %v17781_v55 = vpop.f32.mrf.mxu0  ;;  %v11795_v7 = vcombine.low %v10245_v61, %v10248_v15  ;;  %v10261_v15 = vrot.slane %v17430_v1, 5 }
 0x395   : > { %v7302_v16 = vadd.f32 %v12839_v35, %v18615_v57  ;;  %v17785_v50 = vadd.f32 %v17656_v58, %v7299_v26  ;;  %v18619_v57 = vcombine.low %v17660_v45, %v17664_v8  ;;  %v10260_v58 = vrot.slane %v10258_v51, 4 }
 0x396   : > { %v7223_v33 = vpop.f32.mrf.mxu1  ;;  %v17790_v34 = vpop.f32.mrf.mxu0 }
 0x397   : > { %v7300_v0 = vadd.f32 %v7223_v33, %v18617_v19  ;;  %v17793_v18 = vadd.f32 %v17673_v10, %v7302_v16  ;;  %v10265_v10 = vrot.slane %v17459_v32, 5  ;;  %v10109_v19 = vld [vmem:[#allocation2 + $0xcc] sm:$0xe] }
 0x398   : > { %v12842_v30 = vpop.f32.mrf.mxu1  ;;  %v17799_v26 = vpop.f32.mrf.mxu0 }
 0x399   : > { %v7305_v35 = vadd.f32 %v12842_v30, %v18618_v48  ;;  %13129 = vmatmul.mubr.bf16.gmra.mxu1 %v18619_v57  ;;  %v17802_v40 = vadd.f32 %v17684_v23, %v7300_v0  ;;  %v11765_v30 = vrot.slane %v10108_v47, 9  ;;  %v10262_v23 = vsel %vm13895_vm5, %v10260_v58, %v10261_v15 }
 0x39a   : > { %13132 = vmatprep.mubr.bf16.mxu1 %v11795_v7  ;;  %v7236_v11 = vpop.f32.mrf.mxu1  ;;  %v7657_v33 = vpop.f32.mrf.mxu0  ;;  %v11766_v7 = vrot.slane %v10109_v19, 9  ;;  %v10267_v1 = vrot.slane %v10265_v10, 4  ;;  %v10268_v48 = vrot.slane %v17465_v56, 5 }
 0x39b   : > { %v7303_v16 = vadd.f32 %v7236_v11, %v17442_v53  ;;  %v17808_v45 = vadd.f32 %v17697_v21, %v7305_v35  ;;  %v10259_v35 = vsel %vm13895_vm5, %v11765_v30, %v10258_v51 }
 0x39c   : > { %v12843_v8 = vpop.f32.mrf.mxu1  ;;  %v11797_v11 = vcombine.low %v10259_v35, %v10262_v23  ;;  %v10266_v51 = vsel %vm13895_vm5, %v11766_v7, %v10265_v10 }
 0x39d   : > { %v7306_v61 = vadd.f32 %v12843_v8, %v17445_v36  ;;  %v17813_v0 = vpop.f32.mrf.mxu0  ;;  %v17816_v32 = vadd.f32 %v17714_v24, %v7303_v16  ;;  %v18620_v16 = vld [vmem:[#allocation33_spill] sm:$0xff] }
 0x39e   : > { %v7239_v53 = vpop.f32.mrf.mxu1 }
 0x39f   : > { %v7304_v21 = vadd.f32 %v7239_v53, %v17452_v60  ;;  %v17822_v36 = vpop.f32.mrf.mxu0  ;;  %v17825_v57 = vadd.f32 %v17735_v38, %v7306_v61  ;;  %v10269_v38 = vsel %vm13895_vm5, %v10267_v1, %v10268_v48 }
 0x3a1   : > { %v12846_v58 = vpop.f32.mrf.mxu1  ;;  %13133 = vmatmul.mubr.bf16.gmra.mxu1 %v11796_v39  ;;  %v17831_v47 = vpop.f32.mrf.mxu0  ;;  %v17834_v60 = vadd.f32 %v17741_v54, %v7304_v21  ;;  %v18621_v39 = vld [vmem:[#allocation34_spill] sm:$0xff]  ;;  %v11798_v54 = vcombine.low %v10266_v51, %v10269_v38 }
 0x3a2   : > { %v7309_v24 = vadd.f32 %v12846_v58, %v17462_v49  ;;  %13136 = vmatprep.mubr.bf16.mxu1 %v11797_v11 }
 0x3a3   : > { %v7252_v56 = vpop.f32.mrf.mxu1  ;;  %v17841_v49 = vpop.f32.mrf.mxu0 }
 0x3a4   : > { %v7307_v15 = vadd.f32 %v7252_v56, %v18620_v16  ;;  %v17844_v9 = vadd.f32 %v17747_v52, %v7309_v24  ;;  %v18623_v56 = vld [vmem:[#allocation35_spill] sm:$0xff] }
 0x3a5   : > { %v12847_v43 = vpop.f32.mrf.mxu1  ;;  %v17847_v8 = vpop.f32.mrf.mxu0 }
 0x3a6   : > { %v7310_v19 = vadd.f32 %v12847_v43, %v18621_v39  ;;  %v17850_v61 = vadd.f32 %v17754_v59, %v7307_v15 }
 0x3a7   : > { %v7255_v10 = vpop.f32.mrf.mxu1  ;;  %v17853_v30 = vpop.f32.mrf.mxu0 }
 0x3a8   : > { %v7308_v37 = vadd.f32 %v7255_v10, %v17496_v46  ;;  %v17856_v23 = vadd.f32 %v17763_v2, %v7310_v19  ;;  %v18622_v2 = vld [vmem:[#allocation36_spill] sm:$0xff] }
 0x3a9   : > { %v12850_v53 = vpop.f32.mrf.mxu1  ;;  %13137 = vmatmul.mubr.bf16.gmra.mxu1 %v11798_v54  ;;  %v17859_v7 = vpop.f32.mrf.mxu0 }
 0x3aa   : > { %v7313_v52 = vadd.f32 %v12850_v53, %v17505_v29  ;;  %v17862_v1 = vadd.f32 %v17773_v14, %v7308_v37 }
 0x3ab   : > { %v7268_v48 = vpop.f32.mrf.mxu1  ;;  %v17865_v21 = vpop.f32.mrf.mxu0 }
 0x3ac   : > { %v7311_v59 = vadd.f32 %v7268_v48, %v17516_v12  ;;  %v17868_v46 = vadd.f32 %v17781_v55, %v7313_v52 }
 0x3ad   : > { %v12851_v35 = vpop.f32.mrf.mxu1  ;;  %v17871_v11 = vpop.f32.mrf.mxu0 }
 0x3ae   : > { %v7314_v58 = vadd.f32 %v12851_v35, %v18622_v2  ;;  %v17874_v29 = vadd.f32 %v17790_v34, %v7311_v59 }
 0x3af   : > { %v7271_v24 = vpop.f32.mrf.mxu1  ;;  %v17877_v51 = vpop.f32.mrf.mxu0 }
 0x3b0   : > { %v7312_v14 = vadd.f32 %v7271_v24, %v18623_v56  ;;  %v17880_v12 = vadd.f32 %v17799_v26, %v7314_v58 }
 0x3b1   : > { %v12918_v38 = vpop.f32.mrf.mxu1  ;;  %v17885_v16 = vpop.f32.mrf.mxu0 }
 0x3b2   : > { %v17883_v55 = vadd.f32 %v12918_v38, %v17690_v17  ;;  %v17887_v15 = vadd.f32 %v7657_v33, %v7312_v14 }
 0x3b3   : > { %v8296_v43 = vpop.f32.mrf.mxu1  ;;  %v17892_v39 = vpop.f32.mrf.mxu0 }
 0x3b4   : > { %v17890_v34 = vadd.f32 %v8296_v43, %v17694_v41 }
 0x3b5   : > { %v12919_v19 = vpop.f32.mrf.mxu1  ;;  %v17897_v26 = vpop.f32.mrf.mxu0 }
 0x3b6   : > { %v17895_v54 = vadd.f32 %v12919_v19, %v17701_v6 }
 0x3b7   : > { %v8299_v10 = vpop.f32.mrf.mxu1  ;;  %v17902_v37 = vpop.f32.mrf.mxu0 }
 0x3b8   : > { %v17900_v17 = vadd.f32 %v8299_v10, %v17705_v44 }
 0x3b9   : > { %v12922_v33 = vpop.f32.mrf.mxu1  ;;  %v17907_v41 = vpop.f32.mrf.mxu0 }
 0x3ba   : > { %v17905_v53 = vadd.f32 %v12922_v33, %v17708_v3  ;;  %18624 = vst [vmem:[#allocation38_spill] sm:$0xff] %v17907_v41 }
 0x3bb   : > { %v8312_v52 = vpop.f32.mrf.mxu1  ;;  %v17912_v6 = vpop.f32.mrf.mxu0 }
 0x3bc   : > { %v17910_v48 = vadd.f32 %v8312_v52, %v17711_v27  ;;  %18625 = vst [vmem:[#allocation37_spill] sm:$0xff] %v17912_v6 }
 0x3bd   : > { %v12923_v59 = vpop.f32.mrf.mxu1  ;;  %v17917_v44 = vpop.f32.mrf.mxu0 }
 0x3be   : > { %v17915_v35 = vadd.f32 %v12923_v59, %v17717_v31  ;;  %18626 = vst [vmem:[#allocation39_spill] sm:$0xff] %v17917_v44 }
 0x3bf   : > { %v8315_v2 = vpop.f32.mrf.mxu1  ;;  %v17922_v3 = vpop.f32.mrf.mxu0 }
 0x3c0   : > { %v17920_v58 = vadd.f32 %v8315_v2, %v17720_v5  ;;  %18627 = vst [vmem:[#allocation40_spill] sm:$0xff] %v17922_v3 }
 0x3c1   : > { %v12926_v24 = vpop.f32.mrf.mxu1  ;;  %v17927_v27 = vpop.f32.mrf.mxu0 }
 0x3c2   : > { %v17925_v56 = vadd.f32 %v12926_v24, %v17723_v62  ;;  %18628 = vst [vmem:[#allocation41_spill] sm:$0xff] %v17927_v27 }
 0x3c3   : > { %v8328_v14 = vpop.f32.mrf.mxu1  ;;  %v17932_v31 = vpop.f32.mrf.mxu0 }
 0x3c4   : > { %v17930_v38 = vadd.f32 %v8328_v14, %v17726_v4  ;;  %18629 = vst [vmem:[#allocation43_spill] sm:$0xff] %v17932_v31 }
 0x3c5   : > { %v12927_v43 = vpop.f32.mrf.mxu1  ;;  %v17937_v5 = vpop.f32.mrf.mxu0 }
 0x3c6   : > { %v17935_v19 = vadd.f32 %v12927_v43, %v17729_v63  ;;  %18630 = vst [vmem:[#allocation42_spill] sm:$0xff] %v17937_v5 }
 0x3c7   : > { %v8331_v10 = vpop.f32.mrf.mxu1  ;;  %v17942_v62 = vpop.f32.mrf.mxu0 }
 0x3c8   : > { %v17940_v33 = vadd.f32 %v8331_v10, %v17738_v20  ;;  %18631 = vst [vmem:[#allocation45_spill] sm:$0xff] %v17942_v62 }
 0x3c9   : > { %v12930_v52 = vpop.f32.mrf.mxu1  ;;  %v17947_v4 = vpop.f32.mrf.mxu0 }
 0x3ca   : > { %v17945_v59 = vadd.f32 %v12930_v52, %v17744_v25  ;;  %18632 = vst [vmem:[#allocation56_spill] sm:$0xff] %v17947_v4 }
 0x3cb   : > { %v8344_v2 = vpop.f32.mrf.mxu1  ;;  %v17952_v14 = vpop.f32.mrf.mxu0 }
 0x3cc   : > { %v17950_v24 = vadd.f32 %v8344_v2, %v17751_v13  ;;  %18633 = vst [vmem:[#allocation47_spill] sm:$0xff] %v17952_v14 }
 0x3cd   : > { %v12931_v63 = vpop.f32.mrf.mxu1  ;;  %v17960_v5 = vpop.f32.mrf.mxu0 }
 0x3ce   : > { %v17955_v43 = vadd.f32 %v12931_v63, %v17757_v22  ;;  %18636 = vst [vmem:[#allocation46_spill] sm:$0xff] %v17960_v5 }
 0x3cf   : > { %v8347_v20 = vpop.f32.mrf.mxu1  ;;  %v17968_v4 = vpop.f32.mrf.mxu0 }
 0x3d0   : > { %18634 = vst [vmem:[#allocation44_spill] sm:$0xff] %v17955_v43  ;;  %v17958_v10 = vadd.f32 %v8347_v20, %v17766_v28  ;;  %18639 = vst [vmem:[#allocation53_spill] sm:$0xff] %v17968_v4 }
 0x3d1   : > { %v12934_v62 = vpop.f32.mrf.mxu1  ;;  %v17976_v14 = vpop.f32.mrf.mxu0 }
 0x3d2   : > { %18635 = vst [vmem:[#allocation49_spill] sm:$0xff] %v17958_v10  ;;  %v17963_v25 = vadd.f32 %v12934_v62, %v17776_v42  ;;  %18642 = vst [vmem:[#allocation58_spill] sm:$0xff] %v17976_v14 }
 0x3d3   : > { %v8360_v52 = vpop.f32.mrf.mxu1  ;;  %v17984_v5 = vpop.f32.mrf.mxu0 }
 0x3d4   : > { %18637 = vst [vmem:[#allocation51_spill] sm:$0xff] %v17963_v25  ;;  %v17966_v13 = vadd.f32 %v8360_v52, %v17785_v50  ;;  %18645 = vst [vmem:[#allocation57_spill] sm:$0xff] %v17984_v5 }
 0x3d5   : > { %v12935_v2 = vpop.f32.mrf.mxu1 }
 0x3d6   : > { %18638 = vst [vmem:[#allocation48_spill] sm:$0xff] %v17966_v13  ;;  %v17971_v22 = vadd.f32 %v12935_v2, %v17793_v18 }
 0x3d7   : > { %v8363_v63 = vpop.f32.mrf.mxu1 }
 0x3d8   : > { %18640 = vst [vmem:[#allocation55_spill] sm:$0xff] %v17971_v22  ;;  %v17974_v28 = vadd.f32 %v8363_v63, %v17802_v40  ;;  %v17992_v63 = vpop.f32.mrf.mxu0 }
 0x3d9   : > { %v12938_v20 = vpop.f32.mrf.mxu1  ;;  %18648 = vst [vmem:[#allocation4_spill] sm:$0xff] %v17992_v63 }
 0x3da   : > { %18641 = vst [vmem:[#allocation50_spill] sm:$0xff] %v17974_v28  ;;  %v17979_v42 = vadd.f32 %v12938_v20, %v17808_v45 }
 0x3db   : > { %v8376_v62 = vpop.f32.mrf.mxu1 }
 0x3dc   : > { %18643 = vst [vmem:[#allocation52_spill] sm:$0xff] %v17979_v42  ;;  %v17982_v50 = vadd.f32 %v8376_v62, %v17816_v32  ;;  %v18000_v62 = vpop.f32.mrf.mxu0 }
 0x3dd   : > { %v12939_v52 = vpop.f32.mrf.mxu1  ;;  %18651 = vst [vmem:[#allocation17_spill] sm:$0xff] %v18000_v62 }
 0x3de   : > { %18644 = vst [vmem:[#allocation54_spill] sm:$0xff] %v17982_v50  ;;  %v17987_v18 = vadd.f32 %v12939_v52, %v17825_v57 }
 0x3df   : > { %v8379_v2 = vpop.f32.mrf.mxu1 }
 0x3e0   : > { %18646 = vst [vmem:[#allocation59_spill] sm:$0xff] %v17987_v18  ;;  %v17990_v40 = vadd.f32 %v8379_v2, %v17834_v60  ;;  %v18008_v2 = vpop.f32.mrf.mxu0 }
 0x3e1   : > { %v12942_v14 = vpop.f32.mrf.mxu1  ;;  %18654 = vst [vmem:[#allocation11_spill] sm:$0xff] %v18008_v2 }
 0x3e2   : > { %18647 = vst [vmem:[#allocation3_spill] sm:$0xff] %v17990_v40  ;;  %v17995_v45 = vadd.f32 %v12942_v14, %v17844_v9  ;;  %v18013_v4 = vpop.f32.mrf.mxu0 }
 0x3e3   : > { %v8392_v20 = vpop.f32.mrf.mxu1  ;;  %18656 = vst [vmem:[#allocation12_spill] sm:$0xff] %v18013_v4 }
 0x3e4   : > { %18649 = vst [vmem:[#allocation30_spill] sm:$0xff] %v17995_v45  ;;  %v17998_v32 = vadd.f32 %v8392_v20, %v17850_v61 }
 0x3e5   : > { %v12943_v5 = vpop.f32.mrf.mxu1 }
 0x3e6   : > { %18650 = vst [vmem:[#allocation10_spill] sm:$0xff] %v17998_v32  ;;  %v18003_v57 = vadd.f32 %v12943_v5, %v17856_v23  ;;  %v13062_v62 = vpop.f32.mrf.mxu0 }
 0x3e7   : > { %v8395_v52 = vpop.f32.mrf.mxu1 }
 0x3e8   : > { %18652 = vst [vmem:[#allocation13_spill] sm:$0xff] %v18003_v57  ;;  %v18006_v60 = vadd.f32 %v8395_v52, %v17862_v1 }
 0x3e9   : > { %v12946_v63 = vpop.f32.mrf.mxu1 }
 0x3ea   : > { %18653 = vst [vmem:[#allocation28_spill] sm:$0xff] %v18006_v60  ;;  %v18011_v9 = vadd.f32 %v12946_v63, %v17868_v46  ;;  %v9935_v60 = vpop.f32.mrf.mxu0 }
 0x3eb   : > { %v8408_v14 = vpop.f32.mrf.mxu1 }
 0x3ec   : > { %18655 = vst [vmem:[#allocation19_spill] sm:$0xff] %v18011_v9  ;;  %v18016_v61 = vadd.f32 %v8408_v14, %v17874_v29  ;;  %v18024_v9 = vpop.f32.mrf.mxu0 }
 0x3ed   : > { %v12947_v20 = vpop.f32.mrf.mxu1 }
 0x3ee   : > { %18657 = vst [vmem:[#allocation23_spill] sm:$0xff] %v18016_v61  ;;  %v18019_v23 = vadd.f32 %v12947_v20, %v17880_v12  ;;  %v18028_v29 = vpop.f32.mrf.mxu0 }
 0x3ef   : > { %v8411_v5 = vpop.f32.mrf.mxu1 }
 0x3f0   : > { %18658 = vst [vmem:[#allocation18_spill] sm:$0xff] %v18019_v23  ;;  %v18022_v1 = vadd.f32 %v8411_v5, %v17887_v15 }
 0x3f1   : > { %v13014_v52 = vpop.f32.mrf.mxu1 }
 0x3f2   : > { %18659 = vst [vmem:[#allocation9_spill] sm:$0xff] %v18022_v1 }
 0x3f3   : > { %v9181_v2 = vpop.f32.mrf.mxu1  ;;  %v18034_v20 = vpop.f32.mrf.mxu0 }
 0x3f5   : > { %v13015_v46 = vpop.f32.mrf.mxu1  ;;  %v18040_v1 = vpop.f32.mrf.mxu0 }
 0x3f7   : > { %v9184_v63 = vpop.f32.mrf.mxu1  ;;  %v18046_v32 = vpop.f32.mrf.mxu0 }
 0x3f9   : > { %v13018_v4 = vpop.f32.mrf.mxu1  ;;  %v18052_v18 = vpop.f32.mrf.mxu0 }
 0x3fb   : > { %v18026_v57 = vpop.f32.mrf.mxu1  ;;  %v18058_v31 = vpop.f32.mrf.mxu0 }
 0x3fd   : > { %v18030_v14 = vpop.f32.mrf.mxu1  ;;  %v18064_v22 = vpop.f32.mrf.mxu0 }
 0x3ff   : > { %v18032_v12 = vpop.f32.mrf.mxu1  ;;  %v18070_v44 = vpop.f32.mrf.mxu0 }
 0x401   : > { %v18036_v15 = vpop.f32.mrf.mxu1  ;;  %v18076_v10 = vpop.f32.mrf.mxu0 }
 0x403   : > { %v18038_v5 = vpop.f32.mrf.mxu1 }
 0x405   : > { %v18042_v23 = vpop.f32.mrf.mxu1 }
 0x407   : > { %v18044_v61 = vpop.f32.mrf.mxu1 }
 0x409   : > { %v18048_v45 = vpop.f32.mrf.mxu1 }
 0x40b   : > { %v18050_v40 = vpop.f32.mrf.mxu1 }
 0x40d   : > { %v18054_v50 = vpop.f32.mrf.mxu1 }
 0x40e   : > { %18660 = vst [vmem:[#allocation25_spill] sm:$0xff] %v18054_v50 }
 0x40f   : > { %v18056_v42 = vpop.f32.mrf.mxu1 }
 0x410   : > { %18661 = vst [vmem:[#allocation29_spill] sm:$0xff] %v18056_v42 }
 0x411   : > { %v18060_v28 = vpop.f32.mrf.mxu1 }
 0x412   : > { %18662 = vst [vmem:[#allocation31_spill] sm:$0xff] %v18060_v28  ;;  %v18082_v28 = vpop.f32.mrf.mxu0 }
 0x413   : > { %v18062_v27 = vpop.f32.mrf.mxu1  ;;  %18670 = vst [vmem:[#allocation24_spill] sm:$0xff] %v18082_v28 }
 0x414   : > { %18663 = vst [vmem:[#allocation15_spill] sm:$0xff] %v18062_v27 }
 0x415   : > { %v18066_v3 = vpop.f32.mrf.mxu1 }
 0x416   : > { %18664 = vst [vmem:[#allocation5_spill] sm:$0xff] %v18066_v3  ;;  %v18088_v3 = vpop.f32.mrf.mxu0 }
 0x417   : > { %v18068_v13 = vpop.f32.mrf.mxu1  ;;  %18673 = vst [vmem:[#allocation21_spill] sm:$0xff] %v18088_v3 }
 0x418   : > { %18665 = vst [vmem:[#allocation7_spill] sm:$0xff] %v18068_v13 }
 0x419   : > { %v18072_v25 = vpop.f32.mrf.mxu1 }
 0x41a   : > { %18666 = vst [vmem:[#allocation8_spill] sm:$0xff] %v18072_v25  ;;  %v18094_v25 = vpop.f32.mrf.mxu0 }
 0x41b   : > { %v18074_v6 = vpop.f32.mrf.mxu1  ;;  %18676 = vst [vmem:[#allocation26_spill] sm:$0xff] %v18094_v25 }
 0x41c   : > { %18667 = vst [vmem:[#allocation6_spill] sm:$0xff] %v18074_v6 }
 0x41d   : > { %v18078_v42 = vpop.f32.mrf.mxu1 }
 0x41e   : > { %18668 = vst [vmem:[#allocation22_spill] sm:$0xff] %v18078_v42  ;;  %v8923_v42 = vadd.f32 %v17813_v0, %v17883_v55  ;;  %v8922_v0 = vadd.f32 %v17841_v49, %v17900_v17  ;;  %v18128_v49 = vld [vmem:[%s18362_s6] ss:$0 sm:$0xff] }
 0x41f   : > { %v18080_v50 = vpop.f32.mrf.mxu1 }
 0x420   : > { %18669 = vst [vmem:[#allocation16_spill] sm:$0xff] %v18080_v50  ;;  %v9310_v28 = vadd.f32 %v13014_v52, %v8923_v42 }
 0x421   : > { %v18084_v27 = vpop.f32.mrf.mxu1 }
 0x422   : > { %18671 = vst [vmem:[#allocation20_spill] sm:$0xff] %v18084_v27  ;;  %v8921_v27 = vadd.f32 %v17822_v36, %v17890_v34  ;;  %v10064_v42 = vadd.f32 %v13062_v62, %v9310_v28  ;;  %v8927_v36 = vadd.f32 %v17847_v8, %v17905_v53 }
 0x423   : > { %v18086_v41 = vpop.f32.mrf.mxu1 }
 0x424   : > { %18672 = vst [vmem:[#allocation32_spill] sm:$0xff] %v18086_v41  ;;  %v18104_v41 = vpop.f32.mrf.mxu0  ;;  %v9314_v52 = vadd.f32 %v13018_v4, %v8927_v36  ;;  %v8928_v4 = vadd.f32 %v17859_v7, %v17915_v35 }
 0x425   : > { %v18090_v13 = vpop.f32.mrf.mxu1 }
 0x426   : > { %18674 = vst [vmem:[#allocation27_spill] sm:$0xff] %v18090_v13  ;;  %v9308_v13 = vadd.f32 %v9181_v2, %v8921_v27  ;;  %v18114_v55 = vpop.f32.mrf.mxu0  ;;  %v18121_v27 = vld [vmem:[%s18361_s5] ss:$0 sm:$0xff] }
 0x427   : > { %v18092_v43 = vpop.f32.mrf.mxu1 }
 0x428   : > { %18675 = vst [vmem:[#allocation14_spill] sm:$0xff] %v18092_v43  ;;  %v8924_v43 = vadd.f32 %v17831_v47, %v17895_v54  ;;  %v9309_v47 = vadd.f32 %v9184_v63, %v8922_v0  ;;  %v10062_v2 = vadd.f32 %v9935_v60, %v9308_v13  ;;  %v18130_v8 = vpop.f32.mrf.mxu0  ;;  %v9315_v0 = vadd.f32 %v18030_v14, %v8928_v4 }
 0x429   : > { %v18096_v6 = vpop.f32.mrf.mxu1 }
 0x42a   : > { %18677 = vst [vmem:[#allocation33_spill] sm:$0xff] %v18096_v6  ;;  %v9311_v6 = vadd.f32 %v13015_v46, %v8924_v43  ;;  %v8925_v43 = vadd.f32 %v17853_v30, %v17910_v48  ;;  %v10063_v63 = vadd.f32 %v18028_v29, %v9309_v47  ;;  %v18150_v35 = vpop.f32.mrf.mxu0 }
 0x42b   : > { %v18100_v50 = vpop.f32.mrf.mxu1 }
 0x42c   : > { %v10065_v62 = vadd.f32 %v18024_v9, %v9311_v6  ;;  %v9312_v13 = vadd.f32 %v18026_v57, %v8925_v43  ;;  %v10068_v6 = vadd.f32 %v18034_v20, %v9314_v52  ;;  %v8929_v43 = vadd.f32 %v17877_v51, %v17930_v38 }
 0x42d   : > { %v18106_v3 = vpop.f32.mrf.mxu1 }
 0x42f   : > { %v18110_v25 = vpop.f32.mrf.mxu1 }
 0x431   : > { %v13110_v34 = vpop.f32.mrf.mxu1 }
 0x432   : > { %v10562_v54 = vadd.f32 %v13110_v34, %v10064_v42  ;;  %v8926_v42 = vadd.f32 %v17865_v21, %v17920_v58  ;;  %v8931_v58 = vadd.f32 %v17871_v11, %v17925_v56  ;;  %v10066_v34 = vadd.f32 %v18040_v1, %v9312_v13  ;;  %v18165_v11 = vpop.f32.mrf.mxu0 }
 0x433   : > { %v10433_v17 = vpop.f32.mrf.mxu1 }
 0x434   : > { %v10601_v53 = vmul.f32 %v18121_v27, %v10562_v54  ;;  %v10560_v28 = vadd.f32 %v10433_v17, %v10062_v2  ;;  %v9313_v21 = vadd.f32 %v18032_v12, %v8926_v42  ;;  %v9318_v52 = vadd.f32 %v18036_v15, %v8931_v58 }
 0x435   : > { %v13111_v30 = vpop.f32.mrf.mxu1  ;;  %v10069_v17 = vadd.f32 %v18046_v32, %v9315_v0  ;;  %v8932_v15 = vadd.f32 %v17885_v16, %v17935_v19  ;;  %v18181_v16 = vpop.f32.mrf.mxu0 }
 0x436   : > { %v10640_v48 = vadd.f32 %v18128_v49, %v10601_v53  ;;  %v10599_v60 = vmul.f32 %v18121_v27, %v10560_v28  ;;  %v10563_v46 = vadd.f32 %v13111_v30, %v10065_v62  ;;  %v9316_v62 = vadd.f32 %v18038_v5, %v8929_v43 }
 0x437   : > { %v10436_v7 = vpop.f32.mrf.mxu1  ;;  %v10067_v51 = vadd.f32 %v18052_v18, %v9313_v21 }
 0x438   : > { %v10672_v57 = vmax.f32 %v10640_v48, 0.0  ;;  %v10638_v9 = vadd.f32 %v18128_v49, %v10599_v60  ;;  %v10602_v29 = vmul.f32 %v18121_v27, %v10563_v46  ;;  %v10561_v14 = vadd.f32 %v10436_v7, %v10063_v63 }
 0x439   : > { %v13114_v36 = vpop.f32.mrf.mxu1  ;;  %v9319_v48 = vadd.f32 %v18042_v23, %v8932_v15  ;;  %v8930_v60 = vadd.f32 %v17892_v39, %v17940_v33  ;;  %v10072_v46 = vadd.f32 %v18058_v31, %v9318_v52  ;;  %v8935_v23 = vadd.f32 %v17897_v26, %v17945_v59  ;;  %v18197_v26 = vpop.f32.mrf.mxu0  ;;  %v18680_v52 = vld [vmem:[#allocation25_spill] sm:$0xff] }
 0x43a   : > { %10704 = vst [vmem:[%s18147_s22 + $0x10] sm:$0xff] %v10672_v57  ;;  %v10670_v47 = vmax.f32 %v10638_v9, 0.0  ;;  %v10641_v20 = vadd.f32 %v18128_v49, %v10602_v29  ;;  %v10600_v54 = vmul.f32 %v18121_v27, %v10561_v14  ;;  %v10566_v2 = vadd.f32 %v13114_v36, %v10068_v6 }
 0x43b   : > { %v10449_v12 = vpop.f32.mrf.mxu1  ;;  %v9317_v42 = vadd.f32 %v18044_v61, %v8930_v60  ;;  %v10070_v39 = vadd.f32 %v18064_v22, %v9316_v62  ;;  %v9322_v9 = vadd.f32 %v18048_v45, %v8935_v23  ;;  %v8933_v29 = vadd.f32 %v17902_v37, %v17950_v24  ;;  %v18679_v45 = vld [vmem:[#allocation38_spill] sm:$0xff]  ;;  %v18687_v60 = vld [vmem:[#allocation21_spill] sm:$0xff]  ;;  %v18689_v23 = vld [vmem:[#allocation48_spill] sm:$0xff] }
 0x43c   : > { %10702 = vst [vmem:[%s18147_s22] sm:$0xff] %v10670_v47  ;;  %v10673_v56 = vmax.f32 %v10641_v20, 0.0  ;;  %v10639_v1 = vadd.f32 %v18128_v49, %v10600_v54  ;;  %v10605_v53 = vmul.f32 %v18121_v27, %v10566_v2  ;;  %v10564_v28 = vadd.f32 %v10449_v12, %v10066_v34  ;;  %v18678_v34 = vld [vmem:[#allocation44_spill] sm:$0xff]  ;;  %v18681_v12 = vld [vmem:[#allocation49_spill] sm:$0xff] }
 0x43d   : > { %v13115_v13 = vpop.f32.mrf.mxu1  ;;  %v10073_v14 = vadd.f32 %v18070_v44, %v9319_v48  ;;  %v9320_v36 = vadd.f32 %v18050_v40, %v8933_v29  ;;  %v8936_v47 = vadd.f32 %v18679_v45, %v18678_v34  ;;  %v10071_v37 = vadd.f32 %v18076_v10, %v9317_v42 }
 0x43e   : > { %10705 = vst [vmem:[%s18147_s22 + $0x18] sm:$0xff] %v10673_v56  ;;  %v10671_v38 = vmax.f32 %v10639_v1, 0.0  ;;  %v10644_v32 = vadd.f32 %v18128_v49, %v10605_v53  ;;  %v10603_v4 = vmul.f32 %v18121_v27, %v10564_v28  ;;  %v10567_v30 = vadd.f32 %v13115_v13, %v10069_v17  ;;  %v18682_v17 = vld [vmem:[#allocation37_spill] sm:$0xff]  ;;  %v18683_v1 = vld [vmem:[#allocation24_spill] sm:$0xff]  ;;  %v18213_v28 = vpop.f32.mrf.mxu0 }
 0x43f   : > { %v10452_v5 = vpop.f32.mrf.mxu1  ;;  %v9323_v43 = vadd.f32 %v18680_v52, %v8936_v47  ;;  %v8934_v56 = vadd.f32 %v18682_v17, %v18681_v12  ;;  %v10076_v53 = vadd.f32 %v18683_v1, %v9322_v9  ;;  %v18697_v52 = vld [vmem:[#allocation43_spill] sm:$0xff] }
 0x440   : > { %10703 = vst [vmem:[%s18147_s22 + $0x8] sm:$0xff] %v10671_v38  ;;  %v10676_v19 = vmax.f32 %v10644_v32, 0.0  ;;  %v10642_v18 = vadd.f32 %v18128_v49, %v10603_v4  ;;  %v10606_v63 = vmul.f32 %v18121_v27, %v10567_v30  ;;  %v10565_v0 = vadd.f32 %v10452_v5, %v10067_v51  ;;  %v18684_v51 = vld [vmem:[#allocation29_spill] sm:$0xff]  ;;  %v18685_v32 = vld [vmem:[#allocation51_spill] sm:$0xff] }
 0x441   : > { %v13118_v7 = vpop.f32.mrf.mxu1  ;;  %v9321_v38 = vadd.f32 %v18684_v51, %v8934_v56  ;;  %v18686_v4 = vld [vmem:[#allocation39_spill] sm:$0xff]  ;;  %v10074_v5 = vadd.f32 %v18687_v60, %v9320_v36  ;;  %v18701_v60 = vld [vmem:[#allocation8_spill] sm:$0xff] }
 0x442   : > { %10708 = vst [vmem:[%s18147_s22 + $0x30] sm:$0xff] %v10676_v19  ;;  %v10674_v31 = vmax.f32 %v10642_v18, 0.0  ;;  %v10645_v33 = vadd.f32 %v18128_v49, %v10606_v63  ;;  %v10604_v6 = vmul.f32 %v18121_v27, %v10565_v0  ;;  %v10570_v57 = vadd.f32 %v13118_v7, %v10072_v46  ;;  %v18688_v0 = vld [vmem:[#allocation31_spill] sm:$0xff]  ;;  %v18690_v7 = vld [vmem:[#allocation40_spill] sm:$0xff] }
 0x443   : > { %v10465_v61 = vpop.f32.mrf.mxu1  ;;  %v8939_v30 = vadd.f32 %v18686_v4, %v18685_v32  ;;  %v10075_v45 = vadd.f32 %v18104_v41, %v9321_v38 }
 0x444   : > { %10706 = vst [vmem:[%s18147_s22 + $0x20] sm:$0xff] %v10674_v31  ;;  %v10677_v59 = vmax.f32 %v10645_v33, 0.0  ;;  %v10643_v22 = vadd.f32 %v18128_v49, %v10604_v6  ;;  %v10609_v21 = vmul.f32 %v18121_v27, %v10570_v57  ;;  %v10568_v58 = vadd.f32 %v10465_v61, %v10070_v39  ;;  %v18691_v33 = vld [vmem:[#allocation26_spill] sm:$0xff]  ;;  %v18229_v57 = vpop.f32.mrf.mxu0 }
 0x445   : > { %v13119_v20 = vpop.f32.mrf.mxu1  ;;  %v9326_v42 = vadd.f32 %v18688_v0, %v8939_v30  ;;  %v8937_v39 = vadd.f32 %v18690_v7, %v18689_v23  ;;  %v10077_v6 = vadd.f32 %v18691_v33, %v9323_v43 }
 0x446   : > { %10709 = vst [vmem:[%s18147_s22 + $0x38] sm:$0xff] %v10677_v59  ;;  %v10675_v44 = vmax.f32 %v10643_v22, 0.0  ;;  %v10648_v24 = vadd.f32 %v18128_v49, %v10609_v21  ;;  %v10607_v54 = vmul.f32 %v18121_v27, %v10568_v58  ;;  %v10571_v2 = vadd.f32 %v13119_v20, %v10073_v14  ;;  %v18692_v59 = vld [vmem:[#allocation15_spill] sm:$0xff]  ;;  %v18694_v58 = vld [vmem:[#allocation41_spill] sm:$0xff]  ;;  %v18245_v56 = vpop.f32.mrf.mxu0 }
 0x447   : > { %v10468_v40 = vpop.f32.mrf.mxu1  ;;  %v9324_v22 = vadd.f32 %v18692_v59, %v8937_v39  ;;  %v18693_v21 = vld [vmem:[#allocation55_spill] sm:$0xff]  ;;  %v10080_v17 = vadd.f32 %v18114_v55, %v9326_v42 }
 0x448   : > { %10707 = vst [vmem:[%s18147_s22 + $0x28] sm:$0xff] %v10675_v44  ;;  %v10680_v10 = vmax.f32 %v10648_v24, 0.0  ;;  %v10646_v62 = vadd.f32 %v18128_v49, %v10607_v54  ;;  %v10610_v15 = vmul.f32 %v18121_v27, %v10571_v2  ;;  %v10569_v13 = vadd.f32 %v10468_v40, %v10071_v37  ;;  %v18695_v24 = vld [vmem:[#allocation5_spill] sm:$0xff]  ;;  %v18696_v2 = vld [vmem:[#allocation50_spill] sm:$0xff]  ;;  %v18261_v42 = vpop.f32.mrf.mxu0 }
 0x449   : > { %v13122_v48 = vpop.f32.mrf.mxu1  ;;  %v8940_v36 = vadd.f32 %v18694_v58, %v18693_v21  ;;  %v8938_v43 = vadd.f32 %v18697_v52, %v18696_v2  ;;  %v10078_v32 = vadd.f32 %v18130_v8, %v9324_v22  ;;  %v18707_v58 = vld [vmem:[#allocation22_spill] sm:$0xff]  ;;  %v18710_v52 = vld [vmem:[#allocation16_spill] sm:$0xff] }
 0x44a   : > { %10712 = vst [vmem:[%s18147_s22 + $0x50] sm:$0xff] %v10680_v10  ;;  %v10678_v46 = vmax.f32 %v10646_v62, 0.0  ;;  %v10649_v19 = vadd.f32 %v18128_v49, %v10610_v15  ;;  %v10608_v18 = vmul.f32 %v18121_v27, %v10569_v13  ;;  %v10574_v63 = vadd.f32 %v13122_v48, %v10076_v53  ;;  %v18698_v10 = vld [vmem:[#allocation7_spill] sm:$0xff]  ;;  %v18699_v15 = vld [vmem:[#allocation52_spill] sm:$0xff]  ;;  %v18700_v13 = vld [vmem:[#allocation42_spill] sm:$0xff] }
 0x44b   : > { %v10481_v31 = vpop.f32.mrf.mxu1  ;;  %v9327_v54 = vadd.f32 %v18695_v24, %v8940_v36  ;;  %v9325_v62 = vadd.f32 %v18698_v10, %v8938_v43  ;;  %v8943_v51 = vadd.f32 %v18700_v13, %v18699_v15  ;;  %v18713_v15 = vld [vmem:[#allocation20_spill] sm:$0xff] }
 0x44c   : > { %10710 = vst [vmem:[%s18147_s22 + $0x40] sm:$0xff] %v10678_v46  ;;  %v10681_v9 = vmax.f32 %v10649_v19, 0.0  ;;  %v10647_v29 = vadd.f32 %v18128_v49, %v10608_v18  ;;  %v10613_v61 = vmul.f32 %v18121_v27, %v10574_v63  ;;  %v10572_v14 = vadd.f32 %v10481_v31, %v10074_v5  ;;  %v18702_v46 = vld [vmem:[#allocation54_spill] sm:$0xff]  ;;  %v18703_v19 = vld [vmem:[#allocation45_spill] sm:$0xff] }
 0x44d   : > { %v13123_v34 = vpop.f32.mrf.mxu1  ;;  %v9330_v5 = vadd.f32 %v18701_v60, %v8943_v51  ;;  %v8941_v18 = vadd.f32 %v18703_v19, %v18702_v46  ;;  %v10081_v0 = vadd.f32 %v18150_v35, %v9327_v54  ;;  %v18704_v31 = vld [vmem:[#allocation6_spill] sm:$0xff]  ;;  %v18716_v46 = vld [vmem:[#allocation32_spill] sm:$0xff] }
 0x44e   : > { %10713 = vst [vmem:[%s18147_s22 + $0x58] sm:$0xff] %v10681_v9  ;;  %v10679_v47 = vmax.f32 %v10647_v29, 0.0  ;;  %v10652_v20 = vadd.f32 %v18128_v49, %v10613_v61  ;;  %v10611_v37 = vmul.f32 %v18121_v27, %v10572_v14  ;;  %v10575_v44 = vadd.f32 %v13123_v34, %v10077_v6  ;;  %v18705_v6 = vld [vmem:[#allocation59_spill] sm:$0xff]  ;;  %v18706_v9 = vld [vmem:[#allocation56_spill] sm:$0xff]  ;;  %v18714_v51 = vld [vmem:[#allocation10_spill] sm:$0xff] }
 0x44f   : > { %v10484_v12 = vpop.f32.mrf.mxu1  ;;  %v9328_v33 = vadd.f32 %v18704_v31, %v8941_v18  ;;  %v8944_v29 = vadd.f32 %v18706_v9, %v18705_v6  ;;  %v10079_v14 = vadd.f32 %v18165_v11, %v9325_v62  ;;  %v18708_v34 = vld [vmem:[#allocation3_spill] sm:$0xff]  ;;  %v18717_v18 = vld [vmem:[#allocation13_spill] sm:$0xff] }
 0x450   : > { %10711 = vst [vmem:[%s18147_s22 + $0x48] sm:$0xff] %v10679_v47  ;;  %v10684_v41 = vmax.f32 %v10652_v20, 0.0  ;;  %v10650_v40 = vadd.f32 %v18128_v49, %v10611_v37  ;;  %v10614_v1 = vmul.f32 %v18121_v27, %v10575_v44  ;;  %v10573_v53 = vadd.f32 %v10484_v12, %v10075_v45  ;;  %v18709_v45 = vld [vmem:[#allocation47_spill] sm:$0xff]  ;;  %v13087_v44 = vpop.f32.mrf.mxu0  ;;  %v18711_v12 = vld [vmem:[#allocation30_spill] sm:$0xff] }
 0x451   : > { %v13126_v38 = vpop.f32.mrf.mxu1  ;;  %v9331_v36 = vadd.f32 %v18707_v58, %v8944_v29  ;;  %v8942_v47 = vadd.f32 %v18709_v45, %v18708_v34  ;;  %v10084_v37 = vadd.f32 %v18181_v16, %v9330_v5  ;;  %v18719_v6 = vld [vmem:[#allocation27_spill] sm:$0xff]  ;;  %v18720_v29 = vld [vmem:[#allocation28_spill] sm:$0xff] }
 0x452   : > { %10716 = vst [vmem:[%s18147_s22 + $0x70] sm:$0xff] %v10684_v41  ;;  %v10682_v55 = vmax.f32 %v10650_v40, 0.0  ;;  %v10653_v4 = vadd.f32 %v18128_v49, %v10614_v1  ;;  %v10612_v30 = vmul.f32 %v18121_v27, %v10573_v53  ;;  %v10578_v48 = vadd.f32 %v13126_v38, %v10080_v17  ;;  %v18712_v17 = vld [vmem:[#allocation46_spill] sm:$0xff]  ;;  %v18715_v38 = vld [vmem:[#allocation53_spill] sm:$0xff]  ;;  %v18723_v45 = vld [vmem:[#allocation19_spill] sm:$0xff] }
 0x453   : > { %v10497_v63 = vpop.f32.mrf.mxu1  ;;  %v9329_v43 = vadd.f32 %v18710_v52, %v8942_v47  ;;  %v8947_v41 = vadd.f32 %v18712_v17, %v18711_v12  ;;  %v10082_v1 = vadd.f32 %v18197_v26, %v9328_v33  ;;  %v18724_v47 = vld [vmem:[#allocation4_spill] sm:$0xff]  ;;  %v18726_v17 = vld [vmem:[#allocation23_spill] sm:$0xff] }
 0x454   : > { %10714 = vst [vmem:[%s18147_s22 + $0x60] sm:$0xff] %v10682_v55  ;;  %v10685_v8 = vmax.f32 %v10653_v4, 0.0  ;;  %v10651_v23 = vadd.f32 %v18128_v49, %v10612_v30  ;;  %v10617_v7 = vmul.f32 %v18121_v27, %v10578_v48  ;;  %v10576_v39 = vadd.f32 %v10497_v63, %v10078_v32  ;;  %v10034_v30 = vpop.f32.mrf.mxu0  ;;  %v18718_v63 = vld [vmem:[#allocation58_spill] sm:$0xff] }
 0x455   : > { %v13127_v61 = vpop.f32.mrf.mxu1  ;;  %v9334_v13 = vadd.f32 %v18713_v15, %v8947_v41  ;;  %v8945_v32 = vadd.f32 %v18715_v38, %v18714_v51  ;;  %v10085_v4 = vadd.f32 %v18213_v28, %v9331_v36  ;;  %v18722_v36 = vld [vmem:[#allocation14_spill] sm:$0xff]  ;;  %v18727_v41 = vld [vmem:[#allocation17_spill] sm:$0xff]  ;;  %v18729_v51 = vld [vmem:[#allocation11_spill] sm:$0xff] }
 0x456   : > { %10717 = vst [vmem:[%s18147_s22 + $0x78] sm:$0xff] %v10685_v8  ;;  %v10683_v35 = vmax.f32 %v10651_v23, 0.0  ;;  %v10656_v59 = vadd.f32 %v18128_v49, %v10617_v7  ;;  %v10615_v22 = vmul.f32 %v18121_v27, %v10576_v39  ;;  %v10579_v21 = vadd.f32 %v13127_v61, %v10081_v0  ;;  %v13090_v7 = vpop.f32.mrf.mxu0  ;;  %v18721_v61 = vld [vmem:[#allocation57_spill] sm:$0xff] }
 0x457   : > { %v10500_v20 = vpop.f32.mrf.mxu1  ;;  %v9332_v19 = vadd.f32 %v18716_v46, %v8945_v32  ;;  %v8948_v0 = vadd.f32 %v18718_v63, %v18717_v18  ;;  %v10083_v23 = vadd.f32 %v18229_v57, %v9329_v43  ;;  %v18725_v43 = vld [vmem:[#allocation33_spill] sm:$0xff]  ;;  %v18731_v18 = vld [vmem:[#allocation12_spill] sm:$0xff] }
 0x458   : > { %10715 = vst [vmem:[%s18147_s22 + $0x68] sm:$0xff] %v10683_v35  ;;  %v10688_v24 = vmax.f32 %v10656_v59, 0.0  ;;  %v10654_v11 = vadd.f32 %v18128_v49, %v10615_v22  ;;  %v10618_v54 = vmul.f32 %v18121_v27, %v10579_v21  ;;  %v10577_v2 = vadd.f32 %v10500_v20, %v10079_v14 }
 0x459   : > { %v13130_v40 = vpop.f32.mrf.mxu1  ;;  %v9335_v9 = vadd.f32 %v18719_v6, %v8948_v0  ;;  %v8946_v14 = vadd.f32 %v18721_v61, %v18720_v29  ;;  %v10088_v59 = vadd.f32 %v18245_v56, %v9334_v13  ;;  %v8951_v20 = vadd.f32 %v18724_v47, %v18723_v45  ;;  %v18728_v13 = vld [vmem:[#allocation18_spill] sm:$0xff] }
 0x45a   : > { %10720 = vst [vmem:[%s18147_s22 + $0x90] sm:$0xff] %v10688_v24  ;;  %v10686_v53 = vmax.f32 %v10654_v11, 0.0  ;;  %v10657_v16 = vadd.f32 %v18128_v49, %v10618_v54  ;;  %v10616_v10 = vmul.f32 %v18121_v27, %v10577_v2  ;;  %v10582_v62 = vadd.f32 %v13130_v40, %v10084_v37  ;;  %v10047_v11 = vpop.f32.mrf.mxu0 }
 0x45b   : > { %v10513_v55 = vpop.f32.mrf.mxu1  ;;  %v9333_v34 = vadd.f32 %v18722_v36, %v8946_v14  ;;  %v10086_v24 = vadd.f32 %v18261_v42, %v9332_v19  ;;  %v9338_v12 = vadd.f32 %v18725_v43, %v8951_v20  ;;  %v8949_v40 = vadd.f32 %v18727_v41, %v18726_v17  ;;  %v18730_v19 = vld [vmem:[#allocation9_spill] sm:$0xff] }
 0x45c   : > { %10718 = vst [vmem:[%s18147_s22 + $0x80] sm:$0xff] %v10686_v53  ;;  %v10689_v48 = vmax.f32 %v10657_v16, 0.0  ;;  %v10655_v26 = vadd.f32 %v18128_v49, %v10616_v10  ;;  %v10621_v60 = vmul.f32 %v18121_v27, %v10582_v62  ;;  %v10580_v5 = vadd.f32 %v10513_v55, %v10082_v1 }
 0x45d   : > { %v13131_v8 = vpop.f32.mrf.mxu1  ;;  %v10089_v53 = vadd.f32 %v13087_v44, %v9335_v9  ;;  %v9336_v15 = vadd.f32 %v18100_v50, %v8949_v40  ;;  %v8952_v38 = vadd.f32 %v18729_v51, %v18728_v13  ;;  %v10087_v55 = vadd.f32 %v10034_v30, %v9333_v34 }
 0x45e   : > { %10721 = vst [vmem:[%s18147_s22 + $0x98] sm:$0xff] %v10689_v48  ;;  %v10687_v28 = vmax.f32 %v10655_v26, 0.0  ;;  %v10660_v39 = vadd.f32 %v18128_v49, %v10621_v60  ;;  %v10619_v31 = vmul.f32 %v18121_v27, %v10580_v5  ;;  %v10583_v33 = vadd.f32 %v13131_v8, %v10085_v4  ;;  %v13091_v4 = vpop.f32.mrf.mxu0 }
 0x45f   : > { %v10516_v35 = vpop.f32.mrf.mxu1  ;;  %v10092_v5 = vadd.f32 %v13090_v7, %v9338_v12  ;;  %v9339_v46 = vadd.f32 %v18106_v3, %v8952_v38  ;;  %v8950_v50 = vadd.f32 %v18731_v18, %v18730_v19 }
 0x460   : > { %10719 = vst [vmem:[%s18147_s22 + $0x88] sm:$0xff] %v10687_v28  ;;  %v10692_v22 = vmax.f32 %v10660_v39, 0.0  ;;  %v10658_v57 = vadd.f32 %v18128_v49, %v10619_v31  ;;  %v10622_v21 = vmul.f32 %v18121_v27, %v10583_v33  ;;  %v10581_v58 = vadd.f32 %v10516_v35, %v10083_v23  ;;  %v10050_v7 = vpop.f32.mrf.mxu0 }
 0x461   : > { %v13134_v37 = vpop.f32.mrf.mxu1  ;;  %v10090_v28 = vadd.f32 %v10047_v11, %v9336_v15  ;;  %v9337_v39 = vadd.f32 %v18110_v25, %v8950_v50  ;;  %v10093_v29 = vadd.f32 %v13091_v4, %v9339_v46 }
 0x462   : > { %10724 = vst [vmem:[%s18147_s22 + $0xb0] sm:$0xff] %v10692_v22  ;;  %v10690_v54 = vmax.f32 %v10658_v57, 0.0  ;;  %v10661_v56 = vadd.f32 %v18128_v49, %v10622_v21  ;;  %v10620_v2 = vmul.f32 %v18121_v27, %v10581_v58  ;;  %v10586_v52 = vadd.f32 %v13134_v37, %v10088_v59 }
 0x463   : > { %v10529_v1 = vpop.f32.mrf.mxu1  ;;  %v10091_v22 = vadd.f32 %v10050_v7, %v9337_v39 }
 0x464   : > { %10722 = vst [vmem:[%s18147_s22 + $0xa0] sm:$0xff] %v10690_v54  ;;  %v10693_v16 = vmax.f32 %v10661_v56, 0.0  ;;  %v10659_v42 = vadd.f32 %v18128_v49, %v10620_v2  ;;  %v10625_v10 = vmul.f32 %v18121_v27, %v10586_v52  ;;  %v10584_v62 = vadd.f32 %v10529_v1, %v10086_v24 }
 0x465   : > { %v13135_v32 = vpop.f32.mrf.mxu1 }
 0x466   : > { %10725 = vst [vmem:[%s18147_s22 + $0xb8] sm:$0xff] %v10693_v16  ;;  %v10691_v48 = vmax.f32 %v10659_v42, 0.0  ;;  %v10664_v44 = vadd.f32 %v18128_v49, %v10625_v10  ;;  %v10623_v26 = vmul.f32 %v18121_v27, %v10584_v62  ;;  %v10587_v60 = vadd.f32 %v13135_v32, %v10089_v53 }
 0x467   : > { %v10532_v63 = vpop.f32.mrf.mxu1 }
 0x468   : > { %10723 = vst [vmem:[%s18147_s22 + $0xa8] sm:$0xff] %v10691_v48  ;;  %v10696_v0 = vmax.f32 %v10664_v44, 0.0  ;;  %v10662_v30 = vadd.f32 %v18128_v49, %v10623_v26  ;;  %v10626_v8 = vmul.f32 %v18121_v27, %v10587_v60  ;;  %v10585_v23 = vadd.f32 %v10532_v63, %v10087_v55 }
 0x469   : > { %v13138_v31 = vpop.f32.mrf.mxu1 }
 0x46a   : > { %10728 = vst [vmem:[%s18147_s22 + $0xd0] sm:$0xff] %v10696_v0  ;;  %v10694_v3 = vmax.f32 %v10662_v30, 0.0  ;;  %v10665_v33 = vadd.f32 %v18128_v49, %v10626_v8  ;;  %v10624_v6 = vmul.f32 %v18121_v27, %v10585_v23  ;;  %v10590_v9 = vadd.f32 %v13138_v31, %v10092_v5 }
 0x46b   : > { %v10545_v61 = vpop.f32.mrf.mxu1 }
 0x46c   : > { %10726 = vst [vmem:[%s18147_s22 + $0xc0] sm:$0xff] %v10694_v3  ;;  %v10697_v14 = vmax.f32 %v10665_v33, 0.0  ;;  %v10663_v35 = vadd.f32 %v18128_v49, %v10624_v6  ;;  %v10629_v25 = vmul.f32 %v18121_v27, %v10590_v9  ;;  %v10588_v59 = vadd.f32 %v10545_v61, %v10090_v28 }
 0x46d   : > { %v13139_v57 = vpop.f32.mrf.mxu1 }
 0x46e   : > { %10729 = vst [vmem:[%s18147_s22 + $0xd8] sm:$0xff] %v10697_v14  ;;  %v10695_v21 = vmax.f32 %v10663_v35, 0.0  ;;  %v10668_v58 = vadd.f32 %v18128_v49, %v10629_v25  ;;  %v10627_v36 = vmul.f32 %v18121_v27, %v10588_v59  ;;  %v10591_v34 = vadd.f32 %v13139_v57, %v10093_v29 }
 0x46f   : > { %v10548_v45 = vpop.f32.mrf.mxu1 }
 0x470   : > { %10727 = vst [vmem:[%s18147_s22 + $0xc8] sm:$0xff] %v10695_v21  ;;  %v10700_v47 = vmax.f32 %v10668_v58, 0.0  ;;  %v10666_v20 = vadd.f32 %v18128_v49, %v10627_v36  ;;  %v10630_v37 = vmul.f32 %v18121_v27, %v10591_v34  ;;  %v10589_v24 = vadd.f32 %v10548_v45, %v10091_v22 }
 0x472   : > { %10732 = vst [vmem:[%s18147_s22 + $0xf0] sm:$0xff] %v10700_v47  ;;  %v10698_v11 = vmax.f32 %v10666_v20, 0.0  ;;  %v10669_v54 = vadd.f32 %v18128_v49, %v10630_v37  ;;  %v10628_v56 = vmul.f32 %v18121_v27, %v10589_v24 }
 0x474   : > { %10730 = vst [vmem:[%s18147_s22 + $0xe0] sm:$0xff] %v10698_v11  ;;  %v10701_v2 = vmax.f32 %v10669_v54, 0.0  ;;  %v10667_v52 = vadd.f32 %v18128_v49, %v10628_v56 }
 0x476   : > { %10733 = vst [vmem:[%s18147_s22 + $0xf8] sm:$0xff] %v10701_v2  ;;  %v10699_v43 = vmax.f32 %v10667_v52, 0.0 }
 0x478   : > { %10731 = vst [vmem:[%s18147_s22 + $0xe8] sm:$0xff] %v10699_v43 }
 0x479 PF: > { %s17_s24 = sadd.s32 1, %s13415_s24  }
 0x47a   : > { %p14_p4 = scmp.ge.s32.totalorder %s17_s24, 4  }
 0x47c   :  { %16 = sbr.rel (!%p14_p4) target bundleno = 1 (0x1), region = 98 }

</bundles_post_ra>
